<compile_context>
chip_gen: v7x
topology: tpu7x:2x2x1
jax: 0.10.0
libtpu: 0.0.40
codegen_flags: <defaults>
</compile_context>

<pallas_src>
import functools

import numpy as np
import jax
import jax.numpy as jnp
from jax.experimental import pallas as pl
from jax.experimental.pallas import tpu as pltpu

F32 = jnp.float32
BF16 = jnp.bfloat16

# Safe on every generation: v5e/v6e have 128 MiB physical VMEM, v7x 64 MiB/TC.
VMEM_LIMIT = 48 * 1024 * 1024


# ---------------------------------------------------------------------------
# Small helpers
# ---------------------------------------------------------------------------
def _round_up(v, m):
    return ((v + m - 1) // m) * m


def _pad_rows(a, rows):
    if a.shape[0] == rows:
        return a
    return jnp.pad(a, ((0, rows - a.shape[0]), (0, 0)))


def _tiles(M, N, K, tm_cap=1024):
    """Pick (TM, TN, TK, Mp). TM divides round_up(M,8) whenever possible so no
    HBM row-padding copy is needed; TK is the largest 128-multiple divisor of K
    (<=1024); >=2 parallel grid tiles are exposed when possible (dual-TC v7x)."""
    M8 = _round_up(M, 8)
    TM = 8
    for t in (1024, 512, 256, 128, 64, 32, 16, 8):
        if t <= tm_cap and M8 % t == 0:
            TM = t
            break
    Mp = M8
    if TM < 128 and M8 > 4096:          # awkward large M: pad once, keep big tiles
        TM = 512
        Mp = _round_up(M8, TM)

    if N % 128 == 0:
        TN = 256 if N % 256 == 0 else 128
    else:
        TN = N                           # full-extent (masked stores, half bytes)

    TK = K
    if K % 128 == 0:
        for t in (1024, 896, 768, 640, 512, 384, 256, 128):
            if K % t == 0:
                TK = t
                break

    # v7x: make sure both TensorCores get at least one "parallel" tile.
    if (Mp // TM) * (N // TN) < 2:
        if N % 128 == 0 and TN > 128:
            TN = 128
        elif TM >= 16 and Mp % (TM // 2) == 0:
            TM //= 2
    return TM, TN, TK, Mp


# ---------------------------------------------------------------------------
# Pallas kernels
# ---------------------------------------------------------------------------
def _mm_kernel_single(*refs, relu, has_residual):
    """Single-K-step matmul: dot + bias (+residual, relu) straight to output.
    No accumulator scratch, no pl.when — used by every 1x1 conv / 3x3@cin=64."""
    if has_residual:
        x_ref, w_ref, b_ref, r_ref, o_ref = refs
    else:
        x_ref, w_ref, b_ref, o_ref = refs
        r_ref = None
    y = jnp.dot(x_ref[...], w_ref[...], preferred_element_type=jnp.float32)
    y = y + b_ref[...].astype(jnp.float32)
    if has_residual:
        y = y + r_ref[...].astype(jnp.float32)
    if relu:
        y = jnp.maximum(y, 0.0)
    o_ref[...] = y.astype(o_ref.dtype)


def _mm_kernel_multi(*refs, relu, has_residual):
    """K-accumulated matmul: f32 VMEM accumulator initialised with bias at k==0,
    fused (residual add +) ReLU + store at the last K step."""
    if has_residual:
        x_ref, w_ref, b_ref, r_ref, o_ref, acc_ref = refs
    else:
        x_ref, w_ref, b_ref, o_ref, acc_ref = refs
        r_ref = None

    @pl.when(pl.program_id(2) == 0)
    def _init():
        acc_ref[...] = jnp.broadcast_to(b_ref[...].astype(jnp.float32),
                                        acc_ref.shape)

    acc_ref[...] += jnp.dot(x_ref[...], w_ref[...],
                            preferred_element_type=jnp.float32)

    @pl.when(pl.program_id(2) == pl.num_programs(2) - 1)
    def _fin():
        y = acc_ref[...]
        if has_residual:
            y = y + r_ref[...].astype(jnp.float32)
        if relu:
            y = jnp.maximum(y, 0.0)
        o_ref[...] = y.astype(o_ref.dtype)


def _sobel_feature_kernel(patch_ref, w_ref, const_ref, out_ref):
    """Fused sobel matmul + CRF-net feature construction.

    patch_ref: (TM, 27) bf16 im2col patches of the 3-channel image.
    w_ref:     (27, 128) bf16; lanes 0-2 centre-pixel passthrough, 3-8 sobel.
    const_ref: (8, 128) f32 rows = [sel_r, sel_g, sel_b, centers, scales,
                                    hist_mask, 0, 0].
    out_ref lanes 0..101 = [img, sobel, hist4, hist8, hist16], 102..127 = 0.
    """
    base = jnp.dot(patch_ref[...], w_ref[...],
                   preferred_element_type=jnp.float32)        # (TM, 128) f32
    c = const_ref[...]
    img_b = (base[:, 0:1] * c[0:1, :]
             + base[:, 1:2] * c[1:2, :]
             + base[:, 2:3] * c[2:3, :])                      # per-lane src channel
    hist = jnp.maximum(1.0 - jnp.abs(img_b - c[3:4, :]) * c[4:5, :], 0.0) * c[5:6, :]
    out_ref[...] = (base + hist).astype(out_ref.dtype)        # one wide 128-lane store


def _increase_kernel(rf_ref, o_ref):
    """Monotonic re-parameterisation (`_increase` in the PyTorch module).

    g = diff(rf) via pltpu.roll; r = relu(-min(g)); g' = (g+r)/sum(g+r);
    out = [0, cumsum(g')] via a 10-step roll/masked-add prefix scan (no 4 MiB
    triangular constant, no 1M-MAC matmul)."""
    rf = rf_ref[...]                                          # (B, S) f32
    s = rf.shape[-1]
    lane = jax.lax.broadcasted_iota(jnp.int32, rf.shape, 1)
    # rolled[:, j] = rf[:, (j+1) % s]  ->  g[:, j] = rf[:, j+1] - rf[:, j]
    g = pltpu.roll(rf, s - 1, 1) - rf
    valid = lane < (s - 1)
    min_g = jnp.min(jnp.where(valid, g, jnp.inf), axis=-1, keepdims=True)
    r = jnp.maximum(-min_g, 0.0)
    new_g = jnp.where(valid, g + r, 0.0)
    # eps guards the 0/0 case of a perfectly flat response curve.
    new_g = new_g / (jnp.sum(new_g, axis=-1, keepdims=True) + 1e-12)
    # Exclusive prefix sum: shift right by 1 (zero fill), then Hillis-Steele.
    y = jnp.where(lane >= 1, pltpu.roll(new_g, 1, 1), 0.0)
    d = 1
    while d < s:
        y = y + jnp.where(lane >= d, pltpu.roll(y, d, 1), 0.0)
        d *= 2
    o_ref[...] = y


# ---------------------------------------------------------------------------
# Pallas wrappers
# ---------------------------------------------------------------------------
def matmul_bias_act(x, w, b, relu=False, residual=None,
                    compute_dtype=BF16, out_dtype=None):
    """y = act((x @ w + b) [+ residual]) via the tiled Pallas MXU kernel."""
    M, K = x.shape
    Kw, N = w.shape
    assert K == Kw, (K, Kw)
    if out_dtype is None:
        out_dtype = compute_dtype

    TM, TN, TK, Mp = _tiles(M, N, K)
    nk = K // TK

    xp = _pad_rows(x.astype(compute_dtype), Mp)
    wp = w.astype(compute_dtype)
    bp = b.reshape(1, N).astype(F32)
    has_res = residual is not None

    if nk == 1:
        inputs = [xp, wp, bp]
        in_specs = [
            pl.BlockSpec((TM, K), lambda i, j: (i, 0)),
            pl.BlockSpec((K, TN), lambda i, j: (0, j)),
            pl.BlockSpec((1, TN), lambda i, j: (0, j)),
        ]
        if has_res:
            inputs.append(_pad_rows(residual, Mp))
            in_specs.append(pl.BlockSpec((TM, TN), lambda i, j: (i, j)))
        out = pl.pallas_call(
            functools.partial(_mm_kernel_single, relu=relu, has_residual=has_res),
            out_shape=jax.ShapeDtypeStruct((Mp, N), out_dtype),
            grid_spec=pltpu.PrefetchScalarGridSpec(
                num_scalar_prefetch=0,
                grid=(Mp // TM, N // TN),
                in_specs=in_specs,
                out_specs=pl.BlockSpec((TM, TN), lambda i, j: (i, j)),
            ),
            compiler_params=pltpu.CompilerParams(
                dimension_semantics=("parallel", "parallel"),
                vmem_limit_bytes=VMEM_LIMIT,
            ),
        )(*inputs)
    else:
        inputs = [xp, wp, bp]
        in_specs = [
            pl.BlockSpec((TM, TK), lambda i, j, k: (i, k)),
            pl.BlockSpec((TK, TN), lambda i, j, k: (k, j)),
            pl.BlockSpec((1, TN), lambda i, j, k: (0, j)),
        ]
        if has_res:
            inputs.append(_pad_rows(residual, Mp))
            in_specs.append(pl.BlockSpec((TM, TN), lambda i, j, k: (i, j)))
        out = pl.pallas_call(
            functools.partial(_mm_kernel_multi, relu=relu, has_residual=has_res),
            out_shape=jax.ShapeDtypeStruct((Mp, N), out_dtype),
            grid_spec=pltpu.PrefetchScalarGridSpec(
                num_scalar_prefetch=0,
                grid=(Mp // TM, N // TN, nk),
                in_specs=in_specs,
                out_specs=pl.BlockSpec((TM, TN), lambda i, j, k: (i, j)),
                scratch_shapes=[pltpu.VMEM((TM, TN), jnp.float32)],
            ),
            compiler_params=pltpu.CompilerParams(
                dimension_semantics=("parallel", "parallel", "arbitrary"),
                vmem_limit_bytes=VMEM_LIMIT,
            ),
        )(*inputs)
    return out if Mp == M else out[:M]


def _feature_consts_np():
    c = np.zeros((8, 128), np.float32)
    lane = 9
    for max_bin in (4, 8, 16):
        for i in range(max_bin + 1):
            for ch in range(3):
                c[ch, lane] = 1.0                 # which img channel feeds this lane
                c[3, lane] = i / float(max_bin)   # bin centre
                c[4, lane] = float(max_bin)       # scale
                c[5, lane] = 1.0                  # hist mask
                lane += 1
    assert lane == 102
    return c


_FEATURE_CONSTS = _feature_consts_np()


def sobel_feature(img_nhwc, w_sobel_ext, consts):
    """Fused sobel + histogram-feature prologue.

    img_nhwc: (B, H, W, 3) f32 -> (B*H*W, 128) bf16 feature slab
    (lanes 0..101 = [img, sobel, hist4, hist8, hist16], 102..127 = 0)."""
    padded = jnp.pad(img_nhwc, ((0, 0), (1, 1), (1, 1), (0, 0)), mode="reflect")
    patches, _ = im2col(padded, 3, 1, 0)                  # (B*H*W, 27)
    M = patches.shape[0]
    TM, _, _, Mp = _tiles(M, 128, 27)
    patches = _pad_rows(patches.astype(BF16), Mp)
    out = pl.pallas_call(
        _sobel_feature_kernel,
        out_shape=jax.ShapeDtypeStruct((Mp, 128), BF16),
        grid_spec=pltpu.PrefetchScalarGridSpec(
            num_scalar_prefetch=0,
            grid=(Mp // TM,),
            in_specs=[pl.BlockSpec((TM, 27), lambda i: (i, 0)),
                      pl.BlockSpec((27, 128), lambda i: (0, 0)),
                      pl.BlockSpec((8, 128), lambda i: (0, 0))],
            out_specs=pl.BlockSpec((TM, 128), lambda i: (i, 0)),
        ),
        compiler_params=pltpu.CompilerParams(
            dimension_semantics=("parallel",),
            vmem_limit_bytes=VMEM_LIMIT,
        ),
    )(patches, w_sobel_ext.astype(BF16), consts)
    return out if Mp == M else out[:M]


def increase(rf):
    return pl.pallas_call(
        _increase_kernel,
        out_shape=jax.ShapeDtypeStruct(rf.shape, F32),
    )(rf.astype(F32))


# ---------------------------------------------------------------------------
# Conv / pooling glue (im2col + Pallas matmul)
# ---------------------------------------------------------------------------
def im2col(x, k, stride, pad):
    b, h, w, c = x.shape
    xp = jnp.pad(x, ((0, 0), (pad, pad), (pad, pad), (0, 0)))
    ho = (h + 2 * pad - k) // stride + 1
    wo = (w + 2 * pad - k) // stride + 1
    cols = []
    for dy in range(k):
        for dx in range(k):
            cols.append(xp[:, dy:dy + stride * (ho - 1) + 1:stride,
                           dx:dx + stride * (wo - 1) + 1:stride, :])
    patches = jnp.concatenate(cols, axis=-1)          # patch order: (dy, dx, cin)
    return patches.reshape(b * ho * wo, k * k * c), (b, ho, wo)


def conv2d(x, w_mat, bias, k, stride, pad, relu=False, residual=None):
    """x: NHWC bf16 at native channel width; w_mat: (k*k*Cin, Cout) bf16 with
    row order (dy, dx, cin); bias: (Cout,) f32."""
    r2 = None if residual is None else residual.reshape(-1, residual.shape[-1])
    if k == 1:
        xs = x[:, ::stride, ::stride, :]
        b, ho, wo, c = xs.shape
        y = matmul_bias_act(xs.reshape(-1, c), w_mat, bias, relu=relu, residual=r2)
        return y.reshape(b, ho, wo, -1)
    # TODO(synk): im2col HBM materialization (now bf16, native channels);
    #             tap-fused halo-DMA conv not implemented.
    patches, (b, ho, wo) = im2col(x, k, stride, pad)
    y = matmul_bias_act(patches, w_mat, bias, relu=relu, residual=r2)
    return y.reshape(b, ho, wo, -1)


def max_pool_3x3_s2_p1(x):
    b, h, w, c = x.shape
    xp = jnp.pad(x, ((0, 0), (1, 1), (1, 1), (0, 0)), constant_values=-jnp.inf)
    ho = (h + 2 - 3) // 2 + 1
    wo = (w + 2 - 3) // 2 + 1
    out = None
    for dy in range(3):
        for dx in range(3):
            s = xp[:, dy:dy + 2 * (ho - 1) + 1:2, dx:dx + 2 * (wo - 1) + 1:2, :]
            out = s if out is None else jnp.maximum(out, s)
    return out


# ---------------------------------------------------------------------------
# Parameters (deterministic, synthetic; eval-mode BatchNorm folded into convs;
# NATIVE channel widths, conv weights stored bf16)
# ---------------------------------------------------------------------------
def conv_bn_params(key, k, cin, cout, cin_pad=None, eps=1e-5):
    cin_pad = cin if cin_pad is None else cin_pad
    kw, kb, kg, kbe, km, kv = jax.random.split(key, 6)
    fan_in = k * k * cin
    w = jax.random.normal(kw, (k * k, cin, cout), F32) * np.sqrt(2.0 / fan_in)
    b = jax.random.normal(kb, (cout,), F32) * 0.01
    gamma = jax.random.uniform(kg, (cout,), F32, 0.5, 1.5)
    beta = jax.random.normal(kbe, (cout,), F32) * 0.05
    mean = jax.random.normal(km, (cout,), F32) * 0.05
    var = jax.random.uniform(kv, (cout,), F32, 0.5, 1.5)
    scale = gamma / jnp.sqrt(var + eps)
    w = w * scale[None, None, :]
    bias = (b - mean) * scale + beta
    if cin_pad != cin:                 # pad lanes of the input are exactly zero
        w = jnp.pad(w, ((0, 0), (0, cin_pad - cin), (0, 0)))
    return w.reshape(k * k * cin_pad, cout).astype(BF16), bias.astype(F32)


def init_params(seed=0):
    key = jax.random.PRNGKey(seed)
    layers = [
        ("conv1", 7, 102, 64, 128),     # feature map is a lane-dense 128 slab
        ("conv2", 1, 64, 256, None),
        ("conv3a", 1, 64, 64, None), ("conv3b", 3, 64, 64, None), ("conv3c", 1, 64, 256, None),
        ("conv4a", 1, 256, 64, None), ("conv4b", 3, 64, 256, None), ("conv4c", 1, 256, 256, None),
        ("conv5a", 1, 256, 64, None), ("conv5b", 3, 64, 256, None), ("conv5c", 1, 256, 256, None),
        ("conv6", 1, 256, 512, None),
        ("conv7a", 1, 256, 128, None), ("conv7b", 3, 128, 128, None), ("conv7c", 1, 128, 512, None),
        ("conv8a", 1, 512, 128, None), ("conv8b", 3, 128, 128, None), ("conv8c", 1, 128, 512, None),
    ]
    keys = jax.random.split(key, len(layers) + 2)
    params = {}
    for (name, k, ci, co, cip), kk in zip(layers, keys[:len(layers)]):
        params[name] = conv_bn_params(kk, k, ci, co, cin_pad=cip)
    kd, kh = keys[len(layers):]
    params["dense_w"] = jax.random.normal(kd, (512, 11), F32) / np.sqrt(512.0)
    params["dense_b"] = jnp.zeros((11,), F32)
    params["g0"] = jnp.linspace(0.0, 1.0, 1024, dtype=F32)            # synthetic EMoR g0
    hinv = jax.random.normal(kh, (1024, 11), F32) * 0.01              # synthetic HINV
    params["hinv_t"] = hinv.T                                         # (11, 1024)
    return params


def sobel_weight_ext():
    """(27, 128) weight: lanes 0-2 copy the centre pixel (the image itself),
    lanes 3-8 the sobel gradients [gx_r,gx_g,gx_b,gy_r,gy_g,gy_b], rest zero."""
    sh = np.array([[-1, -2, -1], [0, 0, 0], [1, 2, 1]], np.float32)
    sv = np.array([[-1, 0, 1], [-2, 0, 2], [-1, 0, 1]], np.float32)
    w = np.zeros((27, 128), np.float32)
    for dy in range(3):
        for dx in range(3):
            for c in range(3):
                row = (dy * 3 + dx) * 3 + c
                w[row, 3 + c] = sh[dy, dx]        # grad_x of channel c
                w[row, 6 + c] = sv[dy, dx]        # grad_y of channel c
    for c in range(3):
        w[(1 * 3 + 1) * 3 + c, c] = 1.0           # centre-pixel passthrough
    return jnp.asarray(w)


# ---------------------------------------------------------------------------
# Network forward
# ---------------------------------------------------------------------------
def crf_feature_net(x, p):
    pool1 = max_pool_3x3_s2_p1(conv2d(x, *p["conv1"], k=7, stride=2, pad=3))

    bn2a_b1 = conv2d(pool1, *p["conv2"], k=1, stride=1, pad=0)
    t = conv2d(pool1, *p["conv3a"], k=1, stride=1, pad=0, relu=True)
    t = conv2d(t, *p["conv3b"], k=3, stride=1, pad=1, relu=True)
    res2a = conv2d(t, *p["conv3c"], k=1, stride=1, pad=0, relu=True, residual=bn2a_b1)

    t = conv2d(res2a, *p["conv4a"], k=1, stride=1, pad=0, relu=True)
    t = conv2d(t, *p["conv4b"], k=3, stride=1, pad=1, relu=True)
    res2b = conv2d(t, *p["conv4c"], k=1, stride=1, pad=0, relu=True, residual=res2a)

    t = conv2d(res2b, *p["conv5a"], k=1, stride=1, pad=0, relu=True)
    t = conv2d(t, *p["conv5b"], k=3, stride=1, pad=1, relu=True)
    res2c = conv2d(t, *p["conv5c"], k=1, stride=1, pad=0, relu=True, residual=res2b)

    bn3a_b1 = conv2d(res2c, *p["conv6"], k=1, stride=2, pad=0)
    t = conv2d(res2c, *p["conv7a"], k=1, stride=2, pad=0, relu=True)
    t = conv2d(t, *p["conv7b"], k=3, stride=1, pad=1, relu=True)
    res3a = conv2d(t, *p["conv7c"], k=1, stride=1, pad=0, relu=True, residual=bn3a_b1)

    t = conv2d(res3a, *p["conv8a"], k=1, stride=1, pad=0, relu=True)
    t = conv2d(t, *p["conv8b"], k=3, stride=1, pad=1, relu=True)
    res3b = conv2d(t, *p["conv8c"], k=1, stride=1, pad=0, relu=True, residual=res3a)

    return jnp.mean(res3b.astype(F32), axis=(1, 2))        # (B, 512) f32


def linearization_net(img_nchw, exposure, params, w_sobel_ext, feature_consts):
    # `exposure` is accepted for signature parity but unused (as in the reference).
    del exposure
    img = jnp.transpose(img_nchw, (0, 2, 3, 1)).astype(F32)          # NCHW -> NHWC
    b, h, w, _ = img.shape

    # Fused sobel + histogram features: (B*H*W, 128) bf16, 102 real + 26 zero ch.
    feat = sobel_feature(img, w_sobel_ext, feature_consts).reshape(b, h, w, 128)

    feature = crf_feature_net(feat, params)                          # (B, 512) f32

    # Decode tail stays f32 (tiny).
    pca_w = matmul_bias_act(feature, params["dense_w"], params["dense_b"],
                            compute_dtype=F32, out_dtype=F32)        # (B, 11)
    invcrf = matmul_bias_act(pca_w, params["hinv_t"], params["g0"],
                             compute_dtype=F32, out_dtype=F32)       # (B, 1024)
    return increase(invcrf)                                          # (B, 1024)


# ---------------------------------------------------------------------------
if __name__ == "__main__":
    key = jax.random.PRNGKey(0)
    img = jax.random.uniform(key, (2, 3, 16, 16), F32)   # NCHW, values in [0, 1)
    exposure = jnp.ones((2,), F32)

    params = init_params(seed=0)
    w_sobel_ext = sobel_weight_ext()
    feature_consts = jnp.asarray(_FEATURE_CONSTS)

    fwd = jax.jit(linearization_net)
    out = jax.block_until_ready(fwd(img, exposure, params, w_sobel_ext, feature_consts))

    assert out.shape == (2, 1024), out.shape
    assert bool(jnp.all(jnp.isfinite(out)))
    print("KERNEL_OK")
</pallas_src>

<mosaic_0001>
module attributes {stable_mosaic.version = 11 : i64} {
  func.func @_sobel_feature_kernel(%arg0: i32, %arg1: memref<256x27xbf16, #tpu.memory_space<vmem>>, %arg2: memref<27x128xbf16, #tpu.memory_space<vmem>>, %arg3: memref<8x128xf32, #tpu.memory_space<vmem>>, %arg4: memref<256x128xbf16, #tpu.memory_space<vmem>>) attributes {dimension_semantics = [#tpu.dimension_semantics<parallel>], iteration_bounds = array<i64: 2>, scalar_prefetch = 0 : i64, scratch_operands = 0 : i64, tpu.core_type = #tpu.core_type<tc>, window_params = [{transform_indices = @transform_0, window_bounds = array<i64: 256, 27>}, {pipeline_mode = #tpu.pipeline_mode<synchronous>, transform_indices = @transform_1, window_bounds = array<i64: 27, 128>}, {pipeline_mode = #tpu.pipeline_mode<synchronous>, transform_indices = @transform_2, window_bounds = array<i64: 8, 128>}, {transform_indices = @transform_3, window_bounds = array<i64: 256, 128>}]} {
    %c0 = arith.constant 0 : index
    %c0_0 = arith.constant 0 : index
    %0 = vector.load %arg1[%c0, %c0_0] : memref<256x27xbf16, #tpu.memory_space<vmem>>, vector<256x27xbf16>
    %c0_1 = arith.constant 0 : index
    %c0_2 = arith.constant 0 : index
    %1 = vector.load %arg2[%c0_1, %c0_2] : memref<27x128xbf16, #tpu.memory_space<vmem>>, vector<27x128xbf16>
    %cst = arith.constant dense<0.000000e+00> : vector<256x128xf32>
    %2 = tpu.matmul %0, %1, %cst {dimension_numbers = #tpu.dot_dimension_numbers<[1], [0], [0], [1], [0, 0, 1, 1], [], []>} : vector<256x27xbf16>, vector<27x128xbf16>, vector<256x128xf32> -> vector<256x128xf32>
    %c0_3 = arith.constant 0 : index
    %c0_4 = arith.constant 0 : index
    %3 = vector.load %arg3[%c0_3, %c0_4] : memref<8x128xf32, #tpu.memory_space<vmem>>, vector<8x128xf32>
    %4 = vector.extract_strided_slice %2 {offsets = [0, 0], sizes = [256, 1], strides = [1, 1]} : vector<256x128xf32> to vector<256x1xf32>
    %5 = vector.extract_strided_slice %3 {offsets = [0, 0], sizes = [1, 128], strides = [1, 1]} : vector<8x128xf32> to vector<1x128xf32>
    %6 = vector.broadcast %4 : vector<256x1xf32> to vector<256x128xf32>
    %7 = vector.broadcast %5 : vector<1x128xf32> to vector<256x128xf32>
    %8 = arith.mulf %6, %7 : vector<256x128xf32>
    %9 = vector.extract_strided_slice %2 {offsets = [0, 1], sizes = [256, 1], strides = [1, 1]} : vector<256x128xf32> to vector<256x1xf32>
    %10 = vector.extract_strided_slice %3 {offsets = [1, 0], sizes = [1, 128], strides = [1, 1]} : vector<8x128xf32> to vector<1x128xf32>
    %11 = vector.broadcast %9 : vector<256x1xf32> to vector<256x128xf32>
    %12 = vector.broadcast %10 : vector<1x128xf32> to vector<256x128xf32>
    %13 = arith.mulf %11, %12 : vector<256x128xf32>
    %14 = arith.addf %8, %13 : vector<256x128xf32>
    %15 = vector.extract_strided_slice %2 {offsets = [0, 2], sizes = [256, 1], strides = [1, 1]} : vector<256x128xf32> to vector<256x1xf32>
    %16 = vector.extract_strided_slice %3 {offsets = [2, 0], sizes = [1, 128], strides = [1, 1]} : vector<8x128xf32> to vector<1x128xf32>
    %17 = vector.broadcast %15 : vector<256x1xf32> to vector<256x128xf32>
    %18 = vector.broadcast %16 : vector<1x128xf32> to vector<256x128xf32>
    %19 = arith.mulf %17, %18 : vector<256x128xf32>
    %20 = arith.addf %14, %19 : vector<256x128xf32>
    %21 = vector.extract_strided_slice %3 {offsets = [3, 0], sizes = [1, 128], strides = [1, 1]} : vector<8x128xf32> to vector<1x128xf32>
    %22 = vector.broadcast %21 : vector<1x128xf32> to vector<256x128xf32>
    %23 = arith.subf %20, %22 : vector<256x128xf32>
    %24 = math.absf %23 : vector<256x128xf32>
    %25 = vector.extract_strided_slice %3 {offsets = [4, 0], sizes = [1, 128], strides = [1, 1]} : vector<8x128xf32> to vector<1x128xf32>
    %26 = vector.broadcast %25 : vector<1x128xf32> to vector<256x128xf32>
    %27 = arith.mulf %24, %26 : vector<256x128xf32>
    %cst_5 = arith.constant 1.000000e+00 : f32
    %28 = vector.broadcast %cst_5 : f32 to vector<256x128xf32>
    %29 = arith.subf %28, %27 : vector<256x128xf32>
    %cst_6 = arith.constant 0.000000e+00 : f32
    %30 = vector.broadcast %cst_6 : f32 to vector<256x128xf32>
    %31 = arith.maximumf %29, %30 : vector<256x128xf32>
    %32 = vector.extract_strided_slice %3 {offsets = [5, 0], sizes = [1, 128], strides = [1, 1]} : vector<8x128xf32> to vector<1x128xf32>
    %33 = vector.broadcast %32 : vector<1x128xf32> to vector<256x128xf32>
    %34 = arith.mulf %31, %33 : vector<256x128xf32>
    %35 = arith.addf %2, %34 : vector<256x128xf32>
    %36 = arith.truncf %35 : vector<256x128xf32> to vector<256x128xbf16>
    %c0_7 = arith.constant 0 : index
    %c0_8 = arith.constant 0 : index
    %37 = vector.load %arg4[%c0_7, %c0_8] : memref<256x128xbf16, #tpu.memory_space<vmem>>, vector<256x128xbf16>
    tpu.vector_store %arg4[%c0_7, %c0_8], %36 {strides = array<i32>} : memref<256x128xbf16, #tpu.memory_space<vmem>>, vector<256x128xbf16>,
    return
  }
  func.func @transform_0(%arg0: i32) -> (i32, i32) {
    %c0_i32 = arith.constant 0 : i32
    %c0_i32_0 = arith.constant 0 : i32
    return %arg0, %c0_i32 : i32, i32
  }
  func.func @transform_1(%arg0: i32) -> (i32, i32) {
    %c0_i32 = arith.constant 0 : i32
    %c0_i32_0 = arith.constant 0 : i32
    %c0_i32_1 = arith.constant 0 : i32
    return %c0_i32, %c0_i32_0 : i32, i32
  }
  func.func @transform_2(%arg0: i32) -> (i32, i32) {
    %c0_i32 = arith.constant 0 : i32
    %c0_i32_0 = arith.constant 0 : i32
    %c0_i32_1 = arith.constant 0 : i32
    return %c0_i32, %c0_i32_0 : i32, i32
  }
  func.func @transform_3(%arg0: i32) -> (i32, i32) {
    %c0_i32 = arith.constant 0 : i32
    %c0_i32_0 = arith.constant 0 : i32
    return %arg0, %c0_i32 : i32, i32
  }
}

module attributes {stable_mosaic.version = 11 : i64} {
  func.func @_mm_kernel_multi(%arg0: i32, %arg1: i32, %arg2: i32, %arg3: memref<64x896xbf16, #tpu.memory_space<vmem>>, %arg4: memref<896x64xbf16, #tpu.memory_space<vmem>>, %arg5: memref<1x64xf32, #tpu.memory_space<vmem>>, %arg6: memref<64x64xbf16, #tpu.memory_space<vmem>>, %arg7: memref<64x64xf32, #tpu.memory_space<vmem>>) attributes {dimension_semantics = [#tpu.dimension_semantics<parallel>, #tpu.dimension_semantics<parallel>, #tpu.dimension_semantics<arbitrary>], iteration_bounds = array<i64: 2, 1, 7>, scalar_prefetch = 0 : i64, scratch_operands = 1 : i64, tpu.core_type = #tpu.core_type<tc>, window_params = [{transform_indices = @transform_0, window_bounds = array<i64: 64, 896>}, {transform_indices = @transform_1, window_bounds = array<i64: 896, 64>}, {transform_indices = @transform_2, window_bounds = array<i64: 1, 64>}, {transform_indices = @transform_3, window_bounds = array<i64: 64, 64>}]} {
    %c0_i32 = arith.constant 0 : i32
    %0 = arith.cmpi eq, %arg2, %c0_i32 : i32
    %1 = arith.extui %0 : i1 to i32
    %c0_i32_0 = arith.constant 0 : i32
    %2 = arith.cmpi ne, %1, %c0_i32_0 : i32
    scf.if %2 {
      %c0_9 = arith.constant 0 : index
      %c0_10 = arith.constant 0 : index
      %12 = vector.load %arg5[%c0_9, %c0_10] : memref<1x64xf32, #tpu.memory_space<vmem>>, vector<1x64xf32>
      %13 = vector.shape_cast %12 : vector<1x64xf32> to vector<1x64xf32>
      %14 = vector.broadcast %13 : vector<1x64xf32> to vector<64x64xf32>
      %c0_11 = arith.constant 0 : index
      %c0_12 = arith.constant 0 : index
      %15 = vector.load %arg7[%c0_11, %c0_12] : memref<64x64xf32, #tpu.memory_space<vmem>>, vector<64x64xf32>
      tpu.vector_store %arg7[%c0_11, %c0_12], %14 {strides = array<i32>} : memref<64x64xf32, #tpu.memory_space<vmem>>, vector<64x64xf32>,
    } else {
    }
    %c0 = arith.constant 0 : index
    %c0_1 = arith.constant 0 : index
    %3 = vector.load %arg7[%c0, %c0_1] : memref<64x64xf32, #tpu.memory_space<vmem>>, vector<64x64xf32>
    %c0_2 = arith.constant 0 : index
    %c0_3 = arith.constant 0 : index
    %4 = vector.load %arg3[%c0_2, %c0_3] : memref<64x896xbf16, #tpu.memory_space<vmem>>, vector<64x896xbf16>
    %c0_4 = arith.constant 0 : index
    %c0_5 = arith.constant 0 : index
    %5 = vector.load %arg4[%c0_4, %c0_5] : memref<896x64xbf16, #tpu.memory_space<vmem>>, vector<896x64xbf16>
    %cst = arith.constant dense<0.000000e+00> : vector<64x64xf32>
    %6 = tpu.matmul %4, %5, %cst {dimension_numbers = #tpu.dot_dimension_numbers<[1], [0], [0], [1], [0, 0, 1, 1], [], []>} : vector<64x896xbf16>, vector<896x64xbf16>, vector<64x64xf32> -> vector<64x64xf32>
    %7 = arith.addf %3, %6 : vector<64x64xf32>
    %c0_6 = arith.constant 0 : index
    %c0_7 = arith.constant 0 : index
    %8 = vector.load %arg7[%c0_6, %c0_7] : memref<64x64xf32, #tpu.memory_space<vmem>>, vector<64x64xf32>
    tpu.vector_store %arg7[%c0_6, %c0_7], %7 {strides = array<i32>} : memref<64x64xf32, #tpu.memory_space<vmem>>, vector<64x64xf32>,
    %c6_i32 = arith.constant 6 : i32
    %9 = arith.cmpi eq, %arg2, %c6_i32 : i32
    %10 = arith.extui %9 : i1 to i32
    %c0_i32_8 = arith.constant 0 : i32
    %11 = arith.cmpi ne, %10, %c0_i32_8 : i32
    scf.if %11 {
      %c0_9 = arith.constant 0 : index
      %c0_10 = arith.constant 0 : index
      %12 = vector.load %arg7[%c0_9, %c0_10] : memref<64x64xf32, #tpu.memory_space<vmem>>, vector<64x64xf32>
      %13 = arith.truncf %12 : vector<64x64xf32> to vector<64x64xbf16>
      %c0_11 = arith.constant 0 : index
      %c0_12 = arith.constant 0 : index
      %14 = vector.load %arg6[%c0_11, %c0_12] : memref<64x64xbf16, #tpu.memory_space<vmem>>, vector<64x64xbf16>
      tpu.vector_store %arg6[%c0_11, %c0_12], %13 {strides = array<i32>} : memref<64x64xbf16, #tpu.memory_space<vmem>>, vector<64x64xbf16>,
    } else {
    }
    return
  }
  func.func @transform_0(%arg0: i32, %arg1: i32, %arg2: i32) -> (i32, i32) {
    %c0_i32 = arith.constant 0 : i32
    return %arg0, %arg2 : i32, i32
  }
  func.func @transform_1(%arg0: i32, %arg1: i32, %arg2: i32) -> (i32, i32) {
    %c0_i32 = arith.constant 0 : i32
    return %arg2, %arg1 : i32, i32
  }
  func.func @transform_2(%arg0: i32, %arg1: i32, %arg2: i32) -> (i32, i32) {
    %c0_i32 = arith.constant 0 : i32
    %c0_i32_0 = arith.constant 0 : i32
    return %c0_i32, %arg1 : i32, i32
  }
  func.func @transform_3(%arg0: i32, %arg1: i32, %arg2: i32) -> (i32, i32) {
    %c0_i32 = arith.constant 0 : i32
    return %arg0, %arg1 : i32, i32
  }
}

module attributes {stable_mosaic.version = 11 : i64} {
  func.func @_mm_kernel_single(%arg0: i32, %arg1: i32, %arg2: memref<16x64xbf16, #tpu.memory_space<vmem>>, %arg3: memref<64x64xbf16, #tpu.memory_space<vmem>>, %arg4: memref<1x64xf32, #tpu.memory_space<vmem>>, %arg5: memref<16x64xbf16, #tpu.memory_space<vmem>>) attributes {dimension_semantics = [#tpu.dimension_semantics<parallel>, #tpu.dimension_semantics<parallel>], iteration_bounds = array<i64: 2, 1>, scalar_prefetch = 0 : i64, scratch_operands = 0 : i64, tpu.core_type = #tpu.core_type<tc>, window_params = [{transform_indices = @transform_0, window_bounds = array<i64: 16, 64>}, {transform_indices = @transform_1, window_bounds = array<i64: 64, 64>}, {transform_indices = @transform_2, window_bounds = array<i64: 1, 64>}, {transform_indices = @transform_3, window_bounds = array<i64: 16, 64>}]} {
    %c0 = arith.constant 0 : index
    %c0_0 = arith.constant 0 : index
    %0 = vector.load %arg2[%c0, %c0_0] : memref<16x64xbf16, #tpu.memory_space<vmem>>, vector<16x64xbf16>
    %c0_1 = arith.constant 0 : index
    %c0_2 = arith.constant 0 : index
    %1 = vector.load %arg3[%c0_1, %c0_2] : memref<64x64xbf16, #tpu.memory_space<vmem>>, vector<64x64xbf16>
    %cst = arith.constant dense<0.000000e+00> : vector<16x64xf32>
    %2 = tpu.matmul %0, %1, %cst {dimension_numbers = #tpu.dot_dimension_numbers<[1], [0], [0], [1], [0, 0, 1, 1], [], []>} : vector<16x64xbf16>, vector<64x64xbf16>, vector<16x64xf32> -> vector<16x64xf32>
    %c0_3 = arith.constant 0 : index
    %c0_4 = arith.constant 0 : index
    %3 = vector.load %arg4[%c0_3, %c0_4] : memref<1x64xf32, #tpu.memory_space<vmem>>, vector<1x64xf32>
    %4 = vector.broadcast %3 : vector<1x64xf32> to vector<16x64xf32>
    %5 = arith.addf %2, %4 : vector<16x64xf32>
    %cst_5 = arith.constant 0.000000e+00 : f32
    %6 = vector.broadcast %cst_5 : f32 to vector<16x64xf32>
    %7 = arith.maximumf %5, %6 : vector<16x64xf32>
    %8 = arith.truncf %7 : vector<16x64xf32> to vector<16x64xbf16>
    %c0_6 = arith.constant 0 : index
    %c0_7 = arith.constant 0 : index
    %9 = vector.load %arg5[%c0_6, %c0_7] : memref<16x64xbf16, #tpu.memory_space<vmem>>, vector<16x64xbf16>
    tpu.vector_store %arg5[%c0_6, %c0_7], %8 {strides = array<i32>} : memref<16x64xbf16, #tpu.memory_space<vmem>>, vector<16x64xbf16>,
    return
  }
  func.func @transform_0(%arg0: i32, %arg1: i32) -> (i32, i32) {
    %c0_i32 = arith.constant 0 : i32
    %c0_i32_0 = arith.constant 0 : i32
    return %arg0, %c0_i32 : i32, i32
  }
  func.func @transform_1(%arg0: i32, %arg1: i32) -> (i32, i32) {
    %c0_i32 = arith.constant 0 : i32
    %c0_i32_0 = arith.constant 0 : i32
    return %c0_i32, %arg1 : i32, i32
  }
  func.func @transform_2(%arg0: i32, %arg1: i32) -> (i32, i32) {
    %c0_i32 = arith.constant 0 : i32
    %c0_i32_0 = arith.constant 0 : i32
    return %c0_i32, %arg1 : i32, i32
  }
  func.func @transform_3(%arg0: i32, %arg1: i32) -> (i32, i32) {
    %c0_i32 = arith.constant 0 : i32
    return %arg0, %arg1 : i32, i32
  }
}

module attributes {stable_mosaic.version = 11 : i64} {
  func.func @_mm_kernel_single(%arg0: i32, %arg1: i32, %arg2: memref<32x64xbf16, #tpu.memory_space<vmem>>, %arg3: memref<64x128xbf16, #tpu.memory_space<vmem>>, %arg4: memref<1x128xf32, #tpu.memory_space<vmem>>, %arg5: memref<32x128xbf16, #tpu.memory_space<vmem>>) attributes {dimension_semantics = [#tpu.dimension_semantics<parallel>, #tpu.dimension_semantics<parallel>], iteration_bounds = array<i64: 1, 2>, scalar_prefetch = 0 : i64, scratch_operands = 0 : i64, tpu.core_type = #tpu.core_type<tc>, window_params = [{transform_indices = @transform_0, window_bounds = array<i64: 32, 64>}, {transform_indices = @transform_1, window_bounds = array<i64: 64, 128>}, {transform_indices = @transform_2, window_bounds = array<i64: 1, 128>}, {transform_indices = @transform_3, window_bounds = array<i64: 32, 128>}]} {
    %c0 = arith.constant 0 : index
    %c0_0 = arith.constant 0 : index
    %0 = vector.load %arg2[%c0, %c0_0] : memref<32x64xbf16, #tpu.memory_space<vmem>>, vector<32x64xbf16>
    %c0_1 = arith.constant 0 : index
    %c0_2 = arith.constant 0 : index
    %1 = vector.load %arg3[%c0_1, %c0_2] : memref<64x128xbf16, #tpu.memory_space<vmem>>, vector<64x128xbf16>
    %cst = arith.constant dense<0.000000e+00> : vector<32x128xf32>
    %2 = tpu.matmul %0, %1, %cst {dimension_numbers = #tpu.dot_dimension_numbers<[1], [0], [0], [1], [0, 0, 1, 1], [], []>} : vector<32x64xbf16>, vector<64x128xbf16>, vector<32x128xf32> -> vector<32x128xf32>
    %c0_3 = arith.constant 0 : index
    %c0_4 = arith.constant 0 : index
    %3 = vector.load %arg4[%c0_3, %c0_4] : memref<1x128xf32, #tpu.memory_space<vmem>>, vector<1x128xf32>
    %4 = vector.broadcast %3 : vector<1x128xf32> to vector<32x128xf32>
    %5 = arith.addf %2, %4 : vector<32x128xf32>
    %6 = arith.truncf %5 : vector<32x128xf32> to vector<32x128xbf16>
    %c0_5 = arith.constant 0 : index
    %c0_6 = arith.constant 0 : index
    %7 = vector.load %arg5[%c0_5, %c0_6] : memref<32x128xbf16, #tpu.memory_space<vmem>>, vector<32x128xbf16>
    tpu.vector_store %arg5[%c0_5, %c0_6], %6 {strides = array<i32>} : memref<32x128xbf16, #tpu.memory_space<vmem>>, vector<32x128xbf16>,
    return
  }
  func.func @transform_0(%arg0: i32, %arg1: i32) -> (i32, i32) {
    %c0_i32 = arith.constant 0 : i32
    %c0_i32_0 = arith.constant 0 : i32
    return %arg0, %c0_i32 : i32, i32
  }
  func.func @transform_1(%arg0: i32, %arg1: i32) -> (i32, i32) {
    %c0_i32 = arith.constant 0 : i32
    %c0_i32_0 = arith.constant 0 : i32
    return %c0_i32, %arg1 : i32, i32
  }
  func.func @transform_2(%arg0: i32, %arg1: i32) -> (i32, i32) {
    %c0_i32 = arith.constant 0 : i32
    %c0_i32_0 = arith.constant 0 : i32
    return %c0_i32, %arg1 : i32, i32
  }
  func.func @transform_3(%arg0: i32, %arg1: i32) -> (i32, i32) {
    %c0_i32 = arith.constant 0 : i32
    return %arg0, %arg1 : i32, i32
  }
}

module attributes {stable_mosaic.version = 11 : i64} {
  func.func @_mm_kernel_single(%arg0: i32, %arg1: i32, %arg2: memref<16x576xbf16, #tpu.memory_space<vmem>>, %arg3: memref<576x64xbf16, #tpu.memory_space<vmem>>, %arg4: memref<1x64xf32, #tpu.memory_space<vmem>>, %arg5: memref<16x64xbf16, #tpu.memory_space<vmem>>) attributes {dimension_semantics = [#tpu.dimension_semantics<parallel>, #tpu.dimension_semantics<parallel>], iteration_bounds = array<i64: 2, 1>, scalar_prefetch = 0 : i64, scratch_operands = 0 : i64, tpu.core_type = #tpu.core_type<tc>, window_params = [{transform_indices = @transform_0, window_bounds = array<i64: 16, 576>}, {transform_indices = @transform_1, window_bounds = array<i64: 576, 64>}, {transform_indices = @transform_2, window_bounds = array<i64: 1, 64>}, {transform_indices = @transform_3, window_bounds = array<i64: 16, 64>}]} {
    %c0 = arith.constant 0 : index
    %c0_0 = arith.constant 0 : index
    %0 = vector.load %arg2[%c0, %c0_0] : memref<16x576xbf16, #tpu.memory_space<vmem>>, vector<16x576xbf16>
    %c0_1 = arith.constant 0 : index
    %c0_2 = arith.constant 0 : index
    %1 = vector.load %arg3[%c0_1, %c0_2] : memref<576x64xbf16, #tpu.memory_space<vmem>>, vector<576x64xbf16>
    %cst = arith.constant dense<0.000000e+00> : vector<16x64xf32>
    %2 = tpu.matmul %0, %1, %cst {dimension_numbers = #tpu.dot_dimension_numbers<[1], [0], [0], [1], [0, 0, 1, 1], [], []>} : vector<16x576xbf16>, vector<576x64xbf16>, vector<16x64xf32> -> vector<16x64xf32>
    %c0_3 = arith.constant 0 : index
    %c0_4 = arith.constant 0 : index
    %3 = vector.load %arg4[%c0_3, %c0_4] : memref<1x64xf32, #tpu.memory_space<vmem>>, vector<1x64xf32>
    %4 = vector.broadcast %3 : vector<1x64xf32> to vector<16x64xf32>
    %5 = arith.addf %2, %4 : vector<16x64xf32>
    %cst_5 = arith.constant 0.000000e+00 : f32
    %6 = vector.broadcast %cst_5 : f32 to vector<16x64xf32>
    %7 = arith.maximumf %5, %6 : vector<16x64xf32>
    %8 = arith.truncf %7 : vector<16x64xf32> to vector<16x64xbf16>
    %c0_6 = arith.constant 0 : index
    %c0_7 = arith.constant 0 : index
    %9 = vector.load %arg5[%c0_6, %c0_7] : memref<16x64xbf16, #tpu.memory_space<vmem>>, vector<16x64xbf16>
    tpu.vector_store %arg5[%c0_6, %c0_7], %8 {strides = array<i32>} : memref<16x64xbf16, #tpu.memory_space<vmem>>, vector<16x64xbf16>,
    return
  }
  func.func @transform_0(%arg0: i32, %arg1: i32) -> (i32, i32) {
    %c0_i32 = arith.constant 0 : i32
    %c0_i32_0 = arith.constant 0 : i32
    return %arg0, %c0_i32 : i32, i32
  }
  func.func @transform_1(%arg0: i32, %arg1: i32) -> (i32, i32) {
    %c0_i32 = arith.constant 0 : i32
    %c0_i32_0 = arith.constant 0 : i32
    return %c0_i32, %arg1 : i32, i32
  }
  func.func @transform_2(%arg0: i32, %arg1: i32) -> (i32, i32) {
    %c0_i32 = arith.constant 0 : i32
    %c0_i32_0 = arith.constant 0 : i32
    return %c0_i32, %arg1 : i32, i32
  }
  func.func @transform_3(%arg0: i32, %arg1: i32) -> (i32, i32) {
    %c0_i32 = arith.constant 0 : i32
    return %arg0, %arg1 : i32, i32
  }
}

module attributes {stable_mosaic.version = 11 : i64} {
  func.func @_mm_kernel_single(%arg0: i32, %arg1: i32, %arg2: memref<32x64xbf16, #tpu.memory_space<vmem>>, %arg3: memref<64x128xbf16, #tpu.memory_space<vmem>>, %arg4: memref<1x128xf32, #tpu.memory_space<vmem>>, %arg5: memref<32x128xbf16, #tpu.memory_space<vmem>>, %arg6: memref<32x128xbf16, #tpu.memory_space<vmem>>) attributes {dimension_semantics = [#tpu.dimension_semantics<parallel>, #tpu.dimension_semantics<parallel>], iteration_bounds = array<i64: 1, 2>, scalar_prefetch = 0 : i64, scratch_operands = 0 : i64, tpu.core_type = #tpu.core_type<tc>, window_params = [{transform_indices = @transform_0, window_bounds = array<i64: 32, 64>}, {transform_indices = @transform_1, window_bounds = array<i64: 64, 128>}, {transform_indices = @transform_2, window_bounds = array<i64: 1, 128>}, {transform_indices = @transform_3, window_bounds = array<i64: 32, 128>}, {transform_indices = @transform_4, window_bounds = array<i64: 32, 128>}]} {
    %c0 = arith.constant 0 : index
    %c0_0 = arith.constant 0 : index
    %0 = vector.load %arg2[%c0, %c0_0] : memref<32x64xbf16, #tpu.memory_space<vmem>>, vector<32x64xbf16>
    %c0_1 = arith.constant 0 : index
    %c0_2 = arith.constant 0 : index
    %1 = vector.load %arg3[%c0_1, %c0_2] : memref<64x128xbf16, #tpu.memory_space<vmem>>, vector<64x128xbf16>
    %cst = arith.constant dense<0.000000e+00> : vector<32x128xf32>
    %2 = tpu.matmul %0, %1, %cst {dimension_numbers = #tpu.dot_dimension_numbers<[1], [0], [0], [1], [0, 0, 1, 1], [], []>} : vector<32x64xbf16>, vector<64x128xbf16>, vector<32x128xf32> -> vector<32x128xf32>
    %c0_3 = arith.constant 0 : index
    %c0_4 = arith.constant 0 : index
    %3 = vector.load %arg4[%c0_3, %c0_4] : memref<1x128xf32, #tpu.memory_space<vmem>>, vector<1x128xf32>
    %4 = vector.broadcast %3 : vector<1x128xf32> to vector<32x128xf32>
    %5 = arith.addf %2, %4 : vector<32x128xf32>
    %c0_5 = arith.constant 0 : index
    %c0_6 = arith.constant 0 : index
    %6 = vector.load %arg5[%c0_5, %c0_6] : memref<32x128xbf16, #tpu.memory_space<vmem>>, vector<32x128xbf16>
    %7 = arith.extf %6 : vector<32x128xbf16> to vector<32x128xf32>
    %8 = arith.addf %5, %7 : vector<32x128xf32>
    %cst_7 = arith.constant 0.000000e+00 : f32
    %9 = vector.broadcast %cst_7 : f32 to vector<32x128xf32>
    %10 = arith.maximumf %8, %9 : vector<32x128xf32>
    %11 = arith.truncf %10 : vector<32x128xf32> to vector<32x128xbf16>
    %c0_8 = arith.constant 0 : index
    %c0_9 = arith.constant 0 : index
    %12 = vector.load %arg6[%c0_8, %c0_9] : memref<32x128xbf16, #tpu.memory_space<vmem>>, vector<32x128xbf16>
    tpu.vector_store %arg6[%c0_8, %c0_9], %11 {strides = array<i32>} : memref<32x128xbf16, #tpu.memory_space<vmem>>, vector<32x128xbf16>,
    return
  }
  func.func @transform_0(%arg0: i32, %arg1: i32) -> (i32, i32) {
    %c0_i32 = arith.constant 0 : i32
    %c0_i32_0 = arith.constant 0 : i32
    return %arg0, %c0_i32 : i32, i32
  }
  func.func @transform_1(%arg0: i32, %arg1: i32) -> (i32, i32) {
    %c0_i32 = arith.constant 0 : i32
    %c0_i32_0 = arith.constant 0 : i32
    return %c0_i32, %arg1 : i32, i32
  }
  func.func @transform_2(%arg0: i32, %arg1: i32) -> (i32, i32) {
    %c0_i32 = arith.constant 0 : i32
    %c0_i32_0 = arith.constant 0 : i32
    return %c0_i32, %arg1 : i32, i32
  }
  func.func @transform_3(%arg0: i32, %arg1: i32) -> (i32, i32) {
    %c0_i32 = arith.constant 0 : i32
    return %arg0, %arg1 : i32, i32
  }
  func.func @transform_4(%arg0: i32, %arg1: i32) -> (i32, i32) {
    %c0_i32 = arith.constant 0 : i32
    return %arg0, %arg1 : i32, i32
  }
}

module attributes {stable_mosaic.version = 11 : i64} {
  func.func @_mm_kernel_single(%arg0: i32, %arg1: i32, %arg2: memref<16x256xbf16, #tpu.memory_space<vmem>>, %arg3: memref<256x64xbf16, #tpu.memory_space<vmem>>, %arg4: memref<1x64xf32, #tpu.memory_space<vmem>>, %arg5: memref<16x64xbf16, #tpu.memory_space<vmem>>) attributes {dimension_semantics = [#tpu.dimension_semantics<parallel>, #tpu.dimension_semantics<parallel>], iteration_bounds = array<i64: 2, 1>, scalar_prefetch = 0 : i64, scratch_operands = 0 : i64, tpu.core_type = #tpu.core_type<tc>, window_params = [{transform_indices = @transform_0, window_bounds = array<i64: 16, 256>}, {transform_indices = @transform_1, window_bounds = array<i64: 256, 64>}, {transform_indices = @transform_2, window_bounds = array<i64: 1, 64>}, {transform_indices = @transform_3, window_bounds = array<i64: 16, 64>}]} {
    %c0 = arith.constant 0 : index
    %c0_0 = arith.constant 0 : index
    %0 = vector.load %arg2[%c0, %c0_0] : memref<16x256xbf16, #tpu.memory_space<vmem>>, vector<16x256xbf16>
    %c0_1 = arith.constant 0 : index
    %c0_2 = arith.constant 0 : index
    %1 = vector.load %arg3[%c0_1, %c0_2] : memref<256x64xbf16, #tpu.memory_space<vmem>>, vector<256x64xbf16>
    %cst = arith.constant dense<0.000000e+00> : vector<16x64xf32>
    %2 = tpu.matmul %0, %1, %cst {dimension_numbers = #tpu.dot_dimension_numbers<[1], [0], [0], [1], [0, 0, 1, 1], [], []>} : vector<16x256xbf16>, vector<256x64xbf16>, vector<16x64xf32> -> vector<16x64xf32>
    %c0_3 = arith.constant 0 : index
    %c0_4 = arith.constant 0 : index
    %3 = vector.load %arg4[%c0_3, %c0_4] : memref<1x64xf32, #tpu.memory_space<vmem>>, vector<1x64xf32>
    %4 = vector.broadcast %3 : vector<1x64xf32> to vector<16x64xf32>
    %5 = arith.addf %2, %4 : vector<16x64xf32>
    %cst_5 = arith.constant 0.000000e+00 : f32
    %6 = vector.broadcast %cst_5 : f32 to vector<16x64xf32>
    %7 = arith.maximumf %5, %6 : vector<16x64xf32>
    %8 = arith.truncf %7 : vector<16x64xf32> to vector<16x64xbf16>
    %c0_6 = arith.constant 0 : index
    %c0_7 = arith.constant 0 : index
    %9 = vector.load %arg5[%c0_6, %c0_7] : memref<16x64xbf16, #tpu.memory_space<vmem>>, vector<16x64xbf16>
    tpu.vector_store %arg5[%c0_6, %c0_7], %8 {strides = array<i32>} : memref<16x64xbf16, #tpu.memory_space<vmem>>, vector<16x64xbf16>,
    return
  }
  func.func @transform_0(%arg0: i32, %arg1: i32) -> (i32, i32) {
    %c0_i32 = arith.constant 0 : i32
    %c0_i32_0 = arith.constant 0 : i32
    return %arg0, %c0_i32 : i32, i32
  }
  func.func @transform_1(%arg0: i32, %arg1: i32) -> (i32, i32) {
    %c0_i32 = arith.constant 0 : i32
    %c0_i32_0 = arith.constant 0 : i32
    return %c0_i32, %arg1 : i32, i32
  }
  func.func @transform_2(%arg0: i32, %arg1: i32) -> (i32, i32) {
    %c0_i32 = arith.constant 0 : i32
    %c0_i32_0 = arith.constant 0 : i32
    return %c0_i32, %arg1 : i32, i32
  }
  func.func @transform_3(%arg0: i32, %arg1: i32) -> (i32, i32) {
    %c0_i32 = arith.constant 0 : i32
    return %arg0, %arg1 : i32, i32
  }
}

module attributes {stable_mosaic.version = 11 : i64} {
  func.func @_mm_kernel_single(%arg0: i32, %arg1: i32, %arg2: memref<32x256xbf16, #tpu.memory_space<vmem>>, %arg3: memref<256x128xbf16, #tpu.memory_space<vmem>>, %arg4: memref<1x128xf32, #tpu.memory_space<vmem>>, %arg5: memref<32x128xbf16, #tpu.memory_space<vmem>>, %arg6: memref<32x128xbf16, #tpu.memory_space<vmem>>) attributes {dimension_semantics = [#tpu.dimension_semantics<parallel>, #tpu.dimension_semantics<parallel>], iteration_bounds = array<i64: 1, 2>, scalar_prefetch = 0 : i64, scratch_operands = 0 : i64, tpu.core_type = #tpu.core_type<tc>, window_params = [{transform_indices = @transform_0, window_bounds = array<i64: 32, 256>}, {transform_indices = @transform_1, window_bounds = array<i64: 256, 128>}, {transform_indices = @transform_2, window_bounds = array<i64: 1, 128>}, {transform_indices = @transform_3, window_bounds = array<i64: 32, 128>}, {transform_indices = @transform_4, window_bounds = array<i64: 32, 128>}]} {
    %c0 = arith.constant 0 : index
    %c0_0 = arith.constant 0 : index
    %0 = vector.load %arg2[%c0, %c0_0] : memref<32x256xbf16, #tpu.memory_space<vmem>>, vector<32x256xbf16>
    %c0_1 = arith.constant 0 : index
    %c0_2 = arith.constant 0 : index
    %1 = vector.load %arg3[%c0_1, %c0_2] : memref<256x128xbf16, #tpu.memory_space<vmem>>, vector<256x128xbf16>
    %cst = arith.constant dense<0.000000e+00> : vector<32x128xf32>
    %2 = tpu.matmul %0, %1, %cst {dimension_numbers = #tpu.dot_dimension_numbers<[1], [0], [0], [1], [0, 0, 1, 1], [], []>} : vector<32x256xbf16>, vector<256x128xbf16>, vector<32x128xf32> -> vector<32x128xf32>
    %c0_3 = arith.constant 0 : index
    %c0_4 = arith.constant 0 : index
    %3 = vector.load %arg4[%c0_3, %c0_4] : memref<1x128xf32, #tpu.memory_space<vmem>>, vector<1x128xf32>
    %4 = vector.broadcast %3 : vector<1x128xf32> to vector<32x128xf32>
    %5 = arith.addf %2, %4 : vector<32x128xf32>
    %c0_5 = arith.constant 0 : index
    %c0_6 = arith.constant 0 : index
    %6 = vector.load %arg5[%c0_5, %c0_6] : memref<32x128xbf16, #tpu.memory_space<vmem>>, vector<32x128xbf16>
    %7 = arith.extf %6 : vector<32x128xbf16> to vector<32x128xf32>
    %8 = arith.addf %5, %7 : vector<32x128xf32>
    %cst_7 = arith.constant 0.000000e+00 : f32
    %9 = vector.broadcast %cst_7 : f32 to vector<32x128xf32>
    %10 = arith.maximumf %8, %9 : vector<32x128xf32>
    %11 = arith.truncf %10 : vector<32x128xf32> to vector<32x128xbf16>
    %c0_8 = arith.constant 0 : index
    %c0_9 = arith.constant 0 : index
    %12 = vector.load %arg6[%c0_8, %c0_9] : memref<32x128xbf16, #tpu.memory_space<vmem>>, vector<32x128xbf16>
    tpu.vector_store %arg6[%c0_8, %c0_9], %11 {strides = array<i32>} : memref<32x128xbf16, #tpu.memory_space<vmem>>, vector<32x128xbf16>,
    return
  }
  func.func @transform_0(%arg0: i32, %arg1: i32) -> (i32, i32) {
    %c0_i32 = arith.constant 0 : i32
    %c0_i32_0 = arith.constant 0 : i32
    return %arg0, %c0_i32 : i32, i32
  }
  func.func @transform_1(%arg0: i32, %arg1: i32) -> (i32, i32) {
    %c0_i32 = arith.constant 0 : i32
    %c0_i32_0 = arith.constant 0 : i32
    return %c0_i32, %arg1 : i32, i32
  }
  func.func @transform_2(%arg0: i32, %arg1: i32) -> (i32, i32) {
    %c0_i32 = arith.constant 0 : i32
    %c0_i32_0 = arith.constant 0 : i32
    return %c0_i32, %arg1 : i32, i32
  }
  func.func @transform_3(%arg0: i32, %arg1: i32) -> (i32, i32) {
    %c0_i32 = arith.constant 0 : i32
    return %arg0, %arg1 : i32, i32
  }
  func.func @transform_4(%arg0: i32, %arg1: i32) -> (i32, i32) {
    %c0_i32 = arith.constant 0 : i32
    return %arg0, %arg1 : i32, i32
  }
}

module attributes {stable_mosaic.version = 11 : i64} {
  func.func @_mm_kernel_single(%arg0: i32, %arg1: i32, %arg2: memref<32x576xbf16, #tpu.memory_space<vmem>>, %arg3: memref<576x128xbf16, #tpu.memory_space<vmem>>, %arg4: memref<1x128xf32, #tpu.memory_space<vmem>>, %arg5: memref<32x128xbf16, #tpu.memory_space<vmem>>) attributes {dimension_semantics = [#tpu.dimension_semantics<parallel>, #tpu.dimension_semantics<parallel>], iteration_bounds = array<i64: 1, 2>, scalar_prefetch = 0 : i64, scratch_operands = 0 : i64, tpu.core_type = #tpu.core_type<tc>, window_params = [{transform_indices = @transform_0, window_bounds = array<i64: 32, 576>}, {transform_indices = @transform_1, window_bounds = array<i64: 576, 128>}, {transform_indices = @transform_2, window_bounds = array<i64: 1, 128>}, {transform_indices = @transform_3, window_bounds = array<i64: 32, 128>}]} {
    %c0 = arith.constant 0 : index
    %c0_0 = arith.constant 0 : index
    %0 = vector.load %arg2[%c0, %c0_0] : memref<32x576xbf16, #tpu.memory_space<vmem>>, vector<32x576xbf16>
    %c0_1 = arith.constant 0 : index
    %c0_2 = arith.constant 0 : index
    %1 = vector.load %arg3[%c0_1, %c0_2] : memref<576x128xbf16, #tpu.memory_space<vmem>>, vector<576x128xbf16>
    %cst = arith.constant dense<0.000000e+00> : vector<32x128xf32>
    %2 = tpu.matmul %0, %1, %cst {dimension_numbers = #tpu.dot_dimension_numbers<[1], [0], [0], [1], [0, 0, 1, 1], [], []>} : vector<32x576xbf16>, vector<576x128xbf16>, vector<32x128xf32> -> vector<32x128xf32>
    %c0_3 = arith.constant 0 : index
    %c0_4 = arith.constant 0 : index
    %3 = vector.load %arg4[%c0_3, %c0_4] : memref<1x128xf32, #tpu.memory_space<vmem>>, vector<1x128xf32>
    %4 = vector.broadcast %3 : vector<1x128xf32> to vector<32x128xf32>
    %5 = arith.addf %2, %4 : vector<32x128xf32>
    %cst_5 = arith.constant 0.000000e+00 : f32
    %6 = vector.broadcast %cst_5 : f32 to vector<32x128xf32>
    %7 = arith.maximumf %5, %6 : vector<32x128xf32>
    %8 = arith.truncf %7 : vector<32x128xf32> to vector<32x128xbf16>
    %c0_6 = arith.constant 0 : index
    %c0_7 = arith.constant 0 : index
    %9 = vector.load %arg5[%c0_6, %c0_7] : memref<32x128xbf16, #tpu.memory_space<vmem>>, vector<32x128xbf16>
    tpu.vector_store %arg5[%c0_6, %c0_7], %8 {strides = array<i32>} : memref<32x128xbf16, #tpu.memory_space<vmem>>, vector<32x128xbf16>,
    return
  }
  func.func @transform_0(%arg0: i32, %arg1: i32) -> (i32, i32) {
    %c0_i32 = arith.constant 0 : i32
    %c0_i32_0 = arith.constant 0 : i32
    return %arg0, %c0_i32 : i32, i32
  }
  func.func @transform_1(%arg0: i32, %arg1: i32) -> (i32, i32) {
    %c0_i32 = arith.constant 0 : i32
    %c0_i32_0 = arith.constant 0 : i32
    return %c0_i32, %arg1 : i32, i32
  }
  func.func @transform_2(%arg0: i32, %arg1: i32) -> (i32, i32) {
    %c0_i32 = arith.constant 0 : i32
    %c0_i32_0 = arith.constant 0 : i32
    return %c0_i32, %arg1 : i32, i32
  }
  func.func @transform_3(%arg0: i32, %arg1: i32) -> (i32, i32) {
    %c0_i32 = arith.constant 0 : i32
    return %arg0, %arg1 : i32, i32
  }
}

module attributes {stable_mosaic.version = 11 : i64} {
  func.func @_mm_kernel_single(%arg0: i32, %arg1: i32, %arg2: memref<8x256xbf16, #tpu.memory_space<vmem>>, %arg3: memref<256x128xbf16, #tpu.memory_space<vmem>>, %arg4: memref<1x128xf32, #tpu.memory_space<vmem>>, %arg5: memref<8x128xbf16, #tpu.memory_space<vmem>>) attributes {dimension_semantics = [#tpu.dimension_semantics<parallel>, #tpu.dimension_semantics<parallel>], iteration_bounds = array<i64: 1, 1>, scalar_prefetch = 0 : i64, scratch_operands = 0 : i64, tpu.core_type = #tpu.core_type<tc>, window_params = [{transform_indices = @transform_0, window_bounds = array<i64: 8, 256>}, {transform_indices = @transform_1, window_bounds = array<i64: 256, 128>}, {transform_indices = @transform_2, window_bounds = array<i64: 1, 128>}, {transform_indices = @transform_3, window_bounds = array<i64: 8, 128>}]} {
    %c0 = arith.constant 0 : index
    %c0_0 = arith.constant 0 : index
    %0 = vector.load %arg2[%c0, %c0_0] : memref<8x256xbf16, #tpu.memory_space<vmem>>, vector<8x256xbf16>
    %c0_1 = arith.constant 0 : index
    %c0_2 = arith.constant 0 : index
    %1 = vector.load %arg3[%c0_1, %c0_2] : memref<256x128xbf16, #tpu.memory_space<vmem>>, vector<256x128xbf16>
    %cst = arith.constant dense<0.000000e+00> : vector<8x128xf32>
    %2 = tpu.matmul %0, %1, %cst {dimension_numbers = #tpu.dot_dimension_numbers<[1], [0], [0], [1], [0, 0, 1, 1], [], []>} : vector<8x256xbf16>, vector<256x128xbf16>, vector<8x128xf32> -> vector<8x128xf32>
    %c0_3 = arith.constant 0 : index
    %c0_4 = arith.constant 0 : index
    %3 = vector.load %arg4[%c0_3, %c0_4] : memref<1x128xf32, #tpu.memory_space<vmem>>, vector<1x128xf32>
    %4 = vector.broadcast %3 : vector<1x128xf32> to vector<8x128xf32>
    %5 = arith.addf %2, %4 : vector<8x128xf32>
    %cst_5 = arith.constant 0.000000e+00 : f32
    %6 = vector.broadcast %cst_5 : f32 to vector<8x128xf32>
    %7 = arith.maximumf %5, %6 : vector<8x128xf32>
    %8 = arith.truncf %7 : vector<8x128xf32> to vector<8x128xbf16>
    %c0_6 = arith.constant 0 : index
    %c0_7 = arith.constant 0 : index
    %9 = vector.load %arg5[%c0_6, %c0_7] : memref<8x128xbf16, #tpu.memory_space<vmem>>, vector<8x128xbf16>
    tpu.vector_store %arg5[%c0_6, %c0_7], %8 {strides = array<i32>} : memref<8x128xbf16, #tpu.memory_space<vmem>>, vector<8x128xbf16>,
    return
  }
  func.func @transform_0(%arg0: i32, %arg1: i32) -> (i32, i32) {
    %c0_i32 = arith.constant 0 : i32
    %c0_i32_0 = arith.constant 0 : i32
    return %arg0, %c0_i32 : i32, i32
  }
  func.func @transform_1(%arg0: i32, %arg1: i32) -> (i32, i32) {
    %c0_i32 = arith.constant 0 : i32
    %c0_i32_0 = arith.constant 0 : i32
    return %c0_i32, %arg1 : i32, i32
  }
  func.func @transform_2(%arg0: i32, %arg1: i32) -> (i32, i32) {
    %c0_i32 = arith.constant 0 : i32
    %c0_i32_0 = arith.constant 0 : i32
    return %c0_i32, %arg1 : i32, i32
  }
  func.func @transform_3(%arg0: i32, %arg1: i32) -> (i32, i32) {
    %c0_i32 = arith.constant 0 : i32
    return %arg0, %arg1 : i32, i32
  }
}

module attributes {stable_mosaic.version = 11 : i64} {
  func.func @_mm_kernel_multi(%arg0: i32, %arg1: i32, %arg2: i32, %arg3: memref<8x384xbf16, #tpu.memory_space<vmem>>, %arg4: memref<384x128xbf16, #tpu.memory_space<vmem>>, %arg5: memref<1x128xf32, #tpu.memory_space<vmem>>, %arg6: memref<8x128xbf16, #tpu.memory_space<vmem>>, %arg7: memref<8x128xf32, #tpu.memory_space<vmem>>) attributes {dimension_semantics = [#tpu.dimension_semantics<parallel>, #tpu.dimension_semantics<parallel>, #tpu.dimension_semantics<arbitrary>], iteration_bounds = array<i64: 1, 1, 3>, scalar_prefetch = 0 : i64, scratch_operands = 1 : i64, tpu.core_type = #tpu.core_type<tc>, window_params = [{transform_indices = @transform_0, window_bounds = array<i64: 8, 384>}, {transform_indices = @transform_1, window_bounds = array<i64: 384, 128>}, {transform_indices = @transform_2, window_bounds = array<i64: 1, 128>}, {transform_indices = @transform_3, window_bounds = array<i64: 8, 128>}]} {
    %c0_i32 = arith.constant 0 : i32
    %0 = arith.cmpi eq, %arg2, %c0_i32 : i32
    %1 = arith.extui %0 : i1 to i32
    %c0_i32_0 = arith.constant 0 : i32
    %2 = arith.cmpi ne, %1, %c0_i32_0 : i32
    scf.if %2 {
      %c0_9 = arith.constant 0 : index
      %c0_10 = arith.constant 0 : index
      %12 = vector.load %arg5[%c0_9, %c0_10] : memref<1x128xf32, #tpu.memory_space<vmem>>, vector<1x128xf32>
      %13 = vector.shape_cast %12 : vector<1x128xf32> to vector<1x128xf32>
      %14 = vector.broadcast %13 : vector<1x128xf32> to vector<8x128xf32>
      %c0_11 = arith.constant 0 : index
      %c0_12 = arith.constant 0 : index
      %15 = vector.load %arg7[%c0_11, %c0_12] : memref<8x128xf32, #tpu.memory_space<vmem>>, vector<8x128xf32>
      tpu.vector_store %arg7[%c0_11, %c0_12], %14 {strides = array<i32>} : memref<8x128xf32, #tpu.memory_space<vmem>>, vector<8x128xf32>,
    } else {
    }
    %c0 = arith.constant 0 : index
    %c0_1 = arith.constant 0 : index
    %3 = vector.load %arg7[%c0, %c0_1] : memref<8x128xf32, #tpu.memory_space<vmem>>, vector<8x128xf32>
    %c0_2 = arith.constant 0 : index
    %c0_3 = arith.constant 0 : index
    %4 = vector.load %arg3[%c0_2, %c0_3] : memref<8x384xbf16, #tpu.memory_space<vmem>>, vector<8x384xbf16>
    %c0_4 = arith.constant 0 : index
    %c0_5 = arith.constant 0 : index
    %5 = vector.load %arg4[%c0_4, %c0_5] : memref<384x128xbf16, #tpu.memory_space<vmem>>, vector<384x128xbf16>
    %cst = arith.constant dense<0.000000e+00> : vector<8x128xf32>
    %6 = tpu.matmul %4, %5, %cst {dimension_numbers = #tpu.dot_dimension_numbers<[1], [0], [0], [1], [0, 0, 1, 1], [], []>} : vector<8x384xbf16>, vector<384x128xbf16>, vector<8x128xf32> -> vector<8x128xf32>
    %7 = arith.addf %3, %6 : vector<8x128xf32>
    %c0_6 = arith.constant 0 : index
    %c0_7 = arith.constant 0 : index
    %8 = vector.load %arg7[%c0_6, %c0_7] : memref<8x128xf32, #tpu.memory_space<vmem>>, vector<8x128xf32>
    tpu.vector_store %arg7[%c0_6, %c0_7], %7 {strides = array<i32>} : memref<8x128xf32, #tpu.memory_space<vmem>>, vector<8x128xf32>,
    %c2_i32 = arith.constant 2 : i32
    %9 = arith.cmpi eq, %arg2, %c2_i32 : i32
    %10 = arith.extui %9 : i1 to i32
    %c0_i32_8 = arith.constant 0 : i32
    %11 = arith.cmpi ne, %10, %c0_i32_8 : i32
    scf.if %11 {
      %c0_9 = arith.constant 0 : index
      %c0_10 = arith.constant 0 : index
      %12 = vector.load %arg7[%c0_9, %c0_10] : memref<8x128xf32, #tpu.memory_space<vmem>>, vector<8x128xf32>
      %cst_11 = arith.constant 0.000000e+00 : f32
      %13 = vector.broadcast %cst_11 : f32 to vector<8x128xf32>
      %14 = arith.maximumf %12, %13 : vector<8x128xf32>
      %15 = arith.truncf %14 : vector<8x128xf32> to vector<8x128xbf16>
      %c0_12 = arith.constant 0 : index
      %c0_13 = arith.constant 0 : index
      %16 = vector.load %arg6[%c0_12, %c0_13] : memref<8x128xbf16, #tpu.memory_space<vmem>>, vector<8x128xbf16>
      tpu.vector_store %arg6[%c0_12, %c0_13], %15 {strides = array<i32>} : memref<8x128xbf16, #tpu.memory_space<vmem>>, vector<8x128xbf16>,
    } else {
    }
    return
  }
  func.func @transform_0(%arg0: i32, %arg1: i32, %arg2: i32) -> (i32, i32) {
    %c0_i32 = arith.constant 0 : i32
    return %arg0, %arg2 : i32, i32
  }
  func.func @transform_1(%arg0: i32, %arg1: i32, %arg2: i32) -> (i32, i32) {
    %c0_i32 = arith.constant 0 : i32
    return %arg2, %arg1 : i32, i32
  }
  func.func @transform_2(%arg0: i32, %arg1: i32, %arg2: i32) -> (i32, i32) {
    %c0_i32 = arith.constant 0 : i32
    %c0_i32_0 = arith.constant 0 : i32
    return %c0_i32, %arg1 : i32, i32
  }
  func.func @transform_3(%arg0: i32, %arg1: i32, %arg2: i32) -> (i32, i32) {
    %c0_i32 = arith.constant 0 : i32
    return %arg0, %arg1 : i32, i32
  }
}

module attributes {stable_mosaic.version = 11 : i64} {
  func.func @_mm_kernel_single(%arg0: i32, %arg1: i32, %arg2: memref<8x256xbf16, #tpu.memory_space<vmem>>, %arg3: memref<256x256xbf16, #tpu.memory_space<vmem>>, %arg4: memref<1x256xf32, #tpu.memory_space<vmem>>, %arg5: memref<8x256xbf16, #tpu.memory_space<vmem>>) attributes {dimension_semantics = [#tpu.dimension_semantics<parallel>, #tpu.dimension_semantics<parallel>], iteration_bounds = array<i64: 1, 2>, scalar_prefetch = 0 : i64, scratch_operands = 0 : i64, tpu.core_type = #tpu.core_type<tc>, window_params = [{transform_indices = @transform_0, window_bounds = array<i64: 8, 256>}, {transform_indices = @transform_1, window_bounds = array<i64: 256, 256>}, {transform_indices = @transform_2, window_bounds = array<i64: 1, 256>}, {transform_indices = @transform_3, window_bounds = array<i64: 8, 256>}]} {
    %c0 = arith.constant 0 : index
    %c0_0 = arith.constant 0 : index
    %0 = vector.load %arg2[%c0, %c0_0] : memref<8x256xbf16, #tpu.memory_space<vmem>>, vector<8x256xbf16>
    %c0_1 = arith.constant 0 : index
    %c0_2 = arith.constant 0 : index
    %1 = vector.load %arg3[%c0_1, %c0_2] : memref<256x256xbf16, #tpu.memory_space<vmem>>, vector<256x256xbf16>
    %cst = arith.constant dense<0.000000e+00> : vector<8x256xf32>
    %2 = tpu.matmul %0, %1, %cst {dimension_numbers = #tpu.dot_dimension_numbers<[1], [0], [0], [1], [0, 0, 1, 1], [], []>} : vector<8x256xbf16>, vector<256x256xbf16>, vector<8x256xf32> -> vector<8x256xf32>
    %c0_3 = arith.constant 0 : index
    %c0_4 = arith.constant 0 : index
    %3 = vector.load %arg4[%c0_3, %c0_4] : memref<1x256xf32, #tpu.memory_space<vmem>>, vector<1x256xf32>
    %4 = vector.broadcast %3 : vector<1x256xf32> to vector<8x256xf32>
    %5 = arith.addf %2, %4 : vector<8x256xf32>
    %6 = arith.truncf %5 : vector<8x256xf32> to vector<8x256xbf16>
    %c0_5 = arith.constant 0 : index
    %c0_6 = arith.constant 0 : index
    %7 = vector.load %arg5[%c0_5, %c0_6] : memref<8x256xbf16, #tpu.memory_space<vmem>>, vector<8x256xbf16>
    tpu.vector_store %arg5[%c0_5, %c0_6], %6 {strides = array<i32>} : memref<8x256xbf16, #tpu.memory_space<vmem>>, vector<8x256xbf16>,
    return
  }
  func.func @transform_0(%arg0: i32, %arg1: i32) -> (i32, i32) {
    %c0_i32 = arith.constant 0 : i32
    %c0_i32_0 = arith.constant 0 : i32
    return %arg0, %c0_i32 : i32, i32
  }
  func.func @transform_1(%arg0: i32, %arg1: i32) -> (i32, i32) {
    %c0_i32 = arith.constant 0 : i32
    %c0_i32_0 = arith.constant 0 : i32
    return %c0_i32, %arg1 : i32, i32
  }
  func.func @transform_2(%arg0: i32, %arg1: i32) -> (i32, i32) {
    %c0_i32 = arith.constant 0 : i32
    %c0_i32_0 = arith.constant 0 : i32
    return %c0_i32, %arg1 : i32, i32
  }
  func.func @transform_3(%arg0: i32, %arg1: i32) -> (i32, i32) {
    %c0_i32 = arith.constant 0 : i32
    return %arg0, %arg1 : i32, i32
  }
}

module attributes {stable_mosaic.version = 11 : i64} {
  func.func @_mm_kernel_single(%arg0: i32, %arg1: i32, %arg2: memref<8x128xbf16, #tpu.memory_space<vmem>>, %arg3: memref<128x256xbf16, #tpu.memory_space<vmem>>, %arg4: memref<1x256xf32, #tpu.memory_space<vmem>>, %arg5: memref<8x256xbf16, #tpu.memory_space<vmem>>, %arg6: memref<8x256xbf16, #tpu.memory_space<vmem>>) attributes {dimension_semantics = [#tpu.dimension_semantics<parallel>, #tpu.dimension_semantics<parallel>], iteration_bounds = array<i64: 1, 2>, scalar_prefetch = 0 : i64, scratch_operands = 0 : i64, tpu.core_type = #tpu.core_type<tc>, window_params = [{transform_indices = @transform_0, window_bounds = array<i64: 8, 128>}, {transform_indices = @transform_1, window_bounds = array<i64: 128, 256>}, {transform_indices = @transform_2, window_bounds = array<i64: 1, 256>}, {transform_indices = @transform_3, window_bounds = array<i64: 8, 256>}, {transform_indices = @transform_4, window_bounds = array<i64: 8, 256>}]} {
    %c0 = arith.constant 0 : index
    %c0_0 = arith.constant 0 : index
    %0 = vector.load %arg2[%c0, %c0_0] : memref<8x128xbf16, #tpu.memory_space<vmem>>, vector<8x128xbf16>
    %c0_1 = arith.constant 0 : index
    %c0_2 = arith.constant 0 : index
    %1 = vector.load %arg3[%c0_1, %c0_2] : memref<128x256xbf16, #tpu.memory_space<vmem>>, vector<128x256xbf16>
    %cst = arith.constant dense<0.000000e+00> : vector<8x256xf32>
    %2 = tpu.matmul %0, %1, %cst {dimension_numbers = #tpu.dot_dimension_numbers<[1], [0], [0], [1], [0, 0, 1, 1], [], []>} : vector<8x128xbf16>, vector<128x256xbf16>, vector<8x256xf32> -> vector<8x256xf32>
    %c0_3 = arith.constant 0 : index
    %c0_4 = arith.constant 0 : index
    %3 = vector.load %arg4[%c0_3, %c0_4] : memref<1x256xf32, #tpu.memory_space<vmem>>, vector<1x256xf32>
    %4 = vector.broadcast %3 : vector<1x256xf32> to vector<8x256xf32>
    %5 = arith.addf %2, %4 : vector<8x256xf32>
    %c0_5 = arith.constant 0 : index
    %c0_6 = arith.constant 0 : index
    %6 = vector.load %arg5[%c0_5, %c0_6] : memref<8x256xbf16, #tpu.memory_space<vmem>>, vector<8x256xbf16>
    %7 = arith.extf %6 : vector<8x256xbf16> to vector<8x256xf32>
    %8 = arith.addf %5, %7 : vector<8x256xf32>
    %cst_7 = arith.constant 0.000000e+00 : f32
    %9 = vector.broadcast %cst_7 : f32 to vector<8x256xf32>
    %10 = arith.maximumf %8, %9 : vector<8x256xf32>
    %11 = arith.truncf %10 : vector<8x256xf32> to vector<8x256xbf16>
    %c0_8 = arith.constant 0 : index
    %c0_9 = arith.constant 0 : index
    %12 = vector.load %arg6[%c0_8, %c0_9] : memref<8x256xbf16, #tpu.memory_space<vmem>>, vector<8x256xbf16>
    tpu.vector_store %arg6[%c0_8, %c0_9], %11 {strides = array<i32>} : memref<8x256xbf16, #tpu.memory_space<vmem>>, vector<8x256xbf16>,
    return
  }
  func.func @transform_0(%arg0: i32, %arg1: i32) -> (i32, i32) {
    %c0_i32 = arith.constant 0 : i32
    %c0_i32_0 = arith.constant 0 : i32
    return %arg0, %c0_i32 : i32, i32
  }
  func.func @transform_1(%arg0: i32, %arg1: i32) -> (i32, i32) {
    %c0_i32 = arith.constant 0 : i32
    %c0_i32_0 = arith.constant 0 : i32
    return %c0_i32, %arg1 : i32, i32
  }
  func.func @transform_2(%arg0: i32, %arg1: i32) -> (i32, i32) {
    %c0_i32 = arith.constant 0 : i32
    %c0_i32_0 = arith.constant 0 : i32
    return %c0_i32, %arg1 : i32, i32
  }
  func.func @transform_3(%arg0: i32, %arg1: i32) -> (i32, i32) {
    %c0_i32 = arith.constant 0 : i32
    return %arg0, %arg1 : i32, i32
  }
  func.func @transform_4(%arg0: i32, %arg1: i32) -> (i32, i32) {
    %c0_i32 = arith.constant 0 : i32
    return %arg0, %arg1 : i32, i32
  }
}

module attributes {stable_mosaic.version = 11 : i64} {
  func.func @_mm_kernel_single(%arg0: i32, %arg1: i32, %arg2: memref<8x512xbf16, #tpu.memory_space<vmem>>, %arg3: memref<512x128xbf16, #tpu.memory_space<vmem>>, %arg4: memref<1x128xf32, #tpu.memory_space<vmem>>, %arg5: memref<8x128xbf16, #tpu.memory_space<vmem>>) attributes {dimension_semantics = [#tpu.dimension_semantics<parallel>, #tpu.dimension_semantics<parallel>], iteration_bounds = array<i64: 1, 1>, scalar_prefetch = 0 : i64, scratch_operands = 0 : i64, tpu.core_type = #tpu.core_type<tc>, window_params = [{transform_indices = @transform_0, window_bounds = array<i64: 8, 512>}, {transform_indices = @transform_1, window_bounds = array<i64: 512, 128>}, {transform_indices = @transform_2, window_bounds = array<i64: 1, 128>}, {transform_indices = @transform_3, window_bounds = array<i64: 8, 128>}]} {
    %c0 = arith.constant 0 : index
    %c0_0 = arith.constant 0 : index
    %0 = vector.load %arg2[%c0, %c0_0] : memref<8x512xbf16, #tpu.memory_space<vmem>>, vector<8x512xbf16>
    %c0_1 = arith.constant 0 : index
    %c0_2 = arith.constant 0 : index
    %1 = vector.load %arg3[%c0_1, %c0_2] : memref<512x128xbf16, #tpu.memory_space<vmem>>, vector<512x128xbf16>
    %cst = arith.constant dense<0.000000e+00> : vector<8x128xf32>
    %2 = tpu.matmul %0, %1, %cst {dimension_numbers = #tpu.dot_dimension_numbers<[1], [0], [0], [1], [0, 0, 1, 1], [], []>} : vector<8x512xbf16>, vector<512x128xbf16>, vector<8x128xf32> -> vector<8x128xf32>
    %c0_3 = arith.constant 0 : index
    %c0_4 = arith.constant 0 : index
    %3 = vector.load %arg4[%c0_3, %c0_4] : memref<1x128xf32, #tpu.memory_space<vmem>>, vector<1x128xf32>
    %4 = vector.broadcast %3 : vector<1x128xf32> to vector<8x128xf32>
    %5 = arith.addf %2, %4 : vector<8x128xf32>
    %cst_5 = arith.constant 0.000000e+00 : f32
    %6 = vector.broadcast %cst_5 : f32 to vector<8x128xf32>
    %7 = arith.maximumf %5, %6 : vector<8x128xf32>
    %8 = arith.truncf %7 : vector<8x128xf32> to vector<8x128xbf16>
    %c0_6 = arith.constant 0 : index
    %c0_7 = arith.constant 0 : index
    %9 = vector.load %arg5[%c0_6, %c0_7] : memref<8x128xbf16, #tpu.memory_space<vmem>>, vector<8x128xbf16>
    tpu.vector_store %arg5[%c0_6, %c0_7], %8 {strides = array<i32>} : memref<8x128xbf16, #tpu.memory_space<vmem>>, vector<8x128xbf16>,
    return
  }
  func.func @transform_0(%arg0: i32, %arg1: i32) -> (i32, i32) {
    %c0_i32 = arith.constant 0 : i32
    %c0_i32_0 = arith.constant 0 : i32
    return %arg0, %c0_i32 : i32, i32
  }
  func.func @transform_1(%arg0: i32, %arg1: i32) -> (i32, i32) {
    %c0_i32 = arith.constant 0 : i32
    %c0_i32_0 = arith.constant 0 : i32
    return %c0_i32, %arg1 : i32, i32
  }
  func.func @transform_2(%arg0: i32, %arg1: i32) -> (i32, i32) {
    %c0_i32 = arith.constant 0 : i32
    %c0_i32_0 = arith.constant 0 : i32
    return %c0_i32, %arg1 : i32, i32
  }
  func.func @transform_3(%arg0: i32, %arg1: i32) -> (i32, i32) {
    %c0_i32 = arith.constant 0 : i32
    return %arg0, %arg1 : i32, i32
  }
}

module attributes {stable_mosaic.version = 11 : i64} {
  func.func @_mm_kernel_single(%arg0: i32, %arg1: i32, %arg2: memref<8x512xf32, #tpu.memory_space<vmem>>, %arg3: memref<512x11xf32, #tpu.memory_space<vmem>>, %arg4: memref<1x11xf32, #tpu.memory_space<vmem>>, %arg5: memref<8x11xf32, #tpu.memory_space<vmem>>) attributes {dimension_semantics = [#tpu.dimension_semantics<parallel>, #tpu.dimension_semantics<parallel>], iteration_bounds = array<i64: 1, 1>, scalar_prefetch = 0 : i64, scratch_operands = 0 : i64, tpu.core_type = #tpu.core_type<tc>, window_params = [{transform_indices = @transform_0, window_bounds = array<i64: 8, 512>}, {transform_indices = @transform_1, window_bounds = array<i64: 512, 11>}, {transform_indices = @transform_2, window_bounds = array<i64: 1, 11>}, {transform_indices = @transform_3, window_bounds = array<i64: 8, 11>}]} {
    %c0 = arith.constant 0 : index
    %c0_0 = arith.constant 0 : index
    %0 = vector.load %arg2[%c0, %c0_0] : memref<8x512xf32, #tpu.memory_space<vmem>>, vector<8x512xf32>
    %c0_1 = arith.constant 0 : index
    %c0_2 = arith.constant 0 : index
    %1 = vector.load %arg3[%c0_1, %c0_2] : memref<512x11xf32, #tpu.memory_space<vmem>>, vector<512x11xf32>
    %cst = arith.constant dense<0.000000e+00> : vector<8x11xf32>
    %2 = tpu.matmul %0, %1, %cst {dimension_numbers = #tpu.dot_dimension_numbers<[1], [0], [0], [1], [0, 0, 1, 1], [], []>} : vector<8x512xf32>, vector<512x11xf32>, vector<8x11xf32> -> vector<8x11xf32>
    %c0_3 = arith.constant 0 : index
    %c0_4 = arith.constant 0 : index
    %3 = vector.load %arg4[%c0_3, %c0_4] : memref<1x11xf32, #tpu.memory_space<vmem>>, vector<1x11xf32>
    %4 = vector.broadcast %3 : vector<1x11xf32> to vector<8x11xf32>
    %5 = arith.addf %2, %4 : vector<8x11xf32>
    %c0_5 = arith.constant 0 : index
    %c0_6 = arith.constant 0 : index
    %6 = vector.load %arg5[%c0_5, %c0_6] : memref<8x11xf32, #tpu.memory_space<vmem>>, vector<8x11xf32>
    tpu.vector_store %arg5[%c0_5, %c0_6], %5 {strides = array<i32>} : memref<8x11xf32, #tpu.memory_space<vmem>>, vector<8x11xf32>,
    return
  }
  func.func @transform_0(%arg0: i32, %arg1: i32) -> (i32, i32) {
    %c0_i32 = arith.constant 0 : i32
    %c0_i32_0 = arith.constant 0 : i32
    return %arg0, %c0_i32 : i32, i32
  }
  func.func @transform_1(%arg0: i32, %arg1: i32) -> (i32, i32) {
    %c0_i32 = arith.constant 0 : i32
    %c0_i32_0 = arith.constant 0 : i32
    return %c0_i32, %arg1 : i32, i32
  }
  func.func @transform_2(%arg0: i32, %arg1: i32) -> (i32, i32) {
    %c0_i32 = arith.constant 0 : i32
    %c0_i32_0 = arith.constant 0 : i32
    return %c0_i32, %arg1 : i32, i32
  }
  func.func @transform_3(%arg0: i32, %arg1: i32) -> (i32, i32) {
    %c0_i32 = arith.constant 0 : i32
    return %arg0, %arg1 : i32, i32
  }
}

module attributes {stable_mosaic.version = 11 : i64} {
  func.func @_mm_kernel_single(%arg0: i32, %arg1: i32, %arg2: memref<8x11xf32, #tpu.memory_space<vmem>>, %arg3: memref<11x256xf32, #tpu.memory_space<vmem>>, %arg4: memref<1x256xf32, #tpu.memory_space<vmem>>, %arg5: memref<8x256xf32, #tpu.memory_space<vmem>>) attributes {dimension_semantics = [#tpu.dimension_semantics<parallel>, #tpu.dimension_semantics<parallel>], iteration_bounds = array<i64: 1, 4>, scalar_prefetch = 0 : i64, scratch_operands = 0 : i64, tpu.core_type = #tpu.core_type<tc>, window_params = [{transform_indices = @transform_0, window_bounds = array<i64: 8, 11>}, {transform_indices = @transform_1, window_bounds = array<i64: 11, 256>}, {transform_indices = @transform_2, window_bounds = array<i64: 1, 256>}, {transform_indices = @transform_3, window_bounds = array<i64: 8, 256>}]} {
    %c0 = arith.constant 0 : index
    %c0_0 = arith.constant 0 : index
    %0 = vector.load %arg2[%c0, %c0_0] : memref<8x11xf32, #tpu.memory_space<vmem>>, vector<8x11xf32>
    %c0_1 = arith.constant 0 : index
    %c0_2 = arith.constant 0 : index
    %1 = vector.load %arg3[%c0_1, %c0_2] : memref<11x256xf32, #tpu.memory_space<vmem>>, vector<11x256xf32>
    %cst = arith.constant dense<0.000000e+00> : vector<8x256xf32>
    %2 = tpu.matmul %0, %1, %cst {dimension_numbers = #tpu.dot_dimension_numbers<[1], [0], [0], [1], [0, 0, 1, 1], [], []>} : vector<8x11xf32>, vector<11x256xf32>, vector<8x256xf32> -> vector<8x256xf32>
    %c0_3 = arith.constant 0 : index
    %c0_4 = arith.constant 0 : index
    %3 = vector.load %arg4[%c0_3, %c0_4] : memref<1x256xf32, #tpu.memory_space<vmem>>, vector<1x256xf32>
    %4 = vector.broadcast %3 : vector<1x256xf32> to vector<8x256xf32>
    %5 = arith.addf %2, %4 : vector<8x256xf32>
    %c0_5 = arith.constant 0 : index
    %c0_6 = arith.constant 0 : index
    %6 = vector.load %arg5[%c0_5, %c0_6] : memref<8x256xf32, #tpu.memory_space<vmem>>, vector<8x256xf32>
    tpu.vector_store %arg5[%c0_5, %c0_6], %5 {strides = array<i32>} : memref<8x256xf32, #tpu.memory_space<vmem>>, vector<8x256xf32>,
    return
  }
  func.func @transform_0(%arg0: i32, %arg1: i32) -> (i32, i32) {
    %c0_i32 = arith.constant 0 : i32
    %c0_i32_0 = arith.constant 0 : i32
    return %arg0, %c0_i32 : i32, i32
  }
  func.func @transform_1(%arg0: i32, %arg1: i32) -> (i32, i32) {
    %c0_i32 = arith.constant 0 : i32
    %c0_i32_0 = arith.constant 0 : i32
    return %c0_i32, %arg1 : i32, i32
  }
  func.func @transform_2(%arg0: i32, %arg1: i32) -> (i32, i32) {
    %c0_i32 = arith.constant 0 : i32
    %c0_i32_0 = arith.constant 0 : i32
    return %c0_i32, %arg1 : i32, i32
  }
  func.func @transform_3(%arg0: i32, %arg1: i32) -> (i32, i32) {
    %c0_i32 = arith.constant 0 : i32
    return %arg0, %arg1 : i32, i32
  }
}

module attributes {stable_mosaic.version = 11 : i64} {
  func.func @_increase_kernel(%arg0: memref<2x1024xf32, #tpu.memory_space<vmem>>, %arg1: memref<2x1024xf32, #tpu.memory_space<vmem>>) attributes {dimension_semantics = [], scalar_prefetch = 0 : i64, scratch_operands = 0 : i64, tpu.core_type = #tpu.core_type<tc>} {
    %c0 = arith.constant 0 : index
    %c0_0 = arith.constant 0 : index
    %0 = vector.load %arg0[%c0, %c0_0] : memref<2x1024xf32, #tpu.memory_space<vmem>>, vector<2x1024xf32>
    %1 = tpu.iota {dimensions = array<i32: 1>} : vector<2x1024xi32>
    %c1023_i32 = arith.constant 1023 : i32
    %2 = tpu.dynamic_rotate %0 by %c1023_i32 dim 1 : vector<2x1024xf32>, i32 -> vector<2x1024xf32>
    %3 = arith.subf %2, %0 : vector<2x1024xf32>
    %c1023_i32_1 = arith.constant 1023 : i32
    %4 = vector.broadcast %c1023_i32_1 : i32 to vector<2x1024xi32>
    %5 = arith.cmpi slt, %1, %4 : vector<2x1024xi32>
    %cst = arith.constant 0x7F800000 : f32
    %6 = vector.broadcast %cst : f32 to vector<2x1024xf32>
    %7 = arith.select %5, %3, %6 : vector<2x1024xi1>, vector<2x1024xf32>
    %cst_2 = arith.constant dense<0x7F800000> : vector<2xf32>
    %8 = vector.multi_reduction <minimumf>, %7, %cst_2 [1] : vector<2x1024xf32> to vector<2xf32>
    %9 = vector.shape_cast %8 : vector<2xf32> to vector<2x1xf32>
    %cst_3 = arith.constant 0.000000e+00 : f32
    %10 = vector.broadcast %cst_3 : f32 to vector<2x1xf32>
    %11 = arith.subf %10, %9 : vector<2x1xf32>
    %cst_4 = arith.constant 0.000000e+00 : f32
    %12 = vector.broadcast %cst_4 : f32 to vector<2x1xf32>
    %13 = arith.maximumf %11, %12 : vector<2x1xf32>
    %14 = vector.broadcast %13 : vector<2x1xf32> to vector<2x1024xf32>
    %15 = arith.addf %3, %14 : vector<2x1024xf32>
    %cst_5 = arith.constant 0.000000e+00 : f32
    %16 = vector.broadcast %cst_5 : f32 to vector<2x1024xf32>
    %17 = arith.select %5, %15, %16 : vector<2x1024xi1>, vector<2x1024xf32>
    %cst_6 = arith.constant dense<0.000000e+00> : vector<2xf32>
    %18 = vector.multi_reduction <add>, %17, %cst_6 [1] : vector<2x1024xf32> to vector<2xf32>
    %19 = vector.shape_cast %18 : vector<2xf32> to vector<2x1xf32>
    %cst_7 = arith.constant 9.99999996E-13 : f32
    %20 = vector.broadcast %cst_7 : f32 to vector<2x1xf32>
    %21 = arith.addf %19, %20 : vector<2x1xf32>
    %22 = vector.broadcast %21 : vector<2x1xf32> to vector<2x1024xf32>
    %23 = arith.divf %17, %22 : vector<2x1024xf32>
    %c1_i32 = arith.constant 1 : i32
    %24 = vector.broadcast %c1_i32 : i32 to vector<2x1024xi32>
    %25 = arith.cmpi sge, %1, %24 : vector<2x1024xi32>
    %c1_i32_8 = arith.constant 1 : i32
    %26 = tpu.dynamic_rotate %23 by %c1_i32_8 dim 1 : vector<2x1024xf32>, i32 -> vector<2x1024xf32>
    %cst_9 = arith.constant 0.000000e+00 : f32
    %27 = vector.broadcast %cst_9 : f32 to vector<2x1024xf32>
    %28 = arith.select %25, %26, %27 : vector<2x1024xi1>, vector<2x1024xf32>
    %c1_i32_10 = arith.constant 1 : i32
    %29 = vector.broadcast %c1_i32_10 : i32 to vector<2x1024xi32>
    %30 = arith.cmpi sge, %1, %29 : vector<2x1024xi32>
    %c1_i32_11 = arith.constant 1 : i32
    %31 = tpu.dynamic_rotate %28 by %c1_i32_11 dim 1 : vector<2x1024xf32>, i32 -> vector<2x1024xf32>
    %cst_12 = arith.constant 0.000000e+00 : f32
    %32 = vector.broadcast %cst_12 : f32 to vector<2x1024xf32>
    %33 = arith.select %30, %31, %32 : vector<2x1024xi1>, vector<2x1024xf32>
    %34 = arith.addf %28, %33 : vector<2x1024xf32>
    %c2_i32 = arith.constant 2 : i32
    %35 = vector.broadcast %c2_i32 : i32 to vector<2x1024xi32>
    %36 = arith.cmpi sge, %1, %35 : vector<2x1024xi32>
    %c2_i32_13 = arith.constant 2 : i32
    %37 = tpu.dynamic_rotate %34 by %c2_i32_13 dim 1 : vector<2x1024xf32>, i32 -> vector<2x1024xf32>
    %cst_14 = arith.constant 0.000000e+00 : f32
    %38 = vector.broadcast %cst_14 : f32 to vector<2x1024xf32>
    %39 = arith.select %36, %37, %38 : vector<2x1024xi1>, vector<2x1024xf32>
    %40 = arith.addf %34, %39 : vector<2x1024xf32>
    %c4_i32 = arith.constant 4 : i32
    %41 = vector.broadcast %c4_i32 : i32 to vector<2x1024xi32>
    %42 = arith.cmpi sge, %1, %41 : vector<2x1024xi32>
    %c4_i32_15 = arith.constant 4 : i32
    %43 = tpu.dynamic_rotate %40 by %c4_i32_15 dim 1 : vector<2x1024xf32>, i32 -> vector<2x1024xf32>
    %cst_16 = arith.constant 0.000000e+00 : f32
    %44 = vector.broadcast %cst_16 : f32 to vector<2x1024xf32>
    %45 = arith.select %42, %43, %44 : vector<2x1024xi1>, vector<2x1024xf32>
    %46 = arith.addf %40, %45 : vector<2x1024xf32>
    %c8_i32 = arith.constant 8 : i32
    %47 = vector.broadcast %c8_i32 : i32 to vector<2x1024xi32>
    %48 = arith.cmpi sge, %1, %47 : vector<2x1024xi32>
    %c8_i32_17 = arith.constant 8 : i32
    %49 = tpu.dynamic_rotate %46 by %c8_i32_17 dim 1 : vector<2x1024xf32>, i32 -> vector<2x1024xf32>
    %cst_18 = arith.constant 0.000000e+00 : f32
    %50 = vector.broadcast %cst_18 : f32 to vector<2x1024xf32>
    %51 = arith.select %48, %49, %50 : vector<2x1024xi1>, vector<2x1024xf32>
    %52 = arith.addf %46, %51 : vector<2x1024xf32>
    %c16_i32 = arith.constant 16 : i32
    %53 = vector.broadcast %c16_i32 : i32 to vector<2x1024xi32>
    %54 = arith.cmpi sge, %1, %53 : vector<2x1024xi32>
    %c16_i32_19 = arith.constant 16 : i32
    %55 = tpu.dynamic_rotate %52 by %c16_i32_19 dim 1 : vector<2x1024xf32>, i32 -> vector<2x1024xf32>
    %cst_20 = arith.constant 0.000000e+00 : f32
    %56 = vector.broadcast %cst_20 : f32 to vector<2x1024xf32>
    %57 = arith.select %54, %55, %56 : vector<2x1024xi1>, vector<2x1024xf32>
    %58 = arith.addf %52, %57 : vector<2x1024xf32>
    %c32_i32 = arith.constant 32 : i32
    %59 = vector.broadcast %c32_i32 : i32 to vector<2x1024xi32>
    %60 = arith.cmpi sge, %1, %59 : vector<2x1024xi32>
    %c32_i32_21 = arith.constant 32 : i32
    %61 = tpu.dynamic_rotate %58 by %c32_i32_21 dim 1 : vector<2x1024xf32>, i32 -> vector<2x1024xf32>
    %cst_22 = arith.constant 0.000000e+00 : f32
    %62 = vector.broadcast %cst_22 : f32 to vector<2x1024xf32>
    %63 = arith.select %60, %61, %62 : vector<2x1024xi1>, vector<2x1024xf32>
    %64 = arith.addf %58, %63 : vector<2x1024xf32>
    %c64_i32 = arith.constant 64 : i32
    %65 = vector.broadcast %c64_i32 : i32 to vector<2x1024xi32>
    %66 = arith.cmpi sge, %1, %65 : vector<2x1024xi32>
    %c64_i32_23 = arith.constant 64 : i32
    %67 = tpu.dynamic_rotate %64 by %c64_i32_23 dim 1 : vector<2x1024xf32>, i32 -> vector<2x1024xf32>
    %cst_24 = arith.constant 0.000000e+00 : f32
    %68 = vector.broadcast %cst_24 : f32 to vector<2x1024xf32>
    %69 = arith.select %66, %67, %68 : vector<2x1024xi1>, vector<2x1024xf32>
    %70 = arith.addf %64, %69 : vector<2x1024xf32>
    %c128_i32 = arith.constant 128 : i32
    %71 = vector.broadcast %c128_i32 : i32 to vector<2x1024xi32>
    %72 = arith.cmpi sge, %1, %71 : vector<2x1024xi32>
    %c128_i32_25 = arith.constant 128 : i32
    %73 = tpu.dynamic_rotate %70 by %c128_i32_25 dim 1 : vector<2x1024xf32>, i32 -> vector<2x1024xf32>
    %cst_26 = arith.constant 0.000000e+00 : f32
    %74 = vector.broadcast %cst_26 : f32 to vector<2x1024xf32>
    %75 = arith.select %72, %73, %74 : vector<2x1024xi1>, vector<2x1024xf32>
    %76 = arith.addf %70, %75 : vector<2x1024xf32>
    %c256_i32 = arith.constant 256 : i32
    %77 = vector.broadcast %c256_i32 : i32 to vector<2x1024xi32>
    %78 = arith.cmpi sge, %1, %77 : vector<2x1024xi32>
    %c256_i32_27 = arith.constant 256 : i32
    %79 = tpu.dynamic_rotate %76 by %c256_i32_27 dim 1 : vector<2x1024xf32>, i32 -> vector<2x1024xf32>
    %cst_28 = arith.constant 0.000000e+00 : f32
    %80 = vector.broadcast %cst_28 : f32 to vector<2x1024xf32>
    %81 = arith.select %78, %79, %80 : vector<2x1024xi1>, vector<2x1024xf32>
    %82 = arith.addf %76, %81 : vector<2x1024xf32>
    %c512_i32 = arith.constant 512 : i32
    %83 = vector.broadcast %c512_i32 : i32 to vector<2x1024xi32>
    %84 = arith.cmpi sge, %1, %83 : vector<2x1024xi32>
    %c512_i32_29 = arith.constant 512 : i32
    %85 = tpu.dynamic_rotate %82 by %c512_i32_29 dim 1 : vector<2x1024xf32>, i32 -> vector<2x1024xf32>
    %cst_30 = arith.constant 0.000000e+00 : f32
    %86 = vector.broadcast %cst_30 : f32 to vector<2x1024xf32>
    %87 = arith.select %84, %85, %86 : vector<2x1024xi1>, vector<2x1024xf32>
    %88 = arith.addf %82, %87 : vector<2x1024xf32>
    %c0_31 = arith.constant 0 : index
    %c0_32 = arith.constant 0 : index
    %89 = vector.load %arg1[%c0_31, %c0_32] : memref<2x1024xf32, #tpu.memory_space<vmem>>, vector<2x1024xf32>
    tpu.vector_store %arg1[%c0_31, %c0_32], %88 {strides = array<i32>} : memref<2x1024xf32, #tpu.memory_space<vmem>>, vector<2x1024xf32>,
    return
  }
}

</mosaic_0001>

<bundles_post_ra>
// kernel: linearization_net.22
= control target key start
LH: loop header
LB: loop body
LE: loop exit
PB: predicated region body
PF: predicated region fallthrough
CT: control target
= control target key end

     0   :  { %8 = vsyncpa [#allocation3], 0  ;;  %s2005_s12 = smov 0   ;;  %s2600_s0 = inlined_call_operand.vmem [shape: bf16[512,27], index: 0, kind: input, shape index: {}]   ;;  %s2601_s1 = inlined_call_operand.vmem [shape: bf16[27,128], index: 1, kind: input, shape index: {}]   ;;  %s2602_s2 = inlined_call_operand.hbm [shape: f32[8,128], index: 2, kind: input, shape index: {}]   ;;  %s2603_s3 = inlined_call_operand.vmem [shape: bf16[512,128], index: 3, kind: output, shape index: {}]  }
   0x1 LB: > { %s1585_s13 = sadd.s32 4294967295, %s1978_s12   ;;  %p1587_p0 = scmp.ge.s32.totalorder %s1978_s12, 1  ;;  %s1978_s12 = sphi %s2005_s12, %s14_s12  }
   0x2   : > { %p113_p1 = scmp.lt.s32.totalorder %s1978_s12, 3  ;;  %p2019_p3 = scmp.eq.s32.totalorder %s1585_s13, 0 }
   0x3   : > { %s1980_s16 = smov [#allocation2]   ;;  %s1940_s21 = scalar_lea.hbm %s2602_s2, 128 }
   0x4   : > { %p2013_p2 = pnand %p1587_p0, %p113_p1  ;;  %s129_s17 = sshll.u32 %s1980_s16, 4  ;;  %s130_s17 = int_to_ptr.vmem [resolvable:$true] %s129_s17 }
   0x5   : > { %s2614_s15 = scalar_select %p2019_p3, 1, 0 }
   0x6   : > { %s2613_s14 = scalar_select %p2013_p2, 1, 0 }
   0x7   : > { %p1853_p4 = pneg %p2013_p2  ;;  %p1941_p6 = scmp.ne.s32.totalorder %s2602_s2, %s1940_s21 }
   0x8   : > { %p1947_p10 = scmp.lt.u32.totalorder %s1940_s21, %s2602_s2 }
   0x9   : > { %p2027_p5 = pnand %p2019_p3, %p1853_p4 }
   0xb   : > { %p1942_p7 = pneg %p2027_p5 }
   0xd   : > { %p1943_p8 = pnand %p1942_p7, %p1941_p6 }
   0xf   : > { %p1944_p9 = pneg %p1943_p8 }
  0x11   : > { %p1949_p11 = pnand %p1947_p10, %p1944_p9 }
  0x13   : > { %1952 = shalt.err (!%p1949_p11)
}
  0x14   : > { %s1953_s26 = scalar_lea.vmem %s130_s17, 128  ;;  %p1961_p1 = scmp.lt.s32.totalorder %s130_s17, %s130_s17 }
  0x15   : > { %p1954_p12 = scmp.ne.s32.totalorder %s130_s17, %s1953_s26  ;;  %p1962_p4 = scmp.lt.s32.totalorder %s1953_s26, %s1953_s26 }
  0x17   : > { %p1956_p13 = pnand %p1954_p12, %p1942_p7  ;;  %p1963_p3 = por %p1962_p4, %p1961_p1 }
  0x19   : > { %p1957_p0 = pneg %p1956_p13 }
  0x1b   : > { %p1964_p2 = pnand %p1963_p3, %p1957_p0 }
  0x1d   : > { %1967 = shalt.err (!%p1964_p2)
}
  0x1e   : > { %1856 = dma.hbm_to_vmem [thread:$0]  (!%p2027_p5), %s2602_s2, 128, %s130_s17, [#allocation3]  }
  0x1f   : > { %p2616_p6 = scmp.ne.s32.totalorder %s2613_s14, 0 }
  0x21   : > { %151 = sbr.rel (%p2616_p6) target bundleno = 630 (0x276), region = 32 }
  0x28   : > { %p2617_p8 = scmp.ne.s32.totalorder %s2614_s15, 0 }
  0x2a   : > { %1973 = dma.done.wait (%p2617_p8), [#allocation3], 128  }
  0x2b   : > { %1975 = vsyncadd (%p2617_p8), [#allocation3], 4294967168  ;;  %s1592_s29 = sshll.u32 %s1585_s13, 5  ;;  %vm364_vm0 = vcmask 1044480   ;;  %v2607_v0 = vmov 0   ;;  %vm365_vm1 = vcmask 1045504   ;;  %v693_v61 = vlaneseq }
  0x2c   : > { %p176_p2 = scmp.lt.s32.totalorder %s1592_s29, 63  ;;  %1873 = vset.pattern.permute.xlu0 %v2607_v0  ;;  %1872 = vset.pattern.permute.xlu1 %v2607_v0  ;;  %v1982_v1 = vmov 65535   ;;  %vm315_vm2 = vcmask 220160   ;;  %v1922_v3 = vld [vmem:[%s2601_s1] sm:$0xff]   ;;  %v1923_v5 = vld [vmem:[%s2601_s1 + $0x8] sm:$0x3f]  }
  0x2d   : > { %v366_v2 = vsel %vm364_vm0, 4294967295, %v1982_v1  ;;  %1809 = vmatprep.subr.bf16.mxu0 %v1922_v3  ;;  %1845 = vmatprep.subr.bf16.mxu1 %v1922_v3  ;;  %v2609_v31 = vmov 2   ;;  %v2611_v32 = vmov 1   ;;  %v2263_v63 = vshrl.u32 %v693_v61, 7 }
  0x2e   : > { %s2624_s29 = smov (!%p176_p2, %s1592_s29), 63  ;;  %v367_v4 = vsel %vm365_vm1, %v366_v2, 0  ;;  %1810 = vmatpush3.bf16.msra.mxu0 %v1922_v3  ;;  %1847 = vmatpush3.bf16.msra.mxu1 %v1922_v3 }
  0x2f   : > { %s1593_s30 = sshll.u32 %s2624_s29, 2  ;;  %v369_v7 = vand.u32 %v1923_v5, %v367_v4  ;;  %v859_v2 = vsub.s32 1, %v2263_v63  ;;  %v695_v3 = vsub.s32 0, %v2263_v63 }
  0x30   : > { %s2065_s6 = scalar_lea.vmem %s2600_s0, %s1593_s30  ;;  %s2367_s14 = scalar_lea.vmem %s2603_s3, %s1593_s30 }
  0x31   : > { %v1924_v6 = vld [vmem:[%s2065_s6] sm:$0xff]   ;;  %1811 = vmatprep.subr.bf16.mxu0 %v369_v7  ;;  %1846 = vmatprep.subr.bf16.mxu1 %v369_v7  ;;  %v1926_v9 = vld [vmem:[%s2065_s6 + $0x8] sm:$0xff]   ;;  %v1928_v11 = vld [vmem:[%s2065_s6 + $0x10] sm:$0xff]  }
  0x32   : > { %v1925_v8 = vld [vmem:[%s2065_s6 + $0x40] sm:$0xff]   ;;  %1813 = vmatprep.mubr.msk.bf16.mxu0 %vm315_vm2, %v1924_v6  ;;  %v1927_v10 = vld [vmem:[%s2065_s6 + $0x48] sm:$0xff]   ;;  %1812 = vmatpush3.bf16.msra.mxu0 %v369_v7  ;;  %v1930_v12 = vld [vmem:[%s2065_s6 + $0x50] sm:$0xff]  }
  0x33   : > { %1829 = vmatprep.mubr.msk.bf16.mxu1 %vm315_vm2, %v1925_v8  ;;  %1848 = vmatpush3.bf16.msra.mxu1 %v369_v7  ;;  %v1929_v13 = vld [vmem:[%s2065_s6 + $0x18] sm:$0xff]   ;;  %v1932_v15 = vld [vmem:[%s2065_s6 + $0x20] sm:$0xff]   ;;  %v1933_v17 = vld [vmem:[%s2065_s6 + $0x28] sm:$0xff]   ;;  %v1055_v8 = vsub.s32 2, %v2263_v63 }
  0x34   : > { %v1931_v14 = vld [vmem:[%s2065_s6 + $0x58] sm:$0xff]   ;;  %v1934_v16 = vld [vmem:[%s2065_s6 + $0x60] sm:$0xff]   ;;  %v1935_v18 = vld [vmem:[%s2065_s6 + $0x68] sm:$0xff]  }
  0x35   : > { %1814 = vmatmul.mubr.msk.bf16.vlgmr.msra.gmra.mrb[0].mxu0 %vm315_vm2, %v1926_v9  ;;  %v1936_v19 = vld [vmem:[%s2065_s6 + $0x30] sm:$0xff]   ;;  %v1937_v21 = vld [vmem:[%s2065_s6 + $0x38] sm:$0xff]   ;;  %v2273_v6 = vld [vmem:[#allocation2] sm:$0xff] }
  0x36   : > { %1830 = vmatmul.mubr.msk.bf16.vlgmr.msra.gmra.mrb[0].mxu1 %vm315_vm2, %v1927_v10  ;;  %1817 = vmatprep.mubr.msk.bf16.mxu0 %vm315_vm2, %v1928_v11  ;;  %v1938_v20 = vld [vmem:[%s2065_s6 + $0x70] sm:$0xff]   ;;  %v1939_v22 = vld [vmem:[%s2065_s6 + $0x78] sm:$0xff]   ;;  %v2277_v7 = vrot.slane %v2273_v6, %v859_v2  ;;  %v2281_v9 = vrot.slane %v2273_v6, %v695_v3 }
  0x37   : > { %1833 = vmatprep.mubr.msk.bf16.mxu1 %vm315_vm2, %v1930_v12 }
  0x3d   : > { %1818 = vmatmul.mubr.msk.bf16.gmra.mrb[4].mxu0 %vm315_vm2, %v1929_v13 }
  0x3e   : > { %1834 = vmatmul.mubr.msk.bf16.gmra.mrb[4].mxu1 %vm315_vm2, %v1931_v14  ;;  %1821 = vmatprep.mubr.msk.bf16.mxu0 %vm315_vm2, %v1932_v15  ;;  %v2288_v14 = vrot.slane %v2273_v6, %v1055_v8 }
  0x3f   : > { %1837 = vmatprep.mubr.msk.bf16.mxu1 %vm315_vm2, %v1934_v16 }
  0x45   : > { %1822 = vmatmul.mubr.msk.bf16.gmra.mrb[8].mxu0 %vm315_vm2, %v1933_v17 }
  0x46   : > { %1838 = vmatmul.mubr.msk.bf16.gmra.mrb[8].mxu1 %vm315_vm2, %v1935_v18  ;;  %1825 = vmatprep.mubr.msk.bf16.mxu0 %vm315_vm2, %v1936_v19  ;;  %v1123_v19 = vsub.s32 3, %v2263_v63 }
  0x47   : > { %1841 = vmatprep.mubr.msk.bf16.mxu1 %vm315_vm2, %v1938_v20 }
  0x4d   : > { %1826 = vmatmul.mubr.msk.bf16.gmra.mrb[12].mxu0 %vm315_vm2, %v1937_v21 }
  0x4e   : > { %1842 = vmatmul.mubr.msk.bf16.gmra.mrb[12].mxu1 %vm315_vm2, %v1939_v22 }
 0x108   : > { %v2105_v23 = vpop.f32.mrb[0].mxu0 }
 0x109   : > { %v2107_v24 = vpop.f32.mrb[0].mxu1  ;;  %545 = vperm.xlu1 %1872, %v2105_v23   ;;  %v2111_v25 = vpop.f32.mrb[1].mxu0 }
 0x10a   : > { %625 = vperm.xlu0 %1873, %v2107_v24   ;;  %v2113_v26 = vpop.f32.mrb[1].mxu1  ;;  %v2115_v27 = vpop.f32.mrb[2].mxu0 }
 0x10b   : > { %v2117_v28 = vpop.f32.mrb[2].mxu1  ;;  %v2119_v29 = vpop.f32.mrb[3].mxu0 }
 0x10c   : > { %v2121_v30 = vpop.f32.mrb[3].mxu1 }
 0x10d   : > { %1874 = vset.pattern.permute.xlu1 %v2611_v32 }
 0x10e   : > { %1876 = vset.pattern.permute.xlu0 %v2609_v31  ;;  %738 = vperm.xlu1 %1874, %v2105_v23  }
 0x10f   : > { %998 = vperm.xlu0 %1876, %v2107_v24  }
 0x110   : > { %v2127_v33 = vpop.f32.mrb[4].mxu0 }
 0x111   : > { %v2129_v34 = vpop.f32.mrb[4].mxu1  ;;  %v2131_v35 = vpop.f32.mrb[5].mxu0 }
 0x112   : > { %v2133_v36 = vpop.f32.mrb[5].mxu1  ;;  %802 = vperm.xlu1 %1874, %v2107_v24   ;;  %v2137_v37 = vpop.f32.mrb[6].mxu0 }
 0x113   : > { %1877 = vset.pattern.permute.xlu0 %v2607_v0  ;;  %v2139_v38 = vpop.f32.mrb[6].mxu1  ;;  %v2142_v39 = vpop.f32.mrb[7].mxu0 }
 0x114   : > { %535 = vperm.xlu0 %1877, %v2111_v25   ;;  %v2144_v40 = vpop.f32.mrb[7].mxu1 }
 0x116   : > { %1875 = vset.pattern.permute.xlu1 %v2609_v31 }
 0x117   : > { %934 = vperm.xlu1 %1875, %v2105_v23  }
 0x118   : > { %615 = vperm.xlu0 %1877, %v2113_v26   ;;  %v2149_v41 = vpop.f32.mrb[8].mxu0 }
 0x119   : > { %v2151_v42 = vpop.f32.mrb[8].mxu1  ;;  %v2153_v43 = vpop.f32.mrb[9].mxu0 }
 0x11a   : > { %v2155_v44 = vpop.f32.mrb[9].mxu1  ;;  %v2157_v45 = vpop.f32.mrb[10].mxu0 }
 0x11b   : > { %v2159_v46 = vpop.f32.mrb[10].mxu1  ;;  %1879 = vset.pattern.permute.xlu1 %v2611_v32  ;;  %v2163_v47 = vpop.f32.mrb[11].mxu0 }
 0x11c   : > { %1878 = vset.pattern.permute.xlu0 %v2611_v32  ;;  %v2165_v48 = vpop.f32.mrb[11].mxu1  ;;  %794 = vperm.xlu1 %1879, %v2113_v26  }
 0x11d   : > { %730 = vperm.xlu0 %1878, %v2111_v25  }
 0x120   : > { %1880 = vset.pattern.permute.xlu1 %v2609_v31  ;;  %v2177_v49 = vpop.f32.mrb[12].mxu0 }
 0x121   : > { %1881 = vset.pattern.permute.xlu0 %v2609_v31  ;;  %926 = vperm.xlu1 %1880, %v2111_v25   ;;  %2618 = vst [vmem:[#allocation5_spill] sm:$0xff] %v2177_v49  ;;  %v2181_v50 = vpop.f32.mrb[12].mxu1  ;;  %v2183_v51 = vpop.f32.mrb[13].mxu0 }
 0x122   : > { %990 = vperm.xlu0 %1881, %v2113_v26   ;;  %v2187_v52 = vpop.f32.mrb[14].mxu0  ;;  %v2193_v54 = vpop.f32.mrb[13].mxu1 }
 0x123   : > { %v2191_v53 = vpop.f32.mrb[15].mxu0  ;;  %v2195_v55 = vpop.f32.mrb[14].mxu1 }
 0x124   : > { %v2199_v56 = vpop.f32.mrb[15].mxu1 }
 0x125   : > { %1882 = vset.pattern.permute.xlu1 %v2607_v0 }
 0x126   : > { %1883 = vset.pattern.permute.xlu0 %v2611_v32  ;;  %550 = vperm.xlu1 %1882, %v2115_v27  }
 0x127   : > { %742 = vperm.xlu0 %1883, %v2115_v27  }
 0x12a   : > { %630 = vperm.xlu1 %1882, %v2117_v28  }
 0x12b   : > { %806 = vperm.xlu0 %1883, %v2117_v28  }
 0x12e   : > { %1884 = vset.pattern.permute.xlu1 %v2609_v31 }
 0x12f   : > { %1885 = vset.pattern.permute.xlu0 %v2607_v0  ;;  %938 = vperm.xlu1 %1884, %v2115_v27  }
 0x130   : > { %540 = vperm.xlu0 %1885, %v2119_v29  }
 0x133   : > { %1002 = vperm.xlu1 %1884, %v2117_v28  }
 0x134   : > { %1888 = vset.pattern.permute.xlu0 %v2611_v32 }
 0x135   : > { %798 = vperm.xlu0 %1888, %v2121_v30  }
 0x137   : > { %1886 = vset.pattern.permute.xlu1 %v2607_v0 }
 0x138   : > { %620 = vperm.xlu1 %1886, %v2121_v30  }
 0x139   : > { %1889 = vset.pattern.permute.xlu0 %v2609_v31 }
 0x13a   : > { %930 = vperm.xlu0 %1889, %v2119_v29  }
 0x13c   : > { %1887 = vset.pattern.permute.xlu1 %v2611_v32 }
 0x13d   : > { %734 = vperm.xlu1 %1887, %v2119_v29  }
 0x13e   : > { %1891 = vset.pattern.permute.xlu0 %v2607_v0 }
 0x13f   : > { %565 = vperm.xlu0 %1891, %v2127_v33  }
 0x141   : > { %1890 = vset.pattern.permute.xlu1 %v2609_v31 }
 0x142   : > { %994 = vperm.xlu1 %1890, %v2121_v30  }
 0x143   : > { %645 = vperm.xlu0 %1891, %v2129_v34  }
 0x146   : > { %1892 = vset.pattern.permute.xlu1 %v2611_v32 }
 0x147   : > { %1893 = vset.pattern.permute.xlu0 %v2609_v31  ;;  %754 = vperm.xlu1 %1892, %v2127_v33  }
 0x148   : > { %950 = vperm.xlu0 %1893, %v2127_v33  }
 0x14b   : > { %818 = vperm.xlu1 %1892, %v2129_v34  }
 0x14c   : > { %1014 = vperm.xlu0 %1893, %v2129_v34  }
 0x14f   : > { %746 = vperm.xlu1 %1892, %v2131_v35  }
 0x150   : > { %1894 = vset.pattern.permute.xlu0 %v2607_v0 }
 0x151   : > { %555 = vperm.xlu0 %1894, %v2131_v35  }
 0x153   : > { %810 = vperm.xlu1 %1892, %v2133_v36  }
 0x155   : > { %635 = vperm.xlu0 %1894, %v2133_v36  }
 0x157   : > { %1896 = vset.pattern.permute.xlu1 %v2607_v0 }
 0x158   : > { %570 = vperm.xlu1 %1896, %v2137_v37  }
 0x159   : > { %1895 = vset.pattern.permute.xlu0 %v2609_v31 }
 0x15a   : > { %942 = vperm.xlu0 %1895, %v2131_v35  }
 0x15c   : > { %650 = vperm.xlu1 %1896, %v2139_v38  }
 0x15e   : > { %1006 = vperm.xlu0 %1895, %v2133_v36  }
 0x160   : > { %1898 = vset.pattern.permute.xlu1 %v2609_v31 }
 0x161   : > { %954 = vperm.xlu1 %1898, %v2137_v37  }
 0x162   : > { %1897 = vset.pattern.permute.xlu0 %v2611_v32 }
 0x163   : > { %758 = vperm.xlu0 %1897, %v2137_v37  }
 0x165   : > { %1018 = vperm.xlu1 %1898, %v2139_v38  }
 0x167   : > { %822 = vperm.xlu0 %1897, %v2139_v38  }
 0x169   : > { %1899 = vset.pattern.permute.xlu1 %v2607_v0 }
 0x16a   : > { %560 = vperm.xlu1 %1899, %v2142_v39  }
 0x16b   : > { %750 = vperm.xlu0 %1897, %v2142_v39  }
 0x16e   : > { %640 = vperm.xlu1 %1899, %v2144_v40  }
 0x16f   : > { %814 = vperm.xlu0 %1897, %v2144_v40  }
 0x172   : > { %1900 = vset.pattern.permute.xlu1 %v2609_v31 }
 0x173   : > { %1901 = vset.pattern.permute.xlu0 %v2607_v0  ;;  %946 = vperm.xlu1 %1900, %v2142_v39  }
 0x174   : > { %585 = vperm.xlu0 %1901, %v2149_v41  }
 0x177   : > { %1010 = vperm.xlu1 %1900, %v2144_v40  }
 0x178   : > { %665 = vperm.xlu0 %1901, %v2151_v42  }
 0x17b   : > { %1902 = vset.pattern.permute.xlu1 %v2611_v32 }
 0x17c   : > { %1903 = vset.pattern.permute.xlu0 %v2609_v31  ;;  %770 = vperm.xlu1 %1902, %v2149_v41  }
 0x17d   : > { %966 = vperm.xlu0 %1903, %v2149_v41  }
 0x180   : > { %834 = vperm.xlu1 %1902, %v2151_v42  }
 0x181   : > { %1030 = vperm.xlu0 %1903, %v2151_v42  }
 0x184   : > { %762 = vperm.xlu1 %1902, %v2153_v43  }
 0x185   : > { %1904 = vset.pattern.permute.xlu0 %v2607_v0 }
 0x186   : > { %575 = vperm.xlu0 %1904, %v2153_v43  }
 0x188   : > { %v546_v57 = vpop.permute.xlu1 %545  ;;  %826 = vperm.xlu1 %1902, %v2155_v44  }
 0x189   : > { %v626_v58 = vpop.permute.xlu0 %625  ;;  %v699_v16 = vmul.f32 %v2281_v9, %v546_v57  ;;  %v2301_v57 = vrot.slane %v2273_v6, %v1123_v19 }
 0x18a   : > { %655 = vperm.xlu0 %1904, %v2155_v44   ;;  %v715_v12 = vmul.f32 %v2281_v9, %v626_v58 }
 0x18c   : > { %1906 = vset.pattern.permute.xlu1 %v2607_v0 }
 0x18d   : > { %v739_v59 = vpop.permute.xlu1 %738  ;;  %590 = vperm.xlu1 %1906, %v2157_v45  }
 0x18e   : > { %1905 = vset.pattern.permute.xlu0 %v2609_v31  ;;  %v999_v60 = vpop.permute.xlu0 %998  ;;  %v863_v13 = vmul.f32 %v2277_v7, %v739_v59 }
 0x18f   : > { %958 = vperm.xlu0 %1905, %v2153_v43   ;;  %v1075_v58 = vmul.f32 %v2288_v14, %v999_v60 }
 0x190   : > { %v895_v18 = vadd.f32 %v863_v13, %v699_v16 }
 0x191   : > { %v803_v62 = vpop.permute.xlu1 %802  ;;  %670 = vperm.xlu1 %1906, %v2159_v46  }
 0x192   : > { %v879_v15 = vmul.f32 %v2277_v7, %v803_v62 }
 0x193   : > { %v536_v1 = vpop.permute.xlu0 %535  ;;  %1022 = vperm.xlu0 %1905, %v2155_v44  }
 0x194   : > { %v911_v20 = vadd.f32 %v879_v15, %v715_v12 }
 0x195   : > { %1908 = vset.pattern.permute.xlu1 %v2609_v31 }
 0x196   : > { %v935_v4 = vpop.permute.xlu1 %934  ;;  %970 = vperm.xlu1 %1908, %v2157_v45   ;;  %v1107_v61 = vadd.f32 %v1075_v58, %v911_v20  ;;  %v697_v20 = vmul.f32 %v2281_v9, %v536_v1  ;;  %v2619_v1 = vmov 2  }
 0x197   : > { %v2269_v5 = vpop.permute.xlu0 %615  ;;  %1907 = vset.pattern.permute.xlu0 %v2611_v32  ;;  %v1059_v17 = vmul.f32 %v2288_v14, %v935_v4  ;;  %v1191_v4 = vsub.s32 4, %v2263_v63 }
 0x198   : > { %774 = vperm.xlu0 %1907, %v2157_v45   ;;  %v1143_v60 = vsub.f32 %v1107_v61, %v2301_v57 }
 0x199   : > { %v1091_v59 = vadd.f32 %v1059_v17, %v895_v18  ;;  %v2313_v17 = vrot.slane %v2273_v6, %v1191_v4 }
 0x19a   : > { %1034 = vperm.xlu1 %1908, %v2159_v46   ;;  %v1175_v18 = vand.u32 2147483647, %v1143_v60 }
 0x19b   : > { %v795_v10 = vpop.permute.xlu1 %794  ;;  %v1127_v3 = vsub.f32 %v1091_v59, %v2301_v57 }
 0x19c   : > { %v731_v11 = vpop.permute.xlu0 %730  ;;  %838 = vperm.xlu0 %1907, %v2159_v46  }
 0x19d   : > { %v1159_v13 = vand.u32 2147483647, %v1127_v3  ;;  %v861_v19 = vmul.f32 %v2277_v7, %v731_v11  ;;  %v1211_v11 = vmul.f32 %v2313_v17, %v1175_v18 }
 0x19e   : > { %1909 = vset.pattern.permute.xlu1 %v2607_v0 }
 0x19f   : > { %580 = vperm.xlu1 %1909, %v2163_v47   ;;  %v1195_v58 = vmul.f32 %v2313_v17, %v1159_v13 }
 0x1a0   : > { %766 = vperm.xlu0 %1907, %v2163_v47   ;;  %v927_v21 = vpop.permute.xlu1 %926 }
 0x1a1   : > { %v991_v22 = vpop.permute.xlu0 %990  ;;  %v1057_v59 = vmul.f32 %v2288_v14, %v927_v21  ;;  %v1227_v21 = vsub.f32 1.0, %v1195_v58  ;;  %v2620_v58 = vmov 0  }
 0x1a3   : > { %660 = vperm.xlu1 %1909, %v2165_v48  }
 0x1a4   : > { %830 = vperm.xlu0 %1907, %v2165_v48  }
 0x1a5   : > { %v551_v2 = vpop.permute.xlu1 %550 }
 0x1a6   : > { %v743_v62 = vpop.permute.xlu0 %742  ;;  %v700_v16 = vmul.f32 %v2281_v9, %v551_v2 }
 0x1a7   : > { %1910 = vset.pattern.permute.xlu1 %v2609_v31  ;;  %v864_v15 = vmul.f32 %v2277_v7, %v743_v62  ;;  %v893_v31 = vadd.f32 %v861_v19, %v697_v20 }
 0x1a8   : > { %1911 = vset.pattern.permute.xlu0 %v2607_v0  ;;  %962 = vperm.xlu1 %1910, %v2163_v47   ;;  %v877_v0 = vmul.f32 %v2277_v7, %v795_v10 }
 0x1a9   : > { %605 = vperm.xlu0 %1911, %v2177_v49   ;;  %v631_v12 = vpop.permute.xlu1 %630  ;;  %v896_v3 = vadd.f32 %v864_v15, %v700_v16  ;;  %v1073_v15 = vmul.f32 %v2288_v14, %v991_v22 }
 0x1aa   : > { %v807_v8 = vpop.permute.xlu0 %806  ;;  %v716_v4 = vmul.f32 %v2281_v9, %v631_v12  ;;  %v1089_v12 = vadd.f32 %v1057_v59, %v893_v31  ;;  %v1259_v31 = vmax.f32 %v1227_v21, 0.0 }
 0x1ab   : > { %v880_v2 = vmul.f32 %v2277_v7, %v807_v8  ;;  %v713_v8 = vmul.f32 %v2281_v9, %v2269_v5 }
 0x1ac   : > { %1026 = vperm.xlu1 %1910, %v2165_v48   ;;  %v1125_v5 = vsub.f32 %v1089_v12, %v2301_v57 }
 0x1ad   : > { %685 = vperm.xlu0 %1911, %v2181_v50   ;;  %v912_v18 = vadd.f32 %v880_v2, %v716_v4 }
 0x1ae   : > { %v939_v61 = vpop.permute.xlu1 %938  ;;  %v1157_v12 = vand.u32 2147483647, %v1125_v5 }
 0x1af   : > { %v541_v62 = vpop.permute.xlu0 %540  ;;  %v1060_v60 = vmul.f32 %v2288_v14, %v939_v61  ;;  %v1291_v61 = vsub.s32 5, %v2263_v63 }
 0x1b0   : > { %1912 = vset.pattern.permute.xlu1 %v2611_v32 }
 0x1b1   : > { %1913 = vset.pattern.permute.xlu0 %v2619_v1  ;;  %v1092_v13 = vadd.f32 %v1060_v60, %v896_v3  ;;  %786 = vperm.xlu1 %1912, %v2177_v49   ;;  %v1243_v3 = vsub.f32 1.0, %v1211_v11  ;;  %v909_v60 = vadd.f32 %v877_v0, %v713_v8  ;;  %v2343_v63 = vrot.slane %v2273_v6, %v1291_v61 }
 0x1b2   : > { %982 = vperm.xlu0 %1913, %v2177_v49   ;;  %v1003_v16 = vpop.permute.xlu1 %1002 }
 0x1b3   : > { %v1128_v10 = vsub.f32 %v1092_v13, %v2301_v57  ;;  %v1076_v19 = vmul.f32 %v2288_v14, %v1003_v16  ;;  %v1105_v22 = vadd.f32 %v1073_v15, %v909_v60  ;;  %v1275_v0 = vmax.f32 %v1243_v3, 0.0 }
 0x1b4   : > { %v799_v20 = vpop.permute.xlu0 %798  ;;  %v1295_v21 = vmul.f32 %v2343_v63, %v1259_v31  ;;  %v1193_v31 = vmul.f32 %v2313_v17, %v1157_v12 }
 0x1b5   : > { %v1160_v32 = vand.u32 2147483647, %v1128_v10  ;;  %v1108_v49 = vadd.f32 %v1076_v19, %v912_v18  ;;  %850 = vperm.xlu1 %1912, %v2181_v50   ;;  %v1141_v15 = vsub.f32 %v1105_v22, %v2301_v57  ;;  %v1311_v16 = vmul.f32 %v2343_v63, %v1275_v0 }
 0x1b6   : > { %1914 = vset.pattern.permute.xlu0 %v2620_v58  ;;  %v698_v10 = vmul.f32 %v2281_v9, %v541_v62  ;;  %v1327_v60 = vadd.f32 %v2105_v23, %v1295_v21  ;;  %v878_v23 = vmul.f32 %v2277_v7, %v799_v20 }
 0x1b7   : > { %595 = vperm.xlu0 %1914, %v2183_v51   ;;  %v1196_v59 = vmul.f32 %v2313_v17, %v1160_v32  ;;  %v1144_v2 = vsub.f32 %v1108_v49, %v2301_v57  ;;  %v621_v4 = vpop.permute.xlu1 %620  ;;  %v1173_v5 = vand.u32 2147483647, %v1141_v15 }
 0x1b8   : > { %v714_v22 = vmul.f32 %v2281_v9, %v621_v4 }
 0x1b9   : > { %v1228_v11 = vsub.f32 1.0, %v1196_v59  ;;  %v1176_v13 = vand.u32 2147483647, %v1144_v2  ;;  %v931_v8 = vpop.permute.xlu0 %930  ;;  %778 = vperm.xlu1 %1912, %v2183_v51   ;;  %v1209_v21 = vmul.f32 %v2313_v17, %v1173_v5 }
 0x1ba   : > { %v1058_v62 = vmul.f32 %v2288_v14, %v931_v8  ;;  %v910_v12 = vadd.f32 %v878_v23, %v714_v22 }
 0x1bb   : > { %675 = vperm.xlu0 %1914, %v2193_v54   ;;  %v1260_v32 = vmax.f32 %v1228_v11, 0.0  ;;  %v1212_v49 = vmul.f32 %v2313_v17, %v1176_v13 }
 0x1bc   : > { %v735_v6 = vpop.permute.xlu1 %734 }
 0x1bd   : > { %v1296_v18 = vmul.f32 %v2343_v63, %v1260_v32  ;;  %v1244_v19 = vsub.f32 1.0, %v1212_v49  ;;  %v862_v61 = vmul.f32 %v2277_v7, %v735_v6  ;;  %842 = vperm.xlu1 %1912, %v2193_v54   ;;  %v1343_v32 = vadd.f32 %v2107_v24, %v1311_v16 }
 0x1be   : > { %v566_v3 = vpop.permute.xlu0 %565  ;;  %v1225_v49 = vsub.f32 1.0, %v1193_v31  ;;  %v2621_v16 = vmov 1  }
 0x1bf   : > { %1915 = vset.pattern.permute.xlu0 %v2619_v1  ;;  %v1328_v59 = vadd.f32 %v2115_v27, %v1296_v18  ;;  %v1276_v2 = vmax.f32 %v1244_v19, 0.0  ;;  %v894_v0 = vadd.f32 %v862_v61, %v698_v10  ;;  %v1241_v61 = vsub.f32 1.0, %v1209_v21 }
 0x1c0   : > { %974 = vperm.xlu0 %1915, %v2183_v51  }
 0x1c1   : > { %v1704_v4 = vpack.c.bf16 %v1328_v59, %v1327_v60  ;;  %v1312_v11 = vmul.f32 %v2343_v63, %v1276_v2  ;;  %v1090_v13 = vadd.f32 %v1058_v62, %v894_v0  ;;  %v995_v27 = vpop.permute.xlu1 %994  ;;  %1916 = vset.pattern.permute.xlu1 %v2620_v58  ;;  %v1257_v59 = vmax.f32 %v1225_v49, 0.0 }
 0x1c2   : > { %v646_v8 = vpop.permute.xlu0 %645  ;;  %v1074_v15 = vmul.f32 %v2288_v14, %v995_v27  ;;  %610 = vperm.xlu1 %1916, %v2187_v52   ;;  %v1273_v2 = vmax.f32 %v1241_v61, 0.0 }
 0x1c3   : > { %1776 = vst [vmem:[%s2367_s14 + $0x8] sm:$0xff] %v1704_v4   ;;  %v1344_v20 = vadd.f32 %v2117_v28, %v1312_v11  ;;  %v1126_v6 = vsub.f32 %v1090_v13, %v2301_v57  ;;  %v1293_v4 = vmul.f32 %v2343_v63, %v1257_v59 }
 0x1c4   : > { %1038 = vperm.xlu0 %1915, %v2193_v54   ;;  %v1106_v18 = vadd.f32 %v1074_v15, %v910_v12  ;;  %v1309_v21 = vmul.f32 %v2343_v63, %v1273_v2 }
 0x1c5   : > { %v1744_v10 = vpack.c.bf16 %v1344_v20, %v1343_v32  ;;  %v1158_v19 = vand.u32 2147483647, %v1126_v6  ;;  %v1325_v32 = vadd.f32 %v1293_v4, %v2111_v25  ;;  %v703_v20 = vmul.f32 %v2281_v9, %v566_v3 }
 0x1c6   : > { %v1142_v60 = vsub.f32 %v1106_v18, %v2301_v57  ;;  %v755_v5 = vpop.permute.xlu1 %754  ;;  %690 = vperm.xlu1 %1916, %v2195_v55   ;;  %v1341_v61 = vadd.f32 %v1309_v21, %v2113_v26 }
 0x1c7   : > { %v951_v22 = vpop.permute.xlu0 %950  ;;  %1784 = vst [vmem:[%s2367_s14 + $0x48] sm:$0xff] %v1744_v10   ;;  %v1194_v24 = vmul.f32 %v2313_v17, %v1158_v19  ;;  %v867_v6 = vmul.f32 %v2277_v7, %v755_v5 }
 0x1c8   : > { %1917 = vset.pattern.permute.xlu0 %v2621_v16  ;;  %v1174_v28 = vand.u32 2147483647, %v1142_v60 }
 0x1c9   : > { %790 = vperm.xlu0 %1917, %v2187_v52   ;;  %v1226_v31 = vsub.f32 1.0, %v1194_v24  ;;  %v899_v3 = vadd.f32 %v867_v6, %v703_v20  ;;  %v1063_v24 = vmul.f32 %v2288_v14, %v951_v22 }
 0x1ca   : > { %v1210_v62 = vmul.f32 %v2313_v17, %v1174_v28  ;;  %v819_v0 = vpop.permute.xlu1 %818  ;;  %1918 = vset.pattern.permute.xlu1 %v2619_v1 }
 0x1cb   : > { %v1015_v23 = vpop.permute.xlu0 %1014  ;;  %v1258_v11 = vmax.f32 %v1226_v31, 0.0  ;;  %986 = vperm.xlu1 %1918, %v2187_v52   ;;  %v883_v60 = vmul.f32 %v2277_v7, %v819_v0  ;;  %v1095_v16 = vadd.f32 %v1063_v24, %v899_v3 }
 0x1cc   : > { %v1242_v13 = vsub.f32 1.0, %v1210_v62  ;;  %v1079_v31 = vmul.f32 %v2288_v14, %v1015_v23 }
 0x1cd   : > { %854 = vperm.xlu0 %1917, %v2195_v55   ;;  %v1294_v27 = vmul.f32 %v2343_v63, %v1258_v11  ;;  %v1131_v2 = vsub.f32 %v1095_v16, %v2301_v57 }
 0x1ce   : > { %v1274_v12 = vmax.f32 %v1242_v13, 0.0  ;;  %v747_v15 = vpop.permute.xlu1 %746 }
 0x1cf   : > { %v1326_v49 = vadd.f32 %v1294_v27, %v2119_v29  ;;  %1919 = vset.pattern.permute.xlu1 %v2620_v58  ;;  %v719_v58 = vmul.f32 %v2281_v9, %v646_v8  ;;  %v1163_v0 = vand.u32 2147483647, %v1131_v2  ;;  %v865_v11 = vmul.f32 %v2277_v7, %v747_v15 }
 0x1d0   : > { %v556_v18 = vpop.permute.xlu0 %555  ;;  %v1310_v10 = vmul.f32 %v2343_v63, %v1274_v12  ;;  %600 = vperm.xlu1 %1919, %v2191_v53  }
 0x1d1   : > { %782 = vperm.xlu0 %1917, %v2191_v53   ;;  %v1699_v19 = vpack.c.bf16 %v1326_v49, %v1325_v32  ;;  %v915_v26 = vadd.f32 %v883_v60, %v719_v58  ;;  %v1199_v32 = vmul.f32 %v2313_v17, %v1163_v0 }
 0x1d2   : > { %v1342_v25 = vadd.f32 %v1310_v10, %v2121_v30  ;;  %v811_v29 = vpop.permute.xlu1 %810 }
 0x1d3   : > { %1700 = vst [vmem:[%s2367_s14] sm:$0xff] %v1699_v19   ;;  %v1111_v8 = vadd.f32 %v1079_v31, %v915_v26  ;;  %v881_v6 = vmul.f32 %v2277_v7, %v811_v29  ;;  %v1231_v24 = vsub.f32 1.0, %v1199_v32 }
 0x1d4   : > { %v636_v5 = vpop.permute.xlu0 %635  ;;  %v1739_v59 = vpack.c.bf16 %v1342_v25, %v1341_v61  ;;  %680 = vperm.xlu1 %1919, %v2199_v56  }
 0x1d5   : > { %846 = vperm.xlu0 %1917, %v2199_v56   ;;  %v1147_v4 = vsub.f32 %v1111_v8, %v2301_v57  ;;  %v717_v15 = vmul.f32 %v2281_v9, %v636_v5 }
 0x1d6   : > { %1783 = vst [vmem:[%s2367_s14 + $0x40] sm:$0xff] %v1739_v59  }
 0x1d7   : > { %v571_v28 = vpop.permute.xlu1 %570  ;;  %v1179_v49 = vand.u32 2147483647, %v1147_v4  ;;  %v913_v26 = vadd.f32 %v881_v6, %v717_v15 }
 0x1d8   : > { %1920 = vset.pattern.permute.xlu1 %v2619_v1  ;;  %v704_v21 = vmul.f32 %v2281_v9, %v571_v28 }
 0x1d9   : > { %v943_v30 = vpop.permute.xlu0 %942  ;;  %1921 = vset.pattern.permute.xlu0 %v2619_v1  ;;  %978 = vperm.xlu1 %1920, %v2191_v53   ;;  %v701_v1 = vmul.f32 %v2281_v9, %v556_v18  ;;  %v1215_v16 = vmul.f32 %v2313_v17, %v1179_v49 }
 0x1da   : > { %1046 = vperm.xlu0 %1921, %v2181_v50   ;;  %v1061_v23 = vmul.f32 %v2288_v14, %v943_v30 }
 0x1db   : > { %v651_v62 = vpop.permute.xlu1 %650  ;;  %v897_v20 = vadd.f32 %v865_v11, %v701_v1  ;;  %v1247_v4 = vsub.f32 1.0, %v1215_v16 }
 0x1dc   : > { %v720_v3 = vmul.f32 %v2281_v9, %v651_v62 }
 0x1dd   : > { %v1007_v22 = vpop.permute.xlu0 %1006  ;;  %1042 = vperm.xlu1 %1920, %v2199_v56   ;;  %v1093_v61 = vadd.f32 %v1061_v23, %v897_v20  ;;  %v1279_v15 = vmax.f32 %v1247_v4, 0.0 }
 0x1de   : > { %v1077_v60 = vmul.f32 %v2288_v14, %v1007_v22  ;;  %v1263_v22 = vmax.f32 %v1231_v24, 0.0 }
 0x1df   : > { %v1129_v2 = vsub.f32 %v1093_v61, %v2301_v57 }
 0x1e0   : > { %v955_v13 = vpop.permute.xlu1 %954  ;;  %v1109_v8 = vadd.f32 %v1077_v60, %v913_v26  ;;  %v1299_v6 = vmul.f32 %v2343_v63, %v1263_v22 }
 0x1e1   : > { %1050 = vperm.xlu1 %1920, %v2195_v55   ;;  %v1064_v18 = vmul.f32 %v2288_v14, %v955_v13  ;;  %v1161_v23 = vand.u32 2147483647, %v1129_v2 }
 0x1e2   : > { %v759_v27 = vpop.permute.xlu0 %758 }
 0x1e3   : > { %v868_v12 = vmul.f32 %v2277_v7, %v759_v27  ;;  %v1145_v27 = vsub.f32 %v1109_v8, %v2301_v57 }
 0x1e4   : > { %v1019_v19 = vpop.permute.xlu1 %1018 }
 0x1e5   : > { %v900_v10 = vadd.f32 %v868_v12, %v704_v21  ;;  %v1080_v5 = vmul.f32 %v2288_v14, %v1019_v19  ;;  %v1197_v19 = vmul.f32 %v2313_v17, %v1161_v23  ;;  %v1177_v61 = vand.u32 2147483647, %v1145_v27 }
 0x1e6   : > { %v823_v25 = vpop.permute.xlu0 %822 }
 0x1e7   : > { %v1096_v59 = vadd.f32 %v1064_v18, %v900_v10  ;;  %v884_v58 = vmul.f32 %v2277_v7, %v823_v25  ;;  %v1229_v2 = vsub.f32 1.0, %v1197_v19  ;;  %v1213_v4 = vmul.f32 %v2313_v17, %v1177_v61 }
 0x1e9   : > { %v1132_v29 = vsub.f32 %v1096_v59, %v2301_v57  ;;  %v916_v28 = vadd.f32 %v884_v58, %v720_v3  ;;  %v561_v31 = vpop.permute.xlu1 %560 }
 0x1ea   : > { %v751_v30 = vpop.permute.xlu0 %750  ;;  %v702_v20 = vmul.f32 %v2281_v9, %v561_v31 }
 0x1eb   : > { %v1164_v62 = vand.u32 2147483647, %v1132_v29  ;;  %v1112_v0 = vadd.f32 %v1080_v5, %v916_v28  ;;  %v866_v49 = vmul.f32 %v2277_v7, %v751_v30  ;;  %v1331_v29 = vadd.f32 %v2127_v33, %v1299_v6 }
 0x1ec   : > { %v1315_v5 = vmul.f32 %v2343_v63, %v1279_v15 }
 0x1ed   : > { %v1200_v11 = vmul.f32 %v2313_v17, %v1164_v62  ;;  %v1148_v1 = vsub.f32 %v1112_v0, %v2301_v57  ;;  %v641_v13 = vpop.permute.xlu1 %640  ;;  %v898_v58 = vadd.f32 %v866_v49, %v702_v20 }
 0x1ee   : > { %v815_v32 = vpop.permute.xlu0 %814  ;;  %v718_v16 = vmul.f32 %v2281_v9, %v641_v13  ;;  %v1347_v13 = vadd.f32 %v2129_v34, %v1315_v5 }
 0x1ef   : > { %v1232_v21 = vsub.f32 1.0, %v1200_v11  ;;  %v1180_v12 = vand.u32 2147483647, %v1148_v1  ;;  %v882_v24 = vmul.f32 %v2277_v7, %v815_v32  ;;  %v1245_v32 = vsub.f32 1.0, %v1213_v4 }
 0x1f1   : > { %v1264_v18 = vmax.f32 %v1232_v21, 0.0  ;;  %v1216_v10 = vmul.f32 %v2313_v17, %v1180_v12  ;;  %v914_v11 = vadd.f32 %v882_v24, %v718_v16  ;;  %v1261_v12 = vmax.f32 %v1229_v2, 0.0 }
 0x1f2   : > { %v947_v60 = vpop.permute.xlu1 %946  ;;  %v1277_v34 = vmax.f32 %v1245_v32, 0.0 }
 0x1f3   : > { %v1300_v25 = vmul.f32 %v2343_v63, %v1264_v18  ;;  %v1248_v3 = vsub.f32 1.0, %v1216_v10  ;;  %v586_v59 = vpop.permute.xlu0 %585  ;;  %v1062_v26 = vmul.f32 %v2288_v14, %v947_v60  ;;  %v1297_v19 = vmul.f32 %v2343_v63, %v1261_v12 }
 0x1f4   : > { %v1313_v16 = vmul.f32 %v2343_v63, %v1277_v34 }
 0x1f5   : > { %v1332_v28 = vadd.f32 %v2137_v37, %v1300_v25  ;;  %v1280_v30 = vmax.f32 %v1248_v3, 0.0  ;;  %v1094_v31 = vadd.f32 %v1062_v26, %v898_v58  ;;  %v1329_v24 = vadd.f32 %v1297_v19, %v2131_v35 }
 0x1f6   : > { %v1011_v0 = vpop.permute.xlu1 %1010 }
 0x1f7   : > { %v1714_v8 = vpack.c.bf16 %v1332_v28, %v1331_v29  ;;  %v1316_v62 = vmul.f32 %v2343_v63, %v1280_v30  ;;  %v666_v22 = vpop.permute.xlu0 %665  ;;  %v1130_v1 = vsub.f32 %v1094_v31, %v2301_v57  ;;  %v1078_v33 = vmul.f32 %v2288_v14, %v1011_v0 }
 0x1f8   : > { %v707_v28 = vmul.f32 %v2281_v9, %v586_v59 }
 0x1f9   : > { %1778 = vst [vmem:[%s2367_s14 + $0x18] sm:$0xff] %v1714_v8   ;;  %v1348_v37 = vadd.f32 %v2139_v38, %v1316_v62  ;;  %v1162_v23 = vand.u32 2147483647, %v1130_v1  ;;  %v1110_v27 = vadd.f32 %v1078_v33, %v914_v11  ;;  %v1345_v62 = vadd.f32 %v1313_v16, %v2133_v36 }
 0x1fa   : > { %v723_v33 = vmul.f32 %v2281_v9, %v666_v22 }
 0x1fb   : > { %v1754_v21 = vpack.c.bf16 %v1348_v37, %v1347_v13  ;;  %v1198_v49 = vmul.f32 %v2313_v17, %v1162_v23  ;;  %v1146_v20 = vsub.f32 %v1110_v27, %v2301_v57  ;;  %v771_v6 = vpop.permute.xlu1 %770 }
 0x1fc   : > { %v967_v15 = vpop.permute.xlu0 %966  ;;  %v871_v30 = vmul.f32 %v2277_v7, %v771_v6 }
 0x1fd   : > { %1786 = vst [vmem:[%s2367_s14 + $0x58] sm:$0xff] %v1754_v21   ;;  %v1230_v18 = vsub.f32 1.0, %v1198_v49  ;;  %v1178_v10 = vand.u32 2147483647, %v1146_v20  ;;  %v1067_v59 = vmul.f32 %v2288_v14, %v967_v15 }
 0x1fe   : > { %v903_v4 = vadd.f32 %v871_v30, %v707_v28 }
 0x1ff   : > { %v1262_v61 = vmax.f32 %v1230_v18, 0.0  ;;  %v1214_v38 = vmul.f32 %v2313_v17, %v1178_v10  ;;  %v835_v25 = vpop.permute.xlu1 %834 }
 0x200   : > { %v1031_v3 = vpop.permute.xlu0 %1030  ;;  %v1099_v13 = vadd.f32 %v1067_v59, %v903_v4 }
 0x201   : > { %v1298_v60 = vmul.f32 %v2343_v63, %v1262_v61  ;;  %v1246_v58 = vsub.f32 1.0, %v1214_v38  ;;  %v1083_v36 = vmul.f32 %v2288_v14, %v1031_v3 }
 0x202   : > { %v1135_v21 = vsub.f32 %v1099_v13, %v2301_v57 }
 0x203   : > { %v1330_v26 = vadd.f32 %v1298_v60, %v2142_v39  ;;  %v1278_v29 = vmax.f32 %v1246_v58, 0.0  ;;  %v763_v5 = vpop.permute.xlu1 %762  ;;  %v887_v39 = vmul.f32 %v2277_v7, %v835_v25 }
 0x204   : > { %v1167_v49 = vand.u32 2147483647, %v1135_v21  ;;  %v869_v6 = vmul.f32 %v2277_v7, %v763_v5 }
 0x205   : > { %v576_v31 = vpop.permute.xlu0 %575  ;;  %v1709_v2 = vpack.c.bf16 %v1330_v26, %v1329_v24  ;;  %v1314_v8 = vmul.f32 %v2343_v63, %v1278_v29  ;;  %v919_v37 = vadd.f32 %v887_v39, %v723_v33 }
 0x206   : > { %v705_v22 = vmul.f32 %v2281_v9, %v576_v31  ;;  %v1203_v61 = vmul.f32 %v2313_v17, %v1167_v49 }
 0x207   : > { %1777 = vst [vmem:[%s2367_s14 + $0x10] sm:$0xff] %v1709_v2   ;;  %v1346_v35 = vadd.f32 %v1314_v8, %v2144_v40  ;;  %v827_v0 = vpop.permute.xlu1 %826  ;;  %v1115_v40 = vadd.f32 %v1083_v36, %v919_v37 }
 0x208   : > { %v901_v25 = vadd.f32 %v869_v6, %v705_v22  ;;  %v885_v3 = vmul.f32 %v2277_v7, %v827_v0  ;;  %v1235_v2 = vsub.f32 1.0, %v1203_v61 }
 0x209   : > { %v656_v11 = vpop.permute.xlu0 %655  ;;  %v1749_v1 = vpack.c.bf16 %v1346_v35, %v1345_v62  ;;  %v1151_v20 = vsub.f32 %v1115_v40, %v2301_v57 }
 0x20a   : > { %v721_v60 = vmul.f32 %v2281_v9, %v656_v11  ;;  %v1267_v37 = vmax.f32 %v1235_v2, 0.0 }
 0x20b   : > { %1785 = vst [vmem:[%s2367_s14 + $0x50] sm:$0xff] %v1749_v1   ;;  %v1183_v38 = vand.u32 2147483647, %v1151_v20 }
 0x20c   : > { %v591_v23 = vpop.permute.xlu1 %590  ;;  %v917_v62 = vadd.f32 %v885_v3, %v721_v60 }
 0x20d   : > { %v708_v19 = vmul.f32 %v2281_v9, %v591_v23  ;;  %v1219_v8 = vmul.f32 %v2313_v17, %v1183_v38 }
 0x20e   : > { %v959_v27 = vpop.permute.xlu0 %958 }
 0x20f   : > { %v1065_v18 = vmul.f32 %v2288_v14, %v959_v27  ;;  %v1251_v23 = vsub.f32 1.0, %v1219_v8 }
 0x210   : > { %v671_v12 = vpop.permute.xlu1 %670 }
 0x211   : > { %v1097_v26 = vadd.f32 %v1065_v18, %v901_v25  ;;  %v724_v5 = vmul.f32 %v2281_v9, %v671_v12  ;;  %v1283_v18 = vmax.f32 %v1251_v23, 0.0 }
 0x212   : > { %v1023_v32 = vpop.permute.xlu0 %1022 }
 0x213   : > { %v1081_v28 = vmul.f32 %v2288_v14, %v1023_v32  ;;  %v1133_v1 = vsub.f32 %v1097_v26, %v2301_v57 }
 0x215   : > { %v971_v15 = vpop.permute.xlu1 %970  ;;  %v1113_v33 = vadd.f32 %v1081_v28, %v917_v62  ;;  %v1165_v40 = vand.u32 2147483647, %v1133_v1 }
 0x216   : > { %v1068_v58 = vmul.f32 %v2288_v14, %v971_v15  ;;  %v1303_v15 = vmul.f32 %v2343_v63, %v1267_v37 }
 0x217   : > { %v775_v10 = vpop.permute.xlu0 %774  ;;  %v1149_v12 = vsub.f32 %v1113_v33, %v2301_v57 }
 0x218   : > { %v872_v34 = vmul.f32 %v2277_v7, %v775_v10 }
 0x219   : > { %v1035_v16 = vpop.permute.xlu1 %1034  ;;  %v1181_v61 = vand.u32 2147483647, %v1149_v12 }
 0x21a   : > { %v904_v24 = vadd.f32 %v872_v34, %v708_v19  ;;  %v1084_v0 = vmul.f32 %v2288_v14, %v1035_v16  ;;  %v1201_v34 = vmul.f32 %v2313_v17, %v1165_v40 }
 0x21b   : > { %v839_v29 = vpop.permute.xlu0 %838 }
 0x21c   : > { %v1100_v30 = vadd.f32 %v1068_v58, %v904_v24  ;;  %v888_v31 = vmul.f32 %v2277_v7, %v839_v29  ;;  %v1335_v29 = vadd.f32 %v2149_v41, %v1303_v15  ;;  %v1233_v2 = vsub.f32 1.0, %v1201_v34 }
 0x21e   : > { %v1136_v35 = vsub.f32 %v1100_v30, %v2301_v57  ;;  %v920_v4 = vadd.f32 %v888_v31, %v724_v5  ;;  %v581_v11 = vpop.permute.xlu1 %580  ;;  %v1319_v5 = vmul.f32 %v2343_v63, %v1283_v18  ;;  %v1265_v37 = vmax.f32 %v1233_v2, 0.0 }
 0x21f   : > { %v767_v39 = vpop.permute.xlu0 %766  ;;  %v706_v22 = vmul.f32 %v2281_v9, %v581_v11 }
 0x220   : > { %v1168_v59 = vand.u32 2147483647, %v1136_v35  ;;  %v1116_v13 = vadd.f32 %v1084_v0, %v920_v4  ;;  %v870_v6 = vmul.f32 %v2277_v7, %v767_v39  ;;  %v1217_v4 = vmul.f32 %v2313_v17, %v1181_v61 }
 0x221   : > { %v1351_v1 = vadd.f32 %v2151_v42, %v1319_v5 }
 0x222   : > { %v1204_v27 = vmul.f32 %v2313_v17, %v1168_v59  ;;  %v1152_v36 = vsub.f32 %v1116_v13, %v2301_v57  ;;  %v661_v21 = vpop.permute.xlu1 %660  ;;  %v902_v58 = vadd.f32 %v870_v6, %v706_v22  ;;  %v1249_v23 = vsub.f32 1.0, %v1217_v4 }
 0x223   : > { %v831_v20 = vpop.permute.xlu0 %830  ;;  %v722_v16 = vmul.f32 %v2281_v9, %v661_v21 }
 0x224   : > { %v1236_v32 = vsub.f32 1.0, %v1204_v27  ;;  %v1184_v49 = vand.u32 2147483647, %v1152_v36  ;;  %v886_v24 = vmul.f32 %v2277_v7, %v831_v20  ;;  %v1281_v42 = vmax.f32 %v1249_v23, 0.0 }
 0x226   : > { %v1268_v10 = vmax.f32 %v1236_v32, 0.0  ;;  %v1220_v19 = vmul.f32 %v2313_v17, %v1184_v49  ;;  %v918_v39 = vadd.f32 %v886_v24, %v722_v16  ;;  %v1301_v49 = vmul.f32 %v2343_v63, %v1265_v37 }
 0x227   : > { %v963_v3 = vpop.permute.xlu1 %962  ;;  %v1317_v61 = vmul.f32 %v2343_v63, %v1281_v42 }
 0x228   : > { %v1304_v38 = vmul.f32 %v2343_v63, %v1268_v10  ;;  %v1252_v25 = vsub.f32 1.0, %v1220_v19  ;;  %v606_v60 = vpop.permute.xlu0 %605  ;;  %v1066_v26 = vmul.f32 %v2288_v14, %v963_v3  ;;  %v1333_v34 = vadd.f32 %v1301_v49, %v2153_v43 }
 0x229   : > { %v711_v10 = vmul.f32 %v2281_v9, %v606_v60 }
 0x22a   : > { %v1336_v28 = vadd.f32 %v2157_v45, %v1304_v38  ;;  %v1284_v30 = vmax.f32 %v1252_v25, 0.0  ;;  %v1098_v31 = vadd.f32 %v1066_v26, %v902_v58 }
 0x22b   : > { %v1027_v35 = vpop.permute.xlu1 %1026 }
 0x22c   : > { %v1724_v8 = vpack.c.bf16 %v1336_v28, %v1335_v29  ;;  %v1320_v62 = vmul.f32 %v2343_v63, %v1284_v30  ;;  %v2511_v0 = vpop.permute.xlu0 %685  ;;  %v1134_v11 = vsub.f32 %v1098_v31, %v2301_v57  ;;  %v1082_v41 = vmul.f32 %v2288_v14, %v1027_v35 }
 0x22d   : > { %v1349_v29 = vadd.f32 %v1317_v61, %v2155_v44 }
 0x22e   : > { %1780 = vst [vmem:[%s2367_s14 + $0x28] sm:$0xff] %v1724_v8   ;;  %v1352_v45 = vadd.f32 %v2159_v46, %v1320_v62  ;;  %v1166_v33 = vand.u32 2147483647, %v1134_v11  ;;  %v1114_v59 = vadd.f32 %v1082_v41, %v918_v39 }
 0x230   : > { %v1764_v13 = vpack.c.bf16 %v1352_v45, %v1351_v1  ;;  %v1202_v27 = vmul.f32 %v2313_v17, %v1166_v33  ;;  %v1150_v36 = vsub.f32 %v1114_v59, %v2301_v57  ;;  %v787_v21 = vpop.permute.xlu1 %786 }
 0x231   : > { %v983_v40 = vpop.permute.xlu0 %982  ;;  %v875_v19 = vmul.f32 %v2277_v7, %v787_v21 }
 0x232   : > { %1788 = vst [vmem:[%s2367_s14 + $0x68] sm:$0xff] %v1764_v13   ;;  %v1234_v12 = vsub.f32 1.0, %v1202_v27  ;;  %v1182_v32 = vand.u32 2147483647, %v1150_v36  ;;  %v1071_v43 = vmul.f32 %v2288_v14, %v983_v40 }
 0x233   : > { %v907_v26 = vadd.f32 %v875_v19, %v711_v10 }
 0x234   : > { %v1266_v20 = vmax.f32 %v1234_v12, 0.0  ;;  %v1218_v46 = vmul.f32 %v2313_v17, %v1182_v32  ;;  %v851_v6 = vpop.permute.xlu1 %850 }
 0x235   : > { %v1103_v31 = vadd.f32 %v1071_v43, %v907_v26  ;;  %v891_v10 = vmul.f32 %v2277_v7, %v851_v6 }
 0x236   : > { %v596_v22 = vpop.permute.xlu0 %595  ;;  %v1302_v15 = vmul.f32 %v2343_v63, %v1266_v20  ;;  %v1250_v18 = vsub.f32 1.0, %v1218_v46 }
 0x237   : > { %v1139_v8 = vsub.f32 %v1103_v31, %v2301_v57  ;;  %v709_v39 = vmul.f32 %v2281_v9, %v596_v22 }
 0x238   : > { %v1334_v38 = vadd.f32 %v1302_v15, %v2163_v47  ;;  %v1282_v25 = vmax.f32 %v1250_v18, 0.0  ;;  %v779_v3 = vpop.permute.xlu1 %778 }
 0x239   : > { %v873_v35 = vmul.f32 %v2277_v7, %v779_v3  ;;  %v1171_v4 = vand.u32 2147483647, %v1139_v8  ;;  %v727_v3 = vmul.f32 %v2281_v9, %v2511_v0 }
 0x23a   : > { %v676_v58 = vpop.permute.xlu0 %675  ;;  %v1719_v24 = vpack.c.bf16 %v1334_v38, %v1333_v34  ;;  %v1318_v16 = vmul.f32 %v2343_v63, %v1282_v25 }
 0x23b   : > { %v905_v1 = vadd.f32 %v873_v35, %v709_v39  ;;  %v1207_v13 = vmul.f32 %v2313_v17, %v1171_v4  ;;  %v725_v27 = vmul.f32 %v2281_v9, %v676_v58  ;;  %v2622_v35 = vld [vmem:[#allocation5_spill] sm:$0xff] }
 0x23c   : > { %1779 = vst [vmem:[%s2367_s14 + $0x20] sm:$0xff] %v1719_v24   ;;  %v1350_v60 = vadd.f32 %v1318_v16, %v2165_v48  ;;  %v843_v5 = vpop.permute.xlu1 %842 }
 0x23d   : > { %v889_v45 = vmul.f32 %v2277_v7, %v843_v5  ;;  %v1239_v32 = vsub.f32 1.0, %v1207_v13 }
 0x23e   : > { %v1759_v28 = vpack.c.bf16 %v1350_v60, %v1349_v29  ;;  %v923_v29 = vadd.f32 %v891_v10, %v727_v3 }
 0x23f   : > { %v975_v30 = vpop.permute.xlu0 %974  ;;  %v921_v12 = vadd.f32 %v889_v45, %v725_v27  ;;  %v1271_v18 = vmax.f32 %v1239_v32, 0.0 }
 0x240   : > { %1787 = vst [vmem:[%s2367_s14 + $0x60] sm:$0xff] %v1759_v28   ;;  %v1069_v48 = vmul.f32 %v2288_v14, %v975_v30 }
 0x241   : > { %v611_v47 = vpop.permute.xlu1 %610  ;;  %v1307_v26 = vmul.f32 %v2343_v63, %v1271_v18 }
 0x242   : > { %v712_v11 = vmul.f32 %v2281_v9, %v611_v47  ;;  %v1101_v36 = vadd.f32 %v1069_v48, %v905_v1 }
 0x243   : > { %v1039_v2 = vpop.permute.xlu0 %1038  ;;  %v1339_v4 = vadd.f32 %v2622_v35, %v1307_v26 }
 0x244   : > { %v1085_v21 = vmul.f32 %v2288_v14, %v1039_v2  ;;  %v1137_v46 = vsub.f32 %v1101_v36, %v2301_v57 }
 0x245   : > { %v2537_v62 = vpop.permute.xlu1 %690 }
 0x246   : > { %v1117_v22 = vadd.f32 %v1085_v21, %v921_v12  ;;  %v1169_v38 = vand.u32 2147483647, %v1137_v46  ;;  %v728_v36 = vmul.f32 %v2281_v9, %v2537_v62 }
 0x248   : > { %v791_v44 = vpop.permute.xlu0 %790  ;;  %v1153_v25 = vsub.f32 %v1117_v22, %v2301_v57  ;;  %v1205_v6 = vmul.f32 %v2313_v17, %v1169_v38 }
 0x249   : > { %v876_v41 = vmul.f32 %v2277_v7, %v791_v44 }
 0x24a   : > { %v987_v59 = vpop.permute.xlu1 %986  ;;  %v1185_v5 = vand.u32 2147483647, %v1153_v25 }
 0x24b   : > { %v908_v33 = vadd.f32 %v876_v41, %v712_v11  ;;  %v1072_v37 = vmul.f32 %v2288_v14, %v987_v59  ;;  %v1237_v11 = vsub.f32 1.0, %v1205_v6 }
 0x24c   : > { %v855_v23 = vpop.permute.xlu0 %854  ;;  %v1221_v41 = vmul.f32 %v2313_v17, %v1185_v5 }
 0x24d   : > { %v1104_v40 = vadd.f32 %v1072_v37, %v908_v33  ;;  %v892_v1 = vmul.f32 %v2277_v7, %v855_v23  ;;  %v1269_v12 = vmax.f32 %v1237_v11, 0.0 }
 0x24e   : > { %v1253_v32 = vsub.f32 1.0, %v1221_v41 }
 0x24f   : > { %v1140_v49 = vsub.f32 %v1104_v40, %v2301_v57  ;;  %v601_v20 = vpop.permute.xlu1 %600 }
 0x250   : > { %v783_v42 = vpop.permute.xlu0 %782  ;;  %v710_v16 = vmul.f32 %v2281_v9, %v601_v20  ;;  %v1285_v62 = vmax.f32 %v1253_v32, 0.0 }
 0x251   : > { %v1172_v15 = vand.u32 2147483647, %v1140_v49  ;;  %v874_v24 = vmul.f32 %v2277_v7, %v783_v42  ;;  %v924_v49 = vadd.f32 %v892_v1, %v728_v36 }
 0x253   : > { %v1208_v19 = vmul.f32 %v2313_v17, %v1172_v15  ;;  %v681_v61 = vpop.permute.xlu1 %680  ;;  %v906_v47 = vadd.f32 %v874_v24, %v710_v16 }
 0x254   : > { %v847_v34 = vpop.permute.xlu0 %846  ;;  %v726_v28 = vmul.f32 %v2281_v9, %v681_v61  ;;  %v1305_v9 = vmul.f32 %v2343_v63, %v1269_v12 }
 0x255   : > { %v1240_v58 = vsub.f32 1.0, %v1208_v19  ;;  %v890_v43 = vmul.f32 %v2277_v7, %v847_v34 }
 0x257   : > { %v1272_v60 = vmax.f32 %v1240_v58, 0.0  ;;  %v922_v45 = vadd.f32 %v890_v43, %v726_v28  ;;  %v1337_v58 = vadd.f32 %v1305_v9, %v2183_v51 }
 0x258   : > { %v979_v31 = vpop.permute.xlu1 %978 }
 0x259   : > { %v1047_v30 = vpop.permute.xlu0 %1046  ;;  %v1308_v0 = vmul.f32 %v2343_v63, %v1272_v60  ;;  %v1070_v8 = vmul.f32 %v2288_v14, %v979_v31 }
 0x25a   : > { %v1087_v2 = vmul.f32 %v2288_v14, %v1047_v30 }
 0x25b   : > { %v1340_v44 = vadd.f32 %v2187_v52, %v1308_v0  ;;  %v1102_v48 = vadd.f32 %v1070_v8, %v906_v47 }
 0x25c   : > { %v1119_v39 = vadd.f32 %v1087_v2, %v923_v29  ;;  %v1043_v33 = vpop.permute.xlu1 %1042 }
 0x25d   : > { %v1734_v59 = vpack.c.bf16 %v1340_v44, %v1339_v4  ;;  %v1138_v37 = vsub.f32 %v1102_v48, %v2301_v57  ;;  %v1086_v27 = vmul.f32 %v2288_v14, %v1043_v33 }
 0x25e   : > { %v1155_v13 = vsub.f32 %v1119_v39, %v2301_v57 }
 0x25f   : > { %1782 = vst [vmem:[%s2367_s14 + $0x38] sm:$0xff] %v1734_v59   ;;  %v1170_v21 = vand.u32 2147483647, %v1138_v37  ;;  %v1118_v40 = vadd.f32 %v1086_v27, %v922_v45 }
 0x260   : > { %v1187_v52 = vand.u32 2147483647, %v1155_v13  ;;  %v1051_v7 = vpop.permute.xlu1 %1050 }
 0x261   : > { %v1206_v42 = vmul.f32 %v2313_v17, %v1170_v21  ;;  %v1154_v20 = vsub.f32 %v1118_v40, %v2301_v57  ;;  %v1088_v46 = vmul.f32 %v2288_v14, %v1051_v7  ;;  %v1321_v14 = vmul.f32 %v2343_v63, %v1285_v62 }
 0x262   : > { %v1223_v23 = vmul.f32 %v2313_v17, %v1187_v52 }
 0x263   : > { %v1238_v22 = vsub.f32 1.0, %v1206_v42  ;;  %v1186_v15 = vand.u32 2147483647, %v1154_v20  ;;  %v1120_v18 = vadd.f32 %v1088_v46, %v924_v49  ;;  %v1353_v5 = vadd.f32 %v1321_v14, %v2193_v54 }
 0x264   : > { %v1255_v10 = vsub.f32 1.0, %v1223_v23 }
 0x265   : > { %v1270_v19 = vmax.f32 %v1238_v22, 0.0  ;;  %v1222_v34 = vmul.f32 %v2313_v17, %v1186_v15  ;;  %v1156_v61 = vsub.f32 %v1120_v18, %v2301_v57 }
 0x266   : > { %v1287_v24 = vmax.f32 %v1255_v10, 0.0 }
 0x267   : > { %v1306_v38 = vmul.f32 %v2343_v63, %v1270_v19  ;;  %v1254_v25 = vsub.f32 1.0, %v1222_v34  ;;  %v1188_v3 = vand.u32 2147483647, %v1156_v61 }
 0x268   : > { %v1323_v43 = vmul.f32 %v2343_v63, %v1287_v24 }
 0x269   : > { %v1338_v16 = vadd.f32 %v1306_v38, %v2191_v53  ;;  %v1286_v26 = vmax.f32 %v1254_v25, 0.0  ;;  %v1224_v29 = vmul.f32 %v2313_v17, %v1188_v3 }
 0x26a   : > { %v1355_v53 = vadd.f32 %v2181_v50, %v1323_v43 }
 0x26b   : > { %v1729_v60 = vpack.c.bf16 %v1338_v16, %v1337_v58  ;;  %v1322_v6 = vmul.f32 %v2343_v63, %v1286_v26  ;;  %v1256_v57 = vsub.f32 1.0, %v1224_v29 }
 0x26d   : > { %1781 = vst [vmem:[%s2367_s14 + $0x30] sm:$0xff] %v1729_v60   ;;  %v1354_v51 = vadd.f32 %v1322_v6, %v2199_v56  ;;  %v1288_v28 = vmax.f32 %v1256_v57, 0.0 }
 0x26f   : > { %v1769_v30 = vpack.c.bf16 %v1354_v51, %v1353_v5  ;;  %v1324_v31 = vmul.f32 %v2343_v63, %v1288_v28 }
 0x271   : > { %1789 = vst [vmem:[%s2367_s14 + $0x70] sm:$0xff] %v1769_v30   ;;  %v1356_v17 = vadd.f32 %v2195_v55, %v1324_v31 }
 0x273   : > { %v1774_v0 = vpack.c.bf16 %v1356_v17, %v1355_v53 }
 0x275   : > { %1790 = vst [vmem:[%s2367_s14 + $0x78] sm:$0xff] %v1774_v0  }
 0x276 PF: > { %s14_s12 = sadd.s32 1, %s1978_s12  }
 0x277   : > { %p11_p3 = scmp.ge.s32.totalorder %s14_s12, 4  }
 0x279   :  { %13 = sbr.rel (!%p11_p3) target bundleno = 1 (0x1), region = 67 }
 0x280   :  { %1539 = vsyncpa [#allocation3], 1 }
 0x281   :  { %1541 = vsyncpa [#allocation3 + $0x1], 1 }

// kernel: linearization_net.23
= control target key start
LH: loop header
LB: loop body
LE: loop exit
PB: predicated region body
PF: predicated region fallthrough
CT: control target
= control target key end

     0   :  { %s1968_s12 = smov 0   ;;  %s1970_s13 = smov 0   ;;  %s2259_s0 = inlined_call_operand.vmem [shape: bf16[128,6272], index: 0, kind: input, shape index: {}]   ;;  %s2260_s1 = inlined_call_operand.vmem [shape: bf16[6272,64], index: 1, kind: input, shape index: {}]   ;;  %s2261_s2 = inlined_call_operand.vmem [shape: f32[1,64], index: 2, kind: input, shape index: {}]   ;;  %s2262_s3 = inlined_call_operand.vmem [shape: bf16[128,64], index: 3, kind: output, shape index: {}]  }
   0x1   :  { %s1972_s14 = smov 0   ;;  %s1974_s15 = smov 0  }
   0x2   :  { %s1976_s16 = smov 0   ;;  %s1978_s17 = smov 0  }
   0x3   :  { %s1980_s18 = smov 0  }
   0x4 LB: > { %s25_s19 = sadd.s32 1, %s1938_s16  ;;  %s32_s20 = sadd.s32 1, %s1942_s17  ;;  %s1946_s18 = sphi %s1980_s18, %s13_s18   ;;  %s1942_s17 = sphi %s1978_s17, %s2268_s17   ;;  %s1938_s16 = sphi %s1976_s16, %s2267_s16   ;;  %s1934_s15 = sphi %s1974_s15, %s2266_s15   ;;  %s1930_s14 = sphi %s1972_s14, %s2265_s14   ;;  %s1926_s13 = sphi %s1970_s13, %s2264_s13   ;;  %s1922_s12 = sphi %s1968_s12, %s2263_s12  }
   0x5   : > { %p26_p0 = scmp.ge.s32.totalorder %s25_s19, 7  ;;  %p48_p1 = scmp.ne.s32.totalorder %s1926_s13, %s1922_s12 }
   0x6   : > { %p49_p2 = scmp.eq.s32.totalorder %s1946_s18, 0  ;;  %s41_s24 = sadd.s32 1, %s1926_s13 }
   0x7   : > { %s2270_s19 = smov (%p26_p0, %s25_s19), 0  ;;  %s2272_s20 = smov (!%p26_p0, %s32_s20), %s1942_s17 }
   0x8   : > { %p50_p3 = por %p49_p2, %p48_p1  ;;  %p34_p4 = scmp.ge.s32.totalorder %s2272_s20, 2 }
   0x9   : > { %s37_s21 = ssub.s32 %s1938_s16, %s2270_s19  ;;  %p1452_p6 = scmp.ge.s32.totalorder %s1946_s18, 14 }
   0xa   : > { %s2274_s20 = smov (%p34_p4, %s2272_s20), 0 }
   0xb   : > { %s36_s22 = ssub.s32 %s1942_s17, %s2274_s20  ;;  %162 = sbr.rel (%p1452_p6) target bundleno = 44 (0x2c), region = 20 }
   0xc   : > { %s38_s23 = sor.u32 %s37_s21, %s36_s22 }
   0xd   : > { %p39_p5 = scmp.eq.s32.totalorder %s38_s23, 0 }
   0xf   : > { %s2019_s25 = scalar_select %p39_p5, %s1926_s13, %s41_s24  }
  0x12   : > { %165 = sbr.rel (!%p50_p3) target bundleno = 44 (0x2c), region = 24  ;;  %s167_s26 = sand.u32 (%p50_p3), 1, %s1926_s13  }
  0x13   : > { %s171_s27 = smul.u32 (%p50_p3), 7, %s1938_s16 }
  0x14   : > { %s1737_s28 = smul.u32 (%p50_p3), 224, %s167_s26 }
  0x15   : > { %s1738_s29 = smul.u32 (%p50_p3), 392, %s1942_s17 }
  0x16   : > { %s2033_s8 = scalar_lea.vmem (%p50_p3), [#allocation3], %s1737_s28 }
  0x17   : > { %s173_s30 = sadd.s32 (%p50_p3), %s1738_s29, %s171_s27 }
  0x18   : > { %s1455_s4 = sshll.u32 (%p50_p3), %s173_s30, 2 }
  0x19   : > { %s2028_s7 = scalar_lea.vmem %s2259_s0, %s1455_s4 }
  0x1a   : > { %v190_v0 = vld [vmem:[%s2028_s7] sm:$0xff]  ;;  %v192_v1 = vld [vmem:[%s2028_s7 + $0x8] sm:$0xff]  ;;  %v194_v2 = vld [vmem:[%s2028_s7 + $0x10] sm:$0xff] }
  0x1b   : > { %191 = vst [vmem:[%s2033_s8] sm:$0xff] %v190_v0  ;;  %193 = vst [vmem:[%s2033_s8 + $0x8] sm:$0xff] %v192_v1  ;;  %v196_v3 = vld [vmem:[%s2028_s7 + $0xc4] sm:$0xff]  ;;  %v198_v4 = vld [vmem:[%s2028_s7 + $0xcc] sm:$0xff] }
  0x1c   : > { %195 = vst [vmem:[%s2033_s8 + $0x10] sm:$0xff] %v194_v2  ;;  %v200_v5 = vld [vmem:[%s2028_s7 + $0xd4] sm:$0xff]  ;;  %197 = vst [vmem:[%s2033_s8 + $0x1c] sm:$0xff] %v196_v3  ;;  %v202_v6 = vld [vmem:[%s2028_s7 + $0x188] sm:$0xff] }
  0x1d   : > { %199 = vst [vmem:[%s2033_s8 + $0x24] sm:$0xff] %v198_v4  ;;  %201 = vst [vmem:[%s2033_s8 + $0x2c] sm:$0xff] %v200_v5  ;;  %v204_v7 = vld [vmem:[%s2028_s7 + $0x190] sm:$0xff]  ;;  %v206_v8 = vld [vmem:[%s2028_s7 + $0x198] sm:$0xff] }
  0x1e   : > { %203 = vst [vmem:[%s2033_s8 + $0x38] sm:$0xff] %v202_v6  ;;  %205 = vst [vmem:[%s2033_s8 + $0x40] sm:$0xff] %v204_v7  ;;  %v208_v9 = vld [vmem:[%s2028_s7 + $0x24c] sm:$0xff]  ;;  %v210_v10 = vld [vmem:[%s2028_s7 + $0x254] sm:$0xff] }
  0x1f   : > { %207 = vst [vmem:[%s2033_s8 + $0x48] sm:$0xff] %v206_v8  ;;  %v212_v11 = vld [vmem:[%s2028_s7 + $0x25c] sm:$0xff]  ;;  %209 = vst [vmem:[%s2033_s8 + $0x54] sm:$0xff] %v208_v9  ;;  %v214_v12 = vld [vmem:[%s2028_s7 + $0x310] sm:$0xff] }
  0x20   : > { %211 = vst [vmem:[%s2033_s8 + $0x5c] sm:$0xff] %v210_v10  ;;  %213 = vst [vmem:[%s2033_s8 + $0x64] sm:$0xff] %v212_v11  ;;  %v216_v13 = vld [vmem:[%s2028_s7 + $0x318] sm:$0xff]  ;;  %v218_v14 = vld [vmem:[%s2028_s7 + $0x320] sm:$0xff] }
  0x21   : > { %215 = vst [vmem:[%s2033_s8 + $0x70] sm:$0xff] %v214_v12  ;;  %217 = vst [vmem:[%s2033_s8 + $0x78] sm:$0xff] %v216_v13  ;;  %v220_v15 = vld [vmem:[%s2028_s7 + $0x3d4] sm:$0xff]  ;;  %v222_v16 = vld [vmem:[%s2028_s7 + $0x3dc] sm:$0xff] }
  0x22   : > { %219 = vst [vmem:[%s2033_s8 + $0x80] sm:$0xff] %v218_v14  ;;  %v224_v17 = vld [vmem:[%s2028_s7 + $0x3e4] sm:$0xff]  ;;  %221 = vst [vmem:[%s2033_s8 + $0x8c] sm:$0xff] %v220_v15  ;;  %v226_v18 = vld [vmem:[%s2028_s7 + $0x498] sm:$0xff] }
  0x23   : > { %223 = vst [vmem:[%s2033_s8 + $0x94] sm:$0xff] %v222_v16  ;;  %225 = vst [vmem:[%s2033_s8 + $0x9c] sm:$0xff] %v224_v17  ;;  %v228_v19 = vld [vmem:[%s2028_s7 + $0x4a0] sm:$0xff]  ;;  %v230_v20 = vld [vmem:[%s2028_s7 + $0x4a8] sm:$0xff] }
  0x24   : > { %227 = vst [vmem:[%s2033_s8 + $0xa8] sm:$0xff] %v226_v18  ;;  %229 = vst [vmem:[%s2033_s8 + $0xb0] sm:$0xff] %v228_v19  ;;  %v232_v21 = vld [vmem:[%s2028_s7 + $0x55c] sm:$0xff]  ;;  %v234_v22 = vld [vmem:[%s2028_s7 + $0x564] sm:$0xff] }
  0x25   : > { %231 = vst [vmem:[%s2033_s8 + $0xb8] sm:$0xff] %v230_v20  ;;  %v236_v23 = vld [vmem:[%s2028_s7 + $0x56c] sm:$0xff]  ;;  %233 = vst [vmem:[%s2033_s8 + $0xc4] sm:$0xff] %v232_v21  ;;  %v1456_v24 = vld [vmem:[%s2028_s7 + $0x18] sm:$0xf] }
  0x26   : > { %235 = vst [vmem:[%s2033_s8 + $0xcc] sm:$0xff] %v234_v22  ;;  %237 = vst [vmem:[%s2033_s8 + $0xd4] sm:$0xff] %v236_v23  ;;  %v1458_v25 = vld [vmem:[%s2028_s7 + $0xdc] sm:$0xf]  ;;  %v1460_v26 = vld [vmem:[%s2028_s7 + $0x1a0] sm:$0xf] }
  0x27   : > { %1457 = vst [vmem:[%s2033_s8 + $0x18] sm:$0xf] %v1456_v24  ;;  %1459 = vst [vmem:[%s2033_s8 + $0x34] sm:$0xf] %v1458_v25  ;;  %v1462_v27 = vld [vmem:[%s2028_s7 + $0x264] sm:$0xf] }
  0x28   : > { %1461 = vst [vmem:[%s2033_s8 + $0x50] sm:$0xf] %v1460_v26  ;;  %v1464_v28 = vld [vmem:[%s2028_s7 + $0x328] sm:$0xf]  ;;  %v1466_v29 = vld [vmem:[%s2028_s7 + $0x3ec] sm:$0xf] }
  0x29   : > { %1463 = vst [vmem:[%s2033_s8 + $0x6c] sm:$0xf] %v1462_v27  ;;  %1465 = vst [vmem:[%s2033_s8 + $0x88] sm:$0xf] %v1464_v28  ;;  %v1468_v30 = vld [vmem:[%s2028_s7 + $0x4b0] sm:$0xf] }
  0x2a   : > { %1467 = vst [vmem:[%s2033_s8 + $0xa4] sm:$0xf] %v1466_v29  ;;  %v1470_v31 = vld [vmem:[%s2028_s7 + $0x574] sm:$0xf]  ;;  %1469 = vst [vmem:[%s2033_s8 + $0xc0] sm:$0xf] %v1468_v30 }
  0x2b   : > { %1471 = vst [vmem:[%s2033_s8 + $0xdc] sm:$0xf] %v1470_v31 }
  0x2c PF: > { %p1472_p7 = scmp.ge.s32.totalorder %s1946_s18, 1  ;;  %p277_p8 = scmp.lt.s32.totalorder %s1946_s18, 15 }
  0x2e   : > { %p278_p9 = pnand %p1472_p7, %p277_p8 }
  0x2f   : > { %s284_s9 = sand.u32 (!%p278_p9), 1, %s1922_s12   ;;  %s323_s10 = smul.u32 (!%p278_p9), 112, %s1930_s14 }
  0x30   : > { %281 = sbr.rel (%p278_p9) target bundleno = 389 (0x185), region = 54  ;;  %s1474_s21 = sshll.u32 (!%p278_p9), %s1934_s15, 3 }
  0x31   : > { %s1739_s11 = smul.u32 (!%p278_p9), 224, %s284_s9  ;;  %p324_p10 = scmp.lt.s32.totalorder (!%p278_p9), %s323_s10, 783 }
  0x32   : > { %p336_p11 = scmp.lt.s32.totalorder (!%p278_p9), %s1474_s21, 15  ;;  %p1476_p12 = scmp.ne.s32.totalorder (!%p278_p9), %s1930_s14, 0 }
  0x33   : > { %s2111_s12 = scalar_lea.vmem (!%p278_p9), [#allocation3], %s1739_s11 }
  0x37   : > { %s2276_s10 = smov (!%p324_p10, %s323_s10), 783  ;;  %s2278_s21 = smov (!%p336_p11, %s1474_s21), 15 }
  0x38   : > { %s1473_s22 = sshll.u32 %s2276_s10, 2  ;;  %s1475_s27 = sshll.u32 %s2278_s21, 2  ;;  %v1477_v32 = vld [vmem:[%s2261_s2] ss:$0 sm:$0xff] (!%p1476_p12)  ;;  %vm356_vm0 = vcmask (!%p1476_p12), 523264  }
  0x39   : > { %s2104_s26 = scalar_lea.vmem %s2260_s1, %s1473_s22  ;;  %s2109_s30 = scalar_lea.vmem %s2262_s3, %s1475_s27  ;;  %357 = vst.msk [vmem:[#allocation2] sm:$0xff] (!%p1476_p12), %vm356_vm0, %v1477_v32  ;;  %358 = vst.msk [vmem:[#allocation2 + $0x8] sm:$0xff] (!%p1476_p12), %vm356_vm0, %v1477_v32 }
  0x3a   : > { %348 = sbr.rel (%p1476_p12) target bundleno = 65 (0x41), region = 62  ;;  %359 = vst.msk [vmem:[#allocation2 + $0x10] sm:$0xff] (!%p1476_p12), %vm356_vm0, %v1477_v32  ;;  %360 = vst.msk [vmem:[#allocation2 + $0x18] sm:$0xff] (!%p1476_p12), %vm356_vm0, %v1477_v32 }
  0x3b   : > { %361 = vst.msk [vmem:[#allocation2 + $0x20] sm:$0xff] (!%p1476_p12), %vm356_vm0, %v1477_v32  ;;  %362 = vst.msk [vmem:[#allocation2 + $0x28] sm:$0xff] (!%p1476_p12), %vm356_vm0, %v1477_v32 }
  0x3c   : > { %363 = vst.msk [vmem:[#allocation2 + $0x30] sm:$0xff] (!%p1476_p12), %vm356_vm0, %v1477_v32  ;;  %364 = vst.msk [vmem:[#allocation2 + $0x38] sm:$0xff] (!%p1476_p12), %vm356_vm0, %v1477_v32 }
  0x41 PF: > { %v1796_v33 = vld [vmem:[%s2104_s26 + $0x40] sm:$0xff]   ;;  %v1800_v37 = vld [vmem:[%s2104_s26 + $0x48] sm:$0xff]   ;;  %v1804_v41 = vld [vmem:[%s2104_s26 + $0x50] sm:$0xff]   ;;  %vm1265_vm1 = vcmask 523264   ;;  %p1562_p13 = scmp.ne.s32.totalorder %s1930_s14, 6 }
  0x42   : > { %v1797_v34 = vld [vmem:[%s2104_s26 + $0xc0] sm:$0xff]   ;;  %1581 = vmatprep.subr.bf16.mxu0 %v1796_v33  ;;  %v1801_v38 = vld [vmem:[%s2104_s26 + $0xc8] sm:$0xff]   ;;  %v1805_v42 = vld [vmem:[%s2104_s26 + $0xd0] sm:$0xff]   ;;  %vm1318_vm2 = vcmask (!%p1562_p13), 519168  }
  0x43   : > { %v1798_v35 = vld [vmem:[%s2104_s26] sm:$0xff]   ;;  %1621 = vmatprep.subr.bf16.mxu1 %v1797_v34  ;;  %v1802_v39 = vld [vmem:[%s2104_s26 + $0x8] sm:$0xff]   ;;  %v1806_v43 = vld [vmem:[%s2104_s26 + $0x10] sm:$0xff]  }
  0x44   : > { %v1799_v36 = vld [vmem:[%s2104_s26 + $0x80] sm:$0xff]   ;;  %1582 = vmatpush3.bf16.msra.mxu0 %v1798_v35  ;;  %v1803_v40 = vld [vmem:[%s2104_s26 + $0x88] sm:$0xff]   ;;  %v1807_v44 = vld [vmem:[%s2104_s26 + $0x90] sm:$0xff]  }
  0x45   : > { %1622 = vmatpush3.bf16.msra.mxu1 %v1799_v36  ;;  %1583 = vmatprep.subr.bf16.mxu0 %v1800_v37  ;;  %v1808_v45 = vld [vmem:[%s2104_s26 + $0x58] sm:$0xff]   ;;  %v1812_v49 = vld [vmem:[%s2104_s26 + $0x60] sm:$0xff]   ;;  %v1816_v53 = vld [vmem:[%s2104_s26 + $0x68] sm:$0xff]  }
  0x46   : > { %1623 = vmatprep.subr.bf16.mxu1 %v1801_v38  ;;  %v1809_v46 = vld [vmem:[%s2104_s26 + $0xd8] sm:$0xff]   ;;  %v1813_v50 = vld [vmem:[%s2104_s26 + $0xe0] sm:$0xff]   ;;  %v1817_v54 = vld [vmem:[%s2104_s26 + $0xe8] sm:$0xff]  }
  0x47   : > { %v1810_v47 = vld [vmem:[%s2104_s26 + $0x18] sm:$0xff]   ;;  %v1814_v51 = vld [vmem:[%s2104_s26 + $0x20] sm:$0xff]   ;;  %v1818_v55 = vld [vmem:[%s2104_s26 + $0x28] sm:$0xff]  }
  0x48   : > { %1584 = vmatpush3.bf16.msra.mxu0 %v1802_v39  ;;  %v1811_v48 = vld [vmem:[%s2104_s26 + $0x98] sm:$0xff]   ;;  %v1815_v52 = vld [vmem:[%s2104_s26 + $0xa0] sm:$0xff]   ;;  %v1819_v56 = vld [vmem:[%s2104_s26 + $0xa8] sm:$0xff]  }
  0x49   : > { %1624 = vmatpush3.bf16.msra.mxu1 %v1803_v40  ;;  %1585 = vmatprep.subr.bf16.mxu0 %v1804_v41  ;;  %v1820_v57 = vld [vmem:[%s2104_s26 + $0x70] sm:$0xff]   ;;  %v1824_v61 = vld [vmem:[%s2104_s26 + $0x78] sm:$0xff]   ;;  %v1830_v2 = vld [vmem:[%s2111_s12 + $0x4] ss:$28 sps:$4 sm:$0xff]  }
  0x4a   : > { %1625 = vmatprep.subr.bf16.mxu1 %v1805_v42  ;;  %v1821_v58 = vld [vmem:[%s2104_s26 + $0xf0] sm:$0xff]   ;;  %v1825_v62 = vld [vmem:[%s2104_s26 + $0xf8] sm:$0xff]   ;;  %v1831_v3 = vld [vmem:[%s2111_s12 + $0x8] ss:$28 sps:$4 sm:$0xff]   ;;  %1029 = vmatprep.mubr.bf16.mxu0 %v1830_v2 }
  0x4b   : > { %v1822_v59 = vld [vmem:[%s2104_s26 + $0x30] sm:$0xff]   ;;  %v1826_v63 = vld [vmem:[%s2104_s26 + $0x38] sm:$0xff]   ;;  %v1833_v4 = vld [vmem:[%s2111_s12 + $0xc] ss:$28 sps:$4 sm:$0xff]  }
  0x4c   : > { %1586 = vmatpush3.bf16.msra.mxu0 %v1806_v43  ;;  %v1823_v60 = vld [vmem:[%s2104_s26 + $0xb0] sm:$0xff]   ;;  %v1827_v0 = vld [vmem:[%s2104_s26 + $0xb8] sm:$0xff]   ;;  %v1834_v5 = vld [vmem:[%s2104_s26 + $0x140] sm:$0xff]   ;;  %1094 = vmatprep.mubr.bf16.mxu1 %v1833_v4 }
  0x4d   : > { %1626 = vmatpush3.bf16.msra.mxu1 %v1807_v44  ;;  %1587 = vmatprep.subr.bf16.mxu0 %v1808_v45  ;;  %v1828_v1 = vld [vmem:[%s2111_s12] ss:$28 sps:$4 sm:$0xff]   ;;  %v1836_v7 = vld [vmem:[%s2104_s26 + $0x148] sm:$0xff]   ;;  %v1843_v12 = vld [vmem:[%s2111_s12 + $0x38] ss:$28 sps:$4 sm:$0xff]  }
  0x4e   : > { %1627 = vmatprep.subr.bf16.mxu1 %v1809_v46  ;;  %v1835_v6 = vld [vmem:[%s2104_s26 + $0x100] sm:$0xff]   ;;  %v1838_v9 = vld [vmem:[%s2104_s26 + $0x108] sm:$0xff]   ;;  %v1839_v10 = vld [vmem:[%s2111_s12 + $0x3c] ss:$28 sps:$4 sm:$0xff]  }
  0x4f   : > { %v1837_v8 = vld [vmem:[%s2104_s26 + $0x180] sm:$0xff]   ;;  %v1845_v14 = vld [vmem:[%s2104_s26 + $0x150] sm:$0xff]   ;;  %v1846_v15 = vld [vmem:[%s2104_s26 + $0x188] sm:$0xff]  }
  0x50   : > { %1588 = vmatpush3.bf16.msra.mxu0 %v1810_v47  ;;  %v1841_v11 = vld [vmem:[%s2111_s12 + $0x44] ss:$28 sps:$4 sm:$0xff]   ;;  %v1847_v16 = vld [vmem:[%s2104_s26 + $0x110] sm:$0xff]   ;;  %v1848_v17 = vld [vmem:[%s2104_s26 + $0x158] sm:$0xff]  }
  0x51   : > { %1628 = vmatpush3.bf16.msra.mxu1 %v1811_v48  ;;  %1589 = vmatprep.subr.bf16.mxu0 %v1812_v49  ;;  %v1844_v13 = vld [vmem:[%s2111_s12 + $0x40] ss:$28 sps:$4 sm:$0xff]   ;;  %v1849_v18 = vld [vmem:[%s2104_s26 + $0x190] sm:$0xff]   ;;  %v1860_v27 = vld [vmem:[%s2104_s26 + $0x168] sm:$0xff]  }
  0x52   : > { %1629 = vmatprep.subr.bf16.mxu1 %v1813_v50  ;;  %v1850_v19 = vld [vmem:[%s2104_s26 + $0x118] sm:$0xff]   ;;  %v1851_v20 = vld [vmem:[%s2111_s12 + $0x74] ss:$28 sps:$4 sm:$0xff]   ;;  %v1857_v24 = vld [vmem:[%s2104_s26 + $0x160] sm:$0xff]  }
  0x53   : > { %v1853_v21 = vld [vmem:[%s2111_s12 + $0x7c] ss:$28 sps:$4 sm:$0xff]   ;;  %v1855_v22 = vld [vmem:[%s2111_s12 + $0x70] ss:$28 sps:$4 sm:$0xff]   ;;  %v1859_v26 = vld [vmem:[%s2104_s26 + $0x120] sm:$0xff]  }
  0x54   : > { %1590 = vmatpush3.bf16.msra.mxu0 %v1814_v51  ;;  %v1856_v23 = vld [vmem:[%s2111_s12 + $0x78] ss:$28 sps:$4 sm:$0xff]   ;;  %v1861_v28 = vld [vmem:[%s2104_s26 + $0x1a0] sm:$0xff]   ;;  %v1862_v29 = vld [vmem:[%s2104_s26 + $0x128] sm:$0xff]  }
  0x55   : > { %1630 = vmatpush3.bf16.msra.mxu1 %v1815_v52  ;;  %1591 = vmatprep.subr.bf16.mxu0 %v1816_v53  ;;  %v1858_v25 = vld [vmem:[%s2104_s26 + $0x198] sm:$0xff]   ;;  %v1863_v30 = vld [vmem:[%s2111_s12 + $0xac] ss:$28 sps:$4 sm:$0xff]   ;;  %v1865_v31 = vld [vmem:[%s2111_s12 + $0xb4] ss:$28 sps:$4 sm:$0xff]  }
  0x56   : > { %1631 = vmatprep.subr.bf16.mxu1 %v1817_v54  ;;  %v1867_v32 = vld [vmem:[%s2111_s12 + $0xa8] ss:$28 sps:$4 sm:$0xff]   ;;  %v1868_v33 = vld [vmem:[%s2111_s12 + $0xb0] ss:$28 sps:$4 sm:$0xff]   ;;  %v1872_v37 = vld [vmem:[%s2104_s26 + $0x178] sm:$0xff]  }
  0x57   : > { %v1869_v34 = vld [vmem:[%s2104_s26 + $0x170] sm:$0xff]   ;;  %v1870_v35 = vld [vmem:[%s2104_s26 + $0x1a8] sm:$0xff]   ;;  %v1874_v39 = vld [vmem:[%s2104_s26 + $0x138] sm:$0xff]  }
  0x58   : > { %1592 = vmatpush3.bf16.msra.mxu0 %v1818_v55  ;;  %v1871_v36 = vld [vmem:[%s2104_s26 + $0x130] sm:$0xff]   ;;  %v1878_v42 = vld [vmem:[%s2104_s26 + $0x1b8] sm:$0xff]   ;;  %v1881_v44 = vld [vmem:[%s2111_s12 + $0x4c] ss:$28 sps:$4 sm:$0xff]  }
  0x59   : > { %1632 = vmatpush3.bf16.msra.mxu1 %v1819_v56  ;;  %1593 = vmatprep.subr.bf16.mxu0 %v1820_v57  ;;  %v1873_v38 = vld [vmem:[%s2104_s26 + $0x1b0] sm:$0xff]   ;;  %v1887_v46 = vld [vmem:[%s2111_s12 + $0x88] ss:$28 sps:$4 sm:$0xff]   ;;  %v1888_v49 = vld [vmem:[%s2111_s12 + $0xc0] ss:$28 sps:$4 sm:$0xff]  }
  0x5a   : > { %1633 = vmatprep.subr.bf16.mxu1 %v1821_v58  ;;  %v1875_v40 = vld [vmem:[%s2111_s12 + $0x10] ss:$28 sps:$4 sm:$0xff]   ;;  %v1879_v43 = vld [vmem:[%s2111_s12 + $0x18] ss:$28 sps:$4 sm:$0xff]   ;;  %v1883_v47 = vld [vmem:[%s2111_s12 + $0x48] ss:$28 sps:$4 sm:$0xff]  }
  0x5b   : > { %v1877_v41 = vld [vmem:[%s2111_s12 + $0x14] ss:$28 sps:$4 sm:$0xff]   ;;  %v1884_v48 = vld [vmem:[%s2111_s12 + $0x84] ss:$28 sps:$4 sm:$0xff]   ;;  %v1889_v51 = vld [vmem:[%s2111_s12 + $0xbc] ss:$28 sps:$4 sm:$0xff]  }
  0x5c   : > { %1594 = vmatpush3.bf16.msra.mxu0 %v1822_v59  ;;  %v1880_v45 = vld [vmem:[%s2111_s12 + $0x50] ss:$28 sps:$4 sm:$0xff]   ;;  %v1886_v50 = vld [vmem:[%s2111_s12 + $0x80] ss:$28 sps:$4 sm:$0xff]   ;;  %v1891_v52 = vld [vmem:[%s2111_s12 + $0xb8] ss:$28 sps:$4 sm:$0xff]  }
  0x5d   : > { %1634 = vmatpush3.bf16.msra.mxu1 %v1823_v60  ;;  %1595 = vmatprep.subr.bf16.mxu0 %v1824_v61 }
  0x5e   : > { %1635 = vmatprep.subr.bf16.mxu1 %v1825_v62 }
  0x60   : > { %1596 = vmatpush3.bf16.msra.mxu0 %v1826_v63 }
  0x61   : > { %1636 = vmatpush3.bf16.msra.mxu1 %v1827_v0  ;;  %1661 = vmatprep.subr.bf16.mxu0 %v1834_v5 }
  0x62   : > { %1713 = vmatprep.subr.bf16.mxu1 %v1837_v8 }
  0x63   : > { %1030 = vmatmul.mubr.bf16.vlgmr.msra.gmra.mrb[0].mxu0 %v1828_v1 }
  0x64   : > { %1095 = vmatmul.mubr.bf16.vlgmr.msra.gmra.mrb[0].mxu1 %v1831_v3  ;;  %1662 = vmatpush3.bf16.msra.mxu0 %v1835_v6 }
  0x65   : > { %1663 = vmatprep.subr.bf16.mxu0 %v1836_v7  ;;  %1714 = vmatpush3.bf16.msra.mxu1 %v1837_v8 }
  0x66   : > { %1037 = vmatprep.mubr.bf16.mxu0 %v1839_v10  ;;  %1102 = vmatprep.mubr.bf16.mxu1 %v1841_v11 }
  0x67   : > { %1715 = vmatprep.subr.bf16.mxu1 %v1846_v15 }
  0x68   : > { %1664 = vmatpush3.bf16.msra.mxu0 %v1838_v9 }
  0x69   : > { %1665 = vmatprep.subr.bf16.mxu0 %v1845_v14  ;;  %1716 = vmatpush3.bf16.msra.mxu1 %v1846_v15 }
  0x6a   : > { %1717 = vmatprep.subr.bf16.mxu1 %v1849_v18 }
  0x6b   : > { %1038 = vmatmul.mubr.bf16.gmra.mrb[4].mxu0 %v1843_v12 }
  0x6c   : > { %1103 = vmatmul.mubr.bf16.gmra.mrb[4].mxu1 %v1844_v13  ;;  %1666 = vmatpush3.bf16.msra.mxu0 %v1847_v16 }
  0x6d   : > { %1667 = vmatprep.subr.bf16.mxu0 %v1848_v17  ;;  %1718 = vmatpush3.bf16.msra.mxu1 %v1849_v18 }
  0x6e   : > { %1045 = vmatprep.mubr.bf16.mxu0 %v1851_v20  ;;  %1110 = vmatprep.mubr.bf16.mxu1 %v1853_v21 }
  0x6f   : > { %1719 = vmatprep.subr.bf16.mxu1 %v1858_v25 }
  0x70   : > { %1668 = vmatpush3.bf16.msra.mxu0 %v1850_v19 }
  0x71   : > { %1669 = vmatprep.subr.bf16.mxu0 %v1857_v24  ;;  %1720 = vmatpush3.bf16.msra.mxu1 %v1858_v25 }
  0x72   : > { %1721 = vmatprep.subr.bf16.mxu1 %v1861_v28 }
  0x73   : > { %1046 = vmatmul.mubr.bf16.gmra.mrb[8].mxu0 %v1855_v22 }
  0x74   : > { %1111 = vmatmul.mubr.bf16.gmra.mrb[8].mxu1 %v1856_v23  ;;  %1670 = vmatpush3.bf16.msra.mxu0 %v1859_v26 }
  0x75   : > { %1671 = vmatprep.subr.bf16.mxu0 %v1860_v27  ;;  %1722 = vmatpush3.bf16.msra.mxu1 %v1861_v28 }
  0x76   : > { %1053 = vmatprep.mubr.bf16.mxu0 %v1863_v30  ;;  %1118 = vmatprep.mubr.bf16.mxu1 %v1865_v31 }
  0x77   : > { %1723 = vmatprep.subr.bf16.mxu1 %v1870_v35 }
  0x78   : > { %1672 = vmatpush3.bf16.msra.mxu0 %v1862_v29 }
  0x79   : > { %1673 = vmatprep.subr.bf16.mxu0 %v1869_v34  ;;  %1724 = vmatpush3.bf16.msra.mxu1 %v1870_v35 }
  0x7a   : > { %1725 = vmatprep.subr.bf16.mxu1 %v1873_v38 }
  0x7b   : > { %1054 = vmatmul.mubr.bf16.gmra.mrb[12].mxu0 %v1867_v32 }
  0x7c   : > { %1119 = vmatmul.mubr.bf16.gmra.mrb[12].mxu1 %v1868_v33  ;;  %1674 = vmatpush3.bf16.msra.mxu0 %v1871_v36 }
  0x7d   : > { %1675 = vmatprep.subr.bf16.mxu0 %v1872_v37  ;;  %1726 = vmatpush3.bf16.msra.mxu1 %v1873_v38 }
  0x7e   : > { %1159 = vmatprep.mubr.bf16.mxu0 %v1877_v41  ;;  %1727 = vmatprep.subr.bf16.mxu1 %v1878_v42 }
  0x7f   : > { %1729 = vmatprep.mubr.bf16.mxu1 %v1879_v43 }
  0x80   : > { %1676 = vmatpush3.bf16.msra.mxu0 %v1874_v39 }
  0x81   : > { %1728 = vmatpush3.bf16.msra.mxu1 %v1878_v42 }
  0x83   : > { %1160 = vmatmul.mubr.bf16.vlgmr.msra.gmra.mrb[16].mxu0 %v1875_v40 }
  0x84   : > { %1167 = vmatprep.mubr.bf16.mxu0 %v1881_v44  ;;  %1730 = vmatmul.mubr.bf16.vlgmr.msra.gmra.mrb[16].mxu1 %v1880_v45 }
  0x85   : > { %1733 = vmatprep.mubr.bf16.mxu1 %v1887_v46 }
  0x8b   : > { %1168 = vmatmul.mubr.bf16.gmra.mrb[20].mxu0 %v1883_v47 }
  0x8c   : > { %1175 = vmatprep.mubr.bf16.mxu0 %v1884_v48  ;;  %1734 = vmatmul.mubr.bf16.gmra.mrb[20].mxu1 %v1888_v49 }
  0x93   : > { %1176 = vmatmul.mubr.bf16.gmra.mrb[24].mxu0 %v1886_v50 }
  0x94   : > { %1183 = vmatprep.mubr.bf16.mxu0 %v1889_v51 }
  0x9b   : > { %1184 = vmatmul.mubr.bf16.gmra.mrb[28].mxu0 %v1891_v52 }
 0x136   : > { %v1597_v53 = vpop.f32.mrb[0].mxu0 }
 0x137   : > { %v1637_v54 = vpop.f32.mrb[0].mxu1  ;;  %v1598_v55 = vpop.f32.mrb[1].mxu0 }
 0x138   : > { %v1599_v56 = vadd.f32 %v1598_v55, %v1597_v53  ;;  %v1638_v57 = vpop.f32.mrb[1].mxu1  ;;  %v1600_v58 = vpop.f32.mrb[2].mxu0  ;;  %v365_v53 = vld [vmem:[#allocation2] sm:$0xff] }
 0x139   : > { %v1639_v59 = vadd.f32 %v1638_v57, %v1637_v54  ;;  %v1640_v60 = vpop.f32.mrb[2].mxu1  ;;  %v1601_v61 = vpop.f32.mrb[3].mxu0 }
 0x13a   : > { %v1602_v62 = vadd.f32 %v1601_v61, %v1600_v58  ;;  %v1641_v63 = vpop.f32.mrb[3].mxu1  ;;  %v366_v58 = vld [vmem:[#allocation2 + $0x8] sm:$0xff] }
 0x13b   : > { %v1097_v0 = vadd.f32 %v1639_v59, %v1599_v56  ;;  %v1642_v1 = vadd.f32 %v1641_v63, %v1640_v60 }
 0x13d   : > { %v1100_v2 = vadd.f32 %v1642_v1, %v1602_v62 }
 0x13e   : > { %v1603_v3 = vpop.f32.mrb[4].mxu0 }
 0x13f   : > { %v1643_v4 = vpop.f32.mrb[4].mxu1  ;;  %v1604_v5 = vpop.f32.mrb[5].mxu0 }
 0x140   : > { %v1605_v6 = vadd.f32 %v1604_v5, %v1603_v3  ;;  %v1644_v7 = vpop.f32.mrb[5].mxu1  ;;  %v1606_v8 = vpop.f32.mrb[6].mxu0 }
 0x141   : > { %v1645_v9 = vadd.f32 %v1644_v7, %v1643_v4  ;;  %v1646_v10 = vpop.f32.mrb[6].mxu1  ;;  %v1607_v11 = vpop.f32.mrb[7].mxu0 }
 0x142   : > { %v1608_v12 = vadd.f32 %v1607_v11, %v1606_v8  ;;  %v1647_v13 = vpop.f32.mrb[7].mxu1  ;;  %v367_v8 = vld [vmem:[#allocation2 + $0x10] sm:$0xff] }
 0x143   : > { %v1105_v14 = vadd.f32 %v1645_v9, %v1605_v6  ;;  %v1648_v15 = vadd.f32 %v1647_v13, %v1646_v10 }
 0x145   : > { %v1108_v16 = vadd.f32 %v1648_v15, %v1608_v12  ;;  %v368_v12 = vld [vmem:[#allocation2 + $0x18] sm:$0xff] }
 0x146   : > { %v1609_v17 = vpop.f32.mrb[8].mxu0 }
 0x147   : > { %v1649_v18 = vpop.f32.mrb[8].mxu1  ;;  %v1610_v19 = vpop.f32.mrb[9].mxu0 }
 0x148   : > { %v1650_v20 = vpop.f32.mrb[9].mxu1  ;;  %v1611_v21 = vadd.f32 %v1610_v19, %v1609_v17  ;;  %v1612_v23 = vpop.f32.mrb[10].mxu0 }
 0x149   : > { %v1651_v22 = vadd.f32 %v1650_v20, %v1649_v18  ;;  %v1652_v24 = vpop.f32.mrb[10].mxu1  ;;  %v1613_v25 = vpop.f32.mrb[11].mxu0 }
 0x14a   : > { %v1653_v26 = vpop.f32.mrb[11].mxu1  ;;  %v1614_v28 = vadd.f32 %v1613_v25, %v1612_v23  ;;  %v369_v25 = vld [vmem:[#allocation2 + $0x20] sm:$0xff] }
 0x14b   : > { %v2201_v27 = vadd.f32 %v1651_v22, %v1611_v21  ;;  %v1654_v29 = vadd.f32 %v1653_v26, %v1652_v24 }
 0x14d   : > { %v2203_v30 = vadd.f32 %v1654_v29, %v1614_v28  ;;  %v370_v28 = vld [vmem:[#allocation2 + $0x28] sm:$0xff] }
 0x14e   : > { %v1615_v31 = vpop.f32.mrb[12].mxu0 }
 0x14f   : > { %v1655_v32 = vpop.f32.mrb[12].mxu1  ;;  %v1616_v33 = vpop.f32.mrb[13].mxu0 }
 0x150   : > { %v1656_v34 = vpop.f32.mrb[13].mxu1  ;;  %v1617_v35 = vadd.f32 %v1616_v33, %v1615_v31  ;;  %v1618_v37 = vpop.f32.mrb[14].mxu0 }
 0x151   : > { %v1657_v36 = vadd.f32 %v1656_v34, %v1655_v32  ;;  %v1658_v38 = vpop.f32.mrb[14].mxu1  ;;  %v1619_v39 = vpop.f32.mrb[15].mxu0 }
 0x152   : > { %v1659_v40 = vpop.f32.mrb[15].mxu1  ;;  %v1620_v42 = vadd.f32 %v1619_v39, %v1618_v37  ;;  %v371_v39 = vld [vmem:[#allocation2 + $0x30] sm:$0xff] }
 0x153   : > { %v2205_v41 = vadd.f32 %v1657_v36, %v1617_v35  ;;  %v1660_v43 = vadd.f32 %v1659_v40, %v1658_v38 }
 0x155   : > { %v2207_v44 = vadd.f32 %v1660_v43, %v1620_v42  ;;  %v372_v42 = vld [vmem:[#allocation2 + $0x38] sm:$0xff] }
 0x156   : > { %v1677_v45 = vpop.f32.mrb[16].mxu0 }
 0x157   : > { %v1678_v46 = vpop.f32.mrb[17].mxu0  ;;  %v1731_v51 = vpop.f32.mrb[16].mxu1 }
 0x158   : > { %v1679_v47 = vadd.f32 %v1678_v46, %v1677_v45  ;;  %v1680_v48 = vpop.f32.mrb[18].mxu0  ;;  %v1226_v54 = vpop.f32.mrb[17].mxu1 }
 0x159   : > { %v1681_v49 = vpop.f32.mrb[19].mxu0  ;;  %v1732_v56 = vpop.f32.mrb[18].mxu1 }
 0x15a   : > { %v1682_v50 = vadd.f32 %v1681_v49, %v1680_v48  ;;  %v1162_v52 = vadd.f32 %v1679_v47, %v1097_v0  ;;  %v1229_v59 = vpop.f32.mrb[19].mxu1 }
 0x15c   : > { %v1227_v55 = vadd.f32 %v1226_v54, %v1162_v52  ;;  %v1165_v57 = vadd.f32 %v1682_v50, %v1100_v2 }
 0x15e   : > { %v1257_v60 = vadd.f32 %v1227_v55, %v365_v53  ;;  %v1230_v61 = vadd.f32 %v1229_v59, %v1165_v57  ;;  %v1683_v62 = vpop.f32.mrb[20].mxu0 }
 0x15f   : > { %v1684_v63 = vpop.f32.mrb[21].mxu0  ;;  %v1735_v7 = vpop.f32.mrb[20].mxu1 }
 0x160   : > { %1266 = vst.msk [vmem:[#allocation2] sm:$0xff] %vm1265_vm1, %v1257_v60  ;;  %v1258_v1 = vadd.f32 %v1230_v61, %v366_v58  ;;  %v1685_v3 = vadd.f32 %v1684_v63, %v1683_v62  ;;  %v1686_v4 = vpop.f32.mrb[22].mxu0  ;;  %v1242_v2 = vpop.f32.mrb[21].mxu1 }
 0x161   : > { %v1687_v5 = vpop.f32.mrb[23].mxu0  ;;  %v1736_v11 = vpop.f32.mrb[22].mxu1 }
 0x162   : > { %1267 = vst.msk [vmem:[#allocation2 + $0x8] sm:$0xff] %vm1265_vm1, %v1258_v1  ;;  %v1170_v0 = vadd.f32 %v1685_v3, %v1105_v14  ;;  %v1688_v6 = vadd.f32 %v1687_v5, %v1686_v4  ;;  %v1245_v13 = vpop.f32.mrb[23].mxu1 }
 0x164   : > { %v1235_v9 = vadd.f32 %v1731_v51, %v1170_v0  ;;  %v1173_v10 = vadd.f32 %v1688_v6, %v1108_v16 }
 0x166   : > { %v1259_v15 = vadd.f32 %v1235_v9, %v367_v8  ;;  %v1238_v17 = vadd.f32 %v1732_v56, %v1173_v10  ;;  %v1689_v18 = vpop.f32.mrb[24].mxu0 }
 0x167   : > { %v1690_v19 = vpop.f32.mrb[25].mxu0  ;;  %v1278_v47 = vld [vmem:[#allocation2] sm:$0xff] (!%p1562_p13) }
 0x168   : > { %1268 = vst.msk [vmem:[#allocation2 + $0x10] sm:$0xff] %vm1265_vm1, %v1259_v15  ;;  %v1260_v20 = vadd.f32 %v1238_v17, %v368_v12  ;;  %v1691_v21 = vadd.f32 %v1690_v19, %v1689_v18  ;;  %v1692_v22 = vpop.f32.mrb[26].mxu0  ;;  %v1573_v49 = vpack.c.bf16 (!%p1562_p13), %v1278_v47, %v1278_v47 }
 0x169   : > { %v1693_v23 = vpop.f32.mrb[27].mxu0 }
 0x16a   : > { %1269 = vst.msk [vmem:[#allocation2 + $0x18] sm:$0xff] %vm1265_vm1, %v1260_v20  ;;  %v1694_v14 = vadd.f32 %v1693_v23, %v1692_v22  ;;  %v1178_v24 = vadd.f32 %v1691_v21, %v2201_v27 }
 0x16b   : > { %1319 = vst.msk [vmem:[%s2109_s30] sm:$0xf] (!%p1562_p13), %vm1318_vm2, %v1573_v49 }
 0x16c   : > { %v1243_v16 = vadd.f32 %v1242_v2, %v1178_v24  ;;  %v1181_v26 = vadd.f32 %v1694_v14, %v2203_v30 }
 0x16e   : > { %v1261_v29 = vadd.f32 %v1243_v16, %v369_v25  ;;  %v1246_v31 = vadd.f32 %v1245_v13, %v1181_v26  ;;  %v1695_v32 = vpop.f32.mrb[28].mxu0 }
 0x16f   : > { %v1696_v33 = vpop.f32.mrb[29].mxu0  ;;  %v1280_v48 = vld [vmem:[#allocation2 + $0x10] sm:$0xff] (!%p1562_p13) }
 0x170   : > { %1270 = vst.msk [vmem:[#allocation2 + $0x20] sm:$0xff] %vm1265_vm1, %v1261_v29  ;;  %v1262_v34 = vadd.f32 %v1246_v31, %v370_v28  ;;  %v1697_v35 = vadd.f32 %v1696_v33, %v1695_v32  ;;  %v1698_v36 = vpop.f32.mrb[30].mxu0  ;;  %v1575_v50 = vpack.c.bf16 (!%p1562_p13), %v1280_v48, %v1280_v48 }
 0x171   : > { %v1699_v37 = vpop.f32.mrb[31].mxu0  ;;  %v1281_v51 = vld [vmem:[#allocation2 + $0x18] sm:$0xff] (!%p1562_p13) }
 0x172   : > { %1271 = vst.msk [vmem:[#allocation2 + $0x28] sm:$0xff] %vm1265_vm1, %v1262_v34  ;;  %v1186_v38 = vadd.f32 %v1697_v35, %v2205_v41  ;;  %v1700_v27 = vadd.f32 %v1699_v37, %v1698_v36  ;;  %v1279_v41 = vld [vmem:[#allocation2 + $0x8] sm:$0xff] (!%p1562_p13)  ;;  %v1576_v54 = vpack.c.bf16 (!%p1562_p13), %v1281_v51, %v1281_v51 }
 0x173   : > { %1321 = vst.msk [vmem:[%s2109_s30 + $0x8] sm:$0xf] (!%p1562_p13), %vm1318_vm2, %v1575_v50 }
 0x174   : > { %v1251_v40 = vadd.f32 %v1735_v7, %v1186_v38  ;;  %v1189_v30 = vadd.f32 %v1700_v27, %v2207_v44  ;;  %1277 = sbr.rel (%p1562_p13) target bundleno = 389 (0x185), region = 66  ;;  %v1574_v44 = vpack.c.bf16 (!%p1562_p13), %v1279_v41, %v1279_v41  ;;  %1322 = vst.msk [vmem:[%s2109_s30 + $0xc] sm:$0xf] (!%p1562_p13), %vm1318_vm2, %v1576_v54 }
 0x176   : > { %v1263_v43 = vadd.f32 %v1251_v40, %v371_v39  ;;  %v1254_v45 = vadd.f32 %v1736_v11, %v1189_v30  ;;  %1320 = vst.msk [vmem:[%s2109_s30 + $0x4] sm:$0xf] (!%p1562_p13), %vm1318_vm2, %v1574_v44 }
 0x177   : > { %v1282_v52 = vld [vmem:[#allocation2 + $0x20] sm:$0xff] (!%p1562_p13) }
 0x178   : > { %1272 = vst.msk [vmem:[#allocation2 + $0x30] sm:$0xff] %vm1265_vm1, %v1263_v43  ;;  %v1264_v46 = vadd.f32 %v1254_v45, %v372_v42  ;;  %v1577_v55 = vpack.c.bf16 (!%p1562_p13), %v1282_v52, %v1282_v52 }
 0x179   : > { %v1283_v53 = vld [vmem:[#allocation2 + $0x28] sm:$0xff] (!%p1562_p13) }
 0x17a   : > { %1273 = vst.msk [vmem:[#allocation2 + $0x38] sm:$0xff] %vm1265_vm1, %v1264_v46  ;;  %v1578_v56 = vpack.c.bf16 (!%p1562_p13), %v1283_v53, %v1283_v53 }
 0x17b   : > { %1323 = vst.msk [vmem:[%s2109_s30 + $0x10] sm:$0xf] %vm1318_vm2, %v1577_v55 }
 0x17c   : > { %1324 = vst.msk [vmem:[%s2109_s30 + $0x14] sm:$0xf] %vm1318_vm2, %v1578_v56 }
 0x17f   : > { %v1284_v57 = vld [vmem:[#allocation2 + $0x30] sm:$0xff] }
 0x180   : > { %v1579_v59 = vpack.c.bf16 %v1284_v57, %v1284_v57 }
 0x181   : > { %v1285_v58 = vld [vmem:[#allocation2 + $0x38] sm:$0xff] }
 0x182   : > { %v1580_v60 = vpack.c.bf16 %v1285_v58, %v1285_v58  ;;  %1325 = vst.msk [vmem:[%s2109_s30 + $0x18] sm:$0xf] %vm1318_vm2, %v1579_v59 }
 0x184   : > { %1326 = vst.msk [vmem:[%s2109_s30 + $0x1c] sm:$0xf] %vm1318_vm2, %v1580_v60 }
 0x185 PF: > { %s13_s18 = sadd.s32 1, %s1946_s18   ;;  %s2263_s12 = smov %s1926_s13 }
 0x186   : > { %p10_p0 = scmp.ge.s32.totalorder %s13_s18, 16   ;;  %s2264_s13 = smov %s2019_s25 }
 0x187   : > { %s2265_s14 = smov %s1938_s16  ;;  %s2266_s15 = smov %s1942_s17 }
 0x188   : > { %s2267_s16 = smov %s2270_s19  ;;  %s2268_s17 = smov %s2274_s20 }
 0x189   :  { %12 = sbr.rel (!%p10_p0) target bundleno = 4 (0x4), region = 113 }

// kernel: linearization_net.25
= control target key start
LH: loop header
LB: loop body
LE: loop exit
PB: predicated region body
PF: predicated region fallthrough
CT: control target
= control target key end

     0   :  { %s550_s12 = smov 0   ;;  %s552_s13 = smov 0   ;;  %s598_s0 = inlined_call_operand.vmem [shape: bf16[32,64], index: 0, kind: input, shape index: {}]   ;;  %s599_s1 = inlined_call_operand.vmem [shape: bf16[64,64], index: 1, kind: input, shape index: {}]   ;;  %s600_s2 = inlined_call_operand.vmem [shape: f32[1,64], index: 2, kind: input, shape index: {}]   ;;  %s601_s3 = inlined_call_operand.vmem [shape: bf16[32,64], index: 3, kind: output, shape index: {}]  }
   0x1   :  { %s554_s14 = smov 0  }
   0x2 LB: > { %s25_s15 = sadd.s32 1, %s522_s13  ;;  %p438_p0 = scmp.ge.s32.totalorder %s526_s14, 1  ;;  %s526_s14 = sphi %s554_s14, %s13_s14   ;;  %s522_s13 = sphi %s552_s13, %s603_s13   ;;  %s518_s12 = sphi %s550_s12, %s602_s12  }
   0x3   : > { %p27_p1 = scmp.ge.s32.totalorder %s25_s15, 2  ;;  %p169_p2 = scmp.lt.s32.totalorder %s526_s14, 3 }
   0x5   : > { %s605_s15 = smov (%p27_p1, %s25_s15), 0  ;;  %p170_p3 = pnand %p438_p0, %p169_p2 }
   0x6   : > { %v499_v0 = vld [vmem:[%s599_s1] sm:$0xff] (!%p170_p3)   ;;  %v528_v1 = vmov (!%p170_p3), 0.0   ;;  %v500_v2 = vld [vmem:[%s599_s1 + $0x8] sm:$0xff] (!%p170_p3)   ;;  %vm529_vm0 = vmmov (!%p170_p3), 0   ;;  %s439_s20 = sshll.u32 (!%p170_p3), %s518_s12, 1  ;;  %v501_v3 = vld [vmem:[%s599_s1 + $0x10] sm:$0xff] (!%p170_p3)  }
   0x7   : > { %173 = sbr.rel (%p170_p3) target bundleno = 244 (0xf4), region = 32  ;;  %461 = vmatprep.subr.bf16.mxu0 (!%p170_p3), %v528_v1  ;;  %469 = vmatprep.mubr.msk.bf16.mxu0 (!%p170_p3), %vm529_vm0, %v528_v1  ;;  %p204_p4 = scmp.lt.s32.totalorder (!%p170_p3), %s439_s20, 3  ;;  %v502_v4 = vld [vmem:[%s599_s1 + $0x18] sm:$0xff] (!%p170_p3)   ;;  %vm272_vm1 = vcmask (!%p170_p3), 523264   ;;  %v443_v6 = vld [vmem:[%s600_s2] ss:$0 sm:$0xff] (!%p170_p3) }
   0x8   : > { %462 = vmatpush3.bf16.msra.mxu0 (!%p170_p3), %v499_v0  ;;  %vm327_vm2 = vcmask (!%p170_p3), 519168  }
   0x9   : > { %463 = vmatprep.subr.bf16.mxu0 (!%p170_p3), %v528_v1 }
   0xc   : > { %464 = vmatpush3.bf16.msra.mxu0 (!%p170_p3), %v500_v2 }
   0xd   : > { %465 = vmatprep.subr.bf16.mxu0 (!%p170_p3), %v528_v1 }
   0xe   : > { %s607_s20 = smov (!%p204_p4, %s439_s20), 3 }
   0xf   : > { %s440_s23 = sshll.u32 %s607_s20, 2 }
  0x10   : > { %s207_s26 = scalar_lea.vmem %s598_s0, %s440_s23  ;;  %466 = vmatpush3.bf16.msra.mxu0 %v501_v3  ;;  %s223_s6 = scalar_lea.vmem %s601_s3, %s440_s23 }
  0x11   : > { %467 = vmatprep.subr.bf16.mxu0 %v528_v1  ;;  %v503_v5 = vld [vmem:[%s207_s26] sm:$0xff]  }
  0x14   : > { %468 = vmatpush3.bf16.msra.mxu0 %v502_v4 }
  0x17   : > { %470 = vmatmul.mubr.msk.bf16.vlgmr.msra.gmra.mrb[0].mxu0 %vm272_vm1, %v503_v5 }
  0xea   : > { %v310_v7 = vpop.f32.mrb[0].mxu0 }
  0xeb   : > { %v311_v8 = vadd.f32 %v443_v6, %v310_v7  ;;  %v471_v9 = vpop.f32.mrb[1].mxu0 }
  0xec   : > { %v313_v10 = vpop.f32.mrb[2].mxu0 }
  0xed   : > { %v317_v11 = vmax.f32 %v311_v8, 0.0  ;;  %v314_v12 = vadd.f32 %v443_v6, %v313_v10  ;;  %v472_v13 = vpop.f32.mrb[3].mxu0 }
  0xef   : > { %v454_v14 = vpack.c.bf16 %v317_v11, %v317_v11  ;;  %v318_v15 = vmax.f32 %v314_v12, 0.0 }
  0xf1   : > { %328 = vst.msk [vmem:[%s223_s6] sm:$0xf] %vm327_vm2, %v454_v14  ;;  %v455_v16 = vpack.c.bf16 %v318_v15, %v318_v15 }
  0xf3   : > { %329 = vst.msk [vmem:[%s223_s6 + $0x4] sm:$0xf] %vm327_vm2, %v455_v16 }
  0xf4 PF: > { %s13_s14 = sadd.s32 1, %s526_s14   ;;  %s602_s12 = smov %s522_s13 }
  0xf5   : > { %p10_p5 = scmp.ge.s32.totalorder %s13_s14, 4   ;;  %s603_s13 = smov %s605_s15 }
  0xf7   :  { %12 = sbr.rel (!%p10_p5) target bundleno = 2 (0x2), region = 68 }

// kernel: linearization_net.24
= control target key start
LH: loop header
LB: loop body
LE: loop exit
PB: predicated region body
PF: predicated region fallthrough
CT: control target
= control target key end

     0   :  { %s735_s12 = smov 0   ;;  %s737_s13 = smov 0   ;;  %s820_s0 = inlined_call_operand.vmem [shape: bf16[32,64], index: 0, kind: input, shape index: {}]   ;;  %s821_s1 = inlined_call_operand.vmem [shape: bf16[64,256], index: 1, kind: input, shape index: {}]   ;;  %s822_s2 = inlined_call_operand.vmem [shape: f32[1,256], index: 2, kind: input, shape index: {}]   ;;  %s823_s3 = inlined_call_operand.vmem [shape: bf16[32,256], index: 3, kind: output, shape index: {}]  }
   0x1   :  { %s739_s14 = smov 0   ;;  %s741_s15 = smov 0  }
   0x2   :  { %s743_s16 = smov 0  }
   0x3 LB: > { %s22_s17 = sadd.s32 1, %s709_s15  ;;  %s569_s18 = sadd.s32 4294967295, %s713_s16   ;;  %s713_s16 = sphi %s743_s16, %s13_s16   ;;  %s709_s15 = sphi %s741_s15, %s828_s15   ;;  %s705_s14 = sphi %s739_s14, %s827_s14   ;;  %s701_s13 = sphi %s737_s13, %s826_s13   ;;  %s697_s12 = sphi %s735_s12, %s825_s12  }
   0x4   : > { %p23_p0 = scmp.ge.s32.totalorder %s22_s17, 2  ;;  %p65_p1 = scmp.ne.s32.totalorder %s701_s13, %s697_s12 }
   0x5   : > { %p66_p2 = scmp.eq.s32.totalorder %s713_s16, 0  ;;  %p123_p4 = scmp.eq.s32.totalorder %s569_s18, 1 }
   0x6   : > { %s830_s17 = smov (%p23_p0, %s22_s17), 0  ;;  %s58_s20 = sadd.s32 1, %s701_s13 }
   0x7   : > { %p67_p3 = por %p66_p2, %p65_p1  ;;  %s55_s19 = ssub.s32 %s709_s15, %s830_s17 }
   0x8   : > { %p56_p5 = scmp.eq.s32.totalorder %s55_s19, 0  ;;  %p770_p6 = por %p123_p4, %p65_p1 }
   0x9   : > { %p573_p7 = scmp.ge.s32.totalorder %s713_s16, 2 }
   0xa   : > { %s775_s22 = scalar_select %p56_p5, %s701_s13, %s58_s20  }
   0xb   : > { %154 = sbr.rel (%p573_p7) target bundleno = 27 (0x1b), region = 20 }
  0x12   : > { %157 = sbr.rel (!%p67_p3) target bundleno = 27 (0x1b), region = 24  ;;  %s159_s23 = sand.u32 (%p67_p3), 1, %s701_s13  }
  0x13   : > { %s575_s24 = sshll.u32 (%p67_p3), %s709_s15, 2  ;;  %s574_s25 = sshll.u32 (%p67_p3), %s159_s23, 5 }
  0x14   : > { %s163_s28 = scalar_lea.vmem (%p67_p3), %s821_s1, %s575_s24  ;;  %s161_s29 = scalar_lea.vmem (%p67_p3), [#allocation2], %s574_s25 }
  0x15   : > { %v179_v0 = vld [vmem:[%s163_s28] sm:$0xf] (%p67_p3)  ;;  %v181_v1 = vld [vmem:[%s163_s28 + $0x8] sm:$0xf] (%p67_p3)  ;;  %v183_v2 = vld [vmem:[%s163_s28 + $0x10] sm:$0xf] (%p67_p3) }
  0x16   : > { %180 = vst [vmem:[%s161_s29] sm:$0xf] (%p67_p3), %v179_v0  ;;  %182 = vst [vmem:[%s161_s29 + $0x4] sm:$0xf] (%p67_p3), %v181_v1  ;;  %v185_v3 = vld [vmem:[%s163_s28 + $0x18] sm:$0xf] (%p67_p3) }
  0x17   : > { %v187_v4 = vld [vmem:[%s163_s28 + $0x20] sm:$0xf] (%p67_p3)  ;;  %184 = vst [vmem:[%s161_s29 + $0x8] sm:$0xf] (%p67_p3), %v183_v2  ;;  %186 = vst [vmem:[%s161_s29 + $0xc] sm:$0xf] (%p67_p3), %v185_v3 }
  0x18   : > { %188 = vst [vmem:[%s161_s29 + $0x10] sm:$0xf] (%p67_p3), %v187_v4  ;;  %v189_v5 = vld [vmem:[%s163_s28 + $0x28] sm:$0xf] (%p67_p3)  ;;  %v191_v6 = vld [vmem:[%s163_s28 + $0x30] sm:$0xf] (%p67_p3) }
  0x19   : > { %v193_v7 = vld [vmem:[%s163_s28 + $0x38] sm:$0xf]  ;;  %190 = vst [vmem:[%s161_s29 + $0x14] sm:$0xf] %v189_v5  ;;  %192 = vst [vmem:[%s161_s29 + $0x18] sm:$0xf] %v191_v6 }
  0x1a   : > { %194 = vst [vmem:[%s161_s29 + $0x1c] sm:$0xf] %v193_v7 }
  0x1b PF: > { %p576_p8 = scmp.ge.s32.totalorder %s713_s16, 1  ;;  %p238_p9 = scmp.lt.s32.totalorder %s713_s16, 3 }
  0x1d   : > { %p239_p10 = pnand %p576_p8, %p238_p9 }
  0x1e   : > { %s245_s30 = sand.u32 (!%p239_p10), 1, %s697_s12   ;;  %v673_v8 = vld [vmem:[%s820_s0] sm:$0xff] (!%p239_p10)   ;;  %vm339_vm0 = vcmask (!%p239_p10), 523264   ;;  %v674_v13 = vld [vmem:[%s820_s0 + $0x8] sm:$0xff] (!%p239_p10)   ;;  %p281_p11 = scmp.lt.s32.totalorder (!%p239_p10), %s705_s14, 1 }
  0x1f   : > { %242 = sbr.rel (%p239_p10) target bundleno = 279 (0x117), region = 69  ;;  %s577_s6 = sshll.u32 (!%p239_p10), %s245_s30, 5  ;;  %625 = vmatprep.mubr.msk.bf16.mxu0 (!%p239_p10), %vm339_vm0, %v673_v8 }
  0x20   : > { %s247_s7 = scalar_lea.vmem (!%p239_p10), [#allocation2], %s577_s6  ;;  %s578_s19 = sshll.u32 (!%p239_p10), %s245_s30, 4 }
  0x21   : > { %v669_v9 = vld [vmem:[%s247_s7] sm:$0xff] (!%p239_p10)   ;;  %v670_v10 = vld [vmem:[%s247_s7 + $0x8] sm:$0xff] (!%p239_p10)   ;;  %v671_v11 = vld [vmem:[%s247_s7 + $0x10] sm:$0xff] (!%p239_p10)   ;;  %s274_s20 = scalar_lea.vmem (!%p239_p10), [#allocation3], %s578_s19 }
  0x22   : > { %617 = vmatprep.subr.bf16.mxu0 (!%p239_p10), %v669_v9  ;;  %v672_v12 = vld [vmem:[%s247_s7 + $0x18] sm:$0xff] (!%p239_p10)  }
  0x23   : > { %618 = vmatpush3.bf16.msra.mxu0 (!%p239_p10), %v669_v9 }
  0x24   : > { %619 = vmatprep.subr.bf16.mxu0 (!%p239_p10), %v670_v10 }
  0x26   : > { %s282_s10 = scalar_select %p281_p11, %s705_s14, 1 }
  0x27   : > { %620 = vmatpush3.bf16.msra.mxu0 %v670_v10  ;;  %s593_s23 = sshll.u32 (%p770_p6), %s705_s14, 2 }
  0x28   : > { %621 = vmatprep.subr.bf16.mxu0 %v671_v11  ;;  %s283_s18 = scalar_lea.vmem %s822_s2, %s282_s10  ;;  %s426_s26 = scalar_lea.vmem (%p770_p6), %s823_s3, %s593_s23 }
  0x29   : > { %v579_v15 = vld [vmem:[%s283_s18] ss:$0 sm:$0xff] }
  0x2b   : > { %622 = vmatpush3.bf16.msra.mxu0 %v671_v11 }
  0x2c   : > { %623 = vmatprep.subr.bf16.mxu0 %v672_v12 }
  0x2f   : > { %624 = vmatpush3.bf16.msra.mxu0 %v672_v12 }
  0x32   : > { %626 = vmatmul.mubr.msk.bf16.vlgmr.msra.gmra.mrb[0].mxu0 %vm339_vm0, %v674_v13 }
 0x105   : > { %v627_v14 = vpop.f32.mrb[0].mxu0 }
 0x106   : > { %v380_v16 = vpop.f32.mrb[1].mxu0  ;;  %v389_v18 = vadd.f32 %v627_v14, %v579_v15 }
 0x107   : > { %v628_v17 = vpop.f32.mrb[2].mxu0  ;;  %v381_v21 = vadd.f32 %v579_v15, %v380_v16  ;;  %421 = sbr.rel (!%p770_p6) target bundleno = 279 (0x117), region = 77 }
 0x108   : > { %v392_v19 = vadd.f32 %v628_v17, %v579_v15  ;;  %v383_v20 = vpop.f32.mrb[3].mxu0 }
 0x109   : > { %v384_v22 = vadd.f32 %v579_v15, %v383_v20 }
 0x10a   : > { %v608_v23 = vpack.c.bf16 %v392_v19, %v389_v18 }
 0x10b   : > { %v603_v24 = vpack.c.bf16 %v384_v22, %v381_v21 }
 0x10c   : > { %610 = vst [vmem:[%s274_s20 + $0x8] sm:$0xff] %v608_v23  }
 0x10d   : > { %604 = vst [vmem:[%s274_s20] sm:$0xff] %v603_v24  }
 0x113   : > { %v446_v27 = vld [vmem:[%s274_s20 + $0x8] sm:$0xf]  ;;  %v448_v28 = vld [vmem:[%s274_s20 + $0xc] sm:$0xf] }
 0x114   : > { %v442_v25 = vld [vmem:[%s274_s20] sm:$0xf]  ;;  %v444_v26 = vld [vmem:[%s274_s20 + $0x4] sm:$0xf]  ;;  %447 = vst [vmem:[%s426_s26 + $0x10] sm:$0xf] %v446_v27 }
 0x115   : > { %443 = vst [vmem:[%s426_s26] sm:$0xf] %v442_v25  ;;  %445 = vst [vmem:[%s426_s26 + $0x8] sm:$0xf] %v444_v26 }
 0x116   : > { %449 = vst [vmem:[%s426_s26 + $0x18] sm:$0xf] %v448_v28 }
 0x117 PF: > { %s13_s16 = sadd.s32 1, %s713_s16   ;;  %s825_s12 = smov %s701_s13 }
 0x118   : > { %p10_p12 = scmp.ge.s32.totalorder %s13_s16, 4   ;;  %s826_s13 = smov %s775_s22 }
 0x119   : > { %s827_s14 = smov %s709_s15  ;;  %s828_s15 = smov %s830_s17 }
 0x11a   :  { %12 = sbr.rel (!%p10_p12) target bundleno = 3 (0x3), region = 155 }

// kernel: linearization_net.27
= control target key start
LH: loop header
LB: loop body
LE: loop exit
PB: predicated region body
PF: predicated region fallthrough
CT: control target
= control target key end

     0   :  { %s894_s15 = smov 0   ;;  %s896_s16 = smov 0   ;;  %s992_s0 = inlined_call_operand.vmem [shape: bf16[32,64], index: 0, kind: input, shape index: {}]   ;;  %s993_s1 = inlined_call_operand.vmem [shape: bf16[64,256], index: 1, kind: input, shape index: {}]   ;;  %s994_s2 = inlined_call_operand.vmem [shape: f32[1,256], index: 2, kind: input, shape index: {}]   ;;  %s995_s3 = inlined_call_operand.vmem [shape: bf16[32,256], index: 3, kind: input, shape index: {}]   ;;  %s996_s4 = inlined_call_operand.vmem [shape: bf16[32,256], index: 4, kind: output, shape index: {}]  }
   0x1   :  { %s898_s17 = smov 0   ;;  %s900_s18 = smov 0  }
   0x2   :  { %s902_s19 = smov 0  }
   0x3 LB: > { %s23_s20 = sadd.s32 1, %s863_s18  ;;  %s711_s21 = sadd.s32 4294967295, %s867_s19   ;;  %s867_s19 = sphi %s902_s19, %s14_s19   ;;  %s863_s18 = sphi %s900_s18, %s1002_s18   ;;  %s859_s17 = sphi %s898_s17, %s1001_s17   ;;  %s855_s16 = sphi %s896_s16, %s1000_s16   ;;  %s851_s15 = sphi %s894_s15, %s999_s15  }
   0x4   : > { %p24_p0 = scmp.ge.s32.totalorder %s23_s20, 2  ;;  %p66_p1 = scmp.ne.s32.totalorder %s855_s16, %s851_s15 }
   0x5   : > { %p67_p2 = scmp.eq.s32.totalorder %s867_s19, 0  ;;  %p152_p4 = scmp.eq.s32.totalorder %s711_s21, 1 }
   0x6   : > { %s1004_s20 = smov (%p24_p0, %s23_s20), 0  ;;  %s59_s24 = sadd.s32 1, %s855_s16 }
   0x7   : > { %p926_p3 = por %p67_p2, %p66_p1  ;;  %s56_s23 = ssub.s32 %s863_s18, %s1004_s20 }
   0x8   : > { %p57_p5 = scmp.eq.s32.totalorder %s56_s23, 0  ;;  %p933_p6 = por %p152_p4, %p66_p1 }
   0x9   : > { %p715_p7 = scmp.ge.s32.totalorder %s867_s19, 2 }
   0xa   : > { %s938_s26 = scalar_select %p57_p5, %s855_s16, %s59_s24  }
   0xb   : > { %183 = sbr.rel (%p715_p7) target bundleno = 34 (0x22), region = 20 }
  0x12   : > { %186 = sbr.rel (!%p926_p3) target bundleno = 27 (0x1b), region = 24  ;;  %s188_s27 = sand.u32 (%p926_p3), 1, %s855_s16  }
  0x13   : > { %s717_s28 = sshll.u32 (%p926_p3), %s863_s18, 2  ;;  %s716_s29 = sshll.u32 (%p926_p3), %s188_s27, 5 }
  0x14   : > { %s192_s6 = scalar_lea.vmem (%p926_p3), %s993_s1, %s717_s28  ;;  %s190_s7 = scalar_lea.vmem (%p926_p3), [#allocation2], %s716_s29 }
  0x15   : > { %v208_v0 = vld [vmem:[%s192_s6] sm:$0xf] (%p926_p3)  ;;  %v210_v1 = vld [vmem:[%s192_s6 + $0x8] sm:$0xf] (%p926_p3)  ;;  %v212_v2 = vld [vmem:[%s192_s6 + $0x10] sm:$0xf] (%p926_p3) }
  0x16   : > { %209 = vst [vmem:[%s190_s7] sm:$0xf] (%p926_p3), %v208_v0  ;;  %211 = vst [vmem:[%s190_s7 + $0x4] sm:$0xf] (%p926_p3), %v210_v1  ;;  %v214_v3 = vld [vmem:[%s192_s6 + $0x18] sm:$0xf] (%p926_p3) }
  0x17   : > { %v216_v4 = vld [vmem:[%s192_s6 + $0x20] sm:$0xf] (%p926_p3)  ;;  %213 = vst [vmem:[%s190_s7 + $0x8] sm:$0xf] (%p926_p3), %v212_v2  ;;  %215 = vst [vmem:[%s190_s7 + $0xc] sm:$0xf] (%p926_p3), %v214_v3 }
  0x18   : > { %217 = vst [vmem:[%s190_s7 + $0x10] sm:$0xf] (%p926_p3), %v216_v4  ;;  %v218_v5 = vld [vmem:[%s192_s6 + $0x28] sm:$0xf] (%p926_p3)  ;;  %v220_v6 = vld [vmem:[%s192_s6 + $0x30] sm:$0xf] (%p926_p3) }
  0x19   : > { %v222_v7 = vld [vmem:[%s192_s6 + $0x38] sm:$0xf]  ;;  %219 = vst [vmem:[%s190_s7 + $0x14] sm:$0xf] %v218_v5  ;;  %221 = vst [vmem:[%s190_s7 + $0x18] sm:$0xf] %v220_v6 }
  0x1a   : > { %223 = vst [vmem:[%s190_s7 + $0x1c] sm:$0xf] %v222_v7 }
  0x1b PF: > { %268 = sbr.rel (!%p926_p3) target bundleno = 34 (0x22), region = 69  ;;  %s270_s8 = sand.u32 (%p926_p3), 1, %s855_s16  }
  0x1c   : > { %s719_s9 = sshll.u32 (%p926_p3), %s863_s18, 2  ;;  %s718_s10 = sshll.u32 (%p926_p3), %s270_s8, 4 }
  0x1d   : > { %s277_s13 = scalar_lea.vmem (%p926_p3), %s995_s3, %s719_s9  ;;  %s272_s14 = scalar_lea.vmem (%p926_p3), [#allocation3], %s718_s10 }
  0x1e   : > { %v293_v8 = vld [vmem:[%s277_s13] sm:$0xf] (%p926_p3)  ;;  %v295_v9 = vld [vmem:[%s277_s13 + $0x8] sm:$0xf] (%p926_p3)  ;;  %v297_v10 = vld [vmem:[%s277_s13 + $0x10] sm:$0xf] (%p926_p3) }
  0x1f   : > { %294 = vst [vmem:[%s272_s14] sm:$0xf] (%p926_p3), %v293_v8  ;;  %296 = vst [vmem:[%s272_s14 + $0x4] sm:$0xf] (%p926_p3), %v295_v9  ;;  %v299_v11 = vld [vmem:[%s277_s13 + $0x18] sm:$0xf] (%p926_p3) }
  0x20   : > { %298 = vst [vmem:[%s272_s14 + $0x8] sm:$0xf] (%p926_p3), %v297_v10  ;;  %300 = vst [vmem:[%s272_s14 + $0xc] sm:$0xf] (%p926_p3), %v299_v11 }
  0x22 PF: > { %p720_p8 = scmp.ge.s32.totalorder %s867_s19, 1  ;;  %p330_p9 = scmp.lt.s32.totalorder %s867_s19, 3 }
  0x24   : > { %p331_p10 = pnand %p720_p8, %p330_p9 }
  0x25   : > { %s337_s21 = sand.u32 (!%p331_p10), 1, %s851_s15   ;;  %v827_v12 = vld [vmem:[%s992_s0] sm:$0xff] (!%p331_p10)   ;;  %vm445_vm0 = vcmask (!%p331_p10), 523264   ;;  %v828_v17 = vld [vmem:[%s992_s0 + $0x8] sm:$0xff] (!%p331_p10)   ;;  %p386_p11 = scmp.lt.s32.totalorder (!%p331_p10), %s859_s17, 1 }
  0x26   : > { %334 = sbr.rel (%p331_p10) target bundleno = 290 (0x122), region = 110  ;;  %s721_s24 = sshll.u32 (!%p331_p10), %s337_s21, 5  ;;  %779 = vmatprep.mubr.msk.bf16.mxu0 (!%p331_p10), %vm445_vm0, %v827_v12 }
  0x27   : > { %s339_s27 = scalar_lea.vmem (!%p331_p10), [#allocation2], %s721_s24  ;;  %s722_s29 = sshll.u32 (!%p331_p10), %s337_s21, 4 }
  0x28   : > { %v823_v13 = vld [vmem:[%s339_s27] sm:$0xff] (!%p331_p10)   ;;  %v824_v14 = vld [vmem:[%s339_s27 + $0x8] sm:$0xff] (!%p331_p10)   ;;  %v825_v15 = vld [vmem:[%s339_s27 + $0x10] sm:$0xff] (!%p331_p10)   ;;  %s346_s8 = scalar_lea.vmem (!%p331_p10), [#allocation3], %s722_s29  ;;  %s379_s9 = scalar_lea.vmem (!%p331_p10), [#allocation4], %s722_s29 }
  0x29   : > { %771 = vmatprep.subr.bf16.mxu0 (!%p331_p10), %v823_v13  ;;  %v826_v16 = vld [vmem:[%s339_s27 + $0x18] sm:$0xff] (!%p331_p10)   ;;  %v746_v19 = vld [vmem:[%s346_s8] sm:$0xff] (!%p331_p10)  }
  0x2a   : > { %772 = vmatpush3.bf16.msra.mxu0 (!%p331_p10), %v823_v13  ;;  %v763_v18 = vld [vmem:[%s346_s8 + $0x8] sm:$0xff] (!%p331_p10)   ;;  %v747_v23 = vunpack.c.l.bf16 (!%p331_p10), %v746_v19  ;;  %v748_v29 = vunpack.c.h.bf16 (!%p331_p10), %v746_v19 }
  0x2b   : > { %773 = vmatprep.subr.bf16.mxu0 (!%p331_p10), %v824_v14  ;;  %v751_v21 = vunpack.c.l.bf16 (!%p331_p10), %v763_v18  ;;  %v752_v26 = vunpack.c.h.bf16 (!%p331_p10), %v763_v18 }
  0x2d   : > { %s387_s30 = scalar_select %p386_p11, %s859_s17, 1 }
  0x2e   : > { %774 = vmatpush3.bf16.msra.mxu0 %v824_v14  ;;  %s738_s10 = sshll.u32 (%p933_p6), %s859_s17, 2 }
  0x2f   : > { %775 = vmatprep.subr.bf16.mxu0 %v825_v15  ;;  %s388_s7 = scalar_lea.vmem %s994_s2, %s387_s30  ;;  %s548_s13 = scalar_lea.vmem (%p933_p6), %s996_s4, %s738_s10 }
  0x30   : > { %v724_v20 = vld [vmem:[%s388_s7] ss:$0 sm:$0xff] }
  0x32   : > { %776 = vmatpush3.bf16.msra.mxu0 %v825_v15 }
  0x33   : > { %777 = vmatprep.subr.bf16.mxu0 %v826_v16 }
  0x36   : > { %778 = vmatpush3.bf16.msra.mxu0 %v826_v16 }
  0x39   : > { %780 = vmatmul.mubr.msk.bf16.vlgmr.msra.gmra.mrb[0].mxu0 %vm445_vm0, %v828_v17 }
 0x10c   : > { %v781_v22 = vpop.f32.mrb[0].mxu0 }
 0x10d   : > { %v495_v24 = vadd.f32 %v781_v22, %v724_v20  ;;  %v486_v25 = vpop.f32.mrb[1].mxu0 }
 0x10e   : > { %v487_v27 = vadd.f32 %v724_v20, %v486_v25  ;;  %v782_v28 = vpop.f32.mrb[2].mxu0 }
 0x10f   : > { %v511_v30 = vadd.f32 %v751_v21, %v495_v24  ;;  %v498_v31 = vadd.f32 %v782_v28, %v724_v20  ;;  %v489_v32 = vpop.f32.mrb[3].mxu0 }
 0x110   : > { %v509_v33 = vadd.f32 %v747_v23, %v487_v27  ;;  %v490_v34 = vadd.f32 %v724_v20, %v489_v32 }
 0x111   : > { %v512_v35 = vadd.f32 %v752_v26, %v498_v31  ;;  %v515_v37 = vmax.f32 %v511_v30, 0.0 }
 0x112   : > { %v510_v36 = vadd.f32 %v748_v29, %v490_v34  ;;  %v513_v39 = vmax.f32 %v509_v33, 0.0  ;;  %543 = sbr.rel (!%p933_p6) target bundleno = 290 (0x122), region = 122 }
 0x113   : > { %v516_v38 = vmax.f32 %v512_v35, 0.0 }
 0x114   : > { %v514_v40 = vmax.f32 %v510_v36, 0.0 }
 0x115   : > { %v761_v41 = vpack.c.bf16 %v516_v38, %v515_v37 }
 0x116   : > { %v756_v42 = vpack.c.bf16 %v514_v40, %v513_v39 }
 0x117   : > { %764 = vst [vmem:[%s379_s9 + $0x8] sm:$0xff] %v761_v41  }
 0x118   : > { %757 = vst [vmem:[%s379_s9] sm:$0xff] %v756_v42  }
 0x11e   : > { %v568_v45 = vld [vmem:[%s379_s9 + $0x8] sm:$0xf]  ;;  %v570_v46 = vld [vmem:[%s379_s9 + $0xc] sm:$0xf] }
 0x11f   : > { %v564_v43 = vld [vmem:[%s379_s9] sm:$0xf]  ;;  %v566_v44 = vld [vmem:[%s379_s9 + $0x4] sm:$0xf]  ;;  %569 = vst [vmem:[%s548_s13 + $0x10] sm:$0xf] %v568_v45 }
 0x120   : > { %565 = vst [vmem:[%s548_s13] sm:$0xf] %v564_v43  ;;  %567 = vst [vmem:[%s548_s13 + $0x8] sm:$0xf] %v566_v44 }
 0x121   : > { %571 = vst [vmem:[%s548_s13 + $0x18] sm:$0xf] %v570_v46 }
 0x122 PF: > { %s14_s19 = sadd.s32 1, %s867_s19   ;;  %s999_s15 = smov %s855_s16 }
 0x123   : > { %p11_p12 = scmp.ge.s32.totalorder %s14_s19, 4   ;;  %s1000_s16 = smov %s938_s26 }
 0x124   : > { %s1001_s17 = smov %s863_s18  ;;  %s1002_s18 = smov %s1004_s20 }
 0x125   :  { %13 = sbr.rel (!%p11_p12) target bundleno = 3 (0x3), region = 208 }

// kernel: linearization_net.26
= control target key start
LH: loop header
LB: loop body
LE: loop exit
PB: predicated region body
PF: predicated region fallthrough
CT: control target
= control target key end

     0   :  { %s1034_s12 = smov 0   ;;  %s1036_s13 = smov 0   ;;  %s1192_s0 = inlined_call_operand.vmem [shape: bf16[32,576], index: 0, kind: input, shape index: {}]   ;;  %s1193_s1 = inlined_call_operand.vmem [shape: bf16[576,64], index: 1, kind: input, shape index: {}]   ;;  %s1194_s2 = inlined_call_operand.vmem [shape: f32[1,64], index: 2, kind: input, shape index: {}]   ;;  %s1195_s3 = inlined_call_operand.vmem [shape: bf16[32,64], index: 3, kind: output, shape index: {}]  }
   0x1   :  { %s1038_s14 = smov 0  }
   0x2 LB: > { %s25_s15 = sadd.s32 1, %s1006_s13  ;;  %p803_p0 = scmp.ge.s32.totalorder %s1010_s14, 1  ;;  %s1010_s14 = sphi %s1038_s14, %s13_s14   ;;  %s1006_s13 = sphi %s1036_s13, %s1197_s13   ;;  %s1002_s12 = sphi %s1034_s12, %s1196_s12  }
   0x3   : > { %p27_p1 = scmp.ge.s32.totalorder %s25_s15, 2  ;;  %p170_p2 = scmp.lt.s32.totalorder %s1010_s14, 3 }
   0x5   : > { %s1199_s15 = smov (%p27_p1, %s25_s15), 0  ;;  %p171_p3 = pnand %p803_p0, %p170_p2 }
   0x6   : > { %v945_v0 = vld [vmem:[%s1193_s1 + $0x40] sm:$0xff] (!%p171_p3)   ;;  %v949_v4 = vld [vmem:[%s1193_s1 + $0x48] sm:$0xff] (!%p171_p3)   ;;  %v953_v8 = vld [vmem:[%s1193_s1 + $0x50] sm:$0xff] (!%p171_p3)   ;;  %s804_s21 = sshll.u32 (!%p171_p3), %s1002_s12, 1  ;;  %v1012_v33 = vmov (!%p171_p3), 0.0   ;;  %vm1013_vm0 = vmmov (!%p171_p3), 0  }
   0x7   : > { %174 = sbr.rel (%p171_p3) target bundleno = 276 (0x114), region = 32  ;;  %v946_v1 = vld [vmem:[%s1193_s1] sm:$0xff] (!%p171_p3)   ;;  %857 = vmatprep.subr.bf16.mxu0 (!%p171_p3), %v945_v0  ;;  %v950_v5 = vld [vmem:[%s1193_s1 + $0x8] sm:$0xff] (!%p171_p3)   ;;  %v954_v9 = vld [vmem:[%s1193_s1 + $0x10] sm:$0xff] (!%p171_p3)   ;;  %p206_p4 = scmp.lt.s32.totalorder (!%p171_p3), %s804_s21, 3  ;;  %vm555_vm1 = vcmask (!%p171_p3), 523264  }
   0x8   : > { %v947_v2 = vld [vmem:[%s1193_s1 + $0xc0] sm:$0xff] (!%p171_p3)   ;;  %858 = vmatpush3.bf16.msra.mxu0 (!%p171_p3), %v946_v1  ;;  %v951_v6 = vld [vmem:[%s1193_s1 + $0xc8] sm:$0xff] (!%p171_p3)   ;;  %v955_v10 = vld [vmem:[%s1193_s1 + $0xd0] sm:$0xff] (!%p171_p3)   ;;  %vm692_vm2 = vcmask (!%p171_p3), 519168  }
   0x9   : > { %v948_v3 = vld [vmem:[%s1193_s1 + $0x80] sm:$0xff] (!%p171_p3)   ;;  %879 = vmatprep.subr.bf16.mxu1 (!%p171_p3), %v947_v2  ;;  %859 = vmatprep.subr.bf16.mxu0 (!%p171_p3), %v949_v4  ;;  %v952_v7 = vld [vmem:[%s1193_s1 + $0x88] sm:$0xff] (!%p171_p3)   ;;  %v956_v11 = vld [vmem:[%s1193_s1 + $0x90] sm:$0xff] (!%p171_p3)  }
   0xa   : > { %880 = vmatpush3.bf16.msra.mxu1 (!%p171_p3), %v948_v3  ;;  %v957_v12 = vld [vmem:[%s1193_s1 + $0x58] sm:$0xff] (!%p171_p3)   ;;  %v961_v16 = vld [vmem:[%s1193_s1 + $0x60] sm:$0xff] (!%p171_p3)   ;;  %v965_v20 = vld [vmem:[%s1193_s1 + $0x68] sm:$0xff] (!%p171_p3)  }
   0xb   : > { %881 = vmatprep.subr.bf16.mxu1 (!%p171_p3), %v951_v6  ;;  %v958_v13 = vld [vmem:[%s1193_s1 + $0x18] sm:$0xff] (!%p171_p3)   ;;  %v962_v17 = vld [vmem:[%s1193_s1 + $0x20] sm:$0xff] (!%p171_p3)   ;;  %v966_v21 = vld [vmem:[%s1193_s1 + $0x28] sm:$0xff] (!%p171_p3)  }
   0xc   : > { %860 = vmatpush3.bf16.msra.mxu0 (!%p171_p3), %v950_v5  ;;  %v959_v14 = vld [vmem:[%s1193_s1 + $0xd8] sm:$0xff] (!%p171_p3)   ;;  %v963_v18 = vld [vmem:[%s1193_s1 + $0xe0] sm:$0xff] (!%p171_p3)   ;;  %v967_v22 = vld [vmem:[%s1193_s1 + $0xe8] sm:$0xff] (!%p171_p3)  }
   0xd   : > { %861 = vmatprep.subr.bf16.mxu0 (!%p171_p3), %v953_v8  ;;  %v960_v15 = vld [vmem:[%s1193_s1 + $0x98] sm:$0xff] (!%p171_p3)   ;;  %v964_v19 = vld [vmem:[%s1193_s1 + $0xa0] sm:$0xff] (!%p171_p3)   ;;  %v968_v23 = vld [vmem:[%s1193_s1 + $0xa8] sm:$0xff] (!%p171_p3)  }
   0xe   : > { %882 = vmatpush3.bf16.msra.mxu1 %v952_v7  ;;  %s1201_s21 = smov (!%p206_p4, %s804_s21), 3  ;;  %v969_v24 = vld [vmem:[%s1193_s1 + $0x70] sm:$0xff]   ;;  %v973_v28 = vld [vmem:[%s1193_s1 + $0x78] sm:$0xff]   ;;  %v983_v37 = vld [vmem:[%s1193_s1 + $0x100] sm:$0xff]  }
   0xf   : > { %883 = vmatprep.subr.bf16.mxu1 %v955_v10  ;;  %s918_s20 = smul.u32 20, %s1201_s21  ;;  %v970_v25 = vld [vmem:[%s1193_s1 + $0x30] sm:$0xff]   ;;  %v974_v29 = vld [vmem:[%s1193_s1 + $0x38] sm:$0xff]   ;;  %v984_v38 = vld [vmem:[%s1193_s1 + $0x108] sm:$0xff]   ;;  %s807_s26 = sshll.u32 %s1201_s21, 2 }
  0x10   : > { %862 = vmatpush3.bf16.msra.mxu0 %v954_v9  ;;  %v971_v26 = vld [vmem:[%s1193_s1 + $0xf0] sm:$0xff]   ;;  %v975_v30 = vld [vmem:[%s1193_s1 + $0xf8] sm:$0xff]   ;;  %v808_v43 = vld [vmem:[%s1194_s2] ss:$0 sm:$0xff]  ;;  %s226_s29 = scalar_lea.vmem %s1195_s3, %s807_s26 }
  0x11   : > { %863 = vmatprep.subr.bf16.mxu0 %v957_v12  ;;  %v972_v27 = vld [vmem:[%s1193_s1 + $0xb0] sm:$0xff]   ;;  %s1148_s4 = scalar_lea.vmem %s1192_s0, %s918_s20  ;;  %v979_v34 = vld [vmem:[%s1193_s1 + $0xb8] sm:$0xff]  }
  0x12   : > { %884 = vmatpush3.bf16.msra.mxu1 %v956_v11  ;;  %v976_v31 = vld [vmem:[%s1148_s4] ss:$20 sps:$4 sm:$0xff]   ;;  %v978_v32 = vld [vmem:[%s1148_s4 + $0x4] ss:$20 sps:$4 sm:$0xff]   ;;  %v980_v35 = vld [vmem:[%s1148_s4 + $0x8] ss:$20 sps:$4 sm:$0xff]  }
  0x13   : > { %885 = vmatprep.subr.bf16.mxu1 %v959_v14  ;;  %591 = vmatprep.mubr.bf16.mxu0 %v978_v32  ;;  %v982_v36 = vld [vmem:[%s1148_s4 + $0xc] ss:$20 sps:$4 sm:$0xff]   ;;  %v985_v39 = vld [vmem:[%s1193_s1 + $0x110] sm:$0xff]   ;;  %v986_v40 = vld [vmem:[%s1193_s1 + $0x118] sm:$0xff]  }
  0x14   : > { %864 = vmatpush3.bf16.msra.mxu0 %v958_v13  ;;  %632 = vmatprep.mubr.bf16.mxu1 %v982_v36  ;;  %v987_v41 = vld [vmem:[%s1148_s4 + $0x10] ss:$20 sps:$4 sm:$0xff]  }
  0x15   : > { %865 = vmatprep.subr.bf16.mxu0 %v961_v16 }
  0x16   : > { %886 = vmatpush3.bf16.msra.mxu1 %v960_v15 }
  0x17   : > { %887 = vmatprep.subr.bf16.mxu1 %v963_v18 }
  0x18   : > { %866 = vmatpush3.bf16.msra.mxu0 %v962_v17 }
  0x19   : > { %867 = vmatprep.subr.bf16.mxu0 %v965_v20 }
  0x1a   : > { %888 = vmatpush3.bf16.msra.mxu1 %v964_v19 }
  0x1b   : > { %889 = vmatprep.subr.bf16.mxu1 %v967_v22 }
  0x1c   : > { %868 = vmatpush3.bf16.msra.mxu0 %v966_v21 }
  0x1d   : > { %869 = vmatprep.subr.bf16.mxu0 %v969_v24 }
  0x1e   : > { %890 = vmatpush3.bf16.msra.mxu1 %v968_v23 }
  0x1f   : > { %891 = vmatprep.subr.bf16.mxu1 %v971_v26 }
  0x20   : > { %870 = vmatpush3.bf16.msra.mxu0 %v970_v25 }
  0x21   : > { %871 = vmatprep.subr.bf16.mxu0 %v973_v28 }
  0x22   : > { %892 = vmatpush3.bf16.msra.mxu1 %v972_v27 }
  0x23   : > { %893 = vmatprep.subr.bf16.mxu1 %v975_v30 }
  0x24   : > { %872 = vmatpush3.bf16.msra.mxu0 %v974_v29 }
  0x25   : > { %906 = vmatprep.subr.bf16.mxu0 %v1012_v33 }
  0x26   : > { %894 = vmatpush3.bf16.msra.mxu1 %v979_v34 }
  0x27   : > { %592 = vmatmul.mubr.bf16.vlgmr.msra.gmra.mrb[0].mxu0 %v976_v31 }
  0x28   : > { %914 = vmatprep.mubr.msk.bf16.mxu0 %vm1013_vm0, %v1012_v33  ;;  %907 = vmatpush3.bf16.msra.mxu0 %v983_v37 }
  0x29   : > { %633 = vmatmul.mubr.bf16.vlgmr.msra.gmra.mrb[0].mxu1 %v980_v35  ;;  %908 = vmatprep.subr.bf16.mxu0 %v1012_v33 }
  0x2c   : > { %909 = vmatpush3.bf16.msra.mxu0 %v984_v38 }
  0x2d   : > { %910 = vmatprep.subr.bf16.mxu0 %v1012_v33 }
  0x30   : > { %911 = vmatpush3.bf16.msra.mxu0 %v985_v39 }
  0x31   : > { %912 = vmatprep.subr.bf16.mxu0 %v1012_v33 }
  0x34   : > { %913 = vmatpush3.bf16.msra.mxu0 %v986_v40 }
  0x37   : > { %915 = vmatmul.mubr.msk.bf16.vlgmr.msra.gmra.mrb[4].mxu0 %vm555_vm1, %v987_v41 }
  0xfa   : > { %v873_v42 = vpop.f32.mrb[0].mxu0 }
  0xfb   : > { %v874_v44 = vpop.f32.mrb[1].mxu0 }
  0xfc   : > { %v875_v45 = vadd.f32 %v874_v44, %v873_v42  ;;  %v876_v46 = vpop.f32.mrb[2].mxu0  ;;  %v895_v47 = vpop.f32.mrb[0].mxu1 }
  0xfd   : > { %v877_v48 = vpop.f32.mrb[3].mxu0  ;;  %v896_v51 = vpop.f32.mrb[1].mxu1 }
  0xfe   : > { %v594_v49 = vadd.f32 %v875_v45, %v808_v43  ;;  %v878_v50 = vadd.f32 %v877_v48, %v876_v46  ;;  %v897_v52 = vadd.f32 %v896_v51, %v895_v47  ;;  %v898_v53 = vpop.f32.mrb[2].mxu1 }
  0xff   : > { %v899_v55 = vpop.f32.mrb[3].mxu1 }
 0x100   : > { %v597_v54 = vadd.f32 %v878_v50, %v808_v43  ;;  %v900_v56 = vadd.f32 %v899_v55, %v898_v53  ;;  %v635_v57 = vadd.f32 %v897_v52, %v594_v49 }
 0x102   : > { %v638_v58 = vadd.f32 %v900_v56, %v597_v54 }
 0x10a   : > { %v675_v59 = vpop.f32.mrb[4].mxu0 }
 0x10b   : > { %v676_v60 = vadd.f32 %v675_v59, %v635_v57  ;;  %v916_v61 = vpop.f32.mrb[5].mxu0 }
 0x10c   : > { %v678_v62 = vpop.f32.mrb[6].mxu0 }
 0x10d   : > { %v682_v63 = vmax.f32 %v676_v60, 0.0  ;;  %v679_v0 = vadd.f32 %v678_v62, %v638_v58  ;;  %v917_v1 = vpop.f32.mrb[7].mxu0 }
 0x10f   : > { %v855_v2 = vpack.c.bf16 %v682_v63, %v682_v63  ;;  %v683_v3 = vmax.f32 %v679_v0, 0.0 }
 0x111   : > { %693 = vst.msk [vmem:[%s226_s29] sm:$0xf] %vm692_vm2, %v855_v2  ;;  %v856_v4 = vpack.c.bf16 %v683_v3, %v683_v3 }
 0x113   : > { %694 = vst.msk [vmem:[%s226_s29 + $0x4] sm:$0xf] %vm692_vm2, %v856_v4 }
 0x114 PF: > { %s13_s14 = sadd.s32 1, %s1010_s14   ;;  %s1196_s12 = smov %s1006_s13 }
 0x115   : > { %p10_p5 = scmp.ge.s32.totalorder %s13_s14, 4   ;;  %s1197_s13 = smov %s1199_s15 }
 0x117   :  { %12 = sbr.rel (!%p10_p5) target bundleno = 2 (0x2), region = 68 }

// kernel: linearization_net.28
= control target key start
LH: loop header
LB: loop body
LE: loop exit
PB: predicated region body
PF: predicated region fallthrough
CT: control target
= control target key end

     0   :  { %s679_s12 = smov 0   ;;  %s681_s13 = smov 0   ;;  %s767_s0 = inlined_call_operand.vmem [shape: bf16[32,256], index: 0, kind: input, shape index: {}]   ;;  %s768_s1 = inlined_call_operand.vmem [shape: bf16[256,64], index: 1, kind: input, shape index: {}]   ;;  %s769_s2 = inlined_call_operand.vmem [shape: f32[1,64], index: 2, kind: input, shape index: {}]   ;;  %s770_s3 = inlined_call_operand.vmem [shape: bf16[32,64], index: 3, kind: output, shape index: {}]  }
   0x1   :  { %s683_s14 = smov 0  }
   0x2 LB: > { %s25_s15 = sadd.s32 1, %s653_s13  ;;  %p538_p0 = scmp.ge.s32.totalorder %s657_s14, 1  ;;  %s657_s14 = sphi %s683_s14, %s13_s14   ;;  %s653_s13 = sphi %s681_s13, %s772_s13   ;;  %s649_s12 = sphi %s679_s12, %s771_s12  }
   0x3   : > { %p27_p1 = scmp.ge.s32.totalorder %s25_s15, 2  ;;  %p170_p2 = scmp.lt.s32.totalorder %s657_s14, 3 }
   0x5   : > { %s774_s15 = smov (%p27_p1, %s25_s15), 0  ;;  %p171_p3 = pnand %p538_p0, %p170_p2 }
   0x6   : > { %v616_v0 = vld [vmem:[%s768_s1 + $0x40] sm:$0xff] (!%p171_p3)   ;;  %s539_s18 = sshll.u32 (!%p171_p3), %s649_s12, 1  ;;  %v618_v2 = vld [vmem:[%s768_s1 + $0x48] sm:$0xff] (!%p171_p3)   ;;  %v620_v4 = vld [vmem:[%s768_s1 + $0x50] sm:$0xff] (!%p171_p3)   ;;  %vm427_vm0 = vcmask (!%p171_p3), 519168  }
   0x7   : > { %174 = sbr.rel (%p171_p3) target bundleno = 263 (0x107), region = 32  ;;  %v617_v1 = vld [vmem:[%s768_s1] sm:$0xff] (!%p171_p3)   ;;  %570 = vmatprep.subr.bf16.mxu0 (!%p171_p3), %v616_v0  ;;  %v619_v3 = vld [vmem:[%s768_s1 + $0x8] sm:$0xff] (!%p171_p3)   ;;  %p206_p4 = scmp.lt.s32.totalorder (!%p171_p3), %s539_s18, 3  ;;  %v621_v5 = vld [vmem:[%s768_s1 + $0x10] sm:$0xff] (!%p171_p3)  }
   0x8   : > { %571 = vmatpush3.bf16.msra.mxu0 (!%p171_p3), %v617_v1  ;;  %v622_v6 = vld [vmem:[%s768_s1 + $0x58] sm:$0xff] (!%p171_p3)   ;;  %v624_v8 = vld [vmem:[%s768_s1 + $0x60] sm:$0xff] (!%p171_p3)   ;;  %v626_v10 = vld [vmem:[%s768_s1 + $0x68] sm:$0xff] (!%p171_p3)  }
   0x9   : > { %572 = vmatprep.subr.bf16.mxu0 (!%p171_p3), %v618_v2  ;;  %v623_v7 = vld [vmem:[%s768_s1 + $0x18] sm:$0xff] (!%p171_p3)   ;;  %v625_v9 = vld [vmem:[%s768_s1 + $0x20] sm:$0xff] (!%p171_p3)   ;;  %v627_v12 = vld [vmem:[%s768_s1 + $0x28] sm:$0xff] (!%p171_p3)  }
   0xa   : > { %v628_v13 = vld [vmem:[%s768_s1 + $0x70] sm:$0xff] (!%p171_p3)   ;;  %v630_v15 = vld [vmem:[%s768_s1 + $0x78] sm:$0xff] (!%p171_p3)   ;;  %v544_v19 = vld [vmem:[%s769_s2] ss:$0 sm:$0xff] (!%p171_p3) }
   0xb   : > { %v629_v14 = vld [vmem:[%s768_s1 + $0x30] sm:$0xff] (!%p171_p3)   ;;  %v631_v16 = vld [vmem:[%s768_s1 + $0x38] sm:$0xff] (!%p171_p3)  }
   0xc   : > { %573 = vmatpush3.bf16.msra.mxu0 (!%p171_p3), %v619_v3 }
   0xd   : > { %574 = vmatprep.subr.bf16.mxu0 (!%p171_p3), %v620_v4 }
   0xe   : > { %s776_s18 = smov (!%p206_p4, %s539_s18), 3 }
   0xf   : > { %s567_s6 = sshll.u32 %s776_s18, 3  ;;  %s543_s5 = sshll.u32 %s776_s18, 2 }
  0x10   : > { %575 = vmatpush3.bf16.msra.mxu0 %v621_v5  ;;  %s210_s11 = scalar_lea.vmem %s767_s0, %s567_s6  ;;  %s226_s8 = scalar_lea.vmem %s770_s3, %s543_s5 }
  0x11   : > { %576 = vmatprep.subr.bf16.mxu0 %v622_v6  ;;  %v634_v11 = vld [vmem:[%s210_s11 + $0x4] ss:$8 sps:$4 sm:$0xff]   ;;  %v632_v17 = vld [vmem:[%s210_s11] ss:$8 sps:$4 sm:$0xff]  }
  0x12   : > { %408 = vmatprep.mubr.bf16.mxu0 %v634_v11 }
  0x14   : > { %577 = vmatpush3.bf16.msra.mxu0 %v623_v7 }
  0x15   : > { %578 = vmatprep.subr.bf16.mxu0 %v624_v8 }
  0x18   : > { %579 = vmatpush3.bf16.msra.mxu0 %v625_v9 }
  0x19   : > { %580 = vmatprep.subr.bf16.mxu0 %v626_v10 }
  0x1c   : > { %581 = vmatpush3.bf16.msra.mxu0 %v627_v12 }
  0x1d   : > { %582 = vmatprep.subr.bf16.mxu0 %v628_v13 }
  0x20   : > { %583 = vmatpush3.bf16.msra.mxu0 %v629_v14 }
  0x21   : > { %584 = vmatprep.subr.bf16.mxu0 %v630_v15 }
  0x24   : > { %585 = vmatpush3.bf16.msra.mxu0 %v631_v16 }
  0x27   : > { %409 = vmatmul.mubr.bf16.vlgmr.msra.gmra.mrb[0].mxu0 %v632_v17 }
  0xfa   : > { %v586_v18 = vpop.f32.mrb[0].mxu0 }
  0xfb   : > { %v587_v20 = vpop.f32.mrb[1].mxu0 }
  0xfc   : > { %v588_v21 = vadd.f32 %v587_v20, %v586_v18  ;;  %v589_v22 = vpop.f32.mrb[2].mxu0 }
  0xfd   : > { %v590_v23 = vpop.f32.mrb[3].mxu0 }
  0xfe   : > { %v411_v24 = vadd.f32 %v588_v21, %v544_v19  ;;  %v591_v25 = vadd.f32 %v590_v23, %v589_v22 }
 0x100   : > { %v417_v26 = vmax.f32 %v411_v24, 0.0  ;;  %v414_v27 = vadd.f32 %v591_v25, %v544_v19 }
 0x102   : > { %v568_v28 = vpack.c.bf16 %v417_v26, %v417_v26  ;;  %v418_v29 = vmax.f32 %v414_v27, 0.0 }
 0x104   : > { %428 = vst.msk [vmem:[%s226_s8] sm:$0xf] %vm427_vm0, %v568_v28  ;;  %v569_v30 = vpack.c.bf16 %v418_v29, %v418_v29 }
 0x106   : > { %429 = vst.msk [vmem:[%s226_s8 + $0x4] sm:$0xf] %vm427_vm0, %v569_v30 }
 0x107 PF: > { %s13_s14 = sadd.s32 1, %s657_s14   ;;  %s771_s12 = smov %s653_s13 }
 0x108   : > { %p10_p5 = scmp.ge.s32.totalorder %s13_s14, 4   ;;  %s772_s13 = smov %s774_s15 }
 0x10a   :  { %12 = sbr.rel (!%p10_p5) target bundleno = 2 (0x2), region = 68 }

// kernel: linearization_net.30
= control target key start
LH: loop header
LB: loop body
LE: loop exit
PB: predicated region body
PF: predicated region fallthrough
CT: control target
= control target key end

     0   :  { %s1146_s15 = smov 0   ;;  %s1148_s16 = smov 0   ;;  %s1342_s0 = inlined_call_operand.vmem [shape: bf16[32,256], index: 0, kind: input, shape index: {}]   ;;  %s1343_s1 = inlined_call_operand.vmem [shape: bf16[256,256], index: 1, kind: input, shape index: {}]   ;;  %s1344_s2 = inlined_call_operand.vmem [shape: f32[1,256], index: 2, kind: input, shape index: {}]   ;;  %s1345_s3 = inlined_call_operand.vmem [shape: bf16[32,256], index: 3, kind: input, shape index: {}]   ;;  %s1346_s4 = inlined_call_operand.vmem [shape: bf16[32,256], index: 4, kind: output, shape index: {}]  }
   0x1   :  { %s1150_s17 = smov 0   ;;  %s1152_s18 = smov 0  }
   0x2   :  { %s1154_s19 = smov 0  }
   0x3 LB: > { %s23_s20 = sadd.s32 1, %s1115_s18  ;;  %s909_s21 = sadd.s32 4294967295, %s1119_s19   ;;  %s1119_s19 = sphi %s1154_s19, %s14_s19   ;;  %s1115_s18 = sphi %s1152_s18, %s1352_s18   ;;  %s1111_s17 = sphi %s1150_s17, %s1351_s17   ;;  %s1107_s16 = sphi %s1148_s16, %s1350_s16   ;;  %s1103_s15 = sphi %s1146_s15, %s1349_s15  }
   0x4   : > { %p24_p0 = scmp.ge.s32.totalorder %s23_s20, 2  ;;  %p66_p1 = scmp.ne.s32.totalorder %s1107_s16, %s1103_s15 }
   0x5   : > { %p67_p2 = scmp.eq.s32.totalorder %s1119_s19, 0  ;;  %p152_p4 = scmp.eq.s32.totalorder %s909_s21, 1 }
   0x6   : > { %s1354_s20 = smov (%p24_p0, %s23_s20), 0  ;;  %s59_s24 = sadd.s32 1, %s1107_s16 }
   0x7   : > { %p1178_p3 = por %p67_p2, %p66_p1  ;;  %s56_s23 = ssub.s32 %s1115_s18, %s1354_s20 }
   0x8   : > { %p57_p5 = scmp.eq.s32.totalorder %s56_s23, 0  ;;  %p1185_p6 = por %p152_p4, %p66_p1 }
   0x9   : > { %p913_p7 = scmp.ge.s32.totalorder %s1119_s19, 2 }
   0xa   : > { %s1190_s26 = scalar_select %p57_p5, %s1107_s16, %s59_s24  }
   0xb   : > { %184 = sbr.rel (%p913_p7) target bundleno = 50 (0x32), region = 20 }
  0x12   : > { %187 = sbr.rel (!%p1178_p3) target bundleno = 43 (0x2b), region = 24  ;;  %s189_s27 = sand.u32 (%p1178_p3), 1, %s1107_s16  }
  0x13   : > { %s915_s28 = sshll.u32 (%p1178_p3), %s1115_s18, 2  ;;  %s914_s29 = sshll.u32 (%p1178_p3), %s189_s27, 7 }
  0x14   : > { %s1200_s6 = scalar_lea.vmem (%p1178_p3), %s1343_s1, %s915_s28  ;;  %s1204_s7 = scalar_lea.vmem (%p1178_p3), [#allocation2], %s914_s29 }
  0x15   : > { %v209_v0 = vld [vmem:[%s1200_s6] sm:$0xf] (%p1178_p3)  ;;  %v211_v1 = vld [vmem:[%s1200_s6 + $0x8] sm:$0xf] (%p1178_p3)  ;;  %v213_v2 = vld [vmem:[%s1200_s6 + $0x10] sm:$0xf] (%p1178_p3) }
  0x16   : > { %210 = vst [vmem:[%s1204_s7] sm:$0xf] (%p1178_p3), %v209_v0  ;;  %212 = vst [vmem:[%s1204_s7 + $0x4] sm:$0xf] (%p1178_p3), %v211_v1  ;;  %v215_v3 = vld [vmem:[%s1200_s6 + $0x18] sm:$0xf] (%p1178_p3) }
  0x17   : > { %v217_v4 = vld [vmem:[%s1200_s6 + $0x20] sm:$0xf] (%p1178_p3)  ;;  %214 = vst [vmem:[%s1204_s7 + $0x8] sm:$0xf] (%p1178_p3), %v213_v2  ;;  %216 = vst [vmem:[%s1204_s7 + $0xc] sm:$0xf] (%p1178_p3), %v215_v3 }
  0x18   : > { %218 = vst [vmem:[%s1204_s7 + $0x10] sm:$0xf] (%p1178_p3), %v217_v4  ;;  %v219_v5 = vld [vmem:[%s1200_s6 + $0x28] sm:$0xf] (%p1178_p3)  ;;  %v221_v6 = vld [vmem:[%s1200_s6 + $0x30] sm:$0xf] (%p1178_p3) }
  0x19   : > { %v223_v7 = vld [vmem:[%s1200_s6 + $0x38] sm:$0xf]  ;;  %220 = vst [vmem:[%s1204_s7 + $0x14] sm:$0xf] %v219_v5  ;;  %222 = vst [vmem:[%s1204_s7 + $0x18] sm:$0xf] %v221_v6 }
  0x1a   : > { %224 = vst [vmem:[%s1204_s7 + $0x1c] sm:$0xf] %v223_v7  ;;  %v225_v8 = vld [vmem:[%s1200_s6 + $0x40] sm:$0xf]  ;;  %v227_v9 = vld [vmem:[%s1200_s6 + $0x48] sm:$0xf] }
  0x1b   : > { %v229_v10 = vld [vmem:[%s1200_s6 + $0x50] sm:$0xf]  ;;  %226 = vst [vmem:[%s1204_s7 + $0x20] sm:$0xf] %v225_v8  ;;  %228 = vst [vmem:[%s1204_s7 + $0x24] sm:$0xf] %v227_v9 }
  0x1c   : > { %230 = vst [vmem:[%s1204_s7 + $0x28] sm:$0xf] %v229_v10  ;;  %v231_v11 = vld [vmem:[%s1200_s6 + $0x58] sm:$0xf]  ;;  %v233_v12 = vld [vmem:[%s1200_s6 + $0x60] sm:$0xf] }
  0x1d   : > { %v235_v13 = vld [vmem:[%s1200_s6 + $0x68] sm:$0xf]  ;;  %232 = vst [vmem:[%s1204_s7 + $0x2c] sm:$0xf] %v231_v11  ;;  %234 = vst [vmem:[%s1204_s7 + $0x30] sm:$0xf] %v233_v12 }
  0x1e   : > { %236 = vst [vmem:[%s1204_s7 + $0x34] sm:$0xf] %v235_v13  ;;  %v237_v14 = vld [vmem:[%s1200_s6 + $0x70] sm:$0xf]  ;;  %v239_v15 = vld [vmem:[%s1200_s6 + $0x78] sm:$0xf] }
  0x1f   : > { %v241_v16 = vld [vmem:[%s1200_s6 + $0x80] sm:$0xf]  ;;  %238 = vst [vmem:[%s1204_s7 + $0x38] sm:$0xf] %v237_v14  ;;  %240 = vst [vmem:[%s1204_s7 + $0x3c] sm:$0xf] %v239_v15 }
  0x20   : > { %242 = vst [vmem:[%s1204_s7 + $0x40] sm:$0xf] %v241_v16  ;;  %v243_v17 = vld [vmem:[%s1200_s6 + $0x88] sm:$0xf]  ;;  %v245_v18 = vld [vmem:[%s1200_s6 + $0x90] sm:$0xf] }
  0x21   : > { %v247_v19 = vld [vmem:[%s1200_s6 + $0x98] sm:$0xf]  ;;  %244 = vst [vmem:[%s1204_s7 + $0x44] sm:$0xf] %v243_v17  ;;  %246 = vst [vmem:[%s1204_s7 + $0x48] sm:$0xf] %v245_v18 }
  0x22   : > { %248 = vst [vmem:[%s1204_s7 + $0x4c] sm:$0xf] %v247_v19  ;;  %v249_v20 = vld [vmem:[%s1200_s6 + $0xa0] sm:$0xf]  ;;  %v251_v21 = vld [vmem:[%s1200_s6 + $0xa8] sm:$0xf] }
  0x23   : > { %v253_v22 = vld [vmem:[%s1200_s6 + $0xb0] sm:$0xf]  ;;  %250 = vst [vmem:[%s1204_s7 + $0x50] sm:$0xf] %v249_v20  ;;  %252 = vst [vmem:[%s1204_s7 + $0x54] sm:$0xf] %v251_v21 }
  0x24   : > { %254 = vst [vmem:[%s1204_s7 + $0x58] sm:$0xf] %v253_v22  ;;  %v255_v23 = vld [vmem:[%s1200_s6 + $0xb8] sm:$0xf]  ;;  %v257_v24 = vld [vmem:[%s1200_s6 + $0xc0] sm:$0xf] }
  0x25   : > { %v259_v25 = vld [vmem:[%s1200_s6 + $0xc8] sm:$0xf]  ;;  %256 = vst [vmem:[%s1204_s7 + $0x5c] sm:$0xf] %v255_v23  ;;  %258 = vst [vmem:[%s1204_s7 + $0x60] sm:$0xf] %v257_v24 }
  0x26   : > { %260 = vst [vmem:[%s1204_s7 + $0x64] sm:$0xf] %v259_v25  ;;  %v261_v26 = vld [vmem:[%s1200_s6 + $0xd0] sm:$0xf]  ;;  %v263_v27 = vld [vmem:[%s1200_s6 + $0xd8] sm:$0xf] }
  0x27   : > { %v265_v28 = vld [vmem:[%s1200_s6 + $0xe0] sm:$0xf]  ;;  %262 = vst [vmem:[%s1204_s7 + $0x68] sm:$0xf] %v261_v26  ;;  %264 = vst [vmem:[%s1204_s7 + $0x6c] sm:$0xf] %v263_v27 }
  0x28   : > { %266 = vst [vmem:[%s1204_s7 + $0x70] sm:$0xf] %v265_v28  ;;  %v267_v29 = vld [vmem:[%s1200_s6 + $0xe8] sm:$0xf]  ;;  %v269_v30 = vld [vmem:[%s1200_s6 + $0xf0] sm:$0xf] }
  0x29   : > { %v271_v31 = vld [vmem:[%s1200_s6 + $0xf8] sm:$0xf]  ;;  %268 = vst [vmem:[%s1204_s7 + $0x74] sm:$0xf] %v267_v29  ;;  %270 = vst [vmem:[%s1204_s7 + $0x78] sm:$0xf] %v269_v30 }
  0x2a   : > { %272 = vst [vmem:[%s1204_s7 + $0x7c] sm:$0xf] %v271_v31 }
  0x2b PF: > { %365 = sbr.rel (!%p1178_p3) target bundleno = 50 (0x32), region = 69  ;;  %s367_s8 = sand.u32 (%p1178_p3), 1, %s1107_s16  }
  0x2c   : > { %s917_s9 = sshll.u32 (%p1178_p3), %s1115_s18, 2  ;;  %s916_s10 = sshll.u32 (%p1178_p3), %s367_s8, 4 }
  0x2d   : > { %s374_s13 = scalar_lea.vmem (%p1178_p3), %s1345_s3, %s917_s9  ;;  %s369_s14 = scalar_lea.vmem (%p1178_p3), [#allocation3], %s916_s10 }
  0x2e   : > { %v390_v32 = vld [vmem:[%s374_s13] sm:$0xf] (%p1178_p3)  ;;  %v392_v33 = vld [vmem:[%s374_s13 + $0x8] sm:$0xf] (%p1178_p3)  ;;  %v394_v34 = vld [vmem:[%s374_s13 + $0x10] sm:$0xf] (%p1178_p3) }
  0x2f   : > { %391 = vst [vmem:[%s369_s14] sm:$0xf] (%p1178_p3), %v390_v32  ;;  %393 = vst [vmem:[%s369_s14 + $0x4] sm:$0xf] (%p1178_p3), %v392_v33  ;;  %v396_v35 = vld [vmem:[%s374_s13 + $0x18] sm:$0xf] (%p1178_p3) }
  0x30   : > { %395 = vst [vmem:[%s369_s14 + $0x8] sm:$0xf] (%p1178_p3), %v394_v34  ;;  %397 = vst [vmem:[%s369_s14 + $0xc] sm:$0xf] (%p1178_p3), %v396_v35 }
  0x32 PF: > { %p918_p8 = scmp.ge.s32.totalorder %s1119_s19, 1  ;;  %p427_p9 = scmp.lt.s32.totalorder %s1119_s19, 3 }
  0x34   : > { %p428_p10 = pnand %p918_p8, %p427_p9 }
  0x35   : > { %s434_s21 = sand.u32 (!%p428_p10), 1, %s1103_s15   ;;  %v1077_v36 = vld [vmem:[%s1342_s0 + $0x4] ss:$8 sps:$4 sm:$0xff] (!%p428_p10)   ;;  %v1080_v37 = vld [vmem:[%s1342_s0 + $0x14] ss:$8 sps:$4 sm:$0xff] (!%p428_p10)   ;;  %p485_p11 = scmp.lt.s32.totalorder (!%p428_p10), %s1111_s17, 1 }
  0x36   : > { %431 = sbr.rel (%p428_p10) target bundleno = 324 (0x144), region = 110  ;;  %s919_s22 = sshll.u32 (!%p428_p10), %s434_s21, 7  ;;  %682 = vmatprep.mubr.bf16.mxu0 (!%p428_p10), %v1077_v36  ;;  %690 = vmatprep.mubr.bf16.mxu1 (!%p428_p10), %v1080_v37  ;;  %v1075_v54 = vld [vmem:[%s1342_s0] ss:$8 sps:$4 sm:$0xff] (!%p428_p10)   ;;  %v1078_v55 = vld [vmem:[%s1342_s0 + $0x10] ss:$8 sps:$4 sm:$0xff] (!%p428_p10)  }
  0x37   : > { %s1286_s29 = scalar_lea.vmem (!%p428_p10), [#allocation2], %s919_s22  ;;  %s1313_s8 = sshll.u32 (!%p428_p10), %s434_s21, 4 }
  0x38   : > { %v1059_v38 = vld [vmem:[%s1286_s29 + $0x40] sm:$0xff] (!%p428_p10)   ;;  %v1061_v40 = vld [vmem:[%s1286_s29 + $0x48] sm:$0xff] (!%p428_p10)   ;;  %v1063_v42 = vld [vmem:[%s1286_s29 + $0x50] sm:$0xff] (!%p428_p10)   ;;  %s443_s13 = scalar_lea.vmem (!%p428_p10), [#allocation3], %s1313_s8  ;;  %s477_s15 = scalar_lea.vmem (!%p428_p10), [#allocation4], %s1313_s8 }
  0x39   : > { %v1060_v39 = vld [vmem:[%s1286_s29] sm:$0xff] (!%p428_p10)   ;;  %975 = vmatprep.subr.bf16.mxu0 (!%p428_p10), %v1059_v38  ;;  %1003 = vmatprep.subr.bf16.mxu1 (!%p428_p10), %v1059_v38  ;;  %v1062_v41 = vld [vmem:[%s1286_s29 + $0x8] sm:$0xff] (!%p428_p10)   ;;  %v1064_v43 = vld [vmem:[%s1286_s29 + $0x10] sm:$0xff] (!%p428_p10)  }
  0x3a   : > { %976 = vmatpush3.bf16.msra.mxu0 (!%p428_p10), %v1060_v39  ;;  %1011 = vmatpush3.bf16.msra.mxu1 (!%p428_p10), %v1060_v39  ;;  %v1065_v44 = vld [vmem:[%s1286_s29 + $0x58] sm:$0xff] (!%p428_p10)   ;;  %v1067_v46 = vld [vmem:[%s1286_s29 + $0x60] sm:$0xff] (!%p428_p10)   ;;  %v1069_v48 = vld [vmem:[%s1286_s29 + $0x68] sm:$0xff] (!%p428_p10)  }
  0x3b   : > { %977 = vmatprep.subr.bf16.mxu0 (!%p428_p10), %v1061_v40  ;;  %1004 = vmatprep.subr.bf16.mxu1 (!%p428_p10), %v1061_v40  ;;  %v1066_v45 = vld [vmem:[%s1286_s29 + $0x18] sm:$0xff] (!%p428_p10)   ;;  %v1068_v47 = vld [vmem:[%s1286_s29 + $0x20] sm:$0xff] (!%p428_p10)   ;;  %v1070_v49 = vld [vmem:[%s1286_s29 + $0x28] sm:$0xff] (!%p428_p10)  }
  0x3c   : > { %v1071_v50 = vld [vmem:[%s1286_s29 + $0x70] sm:$0xff] (!%p428_p10)   ;;  %v1073_v52 = vld [vmem:[%s1286_s29 + $0x78] sm:$0xff] (!%p428_p10)  }
  0x3d   : > { %v1072_v51 = vld [vmem:[%s1286_s29 + $0x30] sm:$0xff]   ;;  %v1074_v53 = vld [vmem:[%s1286_s29 + $0x38] sm:$0xff]   ;;  %s486_s9 = scalar_select %p485_p11, %s1111_s17, 1 }
  0x3e   : > { %978 = vmatpush3.bf16.msra.mxu0 %v1062_v41  ;;  %1012 = vmatpush3.bf16.msra.mxu1 %v1062_v41  ;;  %v956_v56 = vld [vmem:[%s443_s13] sm:$0xff]   ;;  %v973_v57 = vld [vmem:[%s443_s13 + $0x8] sm:$0xff]   ;;  %s948_s14 = sshll.u32 (%p1185_p6), %s1111_s17, 2 }
  0x3f   : > { %979 = vmatprep.subr.bf16.mxu0 %v1063_v42  ;;  %1005 = vmatprep.subr.bf16.mxu1 %v1063_v42  ;;  %s487_s12 = scalar_lea.vmem %s1344_s2, %s486_s9  ;;  %v957_v0 = vunpack.c.l.bf16 %v956_v56  ;;  %v961_v2 = vunpack.c.l.bf16 %v973_v57  ;;  %v958_v6 = vunpack.c.h.bf16 %v956_v56  ;;  %v962_v8 = vunpack.c.h.bf16 %v973_v57  ;;  %s746_s23 = scalar_lea.vmem (%p1185_p6), %s1346_s4, %s948_s14 }
  0x40   : > { %v922_v60 = vld [vmem:[%s487_s12] ss:$0 sm:$0xff] }
  0x42   : > { %980 = vmatpush3.bf16.msra.mxu0 %v1064_v43  ;;  %1013 = vmatpush3.bf16.msra.mxu1 %v1064_v43 }
  0x43   : > { %981 = vmatprep.subr.bf16.mxu0 %v1065_v44  ;;  %1006 = vmatprep.subr.bf16.mxu1 %v1065_v44 }
  0x46   : > { %982 = vmatpush3.bf16.msra.mxu0 %v1066_v45  ;;  %1014 = vmatpush3.bf16.msra.mxu1 %v1066_v45 }
  0x47   : > { %983 = vmatprep.subr.bf16.mxu0 %v1067_v46  ;;  %1007 = vmatprep.subr.bf16.mxu1 %v1067_v46 }
  0x4a   : > { %984 = vmatpush3.bf16.msra.mxu0 %v1068_v47  ;;  %1015 = vmatpush3.bf16.msra.mxu1 %v1068_v47 }
  0x4b   : > { %985 = vmatprep.subr.bf16.mxu0 %v1069_v48  ;;  %1008 = vmatprep.subr.bf16.mxu1 %v1069_v48 }
  0x4e   : > { %986 = vmatpush3.bf16.msra.mxu0 %v1070_v49  ;;  %1016 = vmatpush3.bf16.msra.mxu1 %v1070_v49 }
  0x4f   : > { %987 = vmatprep.subr.bf16.mxu0 %v1071_v50  ;;  %1009 = vmatprep.subr.bf16.mxu1 %v1071_v50 }
  0x52   : > { %988 = vmatpush3.bf16.msra.mxu0 %v1072_v51  ;;  %1017 = vmatpush3.bf16.msra.mxu1 %v1072_v51 }
  0x53   : > { %989 = vmatprep.subr.bf16.mxu0 %v1073_v52  ;;  %1010 = vmatprep.subr.bf16.mxu1 %v1073_v52 }
  0x56   : > { %990 = vmatpush3.bf16.msra.mxu0 %v1074_v53  ;;  %1018 = vmatpush3.bf16.msra.mxu1 %v1074_v53 }
  0x59   : > { %683 = vmatmul.mubr.bf16.vlgmr.msra.gmra.mrb[0].mxu0 %v1075_v54  ;;  %691 = vmatmul.mubr.bf16.vlgmr.msra.gmra.mrb[0].mxu1 %v1078_v55 }
 0x12c   : > { %v991_v58 = vpop.f32.mrb[0].mxu0  ;;  %v997_v59 = vpop.f32.mrb[0].mxu1 }
 0x12d   : > { %v992_v61 = vpop.f32.mrb[1].mxu0  ;;  %v998_v62 = vpop.f32.mrb[1].mxu1 }
 0x12e   : > { %v993_v63 = vadd.f32 %v992_v61, %v991_v58  ;;  %v999_v1 = vadd.f32 %v998_v62, %v997_v59  ;;  %v994_v3 = vpop.f32.mrb[2].mxu0  ;;  %v1000_v4 = vpop.f32.mrb[2].mxu1 }
 0x12f   : > { %v995_v5 = vpop.f32.mrb[3].mxu0  ;;  %v1001_v7 = vpop.f32.mrb[3].mxu1 }
 0x130   : > { %v685_v9 = vadd.f32 %v993_v63, %v922_v60  ;;  %v693_v10 = vadd.f32 %v999_v1, %v922_v60  ;;  %v996_v11 = vadd.f32 %v995_v5, %v994_v3  ;;  %v1002_v12 = vadd.f32 %v1001_v7, %v1000_v4 }
 0x132   : > { %v707_v13 = vadd.f32 %v957_v0, %v685_v9  ;;  %v709_v14 = vadd.f32 %v961_v2, %v693_v10  ;;  %v688_v15 = vadd.f32 %v996_v11, %v922_v60  ;;  %v696_v16 = vadd.f32 %v1002_v12, %v922_v60 }
 0x134   : > { %v708_v17 = vadd.f32 %v958_v6, %v688_v15  ;;  %v710_v18 = vadd.f32 %v962_v8, %v696_v16  ;;  %v711_v19 = vmax.f32 %v707_v13, 0.0  ;;  %v713_v20 = vmax.f32 %v709_v14, 0.0  ;;  %741 = sbr.rel (!%p1185_p6) target bundleno = 324 (0x144), region = 122 }
 0x136   : > { %v712_v21 = vmax.f32 %v708_v17, 0.0  ;;  %v714_v22 = vmax.f32 %v710_v18, 0.0 }
 0x138   : > { %v966_v23 = vpack.c.bf16 %v712_v21, %v711_v19  ;;  %v971_v24 = vpack.c.bf16 %v714_v22, %v713_v20 }
 0x13a   : > { %967 = vst [vmem:[%s477_s15] sm:$0xff] %v966_v23   ;;  %974 = vst [vmem:[%s477_s15 + $0x8] sm:$0xff] %v971_v24  }
 0x141   : > { %v762_v25 = vld [vmem:[%s477_s15] sm:$0xf]  ;;  %v764_v26 = vld [vmem:[%s477_s15 + $0x4] sm:$0xf]  ;;  %v766_v27 = vld [vmem:[%s477_s15 + $0x8] sm:$0xf] }
 0x142   : > { %v768_v28 = vld [vmem:[%s477_s15 + $0xc] sm:$0xf]  ;;  %763 = vst [vmem:[%s746_s23] sm:$0xf] %v762_v25  ;;  %765 = vst [vmem:[%s746_s23 + $0x8] sm:$0xf] %v764_v26 }
 0x143   : > { %767 = vst [vmem:[%s746_s23 + $0x10] sm:$0xf] %v766_v27  ;;  %769 = vst [vmem:[%s746_s23 + $0x18] sm:$0xf] %v768_v28 }
 0x144 PF: > { %s14_s19 = sadd.s32 1, %s1119_s19   ;;  %s1349_s15 = smov %s1107_s16 }
 0x145   : > { %p11_p12 = scmp.ge.s32.totalorder %s14_s19, 4   ;;  %s1350_s16 = smov %s1190_s26 }
 0x146   : > { %s1351_s17 = smov %s1115_s18  ;;  %s1352_s18 = smov %s1354_s20 }
 0x147   :  { %13 = sbr.rel (!%p11_p12) target bundleno = 3 (0x3), region = 208 }

// kernel: linearization_net.29
= control target key start
LH: loop header
LB: loop body
LE: loop exit
PB: predicated region body
PF: predicated region fallthrough
CT: control target
= control target key end

     0   :  { %s1540_s12 = smov 0   ;;  %s1542_s13 = smov 0   ;;  %s1837_s0 = inlined_call_operand.vmem [shape: bf16[32,576], index: 0, kind: input, shape index: {}]   ;;  %s1838_s1 = inlined_call_operand.vmem [shape: bf16[576,256], index: 1, kind: input, shape index: {}]   ;;  %s1839_s2 = inlined_call_operand.vmem [shape: f32[1,256], index: 2, kind: input, shape index: {}]   ;;  %s1840_s3 = inlined_call_operand.vmem [shape: bf16[32,256], index: 3, kind: output, shape index: {}]  }
   0x1   :  { %s1544_s14 = smov 0   ;;  %s1546_s15 = smov 0  }
   0x2   :  { %s1548_s16 = smov 0  }
   0x3 LB: > { %s22_s17 = sadd.s32 1, %s1514_s15  ;;  %s1234_s18 = sadd.s32 4294967295, %s1518_s16   ;;  %s1518_s16 = sphi %s1548_s16, %s13_s16   ;;  %s1514_s15 = sphi %s1546_s15, %s1845_s15   ;;  %s1510_s14 = sphi %s1544_s14, %s1844_s14   ;;  %s1506_s13 = sphi %s1542_s13, %s1843_s13   ;;  %s1502_s12 = sphi %s1540_s12, %s1842_s12  }
   0x4   : > { %p23_p0 = scmp.ge.s32.totalorder %s22_s17, 2  ;;  %p65_p1 = scmp.ne.s32.totalorder %s1506_s13, %s1502_s12 }
   0x5   : > { %p66_p2 = scmp.eq.s32.totalorder %s1518_s16, 0  ;;  %p123_p4 = scmp.eq.s32.totalorder %s1234_s18, 1 }
   0x6   : > { %s1847_s17 = smov (%p23_p0, %s22_s17), 0  ;;  %s58_s20 = sadd.s32 1, %s1506_s13 }
   0x7   : > { %p67_p3 = por %p66_p2, %p65_p1  ;;  %s55_s19 = ssub.s32 %s1514_s15, %s1847_s17 }
   0x8   : > { %p56_p5 = scmp.eq.s32.totalorder %s55_s19, 0  ;;  %p1575_p6 = por %p123_p4, %p65_p1 }
   0x9   : > { %p1238_p7 = scmp.ge.s32.totalorder %s1518_s16, 2 }
   0xa   : > { %s1580_s22 = scalar_select %p56_p5, %s1506_s13, %s58_s20  }
   0xb   : > { %155 = sbr.rel (%p1238_p7) target bundleno = 70 (0x46), region = 20 }
  0x12   : > { %158 = sbr.rel (!%p67_p3) target bundleno = 70 (0x46), region = 24  ;;  %s160_s23 = sand.u32 (%p67_p3), 1, %s1506_s13  }
  0x13   : > { %s1239_s24 = sshll.u32 (%p67_p3), %s1514_s15, 2  ;;  %s1388_s25 = smul.u32 (%p67_p3), 288, %s160_s23 }
  0x14   : > { %s1588_s28 = scalar_lea.vmem (%p67_p3), %s1838_s1, %s1239_s24 }
  0x15   : > { %v180_v0 = vld [vmem:[%s1588_s28] sm:$0xf] (%p67_p3)  ;;  %v182_v1 = vld [vmem:[%s1588_s28 + $0x8] sm:$0xf] (%p67_p3)  ;;  %v184_v2 = vld [vmem:[%s1588_s28 + $0x10] sm:$0xf] (%p67_p3) }
  0x16   : > { %v186_v3 = vld [vmem:[%s1588_s28 + $0x18] sm:$0xf] (%p67_p3)  ;;  %v188_v4 = vld [vmem:[%s1588_s28 + $0x20] sm:$0xf] (%p67_p3)  ;;  %s1595_s29 = scalar_lea.vmem (%p67_p3), [#allocation2], %s1388_s25 }
  0x17   : > { %181 = vst [vmem:[%s1595_s29] sm:$0xf] (%p67_p3), %v180_v0  ;;  %183 = vst [vmem:[%s1595_s29 + $0x4] sm:$0xf] (%p67_p3), %v182_v1  ;;  %v190_v5 = vld [vmem:[%s1588_s28 + $0x28] sm:$0xf] (%p67_p3) }
  0x18   : > { %185 = vst [vmem:[%s1595_s29 + $0x8] sm:$0xf] (%p67_p3), %v184_v2  ;;  %187 = vst [vmem:[%s1595_s29 + $0xc] sm:$0xf] (%p67_p3), %v186_v3  ;;  %v192_v6 = vld [vmem:[%s1588_s28 + $0x30] sm:$0xf] (%p67_p3) }
  0x19   : > { %189 = vst [vmem:[%s1595_s29 + $0x10] sm:$0xf] %v188_v4  ;;  %v194_v7 = vld [vmem:[%s1588_s28 + $0x38] sm:$0xf]  ;;  %191 = vst [vmem:[%s1595_s29 + $0x14] sm:$0xf] %v190_v5 }
  0x1a   : > { %193 = vst [vmem:[%s1595_s29 + $0x18] sm:$0xf] %v192_v6  ;;  %195 = vst [vmem:[%s1595_s29 + $0x1c] sm:$0xf] %v194_v7  ;;  %v196_v8 = vld [vmem:[%s1588_s28 + $0x40] sm:$0xf] }
  0x1b   : > { %v198_v9 = vld [vmem:[%s1588_s28 + $0x48] sm:$0xf]  ;;  %v200_v10 = vld [vmem:[%s1588_s28 + $0x50] sm:$0xf]  ;;  %197 = vst [vmem:[%s1595_s29 + $0x20] sm:$0xf] %v196_v8 }
  0x1c   : > { %199 = vst [vmem:[%s1595_s29 + $0x24] sm:$0xf] %v198_v9  ;;  %201 = vst [vmem:[%s1595_s29 + $0x28] sm:$0xf] %v200_v10  ;;  %v202_v11 = vld [vmem:[%s1588_s28 + $0x58] sm:$0xf] }
  0x1d   : > { %v204_v12 = vld [vmem:[%s1588_s28 + $0x60] sm:$0xf]  ;;  %v206_v13 = vld [vmem:[%s1588_s28 + $0x68] sm:$0xf]  ;;  %203 = vst [vmem:[%s1595_s29 + $0x2c] sm:$0xf] %v202_v11 }
  0x1e   : > { %205 = vst [vmem:[%s1595_s29 + $0x30] sm:$0xf] %v204_v12  ;;  %207 = vst [vmem:[%s1595_s29 + $0x34] sm:$0xf] %v206_v13  ;;  %v208_v14 = vld [vmem:[%s1588_s28 + $0x70] sm:$0xf] }
  0x1f   : > { %v210_v15 = vld [vmem:[%s1588_s28 + $0x78] sm:$0xf]  ;;  %v212_v16 = vld [vmem:[%s1588_s28 + $0x80] sm:$0xf]  ;;  %209 = vst [vmem:[%s1595_s29 + $0x38] sm:$0xf] %v208_v14 }
  0x20   : > { %211 = vst [vmem:[%s1595_s29 + $0x3c] sm:$0xf] %v210_v15  ;;  %213 = vst [vmem:[%s1595_s29 + $0x40] sm:$0xf] %v212_v16  ;;  %v214_v17 = vld [vmem:[%s1588_s28 + $0x88] sm:$0xf] }
  0x21   : > { %v216_v18 = vld [vmem:[%s1588_s28 + $0x90] sm:$0xf]  ;;  %v218_v19 = vld [vmem:[%s1588_s28 + $0x98] sm:$0xf]  ;;  %215 = vst [vmem:[%s1595_s29 + $0x44] sm:$0xf] %v214_v17 }
  0x22   : > { %217 = vst [vmem:[%s1595_s29 + $0x48] sm:$0xf] %v216_v18  ;;  %219 = vst [vmem:[%s1595_s29 + $0x4c] sm:$0xf] %v218_v19  ;;  %v220_v20 = vld [vmem:[%s1588_s28 + $0xa0] sm:$0xf] }
  0x23   : > { %v222_v21 = vld [vmem:[%s1588_s28 + $0xa8] sm:$0xf]  ;;  %v224_v22 = vld [vmem:[%s1588_s28 + $0xb0] sm:$0xf]  ;;  %221 = vst [vmem:[%s1595_s29 + $0x50] sm:$0xf] %v220_v20 }
  0x24   : > { %223 = vst [vmem:[%s1595_s29 + $0x54] sm:$0xf] %v222_v21  ;;  %225 = vst [vmem:[%s1595_s29 + $0x58] sm:$0xf] %v224_v22  ;;  %v226_v23 = vld [vmem:[%s1588_s28 + $0xb8] sm:$0xf] }
  0x25   : > { %v228_v24 = vld [vmem:[%s1588_s28 + $0xc0] sm:$0xf]  ;;  %v230_v25 = vld [vmem:[%s1588_s28 + $0xc8] sm:$0xf]  ;;  %227 = vst [vmem:[%s1595_s29 + $0x5c] sm:$0xf] %v226_v23 }
  0x26   : > { %229 = vst [vmem:[%s1595_s29 + $0x60] sm:$0xf] %v228_v24  ;;  %231 = vst [vmem:[%s1595_s29 + $0x64] sm:$0xf] %v230_v25  ;;  %v232_v26 = vld [vmem:[%s1588_s28 + $0xd0] sm:$0xf] }
  0x27   : > { %v234_v27 = vld [vmem:[%s1588_s28 + $0xd8] sm:$0xf]  ;;  %v236_v28 = vld [vmem:[%s1588_s28 + $0xe0] sm:$0xf]  ;;  %233 = vst [vmem:[%s1595_s29 + $0x68] sm:$0xf] %v232_v26 }
  0x28   : > { %235 = vst [vmem:[%s1595_s29 + $0x6c] sm:$0xf] %v234_v27  ;;  %237 = vst [vmem:[%s1595_s29 + $0x70] sm:$0xf] %v236_v28  ;;  %v238_v29 = vld [vmem:[%s1588_s28 + $0xe8] sm:$0xf] }
  0x29   : > { %v240_v30 = vld [vmem:[%s1588_s28 + $0xf0] sm:$0xf]  ;;  %v242_v31 = vld [vmem:[%s1588_s28 + $0xf8] sm:$0xf]  ;;  %239 = vst [vmem:[%s1595_s29 + $0x74] sm:$0xf] %v238_v29 }
  0x2a   : > { %241 = vst [vmem:[%s1595_s29 + $0x78] sm:$0xf] %v240_v30  ;;  %243 = vst [vmem:[%s1595_s29 + $0x7c] sm:$0xf] %v242_v31  ;;  %v244_v32 = vld [vmem:[%s1588_s28 + $0x100] sm:$0xf] }
  0x2b   : > { %v246_v33 = vld [vmem:[%s1588_s28 + $0x108] sm:$0xf]  ;;  %v248_v34 = vld [vmem:[%s1588_s28 + $0x110] sm:$0xf]  ;;  %245 = vst [vmem:[%s1595_s29 + $0x80] sm:$0xf] %v244_v32 }
  0x2c   : > { %247 = vst [vmem:[%s1595_s29 + $0x84] sm:$0xf] %v246_v33  ;;  %249 = vst [vmem:[%s1595_s29 + $0x88] sm:$0xf] %v248_v34  ;;  %v250_v35 = vld [vmem:[%s1588_s28 + $0x118] sm:$0xf] }
  0x2d   : > { %v252_v36 = vld [vmem:[%s1588_s28 + $0x120] sm:$0xf]  ;;  %v254_v37 = vld [vmem:[%s1588_s28 + $0x128] sm:$0xf]  ;;  %251 = vst [vmem:[%s1595_s29 + $0x8c] sm:$0xf] %v250_v35 }
  0x2e   : > { %253 = vst [vmem:[%s1595_s29 + $0x90] sm:$0xf] %v252_v36  ;;  %255 = vst [vmem:[%s1595_s29 + $0x94] sm:$0xf] %v254_v37  ;;  %v256_v38 = vld [vmem:[%s1588_s28 + $0x130] sm:$0xf] }
  0x2f   : > { %v258_v39 = vld [vmem:[%s1588_s28 + $0x138] sm:$0xf]  ;;  %v260_v40 = vld [vmem:[%s1588_s28 + $0x140] sm:$0xf]  ;;  %257 = vst [vmem:[%s1595_s29 + $0x98] sm:$0xf] %v256_v38 }
  0x30   : > { %259 = vst [vmem:[%s1595_s29 + $0x9c] sm:$0xf] %v258_v39  ;;  %261 = vst [vmem:[%s1595_s29 + $0xa0] sm:$0xf] %v260_v40  ;;  %v262_v41 = vld [vmem:[%s1588_s28 + $0x148] sm:$0xf] }
  0x31   : > { %v264_v42 = vld [vmem:[%s1588_s28 + $0x150] sm:$0xf]  ;;  %v266_v43 = vld [vmem:[%s1588_s28 + $0x158] sm:$0xf]  ;;  %263 = vst [vmem:[%s1595_s29 + $0xa4] sm:$0xf] %v262_v41 }
  0x32   : > { %265 = vst [vmem:[%s1595_s29 + $0xa8] sm:$0xf] %v264_v42  ;;  %267 = vst [vmem:[%s1595_s29 + $0xac] sm:$0xf] %v266_v43  ;;  %v268_v44 = vld [vmem:[%s1588_s28 + $0x160] sm:$0xf] }
  0x33   : > { %v270_v45 = vld [vmem:[%s1588_s28 + $0x168] sm:$0xf]  ;;  %v272_v46 = vld [vmem:[%s1588_s28 + $0x170] sm:$0xf]  ;;  %269 = vst [vmem:[%s1595_s29 + $0xb0] sm:$0xf] %v268_v44 }
  0x34   : > { %271 = vst [vmem:[%s1595_s29 + $0xb4] sm:$0xf] %v270_v45  ;;  %273 = vst [vmem:[%s1595_s29 + $0xb8] sm:$0xf] %v272_v46  ;;  %v274_v47 = vld [vmem:[%s1588_s28 + $0x178] sm:$0xf] }
  0x35   : > { %v276_v48 = vld [vmem:[%s1588_s28 + $0x180] sm:$0xf]  ;;  %v278_v49 = vld [vmem:[%s1588_s28 + $0x188] sm:$0xf]  ;;  %275 = vst [vmem:[%s1595_s29 + $0xbc] sm:$0xf] %v274_v47 }
  0x36   : > { %277 = vst [vmem:[%s1595_s29 + $0xc0] sm:$0xf] %v276_v48  ;;  %279 = vst [vmem:[%s1595_s29 + $0xc4] sm:$0xf] %v278_v49  ;;  %v280_v50 = vld [vmem:[%s1588_s28 + $0x190] sm:$0xf] }
  0x37   : > { %v282_v51 = vld [vmem:[%s1588_s28 + $0x198] sm:$0xf]  ;;  %v284_v52 = vld [vmem:[%s1588_s28 + $0x1a0] sm:$0xf]  ;;  %281 = vst [vmem:[%s1595_s29 + $0xc8] sm:$0xf] %v280_v50 }
  0x38   : > { %283 = vst [vmem:[%s1595_s29 + $0xcc] sm:$0xf] %v282_v51  ;;  %285 = vst [vmem:[%s1595_s29 + $0xd0] sm:$0xf] %v284_v52  ;;  %v286_v53 = vld [vmem:[%s1588_s28 + $0x1a8] sm:$0xf] }
  0x39   : > { %v288_v54 = vld [vmem:[%s1588_s28 + $0x1b0] sm:$0xf]  ;;  %v290_v55 = vld [vmem:[%s1588_s28 + $0x1b8] sm:$0xf]  ;;  %287 = vst [vmem:[%s1595_s29 + $0xd4] sm:$0xf] %v286_v53 }
  0x3a   : > { %289 = vst [vmem:[%s1595_s29 + $0xd8] sm:$0xf] %v288_v54  ;;  %291 = vst [vmem:[%s1595_s29 + $0xdc] sm:$0xf] %v290_v55  ;;  %v292_v56 = vld [vmem:[%s1588_s28 + $0x1c0] sm:$0xf] }
  0x3b   : > { %v294_v57 = vld [vmem:[%s1588_s28 + $0x1c8] sm:$0xf]  ;;  %v296_v58 = vld [vmem:[%s1588_s28 + $0x1d0] sm:$0xf]  ;;  %293 = vst [vmem:[%s1595_s29 + $0xe0] sm:$0xf] %v292_v56 }
  0x3c   : > { %295 = vst [vmem:[%s1595_s29 + $0xe4] sm:$0xf] %v294_v57  ;;  %297 = vst [vmem:[%s1595_s29 + $0xe8] sm:$0xf] %v296_v58  ;;  %v298_v59 = vld [vmem:[%s1588_s28 + $0x1d8] sm:$0xf] }
  0x3d   : > { %v300_v60 = vld [vmem:[%s1588_s28 + $0x1e0] sm:$0xf]  ;;  %v302_v61 = vld [vmem:[%s1588_s28 + $0x1e8] sm:$0xf]  ;;  %299 = vst [vmem:[%s1595_s29 + $0xec] sm:$0xf] %v298_v59 }
  0x3e   : > { %301 = vst [vmem:[%s1595_s29 + $0xf0] sm:$0xf] %v300_v60  ;;  %303 = vst [vmem:[%s1595_s29 + $0xf4] sm:$0xf] %v302_v61  ;;  %v304_v62 = vld [vmem:[%s1588_s28 + $0x1f0] sm:$0xf] }
  0x3f   : > { %v306_v63 = vld [vmem:[%s1588_s28 + $0x1f8] sm:$0xf]  ;;  %v308_v0 = vld [vmem:[%s1588_s28 + $0x200] sm:$0xf]  ;;  %305 = vst [vmem:[%s1595_s29 + $0xf8] sm:$0xf] %v304_v62 }
  0x40   : > { %307 = vst [vmem:[%s1595_s29 + $0xfc] sm:$0xf] %v306_v63  ;;  %309 = vst [vmem:[%s1595_s29 + $0x100] sm:$0xf] %v308_v0  ;;  %v310_v1 = vld [vmem:[%s1588_s28 + $0x208] sm:$0xf] }
  0x41   : > { %v312_v2 = vld [vmem:[%s1588_s28 + $0x210] sm:$0xf]  ;;  %v314_v3 = vld [vmem:[%s1588_s28 + $0x218] sm:$0xf]  ;;  %311 = vst [vmem:[%s1595_s29 + $0x104] sm:$0xf] %v310_v1 }
  0x42   : > { %313 = vst [vmem:[%s1595_s29 + $0x108] sm:$0xf] %v312_v2  ;;  %315 = vst [vmem:[%s1595_s29 + $0x10c] sm:$0xf] %v314_v3  ;;  %v316_v4 = vld [vmem:[%s1588_s28 + $0x220] sm:$0xf] }
  0x43   : > { %v318_v5 = vld [vmem:[%s1588_s28 + $0x228] sm:$0xf]  ;;  %v320_v6 = vld [vmem:[%s1588_s28 + $0x230] sm:$0xf]  ;;  %317 = vst [vmem:[%s1595_s29 + $0x110] sm:$0xf] %v316_v4 }
  0x44   : > { %319 = vst [vmem:[%s1595_s29 + $0x114] sm:$0xf] %v318_v5  ;;  %321 = vst [vmem:[%s1595_s29 + $0x118] sm:$0xf] %v320_v6  ;;  %v322_v7 = vld [vmem:[%s1588_s28 + $0x238] sm:$0xf] }
  0x45   : > { %323 = vst [vmem:[%s1595_s29 + $0x11c] sm:$0xf] %v322_v7 }
  0x46 PF: > { %p1240_p8 = scmp.ge.s32.totalorder %s1518_s16, 1  ;;  %p495_p9 = scmp.lt.s32.totalorder %s1518_s16, 3 }
  0x48   : > { %p496_p10 = pnand %p1240_p8, %p495_p9 }
  0x49   : > { %s502_s30 = sand.u32 (!%p496_p10), 1, %s1502_s12   ;;  %v1463_v8 = vld [vmem:[%s1837_s0 + $0x4] ss:$20 sps:$4 sm:$0xff] (!%p496_p10)   ;;  %v1468_v9 = vld [vmem:[%s1837_s0 + $0xc] ss:$20 sps:$4 sm:$0xff] (!%p496_p10)   ;;  %vm902_vm0 = vcmask (!%p496_p10), 523264  }
  0x4a   : > { %499 = sbr.rel (%p496_p10) target bundleno = 358 (0x166), region = 69  ;;  %941 = vmatprep.mubr.bf16.mxu0 (!%p496_p10), %v1463_v8  ;;  %990 = vmatprep.mubr.bf16.mxu1 (!%p496_p10), %v1468_v9  ;;  %v1461_v39 = vld [vmem:[%s1837_s0] ss:$20 sps:$4 sm:$0xff] (!%p496_p10)   ;;  %v1466_v43 = vld [vmem:[%s1837_s0 + $0x8] ss:$20 sps:$4 sm:$0xff] (!%p496_p10)   ;;  %p540_p11 = scmp.lt.s32.totalorder (!%p496_p10), %s1510_s14, 1 }
  0x4b   : > { %s1389_s4 = smul.u32 (!%p496_p10), 288, %s502_s30  ;;  %v1470_v41 = vld [vmem:[%s1837_s0 + $0x2c] ss:$20 sps:$4 sm:$0xff] (!%p496_p10)   ;;  %v1474_v47 = vld [vmem:[%s1837_s0 + $0x34] ss:$20 sps:$4 sm:$0xff] (!%p496_p10)  }
  0x4c   : > { %v1472_v49 = vld [vmem:[%s1837_s0 + $0x28] ss:$20 sps:$4 sm:$0xff] (!%p496_p10)   ;;  %v1478_v50 = vld [vmem:[%s1837_s0 + $0x10] ss:$20 sps:$4 sm:$0xff] (!%p496_p10)   ;;  %v1479_v53 = vld [vmem:[%s1837_s0 + $0x38] ss:$20 sps:$4 sm:$0xff] (!%p496_p10)  }
  0x4d   : > { %s1747_s9 = scalar_lea.vmem (!%p496_p10), [#allocation2], %s1389_s4  ;;  %v1476_v51 = vld [vmem:[%s1837_s0 + $0x30] ss:$20 sps:$4 sm:$0xff] (!%p496_p10)  }
  0x4e   : > { %v1430_v10 = vld [vmem:[%s1747_s9 + $0x40] sm:$0xff] (!%p496_p10)   ;;  %v1434_v14 = vld [vmem:[%s1747_s9 + $0x48] sm:$0xff] (!%p496_p10)   ;;  %v1438_v18 = vld [vmem:[%s1747_s9 + $0x50] sm:$0xff] (!%p496_p10)  }
  0x4f   : > { %v1431_v11 = vld [vmem:[%s1747_s9] sm:$0xff] (!%p496_p10)   ;;  %1314 = vmatprep.subr.bf16.mxu0 (!%p496_p10), %v1430_v10  ;;  %v1435_v15 = vld [vmem:[%s1747_s9 + $0x8] sm:$0xff] (!%p496_p10)   ;;  %v1439_v19 = vld [vmem:[%s1747_s9 + $0x10] sm:$0xff] (!%p496_p10)  }
  0x50   : > { %v1432_v12 = vld [vmem:[%s1747_s9 + $0xc0] sm:$0xff] (!%p496_p10)   ;;  %1315 = vmatpush3.bf16.msra.mxu0 (!%p496_p10), %v1431_v11  ;;  %v1436_v16 = vld [vmem:[%s1747_s9 + $0xc8] sm:$0xff] (!%p496_p10)   ;;  %v1440_v20 = vld [vmem:[%s1747_s9 + $0xd0] sm:$0xff] (!%p496_p10)  }
  0x51   : > { %v1433_v13 = vld [vmem:[%s1747_s9 + $0x80] sm:$0xff]   ;;  %1342 = vmatprep.subr.bf16.mxu1 %v1432_v12  ;;  %1316 = vmatprep.subr.bf16.mxu0 %v1434_v14  ;;  %v1437_v17 = vld [vmem:[%s1747_s9 + $0x88] sm:$0xff]   ;;  %v1441_v21 = vld [vmem:[%s1747_s9 + $0x90] sm:$0xff]   ;;  %s541_s8 = scalar_select %p540_p11, %s1510_s14, 1 }
  0x52   : > { %1343 = vmatpush3.bf16.msra.mxu1 %v1433_v13  ;;  %v1442_v22 = vld [vmem:[%s1747_s9 + $0x58] sm:$0xff]   ;;  %v1446_v26 = vld [vmem:[%s1747_s9 + $0x60] sm:$0xff]   ;;  %v1450_v30 = vld [vmem:[%s1747_s9 + $0x68] sm:$0xff]   ;;  %s1296_s20 = sshll.u32 (%p1575_p6), %s1510_s14, 2 }
  0x53   : > { %1344 = vmatprep.subr.bf16.mxu1 %v1436_v16  ;;  %v1443_v23 = vld [vmem:[%s1747_s9 + $0x18] sm:$0xff]   ;;  %v1447_v27 = vld [vmem:[%s1747_s9 + $0x20] sm:$0xff]   ;;  %v1451_v31 = vld [vmem:[%s1747_s9 + $0x28] sm:$0xff]   ;;  %s542_s18 = scalar_lea.vmem %s1839_s2, %s541_s8  ;;  %s1091_s23 = scalar_lea.vmem (%p1575_p6), %s1840_s3, %s1296_s20 }
  0x54   : > { %1317 = vmatpush3.bf16.msra.mxu0 %v1435_v15  ;;  %v1444_v24 = vld [vmem:[%s1747_s9 + $0xd8] sm:$0xff]   ;;  %v1448_v28 = vld [vmem:[%s1747_s9 + $0xe0] sm:$0xff]   ;;  %v1452_v32 = vld [vmem:[%s1747_s9 + $0xe8] sm:$0xff]  }
  0x55   : > { %1318 = vmatprep.subr.bf16.mxu0 %v1438_v18  ;;  %v1445_v25 = vld [vmem:[%s1747_s9 + $0x98] sm:$0xff]   ;;  %v1449_v29 = vld [vmem:[%s1747_s9 + $0xa0] sm:$0xff]   ;;  %v1453_v33 = vld [vmem:[%s1747_s9 + $0xa8] sm:$0xff]  }
  0x56   : > { %1345 = vmatpush3.bf16.msra.mxu1 %v1437_v17  ;;  %v1454_v34 = vld [vmem:[%s1747_s9 + $0x70] sm:$0xff]   ;;  %v1458_v38 = vld [vmem:[%s1747_s9 + $0x78] sm:$0xff]   ;;  %v1465_v45 = vld [vmem:[%s1747_s9 + $0x100] sm:$0xff]  }
  0x57   : > { %1346 = vmatprep.subr.bf16.mxu1 %v1440_v20  ;;  %v1455_v35 = vld [vmem:[%s1747_s9 + $0x30] sm:$0xff]   ;;  %v1459_v40 = vld [vmem:[%s1747_s9 + $0x38] sm:$0xff]   ;;  %v1469_v46 = vld [vmem:[%s1747_s9 + $0x108] sm:$0xff]  }
  0x58   : > { %1319 = vmatpush3.bf16.msra.mxu0 %v1439_v19  ;;  %v1456_v36 = vld [vmem:[%s1747_s9 + $0xf0] sm:$0xff]   ;;  %v1460_v42 = vld [vmem:[%s1747_s9 + $0xf8] sm:$0xff]   ;;  %v1242_v55 = vld [vmem:[%s542_s18] ss:$0 sm:$0xff] }
  0x59   : > { %1320 = vmatprep.subr.bf16.mxu0 %v1442_v22  ;;  %v1457_v37 = vld [vmem:[%s1747_s9 + $0xb0] sm:$0xff]   ;;  %v1464_v44 = vld [vmem:[%s1747_s9 + $0xb8] sm:$0xff]  }
  0x5a   : > { %1347 = vmatpush3.bf16.msra.mxu1 %v1441_v21  ;;  %v1473_v48 = vld [vmem:[%s1747_s9 + $0x110] sm:$0xff]   ;;  %v1477_v52 = vld [vmem:[%s1747_s9 + $0x118] sm:$0xff]   ;;  %s1241_s9 = sshll.u32 %s502_s30, 4 }
  0x5b   : > { %1348 = vmatprep.subr.bf16.mxu1 %v1444_v24  ;;  %s532_s19 = scalar_lea.vmem [#allocation3], %s1241_s9 }
  0x5c   : > { %1321 = vmatpush3.bf16.msra.mxu0 %v1443_v23 }
  0x5d   : > { %1322 = vmatprep.subr.bf16.mxu0 %v1446_v26 }
  0x5e   : > { %1349 = vmatpush3.bf16.msra.mxu1 %v1445_v25 }
  0x5f   : > { %1350 = vmatprep.subr.bf16.mxu1 %v1448_v28 }
  0x60   : > { %1323 = vmatpush3.bf16.msra.mxu0 %v1447_v27 }
  0x61   : > { %1324 = vmatprep.subr.bf16.mxu0 %v1450_v30 }
  0x62   : > { %1351 = vmatpush3.bf16.msra.mxu1 %v1449_v29 }
  0x63   : > { %1352 = vmatprep.subr.bf16.mxu1 %v1452_v32 }
  0x64   : > { %1325 = vmatpush3.bf16.msra.mxu0 %v1451_v31 }
  0x65   : > { %1326 = vmatprep.subr.bf16.mxu0 %v1454_v34 }
  0x66   : > { %1353 = vmatpush3.bf16.msra.mxu1 %v1453_v33 }
  0x67   : > { %1354 = vmatprep.subr.bf16.mxu1 %v1456_v36 }
  0x68   : > { %1327 = vmatpush3.bf16.msra.mxu0 %v1455_v35 }
  0x69   : > { %1328 = vmatprep.subr.bf16.mxu0 %v1458_v38 }
  0x6a   : > { %1355 = vmatpush3.bf16.msra.mxu1 %v1457_v37 }
  0x6b   : > { %1356 = vmatprep.subr.bf16.mxu1 %v1460_v42 }
  0x6c   : > { %1329 = vmatpush3.bf16.msra.mxu0 %v1459_v40 }
  0x6d   : > { %1376 = vmatprep.subr.bf16.mxu0 %v1465_v45 }
  0x6e   : > { %1357 = vmatpush3.bf16.msra.mxu1 %v1464_v44 }
  0x6f   : > { %942 = vmatmul.mubr.bf16.vlgmr.msra.gmra.mrb[0].mxu0 %v1461_v39 }
  0x70   : > { %1377 = vmatpush3.bf16.msra.mxu0 %v1465_v45  ;;  %949 = vmatprep.mubr.bf16.mxu0 %v1470_v41 }
  0x71   : > { %991 = vmatmul.mubr.bf16.vlgmr.msra.gmra.mrb[0].mxu1 %v1466_v43  ;;  %1378 = vmatprep.subr.bf16.mxu0 %v1469_v46 }
  0x72   : > { %998 = vmatprep.mubr.bf16.mxu1 %v1474_v47 }
  0x74   : > { %1379 = vmatpush3.bf16.msra.mxu0 %v1469_v46 }
  0x75   : > { %1380 = vmatprep.subr.bf16.mxu0 %v1473_v48 }
  0x77   : > { %950 = vmatmul.mubr.bf16.gmra.mrb[4].mxu0 %v1472_v49 }
  0x78   : > { %1381 = vmatpush3.bf16.msra.mxu0 %v1473_v48  ;;  %1384 = vmatprep.mubr.msk.bf16.mxu0 %vm902_vm0, %v1478_v50 }
  0x79   : > { %999 = vmatmul.mubr.bf16.gmra.mrb[4].mxu1 %v1476_v51  ;;  %1382 = vmatprep.subr.bf16.mxu0 %v1477_v52 }
  0x7c   : > { %1383 = vmatpush3.bf16.msra.mxu0 %v1477_v52 }
  0x7f   : > { %1385 = vmatmul.mubr.msk.bf16.vlgmr.msra.gmra.mrb[8].mxu0 %vm902_vm0, %v1479_v53 }
 0x142   : > { %v1330_v54 = vpop.f32.mrb[0].mxu0 }
 0x143   : > { %v1331_v56 = vpop.f32.mrb[1].mxu0 }
 0x144   : > { %v1332_v57 = vadd.f32 %v1331_v56, %v1330_v54  ;;  %v1333_v58 = vpop.f32.mrb[2].mxu0  ;;  %v1358_v59 = vpop.f32.mrb[0].mxu1 }
 0x145   : > { %v1334_v60 = vpop.f32.mrb[3].mxu0  ;;  %v1359_v61 = vpop.f32.mrb[1].mxu1 }
 0x146   : > { %v944_v62 = vadd.f32 %v1332_v57, %v1242_v55  ;;  %v1335_v63 = vadd.f32 %v1334_v60, %v1333_v58  ;;  %v1360_v0 = vadd.f32 %v1359_v61, %v1358_v59  ;;  %v1361_v1 = vpop.f32.mrb[2].mxu1 }
 0x147   : > { %v1362_v2 = vpop.f32.mrb[3].mxu1 }
 0x148   : > { %v947_v3 = vadd.f32 %v1335_v63, %v1242_v55  ;;  %v1363_v4 = vadd.f32 %v1362_v2, %v1361_v1  ;;  %v993_v5 = vadd.f32 %v1360_v0, %v944_v62 }
 0x14a   : > { %v1336_v6 = vpop.f32.mrb[4].mxu0  ;;  %v996_v7 = vadd.f32 %v1363_v4, %v947_v3 }
 0x14b   : > { %v1337_v8 = vpop.f32.mrb[5].mxu0 }
 0x14c   : > { %v1338_v9 = vadd.f32 %v1337_v8, %v1336_v6  ;;  %v1339_v10 = vpop.f32.mrb[6].mxu0  ;;  %v1364_v11 = vpop.f32.mrb[4].mxu1 }
 0x14d   : > { %v1340_v12 = vpop.f32.mrb[7].mxu0  ;;  %v1365_v13 = vpop.f32.mrb[5].mxu1 }
 0x14e   : > { %v952_v14 = vadd.f32 %v1338_v9, %v1242_v55  ;;  %v1341_v15 = vadd.f32 %v1340_v12, %v1339_v10  ;;  %v1366_v16 = vadd.f32 %v1365_v13, %v1364_v11  ;;  %v1367_v17 = vpop.f32.mrb[6].mxu1 }
 0x14f   : > { %v1368_v18 = vpop.f32.mrb[7].mxu1 }
 0x150   : > { %v955_v19 = vadd.f32 %v1341_v15, %v1242_v55  ;;  %v1369_v20 = vadd.f32 %v1368_v18, %v1367_v17  ;;  %v1001_v21 = vadd.f32 %v1366_v16, %v952_v14 }
 0x152   : > { %v1386_v22 = vpop.f32.mrb[8].mxu0  ;;  %v1004_v23 = vadd.f32 %v1369_v20, %v955_v19 }
 0x153   : > { %v1050_v24 = vadd.f32 %v1386_v22, %v1001_v21  ;;  %v1041_v25 = vpop.f32.mrb[9].mxu0 }
 0x154   : > { %v1042_v26 = vadd.f32 %v1041_v25, %v993_v5  ;;  %v1387_v27 = vpop.f32.mrb[10].mxu0 }
 0x155   : > { %v1053_v28 = vadd.f32 %v1387_v27, %v1004_v23  ;;  %v1044_v29 = vpop.f32.mrb[11].mxu0  ;;  %v1058_v31 = vmax.f32 %v1050_v24, 0.0 }
 0x156   : > { %v1045_v30 = vadd.f32 %v1044_v29, %v996_v7  ;;  %v1056_v33 = vmax.f32 %v1042_v26, 0.0  ;;  %1086 = sbr.rel (!%p1575_p6) target bundleno = 358 (0x166), region = 77 }
 0x157   : > { %v1059_v32 = vmax.f32 %v1053_v28, 0.0 }
 0x158   : > { %v1057_v34 = vmax.f32 %v1045_v30, 0.0 }
 0x159   : > { %v1311_v35 = vpack.c.bf16 %v1059_v32, %v1058_v31 }
 0x15a   : > { %v1306_v36 = vpack.c.bf16 %v1057_v34, %v1056_v33 }
 0x15b   : > { %1313 = vst [vmem:[%s532_s19 + $0x8] sm:$0xff] %v1311_v35  }
 0x15c   : > { %1307 = vst [vmem:[%s532_s19] sm:$0xff] %v1306_v36  }
 0x162   : > { %v1111_v39 = vld [vmem:[%s532_s19 + $0x8] sm:$0xf]  ;;  %v1113_v40 = vld [vmem:[%s532_s19 + $0xc] sm:$0xf] }
 0x163   : > { %v1107_v37 = vld [vmem:[%s532_s19] sm:$0xf]  ;;  %v1109_v38 = vld [vmem:[%s532_s19 + $0x4] sm:$0xf]  ;;  %1112 = vst [vmem:[%s1091_s23 + $0x10] sm:$0xf] %v1111_v39 }
 0x164   : > { %1108 = vst [vmem:[%s1091_s23] sm:$0xf] %v1107_v37  ;;  %1110 = vst [vmem:[%s1091_s23 + $0x8] sm:$0xf] %v1109_v38 }
 0x165   : > { %1114 = vst [vmem:[%s1091_s23 + $0x18] sm:$0xf] %v1113_v40 }
 0x166 PF: > { %s13_s16 = sadd.s32 1, %s1518_s16   ;;  %s1842_s12 = smov %s1506_s13 }
 0x167   : > { %p10_p12 = scmp.ge.s32.totalorder %s13_s16, 4   ;;  %s1843_s13 = smov %s1580_s22 }
 0x168   : > { %s1844_s14 = smov %s1514_s15  ;;  %s1845_s15 = smov %s1847_s17 }
 0x169   :  { %12 = sbr.rel (!%p10_p12) target bundleno = 3 (0x3), region = 155 }

// kernel: linearization_net.35
= control target key start
LH: loop header
LB: loop body
LE: loop exit
PB: predicated region body
PF: predicated region fallthrough
CT: control target
= control target key end

     0   :  { %s341_s1 = inlined_call_operand.vmem [shape: bf16[256,128], index: 1, kind: input, shape index: {}]   ;;  %s342_s0 = inlined_call_operand.vmem [shape: bf16[8,256], index: 0, kind: input, shape index: {}]   ;;  %s343_s2 = inlined_call_operand.vmem [shape: f32[1,128], index: 2, kind: input, shape index: {}]   ;;  %s344_s3 = inlined_call_operand.vmem [shape: bf16[8,128], index: 3, kind: output, shape index: {}]  }
   0x1   :  { %v246_v0 = vld [vmem:[%s341_s1 + $0x40] sm:$0xff]   ;;  %v248_v2 = vld [vmem:[%s341_s1 + $0x48] sm:$0xff]   ;;  %v250_v4 = vld [vmem:[%s341_s1 + $0x50] sm:$0xff]  }
   0x2   :  { %v247_v1 = vld [vmem:[%s341_s1] sm:$0xff]   ;;  %224 = vmatprep.subr.bf16.mxu0 %v246_v0  ;;  %v249_v3 = vld [vmem:[%s341_s1 + $0x8] sm:$0xff]   ;;  %v251_v5 = vld [vmem:[%s341_s1 + $0x10] sm:$0xff]  }
   0x3   :  { %225 = vmatpush3.bf16.msra.mxu0 %v247_v1  ;;  %v252_v6 = vld [vmem:[%s341_s1 + $0x58] sm:$0xff]   ;;  %v254_v8 = vld [vmem:[%s341_s1 + $0x60] sm:$0xff]   ;;  %v256_v10 = vld [vmem:[%s341_s1 + $0x68] sm:$0xff]  }
   0x4   :  { %226 = vmatprep.subr.bf16.mxu0 %v248_v2  ;;  %v253_v7 = vld [vmem:[%s341_s1 + $0x18] sm:$0xff]   ;;  %v255_v9 = vld [vmem:[%s341_s1 + $0x20] sm:$0xff]   ;;  %v257_v13 = vld [vmem:[%s341_s1 + $0x28] sm:$0xff]  }
   0x5   :  { %v15_v11 = vld [vmem:[%s342_s0] sm:$0xff]  ;;  %v258_v14 = vld [vmem:[%s341_s1 + $0x70] sm:$0xff]   ;;  %v260_v16 = vld [vmem:[%s341_s1 + $0x78] sm:$0xff]  }
   0x6   :  { %v207_v12 = vcombine.high %v15_v11, %v15_v11  ;;  %v259_v15 = vld [vmem:[%s341_s1 + $0x30] sm:$0xff]   ;;  %v261_v17 = vld [vmem:[%s341_s1 + $0x38] sm:$0xff]   ;;  %v206_v18 = vcombine.low %v15_v11, %v15_v11  ;;  %v205_v20 = vld [vmem:[%s343_s2] ss:$0 sm:$0xff] }
   0x7   :  { %227 = vmatpush3.bf16.msra.mxu0 %v249_v3 }
   0x8   :  { %228 = vmatprep.subr.bf16.mxu0 %v250_v4  ;;  %190 = vmatprep.mubr.bf16.mxu0 %v207_v12 }
   0xb   :  { %229 = vmatpush3.bf16.msra.mxu0 %v251_v5 }
   0xc   :  { %230 = vmatprep.subr.bf16.mxu0 %v252_v6 }
   0xf   :  { %231 = vmatpush3.bf16.msra.mxu0 %v253_v7 }
  0x10   :  { %232 = vmatprep.subr.bf16.mxu0 %v254_v8 }
  0x13   :  { %233 = vmatpush3.bf16.msra.mxu0 %v255_v9 }
  0x14   :  { %234 = vmatprep.subr.bf16.mxu0 %v256_v10 }
  0x17   :  { %235 = vmatpush3.bf16.msra.mxu0 %v257_v13 }
  0x18   :  { %236 = vmatprep.subr.bf16.mxu0 %v258_v14 }
  0x1b   :  { %237 = vmatpush3.bf16.msra.mxu0 %v259_v15 }
  0x1c   :  { %238 = vmatprep.subr.bf16.mxu0 %v260_v16 }
  0x1f   :  { %239 = vmatpush3.bf16.msra.mxu0 %v261_v17 }
  0x22   :  { %191 = vmatmul.mubr.bf16.vlgmr.msra.gmra.mrb[0].mxu0 %v206_v18 }
  0xf5   :  { %v240_v19 = vpop.f32.mrb[0].mxu0 }
  0xf6   :  { %v241_v21 = vpop.f32.mrb[1].mxu0 }
  0xf7   :  { %v242_v22 = vadd.f32 %v241_v21, %v240_v19  ;;  %v243_v23 = vpop.f32.mrb[2].mxu0 }
  0xf8   :  { %v244_v24 = vpop.f32.mrb[3].mxu0 }
  0xf9   :  { %v193_v25 = vadd.f32 %v242_v22, %v205_v20 }
  0xfb   :  { %v198_v26 = vmax.f32 %v193_v25, 0.0 }
  0xfd   :  { %v199_v27 = vpack.c.bf16 %v198_v26, %v198_v26 }
  0xff   :  { %200 = vst [vmem:[%s344_s3] sm:$0xf] %v199_v27 }

// kernel: linearization_net.36
= control target key start
LH: loop header
LB: loop body
LE: loop exit
PB: predicated region body
PF: predicated region fallthrough
CT: control target
= control target key end

     0   :  { %s863_s12 = smov 0   ;;  %s865_s13 = smov 0   ;;  %s938_s0 = inlined_call_operand.vmem [shape: bf16[8,1152], index: 0, kind: input, shape index: {}]   ;;  %s939_s1 = inlined_call_operand.vmem [shape: bf16[1152,128], index: 1, kind: input, shape index: {}]   ;;  %s940_s2 = inlined_call_operand.vmem [shape: f32[1,128], index: 2, kind: input, shape index: {}]   ;;  %s941_s3 = inlined_call_operand.vmem [shape: bf16[8,128], index: 3, kind: output, shape index: {}]  }
   0x1   :  { %s867_s14 = smov 0  }
   0x2 LB: > { %s25_s15 = sadd.s32 1, %s835_s13  ;;  %p677_p0 = scmp.ge.s32.totalorder %s839_s14, 1  ;;  %s839_s14 = sphi %s867_s14, %s13_s14   ;;  %s835_s13 = sphi %s865_s13, %s943_s13   ;;  %s831_s12 = sphi %s863_s12, %s942_s12  }
   0x3   : > { %p26_p1 = scmp.ge.s32.totalorder %s25_s15, 3  ;;  %p189_p2 = scmp.lt.s32.totalorder %s839_s14, 4 }
   0x5   : > { %s945_s15 = smov (%p26_p1, %s25_s15), 0  ;;  %p190_p3 = pnand %p677_p0, %p189_p2 }
   0x6   : > { %s230_s16 = smul.u32 (!%p190_p3), 3, %s831_s12  ;;  %p680_p6 = scmp.ne.s32.totalorder (!%p190_p3), %s831_s12, 0 }
   0x7   : > { %193 = sbr.rel (%p190_p3) target bundleno = 289 (0x121), region = 32 }
   0x8   : > { %s240_s17 = smul.u32 (!%p190_p3), 48, %s831_s12  ;;  %p233_p4 = scmp.lt.s32.totalorder (!%p190_p3), %s230_s16, 8 }
   0xa   : > { %p241_p5 = scmp.lt.s32.totalorder (!%p190_p3), %s240_s17, 143 }
   0xe   : > { %s947_s16 = smov (!%p233_p4, %s230_s16), 8  ;;  %s949_s17 = smov (!%p241_p5, %s240_s17), 143 }
   0xf   : > { %s678_s18 = sshll.u32 %s947_s16, 2  ;;  %s679_s22 = sshll.u32 %s949_s17, 2  ;;  %v681_v0 = vld [vmem:[%s940_s2] ss:$0 sm:$0xff] (!%p680_p6) }
  0x10   : > { %s888_s21 = scalar_lea.vmem %s938_s0, %s678_s18  ;;  %s893_s25 = scalar_lea.vmem %s939_s1, %s679_s22  ;;  %271 = vst [vmem:[#allocation2] sm:$0xff] (!%p680_p6), %v681_v0 }
  0x11   : > { %263 = sbr.rel (%p680_p6) target bundleno = 24 (0x18), region = 36 }
  0x18 PF: > { %v790_v1 = vld [vmem:[%s893_s25 + $0x40] sm:$0xff]   ;;  %v841_v2 = vmov 0.0   ;;  %vm842_vm0 = vmmov 0   ;;  %v793_v5 = vld [vmem:[%s893_s25 + $0x48] sm:$0xff]   ;;  %v796_v8 = vld [vmem:[%s893_s25 + $0x50] sm:$0xff]   ;;  %p709_p7 = scmp.ne.s32.totalorder %s831_s12, 2 }
  0x19   : > { %744 = vmatprep.subr.bf16.mxu1 %v841_v2  ;;  %v791_v3 = vld [vmem:[%s893_s25] sm:$0xff]   ;;  %713 = vmatprep.subr.bf16.mxu0 %v790_v1  ;;  %v794_v6 = vld [vmem:[%s893_s25 + $0x8] sm:$0xff]   ;;  %v797_v9 = vld [vmem:[%s893_s25 + $0x10] sm:$0xff]  }
  0x1a   : > { %v792_v4 = vld [vmem:[%s893_s25 + $0x80] sm:$0xff]   ;;  %760 = vmatprep.mubr.msk.bf16.mxu1 %vm842_vm0, %v841_v2  ;;  %714 = vmatpush3.bf16.msra.mxu0 %v791_v3  ;;  %v795_v7 = vld [vmem:[%s893_s25 + $0x88] sm:$0xff]   ;;  %v798_v10 = vld [vmem:[%s893_s25 + $0x90] sm:$0xff]  }
  0x1b   : > { %745 = vmatpush3.bf16.msra.mxu1 %v792_v4  ;;  %715 = vmatprep.subr.bf16.mxu0 %v793_v5  ;;  %v799_v11 = vld [vmem:[%s893_s25 + $0x58] sm:$0xff]   ;;  %v802_v14 = vld [vmem:[%s893_s25 + $0x60] sm:$0xff]   ;;  %v805_v17 = vld [vmem:[%s893_s25 + $0x68] sm:$0xff]  }
  0x1c   : > { %746 = vmatprep.subr.bf16.mxu1 %v841_v2  ;;  %v800_v12 = vld [vmem:[%s893_s25 + $0x18] sm:$0xff]   ;;  %v803_v15 = vld [vmem:[%s893_s25 + $0x20] sm:$0xff]   ;;  %v806_v18 = vld [vmem:[%s893_s25 + $0x28] sm:$0xff]  }
  0x1d   : > { %v801_v13 = vld [vmem:[%s893_s25 + $0x98] sm:$0xff]   ;;  %v804_v16 = vld [vmem:[%s893_s25 + $0xa0] sm:$0xff]   ;;  %v807_v19 = vld [vmem:[%s893_s25 + $0xa8] sm:$0xff]  }
  0x1e   : > { %716 = vmatpush3.bf16.msra.mxu0 %v794_v6  ;;  %v808_v20 = vld [vmem:[%s893_s25 + $0x70] sm:$0xff]   ;;  %v811_v23 = vld [vmem:[%s893_s25 + $0x78] sm:$0xff]   ;;  %v273_v24 = vld [vmem:[%s888_s21] sm:$0xff] }
  0x1f   : > { %747 = vmatpush3.bf16.msra.mxu1 %v795_v7  ;;  %717 = vmatprep.subr.bf16.mxu0 %v796_v8  ;;  %v809_v21 = vld [vmem:[%s893_s25 + $0x30] sm:$0xff]   ;;  %v683_v25 = vcombine.high %v273_v24, %v273_v24  ;;  %v812_v26 = vld [vmem:[%s893_s25 + $0x38] sm:$0xff]   ;;  %v682_v28 = vcombine.low %v273_v24, %v273_v24  ;;  %v816_v29 = vld [vmem:[%s888_s21 + $0x8] ss:$0 sps:$4 sm:$0xff]  }
  0x20   : > { %748 = vmatprep.subr.bf16.mxu1 %v841_v2  ;;  %v810_v22 = vld [vmem:[%s893_s25 + $0xb0] sm:$0xff]   ;;  %v813_v27 = vld [vmem:[%s893_s25 + $0xb8] sm:$0xff]   ;;  %v272_v36 = vld [vmem:[#allocation2] sm:$0xff] }
  0x21   : > { %510 = vmatprep.mubr.bf16.mxu0 %v683_v25 }
  0x22   : > { %718 = vmatpush3.bf16.msra.mxu0 %v797_v9 }
  0x23   : > { %749 = vmatpush3.bf16.msra.mxu1 %v798_v10  ;;  %719 = vmatprep.subr.bf16.mxu0 %v799_v11 }
  0x24   : > { %750 = vmatprep.subr.bf16.mxu1 %v841_v2 }
  0x26   : > { %720 = vmatpush3.bf16.msra.mxu0 %v800_v12 }
  0x27   : > { %751 = vmatpush3.bf16.msra.mxu1 %v801_v13  ;;  %721 = vmatprep.subr.bf16.mxu0 %v802_v14 }
  0x28   : > { %752 = vmatprep.subr.bf16.mxu1 %v841_v2 }
  0x2a   : > { %722 = vmatpush3.bf16.msra.mxu0 %v803_v15 }
  0x2b   : > { %753 = vmatpush3.bf16.msra.mxu1 %v804_v16  ;;  %723 = vmatprep.subr.bf16.mxu0 %v805_v17 }
  0x2c   : > { %754 = vmatprep.subr.bf16.mxu1 %v841_v2 }
  0x2e   : > { %724 = vmatpush3.bf16.msra.mxu0 %v806_v18 }
  0x2f   : > { %755 = vmatpush3.bf16.msra.mxu1 %v807_v19  ;;  %725 = vmatprep.subr.bf16.mxu0 %v808_v20 }
  0x30   : > { %756 = vmatprep.subr.bf16.mxu1 %v841_v2 }
  0x32   : > { %726 = vmatpush3.bf16.msra.mxu0 %v809_v21 }
  0x33   : > { %757 = vmatpush3.bf16.msra.mxu1 %v810_v22  ;;  %727 = vmatprep.subr.bf16.mxu0 %v811_v23 }
  0x34   : > { %758 = vmatprep.subr.bf16.mxu1 %v841_v2 }
  0x36   : > { %728 = vmatpush3.bf16.msra.mxu0 %v812_v26 }
  0x37   : > { %759 = vmatpush3.bf16.msra.mxu1 %v813_v27 }
  0x39   : > { %511 = vmatmul.mubr.bf16.vlgmr.msra.gmra.mrb[0].mxu0 %v682_v28 }
  0x3a   : > { %761 = vmatmul.mubr.bf16.vlgmr.msra.gmra.mrb[0].mxu1 %v816_v29 }
 0x10c   : > { %v729_v30 = vpop.f32.mrb[0].mxu0 }
 0x10d   : > { %v552_v31 = vpop.f32.mrb[0].mxu1  ;;  %v730_v32 = vpop.f32.mrb[1].mxu0 }
 0x10e   : > { %v731_v33 = vadd.f32 %v730_v32, %v729_v30  ;;  %v762_v34 = vpop.f32.mrb[1].mxu1  ;;  %v732_v35 = vpop.f32.mrb[2].mxu0  ;;  %563 = sbr.rel (%p709_p7) target bundleno = 289 (0x121), region = 40 }
 0x10f   : > { %v555_v37 = vpop.f32.mrb[2].mxu1  ;;  %v733_v38 = vpop.f32.mrb[3].mxu0 }
 0x110   : > { %v553_v39 = vadd.f32 %v731_v33, %v552_v31  ;;  %v763_v40 = vpop.f32.mrb[3].mxu1 }
 0x112   : > { %v558_v41 = vadd.f32 %v553_v39, %v272_v36 }
 0x114   : > { %559 = vst [vmem:[#allocation2] sm:$0xff] %v558_v41 }
 0x11b   : > { %v564_v42 = vld [vmem:[#allocation2] sm:$0xff] }
 0x11c   : > { %v565_v43 = vmax.f32 %v564_v42, 0.0 }
 0x11e   : > { %v566_v44 = vpack.c.bf16 %v565_v43, %v565_v43 }
 0x120   : > { %567 = vst [vmem:[%s941_s3] sm:$0xf] %v566_v44 }
 0x121 PF: > { %s13_s14 = sadd.s32 1, %s839_s14   ;;  %s942_s12 = smov %s835_s13 }
 0x122   : > { %p10_p8 = scmp.ge.s32.totalorder %s13_s14, 5   ;;  %s943_s13 = smov %s945_s15 }
 0x124   :  { %12 = sbr.rel (!%p10_p8) target bundleno = 2 (0x2), region = 76 }

// kernel: linearization_net.37
= control target key start
LH: loop header
LB: loop body
LE: loop exit
PB: predicated region body
PF: predicated region fallthrough
CT: control target
= control target key end

     0   :  { %s852_s15 = smov 0   ;;  %s854_s16 = smov 0   ;;  %s944_s0 = inlined_call_operand.vmem [shape: bf16[8,128], index: 0, kind: input, shape index: {}]   ;;  %s945_s1 = inlined_call_operand.vmem [shape: bf16[128,512], index: 1, kind: input, shape index: {}]   ;;  %s946_s2 = inlined_call_operand.vmem [shape: f32[1,512], index: 2, kind: input, shape index: {}]   ;;  %s947_s3 = inlined_call_operand.vmem [shape: bf16[8,512], index: 3, kind: input, shape index: {}]   ;;  %s948_s4 = inlined_call_operand.vmem [shape: bf16[8,512], index: 4, kind: output, shape index: {}]  }
   0x1   :  { %s856_s17 = smov 0   ;;  %s858_s18 = smov 0  }
   0x2   :  { %s860_s19 = smov 0  }
   0x3 LB: > { %s23_s20 = sadd.s32 1, %s820_s18  ;;  %p66_p1 = scmp.ne.s32.totalorder %s812_s16, %s808_s15  ;;  %s824_s19 = sphi %s860_s19, %s14_s19   ;;  %s820_s18 = sphi %s858_s18, %s952_s18   ;;  %s816_s17 = sphi %s856_s17, %s951_s17   ;;  %s812_s16 = sphi %s854_s16, %s950_s16   ;;  %s808_s15 = sphi %s852_s15, %s949_s15  }
   0x4   : > { %p24_p0 = scmp.ge.s32.totalorder %s23_s20, 2  ;;  %p67_p2 = scmp.eq.s32.totalorder %s824_s19, 0 }
   0x5   : > { %s59_s22 = sadd.s32 1, %s812_s16  ;;  %p689_p5 = scmp.ge.s32.totalorder %s824_s19, 2 }
   0x6   : > { %s954_s20 = smov (%p24_p0, %s23_s20), 0  ;;  %p68_p3 = por %p67_p2, %p66_p1 }
   0x7   : > { %s56_s21 = ssub.s32 %s820_s18, %s954_s20  ;;  %181 = sbr.rel (%p689_p5) target bundleno = 26 (0x1a), region = 20 }
   0x8   : > { %p57_p4 = scmp.eq.s32.totalorder %s56_s21, 0 }
   0xa   : > { %s887_s23 = scalar_select %p57_p4, %s812_s16, %s59_s22  }
   0xe   : > { %184 = sbr.rel (!%p68_p3) target bundleno = 26 (0x1a), region = 24  ;;  %s186_s24 = sand.u32 (%p68_p3), 1, %s812_s16  }
   0xf   : > { %s719_s25 = sshll.u32 (%p68_p3), %s820_s18, 3  ;;  %s690_s26 = sshll.u32 (%p68_p3), %s186_s24, 7 }
  0x10   : > { %s895_s29 = scalar_lea.vmem (%p68_p3), %s945_s1, %s719_s25  ;;  %s188_s30 = scalar_lea.vmem (%p68_p3), [#allocation2], %s690_s26 }
  0x11   : > { %v249_v0 = vld [vmem:[%s895_s29] sm:$0xff] (%p68_p3)  ;;  %v251_v1 = vld [vmem:[%s895_s29 + $0x10] sm:$0xff] (%p68_p3) }
  0x12   : > { %v253_v2 = vld [vmem:[%s895_s29 + $0x20] sm:$0xff] (%p68_p3)  ;;  %250 = vst [vmem:[%s188_s30] sm:$0xff] (%p68_p3), %v249_v0  ;;  %252 = vst [vmem:[%s188_s30 + $0x8] sm:$0xff] (%p68_p3), %v251_v1  ;;  %v255_v3 = vld [vmem:[%s895_s29 + $0x30] sm:$0xff] (%p68_p3) }
  0x13   : > { %254 = vst [vmem:[%s188_s30 + $0x10] sm:$0xff] (%p68_p3), %v253_v2  ;;  %v257_v4 = vld [vmem:[%s895_s29 + $0x40] sm:$0xff] (%p68_p3)  ;;  %v259_v5 = vld [vmem:[%s895_s29 + $0x50] sm:$0xff] (%p68_p3)  ;;  %256 = vst [vmem:[%s188_s30 + $0x18] sm:$0xff] (%p68_p3), %v255_v3 }
  0x14   : > { %258 = vst [vmem:[%s188_s30 + $0x20] sm:$0xff] (%p68_p3), %v257_v4  ;;  %260 = vst [vmem:[%s188_s30 + $0x28] sm:$0xff] (%p68_p3), %v259_v5  ;;  %v261_v6 = vld [vmem:[%s895_s29 + $0x60] sm:$0xff] (%p68_p3)  ;;  %v263_v7 = vld [vmem:[%s895_s29 + $0x70] sm:$0xff] (%p68_p3) }
  0x15   : > { %v265_v8 = vld [vmem:[%s895_s29 + $0x80] sm:$0xff]  ;;  %262 = vst [vmem:[%s188_s30 + $0x30] sm:$0xff] %v261_v6  ;;  %264 = vst [vmem:[%s188_s30 + $0x38] sm:$0xff] %v263_v7  ;;  %v267_v9 = vld [vmem:[%s895_s29 + $0x90] sm:$0xff] }
  0x16   : > { %266 = vst [vmem:[%s188_s30 + $0x40] sm:$0xff] %v265_v8  ;;  %v269_v10 = vld [vmem:[%s895_s29 + $0xa0] sm:$0xff]  ;;  %v271_v11 = vld [vmem:[%s895_s29 + $0xb0] sm:$0xff]  ;;  %268 = vst [vmem:[%s188_s30 + $0x48] sm:$0xff] %v267_v9 }
  0x17   : > { %270 = vst [vmem:[%s188_s30 + $0x50] sm:$0xff] %v269_v10  ;;  %272 = vst [vmem:[%s188_s30 + $0x58] sm:$0xff] %v271_v11  ;;  %v273_v12 = vld [vmem:[%s895_s29 + $0xc0] sm:$0xff]  ;;  %v275_v13 = vld [vmem:[%s895_s29 + $0xd0] sm:$0xff] }
  0x18   : > { %v277_v14 = vld [vmem:[%s895_s29 + $0xe0] sm:$0xff]  ;;  %274 = vst [vmem:[%s188_s30 + $0x60] sm:$0xff] %v273_v12  ;;  %276 = vst [vmem:[%s188_s30 + $0x68] sm:$0xff] %v275_v13  ;;  %v279_v15 = vld [vmem:[%s895_s29 + $0xf0] sm:$0xff] }
  0x19   : > { %278 = vst [vmem:[%s188_s30 + $0x70] sm:$0xff] %v277_v14  ;;  %280 = vst [vmem:[%s188_s30 + $0x78] sm:$0xff] %v279_v15 }
  0x1a PF: > { %p693_p6 = scmp.ge.s32.totalorder %s824_s19, 1  ;;  %p306_p7 = scmp.lt.s32.totalorder %s824_s19, 3 }
  0x1c   : > { %p307_p8 = pnand %p693_p6, %p306_p7 }
  0x1d   : > { %s313_s5 = sand.u32 (!%p307_p8), 1, %s808_s15   ;;  %v826_v16 = vmov (!%p307_p8), 0   ;;  %v390_v33 = vld [vmem:[%s944_s0] sm:$0xf] (!%p307_p8)  ;;  %s695_s10 = sshll.u32 (!%p307_p8), %s816_s17, 1  ;;  %v409_v34 = vlaneseq (!%p307_p8) }
  0x1e   : > { %310 = sbr.rel (%p307_p8) target bundleno = 287 (0x11f), region = 70  ;;  %s694_s6 = sshll.u32 (!%p307_p8), %s313_s5, 7  ;;  %531 = vmatprep.mubr.bf16.mxu0 (!%p307_p8), %v826_v16 }
  0x1f   : > { %s315_s7 = scalar_lea.vmem (!%p307_p8), [#allocation2], %s694_s6  ;;  %p365_p9 = scmp.lt.s32.totalorder (!%p307_p8), %s695_s10, 3  ;;  %v410_v35 = vshrl.u32 (!%p307_p8), %v409_v34, 7 }
  0x20   : > { %v762_v17 = vld [vmem:[%s315_s7 + $0x4] ss:$8 sps:$4 sm:$0xff] (!%p307_p8)   ;;  %v764_v18 = vld [vmem:[%s315_s7] ss:$8 sps:$4 sm:$0xff] (!%p307_p8)   ;;  %v765_v19 = vld [vmem:[%s315_s7 + $0x14] ss:$8 sps:$4 sm:$0xff] (!%p307_p8)  }
  0x21   : > { %499 = vmatprep.subr.bf16.mxu0 (!%p307_p8), %v762_v17  ;;  %v767_v20 = vld [vmem:[%s315_s7 + $0x10] ss:$8 sps:$4 sm:$0xff] (!%p307_p8)   ;;  %v768_v21 = vld [vmem:[%s315_s7 + $0x24] ss:$8 sps:$4 sm:$0xff] (!%p307_p8)   ;;  %v770_v22 = vld [vmem:[%s315_s7 + $0x20] ss:$8 sps:$4 sm:$0xff] (!%p307_p8)  }
  0x22   : > { %500 = vmatpush1.bf16.msra.mxu0 (!%p307_p8), %v764_v18  ;;  %v771_v23 = vld [vmem:[%s315_s7 + $0x34] ss:$8 sps:$4 sm:$0xff] (!%p307_p8)   ;;  %v773_v24 = vld [vmem:[%s315_s7 + $0x30] ss:$8 sps:$4 sm:$0xff] (!%p307_p8)   ;;  %v774_v25 = vld [vmem:[%s315_s7 + $0x44] ss:$8 sps:$4 sm:$0xff] (!%p307_p8)  }
  0x23   : > { %501 = vmatprep.subr.bf16.mxu0 (!%p307_p8), %v765_v19  ;;  %v776_v26 = vld [vmem:[%s315_s7 + $0x40] ss:$8 sps:$4 sm:$0xff] (!%p307_p8)   ;;  %v777_v27 = vld [vmem:[%s315_s7 + $0x54] ss:$8 sps:$4 sm:$0xff] (!%p307_p8)   ;;  %v779_v28 = vld [vmem:[%s315_s7 + $0x50] ss:$8 sps:$4 sm:$0xff] (!%p307_p8)  }
  0x24   : > { %v780_v29 = vld [vmem:[%s315_s7 + $0x64] ss:$8 sps:$4 sm:$0xff] (!%p307_p8)   ;;  %v782_v30 = vld [vmem:[%s315_s7 + $0x60] ss:$8 sps:$4 sm:$0xff] (!%p307_p8)   ;;  %v783_v31 = vld [vmem:[%s315_s7 + $0x74] ss:$8 sps:$4 sm:$0xff] (!%p307_p8)  }
  0x25   : > { %v785_v32 = vld [vmem:[%s315_s7 + $0x70] ss:$8 sps:$4 sm:$0xff]   ;;  %s956_s10 = smov (!%p365_p9, %s695_s10), 3  ;;  %v411_v36 = vsub.s32 0, %v410_v35  ;;  %v415_v38 = vsub.s32 1, %v410_v35 }
  0x26   : > { %502 = vmatpush1.bf16.msra.mxu0 %v767_v20  ;;  %s697_s11 = sshll.u32 %s956_s10, 2  ;;  %s367_s14 = scalar_lea.vmem %s946_s2, %s956_s10 }
  0x27   : > { %503 = vmatprep.subr.bf16.mxu0 %v768_v21  ;;  %s377_s22 = scalar_lea.vmem %s947_s3, %s697_s11  ;;  %v407_v37 = vld [vmem:[%s367_s14] sm:$0x3]  ;;  %s387_s25 = scalar_lea.vmem %s948_s4, %s697_s11 }
  0x28   : > { %v540_v39 = vld [vmem:[%s377_s22] sm:$0xff]  ;;  %v412_v40 = vrot.slane %v407_v37, %v411_v36  ;;  %v416_v41 = vrot.slane %v407_v37, %v415_v38 }
  0x29   : > { %v541_v42 = vunpack.c.l.bf16 %v540_v39  ;;  %v542_v44 = vunpack.c.h.bf16 %v540_v39 }
  0x2a   : > { %504 = vmatpush1.bf16.msra.mxu0 %v770_v22 }
  0x2b   : > { %505 = vmatprep.subr.bf16.mxu0 %v771_v23 }
  0x2e   : > { %506 = vmatpush1.bf16.msra.mxu0 %v773_v24 }
  0x2f   : > { %507 = vmatprep.subr.bf16.mxu0 %v774_v25 }
  0x32   : > { %508 = vmatpush1.bf16.msra.mxu0 %v776_v26 }
  0x33   : > { %509 = vmatprep.subr.bf16.mxu0 %v777_v27 }
  0x36   : > { %510 = vmatpush1.bf16.msra.mxu0 %v779_v28 }
  0x37   : > { %511 = vmatprep.subr.bf16.mxu0 %v780_v29 }
  0x3a   : > { %512 = vmatpush1.bf16.msra.mxu0 %v782_v30 }
  0x3b   : > { %513 = vmatprep.subr.bf16.mxu0 %v783_v31 }
  0x3e   : > { %514 = vmatpush1.bf16.msra.mxu0 %v785_v32 }
  0x41   : > { %532 = vmatmul.mubr.bf16.vlgmr.msra.gmra.mrb[0].mxu0 %v390_v33 }
 0x114   : > { %v533_v43 = vpop.f32.mrb[0].mxu0 }
 0x115   : > { %v534_v45 = vadd.f32 %v533_v43, %v412_v40  ;;  %v535_v46 = vpop.f32.mrb[1].mxu0 }
 0x116   : > { %v536_v47 = vadd.f32 %v535_v46, %v416_v41  ;;  %v537_v48 = vpop.f32.mrb[2].mxu0 }
 0x117   : > { %v543_v49 = vadd.f32 %v541_v42, %v534_v45  ;;  %v538_v50 = vpop.f32.mrb[3].mxu0 }
 0x118   : > { %v544_v51 = vadd.f32 %v542_v44, %v536_v47 }
 0x119   : > { %v545_v52 = vmax.f32 %v543_v49, 0.0 }
 0x11a   : > { %v546_v53 = vmax.f32 %v544_v51, 0.0 }
 0x11c   : > { %v720_v54 = vpack.c.bf16 %v546_v53, %v545_v52 }
 0x11e   : > { %555 = vst [vmem:[%s387_s25] sm:$0xff] %v720_v54 }
 0x11f PF: > { %s14_s19 = sadd.s32 1, %s824_s19   ;;  %s949_s15 = smov %s812_s16 }
 0x120   : > { %p11_p10 = scmp.ge.s32.totalorder %s14_s19, 4   ;;  %s950_s16 = smov %s887_s23 }
 0x121   : > { %s951_s17 = smov %s820_s18  ;;  %s952_s18 = smov %s954_s20 }
 0x122   :  { %13 = sbr.rel (!%p11_p10) target bundleno = 3 (0x3), region = 118 }

// kernel: linearization_net.34
= control target key start
LH: loop header
LB: loop body
LE: loop exit
PB: predicated region body
PF: predicated region fallthrough
CT: control target
= control target key end

     0   :  { %s968_s12 = smov 0   ;;  %s970_s13 = smov 0   ;;  %s1147_s0 = inlined_call_operand.vmem [shape: bf16[8,256], index: 0, kind: input, shape index: {}]   ;;  %s1148_s1 = inlined_call_operand.vmem [shape: bf16[256,512], index: 1, kind: input, shape index: {}]   ;;  %s1149_s2 = inlined_call_operand.vmem [shape: f32[1,512], index: 2, kind: input, shape index: {}]   ;;  %s1150_s3 = inlined_call_operand.vmem [shape: bf16[8,512], index: 3, kind: output, shape index: {}]  }
   0x1   :  { %s972_s14 = smov 0   ;;  %s974_s15 = smov 0  }
   0x2   :  { %s976_s16 = smov 0  }
   0x3 LB: > { %s22_s17 = sadd.s32 1, %s942_s15  ;;  %p65_p1 = scmp.ne.s32.totalorder %s934_s13, %s930_s12  ;;  %s946_s16 = sphi %s976_s16, %s13_s16   ;;  %s942_s15 = sphi %s974_s15, %s1154_s15   ;;  %s938_s14 = sphi %s972_s14, %s1153_s14   ;;  %s934_s13 = sphi %s970_s13, %s1152_s13   ;;  %s930_s12 = sphi %s968_s12, %s1151_s12  }
   0x4   : > { %p23_p0 = scmp.ge.s32.totalorder %s22_s17, 2  ;;  %p66_p2 = scmp.eq.s32.totalorder %s946_s16, 0 }
   0x5   : > { %s58_s19 = sadd.s32 1, %s934_s13  ;;  %p770_p5 = scmp.ge.s32.totalorder %s946_s16, 2 }
   0x6   : > { %s1156_s17 = smov (%p23_p0, %s22_s17), 0  ;;  %p67_p3 = por %p66_p2, %p65_p1 }
   0x7   : > { %s55_s18 = ssub.s32 %s942_s15, %s1156_s17  ;;  %153 = sbr.rel (%p770_p5) target bundleno = 34 (0x22), region = 20 }
   0x8   : > { %p56_p4 = scmp.eq.s32.totalorder %s55_s18, 0 }
   0xa   : > { %s1003_s20 = scalar_select %p56_p4, %s934_s13, %s58_s19  }
   0xe   : > { %156 = sbr.rel (!%p67_p3) target bundleno = 34 (0x22), region = 24  ;;  %s158_s21 = sand.u32 (%p67_p3), 1, %s934_s13  }
   0xf   : > { %s816_s22 = sshll.u32 (%p67_p3), %s942_s15, 3  ;;  %s771_s23 = sshll.u32 (%p67_p3), %s158_s21, 8 }
  0x10   : > { %s1011_s26 = scalar_lea.vmem (%p67_p3), %s1148_s1, %s816_s22  ;;  %s1016_s27 = scalar_lea.vmem (%p67_p3), [#allocation2], %s771_s23 }
  0x11   : > { %v253_v0 = vld [vmem:[%s1011_s26] sm:$0xff] (%p67_p3)  ;;  %v255_v1 = vld [vmem:[%s1011_s26 + $0x10] sm:$0xff] (%p67_p3) }
  0x12   : > { %v257_v2 = vld [vmem:[%s1011_s26 + $0x20] sm:$0xff] (%p67_p3)  ;;  %254 = vst [vmem:[%s1016_s27] sm:$0xff] (%p67_p3), %v253_v0  ;;  %256 = vst [vmem:[%s1016_s27 + $0x8] sm:$0xff] (%p67_p3), %v255_v1  ;;  %v259_v3 = vld [vmem:[%s1011_s26 + $0x30] sm:$0xff] (%p67_p3) }
  0x13   : > { %258 = vst [vmem:[%s1016_s27 + $0x10] sm:$0xff] (%p67_p3), %v257_v2  ;;  %v261_v4 = vld [vmem:[%s1011_s26 + $0x40] sm:$0xff] (%p67_p3)  ;;  %v263_v5 = vld [vmem:[%s1011_s26 + $0x50] sm:$0xff] (%p67_p3)  ;;  %260 = vst [vmem:[%s1016_s27 + $0x18] sm:$0xff] (%p67_p3), %v259_v3 }
  0x14   : > { %262 = vst [vmem:[%s1016_s27 + $0x20] sm:$0xff] (%p67_p3), %v261_v4  ;;  %264 = vst [vmem:[%s1016_s27 + $0x28] sm:$0xff] (%p67_p3), %v263_v5  ;;  %v265_v6 = vld [vmem:[%s1011_s26 + $0x60] sm:$0xff] (%p67_p3)  ;;  %v267_v7 = vld [vmem:[%s1011_s26 + $0x70] sm:$0xff] (%p67_p3) }
  0x15   : > { %v269_v8 = vld [vmem:[%s1011_s26 + $0x80] sm:$0xff]  ;;  %266 = vst [vmem:[%s1016_s27 + $0x30] sm:$0xff] %v265_v6  ;;  %268 = vst [vmem:[%s1016_s27 + $0x38] sm:$0xff] %v267_v7  ;;  %v271_v9 = vld [vmem:[%s1011_s26 + $0x90] sm:$0xff] }
  0x16   : > { %270 = vst [vmem:[%s1016_s27 + $0x40] sm:$0xff] %v269_v8  ;;  %v273_v10 = vld [vmem:[%s1011_s26 + $0xa0] sm:$0xff]  ;;  %v275_v11 = vld [vmem:[%s1011_s26 + $0xb0] sm:$0xff]  ;;  %272 = vst [vmem:[%s1016_s27 + $0x48] sm:$0xff] %v271_v9 }
  0x17   : > { %274 = vst [vmem:[%s1016_s27 + $0x50] sm:$0xff] %v273_v10  ;;  %276 = vst [vmem:[%s1016_s27 + $0x58] sm:$0xff] %v275_v11  ;;  %v277_v12 = vld [vmem:[%s1011_s26 + $0xc0] sm:$0xff]  ;;  %v279_v13 = vld [vmem:[%s1011_s26 + $0xd0] sm:$0xff] }
  0x18   : > { %v281_v14 = vld [vmem:[%s1011_s26 + $0xe0] sm:$0xff]  ;;  %278 = vst [vmem:[%s1016_s27 + $0x60] sm:$0xff] %v277_v12  ;;  %280 = vst [vmem:[%s1016_s27 + $0x68] sm:$0xff] %v279_v13  ;;  %v283_v15 = vld [vmem:[%s1011_s26 + $0xf0] sm:$0xff] }
  0x19   : > { %282 = vst [vmem:[%s1016_s27 + $0x70] sm:$0xff] %v281_v14  ;;  %v285_v16 = vld [vmem:[%s1011_s26 + $0x100] sm:$0xff]  ;;  %v287_v17 = vld [vmem:[%s1011_s26 + $0x110] sm:$0xff]  ;;  %284 = vst [vmem:[%s1016_s27 + $0x78] sm:$0xff] %v283_v15 }
  0x1a   : > { %286 = vst [vmem:[%s1016_s27 + $0x80] sm:$0xff] %v285_v16  ;;  %288 = vst [vmem:[%s1016_s27 + $0x88] sm:$0xff] %v287_v17  ;;  %v289_v18 = vld [vmem:[%s1011_s26 + $0x120] sm:$0xff]  ;;  %v291_v19 = vld [vmem:[%s1011_s26 + $0x130] sm:$0xff] }
  0x1b   : > { %v293_v20 = vld [vmem:[%s1011_s26 + $0x140] sm:$0xff]  ;;  %290 = vst [vmem:[%s1016_s27 + $0x90] sm:$0xff] %v289_v18  ;;  %292 = vst [vmem:[%s1016_s27 + $0x98] sm:$0xff] %v291_v19  ;;  %v295_v21 = vld [vmem:[%s1011_s26 + $0x150] sm:$0xff] }
  0x1c   : > { %294 = vst [vmem:[%s1016_s27 + $0xa0] sm:$0xff] %v293_v20  ;;  %v297_v22 = vld [vmem:[%s1011_s26 + $0x160] sm:$0xff]  ;;  %v299_v23 = vld [vmem:[%s1011_s26 + $0x170] sm:$0xff]  ;;  %296 = vst [vmem:[%s1016_s27 + $0xa8] sm:$0xff] %v295_v21 }
  0x1d   : > { %298 = vst [vmem:[%s1016_s27 + $0xb0] sm:$0xff] %v297_v22  ;;  %300 = vst [vmem:[%s1016_s27 + $0xb8] sm:$0xff] %v299_v23  ;;  %v301_v24 = vld [vmem:[%s1011_s26 + $0x180] sm:$0xff]  ;;  %v303_v25 = vld [vmem:[%s1011_s26 + $0x190] sm:$0xff] }
  0x1e   : > { %v305_v26 = vld [vmem:[%s1011_s26 + $0x1a0] sm:$0xff]  ;;  %302 = vst [vmem:[%s1016_s27 + $0xc0] sm:$0xff] %v301_v24  ;;  %304 = vst [vmem:[%s1016_s27 + $0xc8] sm:$0xff] %v303_v25  ;;  %v307_v27 = vld [vmem:[%s1011_s26 + $0x1b0] sm:$0xff] }
  0x1f   : > { %306 = vst [vmem:[%s1016_s27 + $0xd0] sm:$0xff] %v305_v26  ;;  %v309_v28 = vld [vmem:[%s1011_s26 + $0x1c0] sm:$0xff]  ;;  %v311_v29 = vld [vmem:[%s1011_s26 + $0x1d0] sm:$0xff]  ;;  %308 = vst [vmem:[%s1016_s27 + $0xd8] sm:$0xff] %v307_v27 }
  0x20   : > { %310 = vst [vmem:[%s1016_s27 + $0xe0] sm:$0xff] %v309_v28  ;;  %312 = vst [vmem:[%s1016_s27 + $0xe8] sm:$0xff] %v311_v29  ;;  %v313_v30 = vld [vmem:[%s1011_s26 + $0x1e0] sm:$0xff]  ;;  %v315_v31 = vld [vmem:[%s1011_s26 + $0x1f0] sm:$0xff] }
  0x21   : > { %314 = vst [vmem:[%s1016_s27 + $0xf0] sm:$0xff] %v313_v30  ;;  %316 = vst [vmem:[%s1016_s27 + $0xf8] sm:$0xff] %v315_v31 }
  0x22 PF: > { %p774_p6 = scmp.ge.s32.totalorder %s946_s16, 1  ;;  %p329_p7 = scmp.lt.s32.totalorder %s946_s16, 3 }
  0x24   : > { %p330_p8 = pnand %p774_p6, %p329_p7 }
  0x25   : > { %s336_s28 = sand.u32 (!%p330_p8), 1, %s930_s12   ;;  %v1085_v32 = vld [vmem:[%s1147_s0] sm:$0xff] (!%p330_p8)  ;;  %s776_s6 = sshll.u32 (!%p330_p8), %s938_s14, 1  ;;  %v428_v3 = vlaneseq (!%p330_p8) }
  0x26   : > { %333 = sbr.rel (%p330_p8) target bundleno = 323 (0x143), region = 66  ;;  %s775_s4 = sshll.u32 (!%p330_p8), %s336_s28, 8  ;;  %v780_v33 = vcombine.high (!%p330_p8), %v1085_v32, %v1085_v32  ;;  %v779_v2 = vcombine.low (!%p330_p8), %v1085_v32, %v1085_v32 }
  0x27   : > { %s1089_s5 = scalar_lea.vmem (!%p330_p8), [#allocation2], %s775_s4  ;;  %p379_p9 = scmp.lt.s32.totalorder (!%p330_p8), %s776_s6, 3  ;;  %v429_v4 = vshrl.u32 (!%p330_p8), %v428_v3, 7 }
  0x28   : > { %v858_v34 = vld [vmem:[%s1089_s5 + $0x4] ss:$8 sps:$4 sm:$0xff] (!%p330_p8)   ;;  %637 = vmatprep.mubr.bf16.mxu0 (!%p330_p8), %v780_v33  ;;  %v860_v35 = vld [vmem:[%s1089_s5] ss:$8 sps:$4 sm:$0xff] (!%p330_p8)   ;;  %v861_v36 = vld [vmem:[%s1089_s5 + $0x14] ss:$8 sps:$4 sm:$0xff] (!%p330_p8)  }
  0x29   : > { %605 = vmatprep.subr.bf16.mxu0 (!%p330_p8), %v858_v34  ;;  %v863_v37 = vld [vmem:[%s1089_s5 + $0x10] ss:$8 sps:$4 sm:$0xff] (!%p330_p8)   ;;  %v864_v38 = vld [vmem:[%s1089_s5 + $0x24] ss:$8 sps:$4 sm:$0xff] (!%p330_p8)   ;;  %v866_v39 = vld [vmem:[%s1089_s5 + $0x20] ss:$8 sps:$4 sm:$0xff] (!%p330_p8)  }
  0x2a   : > { %606 = vmatpush1.bf16.msra.mxu0 (!%p330_p8), %v860_v35  ;;  %v867_v40 = vld [vmem:[%s1089_s5 + $0x34] ss:$8 sps:$4 sm:$0xff] (!%p330_p8)   ;;  %v869_v41 = vld [vmem:[%s1089_s5 + $0x30] ss:$8 sps:$4 sm:$0xff] (!%p330_p8)   ;;  %v870_v42 = vld [vmem:[%s1089_s5 + $0x44] ss:$8 sps:$4 sm:$0xff] (!%p330_p8)  }
  0x2b   : > { %607 = vmatprep.subr.bf16.mxu0 (!%p330_p8), %v861_v36  ;;  %v872_v43 = vld [vmem:[%s1089_s5 + $0x40] ss:$8 sps:$4 sm:$0xff] (!%p330_p8)   ;;  %v873_v44 = vld [vmem:[%s1089_s5 + $0x54] ss:$8 sps:$4 sm:$0xff] (!%p330_p8)   ;;  %v875_v45 = vld [vmem:[%s1089_s5 + $0x50] ss:$8 sps:$4 sm:$0xff] (!%p330_p8)  }
  0x2c   : > { %v876_v46 = vld [vmem:[%s1089_s5 + $0x64] ss:$8 sps:$4 sm:$0xff] (!%p330_p8)   ;;  %v878_v47 = vld [vmem:[%s1089_s5 + $0x60] ss:$8 sps:$4 sm:$0xff] (!%p330_p8)   ;;  %v879_v48 = vld [vmem:[%s1089_s5 + $0x74] ss:$8 sps:$4 sm:$0xff] (!%p330_p8)  }
  0x2d   : > { %v881_v49 = vld [vmem:[%s1089_s5 + $0x70] ss:$8 sps:$4 sm:$0xff]   ;;  %v882_v50 = vld [vmem:[%s1089_s5 + $0x84] ss:$8 sps:$4 sm:$0xff]   ;;  %v884_v51 = vld [vmem:[%s1089_s5 + $0x80] ss:$8 sps:$4 sm:$0xff]  }
  0x2e   : > { %608 = vmatpush1.bf16.msra.mxu0 %v863_v37  ;;  %v885_v52 = vld [vmem:[%s1089_s5 + $0x94] ss:$8 sps:$4 sm:$0xff]   ;;  %v887_v53 = vld [vmem:[%s1089_s5 + $0x90] ss:$8 sps:$4 sm:$0xff]   ;;  %v888_v54 = vld [vmem:[%s1089_s5 + $0xa4] ss:$8 sps:$4 sm:$0xff]  }
  0x2f   : > { %609 = vmatprep.subr.bf16.mxu0 %v864_v38  ;;  %v890_v55 = vld [vmem:[%s1089_s5 + $0xa0] ss:$8 sps:$4 sm:$0xff]   ;;  %v891_v56 = vld [vmem:[%s1089_s5 + $0xb4] ss:$8 sps:$4 sm:$0xff]   ;;  %v893_v57 = vld [vmem:[%s1089_s5 + $0xb0] ss:$8 sps:$4 sm:$0xff]  }
  0x30   : > { %v894_v58 = vld [vmem:[%s1089_s5 + $0xc4] ss:$8 sps:$4 sm:$0xff]   ;;  %v896_v59 = vld [vmem:[%s1089_s5 + $0xc0] ss:$8 sps:$4 sm:$0xff]   ;;  %v897_v60 = vld [vmem:[%s1089_s5 + $0xd4] ss:$8 sps:$4 sm:$0xff]  }
  0x31   : > { %v899_v61 = vld [vmem:[%s1089_s5 + $0xd0] ss:$8 sps:$4 sm:$0xff]   ;;  %v900_v62 = vld [vmem:[%s1089_s5 + $0xe4] ss:$8 sps:$4 sm:$0xff]   ;;  %v902_v63 = vld [vmem:[%s1089_s5 + $0xe0] ss:$8 sps:$4 sm:$0xff]  }
  0x32   : > { %610 = vmatpush1.bf16.msra.mxu0 %v866_v39  ;;  %v903_v0 = vld [vmem:[%s1089_s5 + $0xf4] ss:$8 sps:$4 sm:$0xff]   ;;  %v905_v1 = vld [vmem:[%s1089_s5 + $0xf0] ss:$8 sps:$4 sm:$0xff]   ;;  %s1158_s6 = smov (!%p379_p9, %s776_s6), 3  ;;  %v430_v5 = vsub.s32 0, %v429_v4 }
  0x33   : > { %611 = vmatprep.subr.bf16.mxu0 %v867_v40  ;;  %s381_s9 = scalar_lea.vmem %s1149_s2, %s1158_s6  ;;  %v434_v7 = vsub.s32 1, %v429_v4  ;;  %s778_s10 = sshll.u32 %s1158_s6, 2 }
  0x34   : > { %v426_v6 = vld [vmem:[%s381_s9] sm:$0x3]  ;;  %s391_s14 = scalar_lea.vmem %s1150_s3, %s778_s10 }
  0x35   : > { %v431_v8 = vrot.slane %v426_v6, %v430_v5  ;;  %v435_v9 = vrot.slane %v426_v6, %v434_v7 }
  0x36   : > { %612 = vmatpush1.bf16.msra.mxu0 %v869_v41 }
  0x37   : > { %613 = vmatprep.subr.bf16.mxu0 %v870_v42 }
  0x3a   : > { %614 = vmatpush1.bf16.msra.mxu0 %v872_v43 }
  0x3b   : > { %615 = vmatprep.subr.bf16.mxu0 %v873_v44 }
  0x3e   : > { %616 = vmatpush1.bf16.msra.mxu0 %v875_v45 }
  0x3f   : > { %617 = vmatprep.subr.bf16.mxu0 %v876_v46 }
  0x42   : > { %618 = vmatpush1.bf16.msra.mxu0 %v878_v47 }
  0x43   : > { %619 = vmatprep.subr.bf16.mxu0 %v879_v48 }
  0x46   : > { %620 = vmatpush1.bf16.msra.mxu0 %v881_v49 }
  0x47   : > { %621 = vmatprep.subr.bf16.mxu0 %v882_v50 }
  0x4a   : > { %622 = vmatpush1.bf16.msra.mxu0 %v884_v51 }
  0x4b   : > { %623 = vmatprep.subr.bf16.mxu0 %v885_v52 }
  0x4e   : > { %624 = vmatpush1.bf16.msra.mxu0 %v887_v53 }
  0x4f   : > { %625 = vmatprep.subr.bf16.mxu0 %v888_v54 }
  0x52   : > { %626 = vmatpush1.bf16.msra.mxu0 %v890_v55 }
  0x53   : > { %627 = vmatprep.subr.bf16.mxu0 %v891_v56 }
  0x56   : > { %628 = vmatpush1.bf16.msra.mxu0 %v893_v57 }
  0x57   : > { %629 = vmatprep.subr.bf16.mxu0 %v894_v58 }
  0x5a   : > { %630 = vmatpush1.bf16.msra.mxu0 %v896_v59 }
  0x5b   : > { %631 = vmatprep.subr.bf16.mxu0 %v897_v60 }
  0x5e   : > { %632 = vmatpush1.bf16.msra.mxu0 %v899_v61 }
  0x5f   : > { %633 = vmatprep.subr.bf16.mxu0 %v900_v62 }
  0x62   : > { %634 = vmatpush1.bf16.msra.mxu0 %v902_v63 }
  0x63   : > { %635 = vmatprep.subr.bf16.mxu0 %v903_v0 }
  0x66   : > { %636 = vmatpush1.bf16.msra.mxu0 %v905_v1 }
  0x69   : > { %638 = vmatmul.mubr.bf16.vlgmr.msra.gmra.mrb[0].mxu0 %v779_v2 }
 0x13c   : > { %v639_v10 = vpop.f32.mrb[0].mxu0 }
 0x13d   : > { %v640_v11 = vadd.f32 %v639_v10, %v431_v8  ;;  %v641_v12 = vpop.f32.mrb[1].mxu0 }
 0x13e   : > { %v642_v13 = vadd.f32 %v641_v12, %v435_v9  ;;  %v643_v14 = vpop.f32.mrb[2].mxu0 }
 0x13f   : > { %v644_v15 = vpop.f32.mrb[3].mxu0 }
 0x140   : > { %v817_v16 = vpack.c.bf16 %v642_v13, %v640_v11 }
 0x142   : > { %654 = vst [vmem:[%s391_s14] sm:$0xff] %v817_v16 }
 0x143 PF: > { %s13_s16 = sadd.s32 1, %s946_s16   ;;  %s1151_s12 = smov %s934_s13 }
 0x144   : > { %p10_p10 = scmp.ge.s32.totalorder %s13_s16, 4   ;;  %s1152_s13 = smov %s1003_s20 }
 0x145   : > { %s1153_s14 = smov %s942_s15  ;;  %s1154_s15 = smov %s1156_s17 }
 0x146   :  { %12 = sbr.rel (!%p10_p10) target bundleno = 3 (0x3), region = 111 }

// kernel: linearization_net.41
= control target key start
LH: loop header
LB: loop body
LE: loop exit
PB: predicated region body
PF: predicated region fallthrough
CT: control target
= control target key end

     0   :  { %vm229_vm0 = vcmask 89088   ;;  %s600_s1 = inlined_call_operand.vmem [shape: f32[512,11], index: 1, kind: input, shape index: {}]   ;;  %s601_s0 = inlined_call_operand.vmem [shape: f32[8,512], index: 0, kind: input, shape index: {}]   ;;  %s602_s2 = inlined_call_operand.vmem [shape: f32[1,11], index: 2, kind: input, shape index: {}]   ;;  %s603_s3 = inlined_call_operand.vmem [shape: f32[8,11], index: 3, kind: output, shape index: {}]  }
   0x1   :  { %v34_v0 = vld [vmem:[%s600_s1 + $0x80] sm:$0xff]  ;;  %v35_v1 = vld [vmem:[%s600_s1 + $0x88] sm:$0xff]  ;;  %v36_v11 = vld [vmem:[%s600_s1 + $0x90] sm:$0xff] }
   0x2   :  { %v18_v2 = vld [vmem:[%s600_s1] sm:$0xff]  ;;  %v306_v3 = vpack.c.bf16 %v35_v1, %v34_v0  ;;  %v19_v4 = vld [vmem:[%s600_s1 + $0x8] sm:$0xff]  ;;  %v37_v13 = vld [vmem:[%s600_s1 + $0x98] sm:$0xff] }
   0x3   :  { %v66_v5 = vld [vmem:[%s600_s1 + $0x180] sm:$0xff]  ;;  %v67_v6 = vld [vmem:[%s600_s1 + $0x188] sm:$0xff]  ;;  %v308_v7 = vpack.c.bf16 %v19_v4, %v18_v2  ;;  %v20_v14 = vld [vmem:[%s600_s1 + $0x10] sm:$0xff]  ;;  %v310_v16 = vpack.c.bf16 %v37_v13, %v36_v11 }
   0x4   :  { %v338_v8 = vpack.c.bf16 %v67_v6, %v66_v5  ;;  %v50_v9 = vld [vmem:[%s600_s1 + $0x100] sm:$0xff]  ;;  %v51_v10 = vld [vmem:[%s600_s1 + $0x108] sm:$0xff]  ;;  %307 = vmatprep.subr.bf16.mxu0 %v306_v3  ;;  %v21_v15 = vld [vmem:[%s600_s1 + $0x18] sm:$0xff] }
   0x5   :  { %v340_v12 = vpack.c.bf16 %v51_v10, %v50_v9  ;;  %309 = vmatpush3.bf16.msra.mxu0 %v308_v7  ;;  %v312_v17 = vpack.c.bf16 %v21_v15, %v20_v14  ;;  %v68_v18 = vld [vmem:[%s600_s1 + $0x190] sm:$0xff]  ;;  %v69_v19 = vld [vmem:[%s600_s1 + $0x198] sm:$0xff]  ;;  %v38_v23 = vld [vmem:[%s600_s1 + $0xa0] sm:$0xff] }
   0x6   :  { %339 = vmatprep.subr.bf16.mxu1 %v338_v8  ;;  %v52_v20 = vld [vmem:[%s600_s1 + $0x110] sm:$0xff]  ;;  %v342_v21 = vpack.c.bf16 %v69_v19, %v68_v18  ;;  %v53_v22 = vld [vmem:[%s600_s1 + $0x118] sm:$0xff]  ;;  %v39_v24 = vld [vmem:[%s600_s1 + $0xa8] sm:$0xff]  ;;  %311 = vmatprep.subr.bf16.mxu0 %v310_v16 }
   0x7   :  { %341 = vmatpush3.bf16.msra.mxu1 %v340_v12  ;;  %v344_v25 = vpack.c.bf16 %v53_v22, %v52_v20  ;;  %v314_v26 = vpack.c.bf16 %v39_v24, %v38_v23  ;;  %v22_v27 = vld [vmem:[%s600_s1 + $0x20] sm:$0xff]  ;;  %v23_v28 = vld [vmem:[%s600_s1 + $0x28] sm:$0xff]  ;;  %v40_v35 = vld [vmem:[%s600_s1 + $0xb0] sm:$0xff] }
   0x8   :  { %v70_v29 = vld [vmem:[%s600_s1 + $0x1a0] sm:$0xff]  ;;  %343 = vmatprep.subr.bf16.mxu1 %v342_v21  ;;  %v71_v30 = vld [vmem:[%s600_s1 + $0x1a8] sm:$0xff]  ;;  %v316_v33 = vpack.c.bf16 %v23_v28, %v22_v27  ;;  %v41_v36 = vld [vmem:[%s600_s1 + $0xb8] sm:$0xff] }
   0x9   :  { %v54_v31 = vld [vmem:[%s600_s1 + $0x120] sm:$0xff]  ;;  %v55_v32 = vld [vmem:[%s600_s1 + $0x128] sm:$0xff]  ;;  %313 = vmatpush3.bf16.msra.mxu0 %v312_v17  ;;  %v346_v34 = vpack.c.bf16 %v71_v30, %v70_v29  ;;  %v24_v37 = vld [vmem:[%s600_s1 + $0x30] sm:$0xff]  ;;  %v318_v39 = vpack.c.bf16 %v41_v36, %v40_v35 }
   0xa   :  { %315 = vmatprep.subr.bf16.mxu0 %v314_v26  ;;  %v348_v38 = vpack.c.bf16 %v55_v32, %v54_v31  ;;  %v25_v40 = vld [vmem:[%s600_s1 + $0x38] sm:$0xff]  ;;  %v72_v41 = vld [vmem:[%s600_s1 + $0x1b0] sm:$0xff]  ;;  %v42_v46 = vld [vmem:[%s600_s1 + $0xc0] sm:$0xff] }
   0xb   :  { %345 = vmatpush3.bf16.msra.mxu1 %v344_v25  ;;  %v73_v42 = vld [vmem:[%s600_s1 + $0x1b8] sm:$0xff]  ;;  %v56_v44 = vld [vmem:[%s600_s1 + $0x130] sm:$0xff]  ;;  %v43_v47 = vld [vmem:[%s600_s1 + $0xc8] sm:$0xff]  ;;  %v320_v48 = vpack.c.bf16 %v25_v40, %v24_v37 }
   0xc   :  { %347 = vmatprep.subr.bf16.mxu1 %v346_v34  ;;  %v350_v43 = vpack.c.bf16 %v73_v42, %v72_v41  ;;  %v57_v45 = vld [vmem:[%s600_s1 + $0x138] sm:$0xff]  ;;  %v74_v49 = vld [vmem:[%s600_s1 + $0x1c0] sm:$0xff]  ;;  %v75_v50 = vld [vmem:[%s600_s1 + $0x1c8] sm:$0xff]  ;;  %v322_v52 = vpack.c.bf16 %v43_v47, %v42_v46 }
   0xd   :  { %317 = vmatpush3.bf16.msra.mxu0 %v316_v33  ;;  %v352_v51 = vpack.c.bf16 %v57_v45, %v56_v44  ;;  %v26_v53 = vld [vmem:[%s600_s1 + $0x40] sm:$0xff]  ;;  %v27_v54 = vld [vmem:[%s600_s1 + $0x48] sm:$0xff]  ;;  %v354_v56 = vpack.c.bf16 %v75_v50, %v74_v49  ;;  %v44_v58 = vld [vmem:[%s600_s1 + $0xd0] sm:$0xff] }
   0xe   :  { %319 = vmatprep.subr.bf16.mxu0 %v318_v39  ;;  %v58_v55 = vld [vmem:[%s600_s1 + $0x140] sm:$0xff]  ;;  %v59_v57 = vld [vmem:[%s600_s1 + $0x148] sm:$0xff]  ;;  %v45_v59 = vld [vmem:[%s600_s1 + $0xd8] sm:$0xff]  ;;  %v324_v62 = vpack.c.bf16 %v27_v54, %v26_v53 }
   0xf   :  { %349 = vmatpush3.bf16.msra.mxu1 %v348_v38  ;;  %v76_v60 = vld [vmem:[%s600_s1 + $0x1d0] sm:$0xff]  ;;  %v77_v61 = vld [vmem:[%s600_s1 + $0x1d8] sm:$0xff]  ;;  %v356_v63 = vpack.c.bf16 %v59_v57, %v58_v55  ;;  %v326_v0 = vpack.c.bf16 %v45_v59, %v44_v58  ;;  %v46_v6 = vld [vmem:[%s600_s1 + $0xe0] sm:$0xff] }
  0x10   :  { %351 = vmatprep.subr.bf16.mxu1 %v350_v43  ;;  %v28_v1 = vld [vmem:[%s600_s1 + $0x50] sm:$0xff]  ;;  %v29_v2 = vld [vmem:[%s600_s1 + $0x58] sm:$0xff]  ;;  %v358_v4 = vpack.c.bf16 %v77_v61, %v76_v60  ;;  %v47_v7 = vld [vmem:[%s600_s1 + $0xe8] sm:$0xff] }
  0x11   :  { %321 = vmatpush3.bf16.msra.mxu0 %v320_v48  ;;  %v60_v3 = vld [vmem:[%s600_s1 + $0x150] sm:$0xff]  ;;  %v61_v5 = vld [vmem:[%s600_s1 + $0x158] sm:$0xff]  ;;  %v78_v8 = vld [vmem:[%s600_s1 + $0x1e0] sm:$0xff]  ;;  %v328_v10 = vpack.c.bf16 %v29_v2, %v28_v1  ;;  %v330_v14 = vpack.c.bf16 %v47_v7, %v46_v6 }
  0x12   :  { %323 = vmatprep.subr.bf16.mxu0 %v322_v52  ;;  %v79_v9 = vld [vmem:[%s600_s1 + $0x1e8] sm:$0xff]  ;;  %v30_v11 = vld [vmem:[%s600_s1 + $0x60] sm:$0xff]  ;;  %v360_v13 = vpack.c.bf16 %v61_v5, %v60_v3  ;;  %v48_v19 = vld [vmem:[%s600_s1 + $0xf0] sm:$0xff] }
  0x13   :  { %353 = vmatpush3.bf16.msra.mxu1 %v352_v51  ;;  %v31_v12 = vld [vmem:[%s600_s1 + $0x68] sm:$0xff]  ;;  %v62_v15 = vld [vmem:[%s600_s1 + $0x160] sm:$0xff]  ;;  %v362_v18 = vpack.c.bf16 %v79_v9, %v78_v8  ;;  %v49_v20 = vld [vmem:[%s600_s1 + $0xf8] sm:$0xff] }
  0x14   :  { %355 = vmatprep.subr.bf16.mxu1 %v354_v56  ;;  %v63_v16 = vld [vmem:[%s600_s1 + $0x168] sm:$0xff]  ;;  %v17_v21 = vld [vmem:[%s601_s0 + $0x18] sm:$0xff]  ;;  %v80_v22 = vld [vmem:[%s600_s1 + $0x1f0] sm:$0xff]  ;;  %v332_v24 = vpack.c.bf16 %v31_v12, %v30_v11  ;;  %v334_v26 = vpack.c.bf16 %v49_v20, %v48_v19 }
  0x15   :  { %325 = vmatpush3.bf16.msra.mxu0 %v324_v62  ;;  %v15_v17 = vld [vmem:[%s601_s0 + $0x8] sm:$0xff]  ;;  %v81_v23 = vld [vmem:[%s600_s1 + $0x1f8] sm:$0xff]  ;;  %223 = vmatprep.mubr.f32.mxu1 %v17_v21  ;;  %v364_v25 = vpack.c.bf16 %v63_v16, %v62_v15  ;;  %v32_v27 = vld [vmem:[%s600_s1 + $0x70] sm:$0xff] }
  0x16   :  { %327 = vmatprep.subr.bf16.mxu0 %v326_v0  ;;  %153 = vmatprep.mubr.f32.mxu0 %v15_v17  ;;  %v33_v28 = vld [vmem:[%s600_s1 + $0x78] sm:$0xff]  ;;  %v366_v29 = vpack.c.bf16 %v81_v23, %v80_v22  ;;  %v64_v30 = vld [vmem:[%s600_s1 + $0x170] sm:$0xff]  ;;  %v14_v34 = vld [vmem:[%s601_s0] sm:$0xff] }
  0x17   :  { %357 = vmatpush3.bf16.msra.mxu1 %v356_v63  ;;  %v65_v31 = vld [vmem:[%s600_s1 + $0x178] sm:$0xff]  ;;  %v336_v32 = vpack.c.bf16 %v33_v28, %v32_v27  ;;  %v16_v35 = vld [vmem:[%s601_s0 + $0x10] sm:$0xff]  ;;  %v235_v37 = vld [vmem:[%s602_s2] ss:$0 sm:$0xff] }
  0x18   :  { %359 = vmatprep.subr.bf16.mxu1 %v358_v4  ;;  %v368_v33 = vpack.c.bf16 %v65_v31, %v64_v30 }
  0x19   :  { %329 = vmatpush3.bf16.msra.mxu0 %v328_v10 }
  0x1a   :  { %331 = vmatprep.subr.bf16.mxu0 %v330_v14 }
  0x1b   :  { %361 = vmatpush3.bf16.msra.mxu1 %v360_v13 }
  0x1c   :  { %363 = vmatprep.subr.bf16.mxu1 %v362_v18 }
  0x1d   :  { %333 = vmatpush3.bf16.msra.mxu0 %v332_v24 }
  0x1e   :  { %335 = vmatprep.subr.bf16.mxu0 %v334_v26 }
  0x1f   :  { %365 = vmatpush3.bf16.msra.mxu1 %v364_v25 }
  0x20   :  { %367 = vmatprep.subr.bf16.mxu1 %v366_v29 }
  0x21   :  { %337 = vmatpush3.bf16.msra.mxu0 %v336_v32 }
  0x23   :  { %369 = vmatpush3.bf16.msra.mxu1 %v368_v33 }
  0x24   :  { %154 = vmatmul.mubr.f32.vlgmr.msra.gmra.mrb[0].mxu0 %v14_v34 }
  0x26   :  { %224 = vmatmul.mubr.f32.vlgmr.msra.gmra.mrb[0].mxu1 %v16_v35 }
  0xf7   :  { %v268_v36 = vpop.f32.mrb[0].mxu0 }
  0xf8   :  { %v269_v38 = vpop.f32.mrb[1].mxu0 }
  0xf9   :  { %v303_v39 = vpop.f32.mrb[0].mxu1  ;;  %v270_v40 = vadd.f32 %v269_v38, %v268_v36 }
  0xfa   :  { %v304_v41 = vpop.f32.mrb[1].mxu1 }
  0xfb   :  { %v305_v42 = vadd.f32 %v304_v41, %v303_v39  ;;  %v156_v43 = vadd.f32 %v270_v40, %v235_v37 }
  0xfd   :  { %v226_v44 = vadd.f32 %v305_v42, %v156_v43 }
  0xff   :  { %230 = vst.msk [vmem:[%s603_s3] sm:$0xff] %vm229_vm0, %v226_v44 }

// kernel: linearization_net.38
= control target key start
LH: loop header
LB: loop body
LE: loop exit
PB: predicated region body
PF: predicated region fallthrough
CT: control target
= control target key end

     0   :  { %s626_s1 = inlined_call_operand.vmem [shape: bf16[512,128], index: 1, kind: input, shape index: {}]   ;;  %s627_s0 = inlined_call_operand.vmem [shape: bf16[8,512], index: 0, kind: input, shape index: {}]   ;;  %s628_s2 = inlined_call_operand.vmem [shape: f32[1,128], index: 2, kind: input, shape index: {}]   ;;  %s629_s3 = inlined_call_operand.vmem [shape: bf16[8,128], index: 3, kind: output, shape index: {}]  }
   0x1   :  { %v462_v0 = vld [vmem:[%s626_s1 + $0x40] sm:$0xff]   ;;  %v466_v4 = vld [vmem:[%s626_s1 + $0x48] sm:$0xff]   ;;  %v470_v8 = vld [vmem:[%s626_s1 + $0x50] sm:$0xff]  }
   0x2   :  { %v463_v1 = vld [vmem:[%s626_s1 + $0xc0] sm:$0xff]   ;;  %418 = vmatprep.subr.bf16.mxu0 %v462_v0  ;;  %v467_v5 = vld [vmem:[%s626_s1 + $0xc8] sm:$0xff]   ;;  %v471_v9 = vld [vmem:[%s626_s1 + $0xd0] sm:$0xff]  }
   0x3   :  { %v464_v2 = vld [vmem:[%s626_s1] sm:$0xff]   ;;  %440 = vmatprep.subr.bf16.mxu1 %v463_v1  ;;  %v468_v6 = vld [vmem:[%s626_s1 + $0x8] sm:$0xff]   ;;  %v472_v10 = vld [vmem:[%s626_s1 + $0x10] sm:$0xff]  }
   0x4   :  { %v465_v3 = vld [vmem:[%s626_s1 + $0x80] sm:$0xff]   ;;  %419 = vmatpush3.bf16.msra.mxu0 %v464_v2  ;;  %v469_v7 = vld [vmem:[%s626_s1 + $0x88] sm:$0xff]   ;;  %v473_v11 = vld [vmem:[%s626_s1 + $0x90] sm:$0xff]  }
   0x5   :  { %441 = vmatpush3.bf16.msra.mxu1 %v465_v3  ;;  %420 = vmatprep.subr.bf16.mxu0 %v466_v4  ;;  %v474_v12 = vld [vmem:[%s626_s1 + $0x58] sm:$0xff]   ;;  %v478_v16 = vld [vmem:[%s626_s1 + $0x60] sm:$0xff]   ;;  %v482_v20 = vld [vmem:[%s626_s1 + $0x68] sm:$0xff]  }
   0x6   :  { %442 = vmatprep.subr.bf16.mxu1 %v467_v5  ;;  %v475_v13 = vld [vmem:[%s626_s1 + $0xd8] sm:$0xff]   ;;  %v479_v17 = vld [vmem:[%s626_s1 + $0xe0] sm:$0xff]   ;;  %v483_v21 = vld [vmem:[%s626_s1 + $0xe8] sm:$0xff]  }
   0x7   :  { %v476_v14 = vld [vmem:[%s626_s1 + $0x18] sm:$0xff]   ;;  %v480_v18 = vld [vmem:[%s626_s1 + $0x20] sm:$0xff]   ;;  %v484_v22 = vld [vmem:[%s626_s1 + $0x28] sm:$0xff]  }
   0x8   :  { %421 = vmatpush3.bf16.msra.mxu0 %v468_v6  ;;  %v477_v15 = vld [vmem:[%s626_s1 + $0x98] sm:$0xff]   ;;  %v481_v19 = vld [vmem:[%s626_s1 + $0xa0] sm:$0xff]   ;;  %v485_v23 = vld [vmem:[%s626_s1 + $0xa8] sm:$0xff]  }
   0x9   :  { %443 = vmatpush3.bf16.msra.mxu1 %v469_v7  ;;  %422 = vmatprep.subr.bf16.mxu0 %v470_v8  ;;  %v486_v24 = vld [vmem:[%s626_s1 + $0x70] sm:$0xff]   ;;  %v490_v28 = vld [vmem:[%s626_s1 + $0x78] sm:$0xff]   ;;  %v15_v32 = vld [vmem:[%s627_s0] sm:$0xff] }
   0xa   :  { %444 = vmatprep.subr.bf16.mxu1 %v471_v9  ;;  %v487_v25 = vld [vmem:[%s626_s1 + $0xf0] sm:$0xff]   ;;  %v491_v29 = vld [vmem:[%s626_s1 + $0xf8] sm:$0xff]   ;;  %v16_v33 = vld [vmem:[%s627_s0 + $0x8] sm:$0xff]  ;;  %v382_v34 = vcombine.low %v15_v32, %v15_v32  ;;  %v383_v35 = vcombine.high %v15_v32, %v15_v32 }
   0xb   :  { %v488_v26 = vld [vmem:[%s626_s1 + $0x30] sm:$0xff]   ;;  %v492_v30 = vld [vmem:[%s626_s1 + $0x38] sm:$0xff]   ;;  %v384_v36 = vcombine.low %v16_v33, %v16_v33  ;;  %v385_v37 = vcombine.high %v16_v33, %v16_v33  ;;  %v381_v40 = vld [vmem:[%s628_s2] ss:$0 sm:$0xff] }
   0xc   :  { %423 = vmatpush3.bf16.msra.mxu0 %v472_v10  ;;  %v489_v27 = vld [vmem:[%s626_s1 + $0xb0] sm:$0xff]   ;;  %v493_v31 = vld [vmem:[%s626_s1 + $0xb8] sm:$0xff]   ;;  %326 = vmatprep.mubr.bf16.mxu0 %v383_v35 }
   0xd   :  { %445 = vmatpush3.bf16.msra.mxu1 %v473_v11  ;;  %424 = vmatprep.subr.bf16.mxu0 %v474_v12 }
   0xe   :  { %446 = vmatprep.subr.bf16.mxu1 %v475_v13  ;;  %366 = vmatprep.mubr.bf16.mxu1 %v385_v37 }
  0x10   :  { %425 = vmatpush3.bf16.msra.mxu0 %v476_v14 }
  0x11   :  { %447 = vmatpush3.bf16.msra.mxu1 %v477_v15  ;;  %426 = vmatprep.subr.bf16.mxu0 %v478_v16 }
  0x12   :  { %448 = vmatprep.subr.bf16.mxu1 %v479_v17 }
  0x14   :  { %427 = vmatpush3.bf16.msra.mxu0 %v480_v18 }
  0x15   :  { %449 = vmatpush3.bf16.msra.mxu1 %v481_v19  ;;  %428 = vmatprep.subr.bf16.mxu0 %v482_v20 }
  0x16   :  { %450 = vmatprep.subr.bf16.mxu1 %v483_v21 }
  0x18   :  { %429 = vmatpush3.bf16.msra.mxu0 %v484_v22 }
  0x19   :  { %451 = vmatpush3.bf16.msra.mxu1 %v485_v23  ;;  %430 = vmatprep.subr.bf16.mxu0 %v486_v24 }
  0x1a   :  { %452 = vmatprep.subr.bf16.mxu1 %v487_v25 }
  0x1c   :  { %431 = vmatpush3.bf16.msra.mxu0 %v488_v26 }
  0x1d   :  { %453 = vmatpush3.bf16.msra.mxu1 %v489_v27  ;;  %432 = vmatprep.subr.bf16.mxu0 %v490_v28 }
  0x1e   :  { %454 = vmatprep.subr.bf16.mxu1 %v491_v29 }
  0x20   :  { %433 = vmatpush3.bf16.msra.mxu0 %v492_v30 }
  0x21   :  { %455 = vmatpush3.bf16.msra.mxu1 %v493_v31 }
  0x23   :  { %327 = vmatmul.mubr.bf16.vlgmr.msra.gmra.mrb[0].mxu0 %v382_v34 }
  0x24   :  { %367 = vmatmul.mubr.bf16.vlgmr.msra.gmra.mrb[0].mxu1 %v384_v36 }
  0xf6   :  { %v434_v38 = vpop.f32.mrb[0].mxu0 }
  0xf7   :  { %v456_v39 = vpop.f32.mrb[0].mxu1  ;;  %v435_v41 = vpop.f32.mrb[1].mxu0 }
  0xf8   :  { %v457_v42 = vpop.f32.mrb[1].mxu1  ;;  %v436_v43 = vadd.f32 %v435_v41, %v434_v38  ;;  %v437_v45 = vpop.f32.mrb[2].mxu0 }
  0xf9   :  { %v458_v44 = vadd.f32 %v457_v42, %v456_v39  ;;  %v459_v46 = vpop.f32.mrb[2].mxu1  ;;  %v438_v47 = vpop.f32.mrb[3].mxu0 }
  0xfa   :  { %v460_v48 = vpop.f32.mrb[3].mxu1  ;;  %v329_v49 = vadd.f32 %v436_v43, %v381_v40 }
  0xfc   :  { %v369_v50 = vadd.f32 %v458_v44, %v329_v49 }
  0xfe   :  { %v374_v51 = vmax.f32 %v369_v50, 0.0 }
 0x100   :  { %v375_v52 = vpack.c.bf16 %v374_v51, %v374_v51 }
 0x102   :  { %376 = vst [vmem:[%s629_s3] sm:$0xf] %v375_v52 }

// kernel: linearization_net.42
= control target key start
LH: loop header
LB: loop body
LE: loop exit
PB: predicated region body
PF: predicated region fallthrough
CT: control target
= control target key end

     0   :  { %s598_s12 = smov 0   ;;  %s600_s13 = smov 0   ;;  %s669_s0 = inlined_call_operand.vmem [shape: f32[8,11], index: 0, kind: input, shape index: {}]   ;;  %s670_s1 = inlined_call_operand.vmem [shape: f32[11,1024], index: 1, kind: input, shape index: {}]   ;;  %s671_s2 = inlined_call_operand.vmem [shape: f32[1,1024], index: 2, kind: input, shape index: {}]   ;;  %s672_s3 = inlined_call_operand.vmem [shape: f32[8,1024], index: 3, kind: output, shape index: {}]  }
   0x1   :  { %s602_s14 = smov 0   ;;  %s604_s15 = smov 0  }
   0x2   :  { %s606_s16 = smov 0  }
   0x3 LB: > { %s22_s17 = sadd.s32 1, %s570_s15  ;;  %p65_p1 = scmp.ne.s32.totalorder %s562_s13, %s558_s12  ;;  %s574_s16 = sphi %s606_s16, %s13_s16   ;;  %s570_s15 = sphi %s604_s15, %s676_s15   ;;  %s566_s14 = sphi %s602_s14, %s675_s14   ;;  %s562_s13 = sphi %s600_s13, %s674_s13   ;;  %s558_s12 = sphi %s598_s12, %s673_s12  }
   0x4   : > { %p23_p0 = scmp.ge.s32.totalorder %s22_s17, 4  ;;  %p66_p2 = scmp.eq.s32.totalorder %s574_s16, 0 }
   0x5   : > { %s58_s19 = sadd.s32 1, %s562_s13  ;;  %p473_p5 = scmp.ge.s32.totalorder %s574_s16, 4 }
   0x6   : > { %s678_s17 = smov (%p23_p0, %s22_s17), 0  ;;  %p67_p3 = por %p66_p2, %p65_p1 }
   0x7   : > { %s55_s18 = ssub.s32 %s570_s15, %s678_s17  ;;  %152 = sbr.rel (%p473_p5) target bundleno = 21 (0x15), region = 20 }
   0x8   : > { %p56_p4 = scmp.eq.s32.totalorder %s55_s18, 0 }
   0xa   : > { %s633_s20 = scalar_select %p56_p4, %s562_s13, %s58_s19  }
   0xe   : > { %155 = sbr.rel (!%p67_p3) target bundleno = 21 (0x15), region = 24  ;;  %s157_s21 = sand.u32 (%p67_p3), 1, %s562_s13  }
   0xf   : > { %s487_s22 = sshll.u32 (%p67_p3), %s570_s15, 4  ;;  %s474_s23 = sshll.u32 (%p67_p3), %s157_s21, 5 }
  0x10   : > { %s162_s26 = scalar_lea.vmem (%p67_p3), %s670_s1, %s487_s22  ;;  %s159_s27 = scalar_lea.vmem (%p67_p3), [#allocation2], %s474_s23 }
  0x11   : > { %v175_v0 = vld [vmem:[%s162_s26] sm:$0xff] (%p67_p3)  ;;  %v177_v1 = vld [vmem:[%s162_s26 + $0x8] sm:$0xff] (%p67_p3) }
  0x12   : > { %v179_v2 = vld [vmem:[%s162_s26 + $0x40] sm:$0xff] (%p67_p3)  ;;  %176 = vst [vmem:[%s159_s27] sm:$0xff] (%p67_p3), %v175_v0  ;;  %178 = vst [vmem:[%s159_s27 + $0x8] sm:$0xff] (%p67_p3), %v177_v1  ;;  %v181_v3 = vld [vmem:[%s162_s26 + $0x48] sm:$0xff] (%p67_p3) }
  0x13   : > { %180 = vst [vmem:[%s159_s27 + $0x10] sm:$0xff] (%p67_p3), %v179_v2  ;;  %182 = vst [vmem:[%s159_s27 + $0x18] sm:$0xff] (%p67_p3), %v181_v3 }
  0x15 PF: > { %p477_p6 = scmp.ge.s32.totalorder %s574_s16, 1  ;;  %p195_p7 = scmp.lt.s32.totalorder %s574_s16, 5 }
  0x17   : > { %p196_p8 = pnand %p477_p6, %p195_p7 }
  0x18   : > { %s202_s28 = sand.u32 (!%p196_p8), 1, %s558_s12   ;;  %vm278_vm0 = vcmask (!%p196_p8), 1042432   ;;  %v576_v4 = vmov (!%p196_p8), 0.0   ;;  %vm577_vm1 = vmmov (!%p196_p8), 1   ;;  %v257_v11 = vld [vmem:[%s669_s0] sm:$0xff] (!%p196_p8)  ;;  %vm274_vm3 = vcmask (!%p196_p8), 89088  }
  0x19   : > { %199 = sbr.rel (%p196_p8) target bundleno = 250 (0xfa), region = 51  ;;  %s478_s29 = sshll.u32 (!%p196_p8), %s202_s28, 5  ;;  %349 = vmatprep.mubr.f32.mxu0 (!%p196_p8), %v576_v4  ;;  %vm489_vm2 = vmpackc.low (!%p196_p8), %vm278_vm0, %vm577_vm1  ;;  %v264_v12 = vlaneseq (!%p196_p8) }
  0x1a   : > { %s204_s30 = scalar_lea.vmem (!%p196_p8), [#allocation2], %s478_s29  ;;  %s479_s6 = sshll.u32 (!%p196_p8), %s566_s14, 1 }
  0x1b   : > { %v259_v5 = vld [vmem:[%s204_s30 + $0x8] sm:$0xff] (!%p196_p8)  ;;  %v261_v6 = vld [vmem:[%s204_s30 + $0x18] sm:$0x7] (!%p196_p8)  ;;  %v258_v7 = vld [vmem:[%s204_s30] sm:$0xff] (!%p196_p8)  ;;  %p243_p9 = scmp.lt.s32.totalorder (!%p196_p8), %s479_s6, 7  ;;  %v265_v13 = vshrl.u32 (!%p196_p8), %v264_v12, 7 }
  0x1c   : > { %v488_v8 = vpack.c.bf16 (!%p196_p8), %v261_v6, %v259_v5  ;;  %v260_v9 = vld [vmem:[%s204_s30 + $0x10] sm:$0x7] (!%p196_p8) }
  0x1d   : > { %v491_v10 = vpack.c.bf16 (!%p196_p8), %v260_v9, %v258_v7  ;;  %v266_v14 = vsub.s32 (!%p196_p8), 0, %v265_v13  ;;  %v270_v16 = vsub.s32 (!%p196_p8), 1, %v265_v13 }
  0x1e   : > { %490 = vmatprep.subr.msk.bf16.mxu0 (!%p196_p8), %vm489_vm2, %v488_v8 }
  0x1f   : > { %493 = vmatpush1.bf16.msk.msra.mxu0 (!%p196_p8), %vm489_vm2, %v491_v10 }
  0x20   : > { %s680_s6 = smov (!%p243_p9, %s479_s6), 7 }
  0x21   : > { %s245_s9 = scalar_lea.vmem %s671_s2, %s680_s6  ;;  %s481_s10 = sshll.u32 %s680_s6, 3 }
  0x22   : > { %484 = vmatmul.mubr.msk.f32.vlgmr.msra.gmra.mrb[0].mxu0 %vm274_vm3, %v257_v11  ;;  %v262_v15 = vld [vmem:[%s245_s9] sm:$0x3]  ;;  %s255_s18 = scalar_lea.vmem %s672_s3, %s481_s10 }
  0x23   : > { %v267_v17 = vrot.slane %v262_v15, %v266_v14  ;;  %v271_v18 = vrot.slane %v262_v15, %v270_v16 }
  0xf5   : > { %v351_v19 = vpop.f32.mrb[0].mxu0 }
  0xf6   : > { %v352_v20 = vadd.f32 %v351_v19, %v267_v17  ;;  %v353_v21 = vpop.f32.mrb[1].mxu0 }
  0xf7   : > { %v354_v22 = vadd.f32 %v353_v21, %v271_v18 }
  0xf8   : > { %356 = vst [vmem:[%s255_s18] sm:$0xff] %v352_v20 }
  0xf9   : > { %357 = vst [vmem:[%s255_s18 + $0x8] sm:$0xff] %v354_v22 }
  0xfa PF: > { %s13_s16 = sadd.s32 1, %s574_s16   ;;  %s673_s12 = smov %s562_s13 }
  0xfb   : > { %p10_p10 = scmp.ge.s32.totalorder %s13_s16, 6   ;;  %s674_s13 = smov %s633_s20 }
  0xfc   : > { %s675_s14 = smov %s570_s15  ;;  %s676_s15 = smov %s678_s17 }
  0xfd   :  { %12 = sbr.rel (!%p10_p10) target bundleno = 3 (0x3), region = 96 }

// kernel: linearization_net.43
= control target key start
LH: loop header
LB: loop body
LE: loop exit
PB: predicated region body
PF: predicated region fallthrough
CT: control target
= control target key end

     0   :  { %v11_v1 = vlaneseq  ;;  %v721_v3 = vmov 1983009808   ;;  %s973_s0 = inlined_call_operand.vmem [shape: f32[2,1024], index: 0, kind: input, shape index: {}]   ;;  %s974_s1 = inlined_call_operand.hbm [shape: f32[2,1024], index: 1, kind: output, shape index: {}]  }
   0x1   :  { %v9_v0 = vld [vmem:[%s973_s0] sm:$0xff]  ;;  %v10_v2 = vld [vmem:[%s973_s0 + $0x8] sm:$0xff]  ;;  %v24_v4 = vunpack.c.l.s4 %v721_v3 }
   0x2   :  { %6 = vsyncpa [#allocation3], 0  ;;  %v27_v5 = vshrl.u32 %v11_v1, 7  ;;  %v22_v7 = vcombine.high %v9_v0, %v9_v0  ;;  %v39_v8 = vcombine.high %v10_v2, %v10_v2  ;;  %s722_s10 = smov 127   ;;  %v753_v18 = vand.u32 127, %v11_v1  ;;  %s723_s0 = smov 1  }
   0x3   :  { %v25_v6 = vunpack.c.0.s8 %v24_v4  ;;  %vm113_vm2 = vcmask 1041408   ;;  %s724_s11 = smov 2   ;;  %s725_s12 = smov 4  }
   0x4   :  { %vm80_vm0 = vcmp.lt.s32.totalorder %v753_v18, 127  ;;  %v19_v23 = vadd.s32 896, %v753_v18  ;;  %vm200_vm3 = vcmp.lt.s32.totalorder %v753_v18, 1  ;;  %vm176_vm4 = vcmp.ge.s32.totalorder %v753_v18, 1  ;;  %s726_s13 = smov 8   ;;  %s727_s14 = smov 16  }
   0x5   :  { %v747_v9 = vsub.s32 %v25_v6, %v27_v5  ;;  %vm281_vm5 = vcmp.lt.s32.totalorder %v753_v18, 2  ;;  %vm257_vm6 = vcmp.ge.s32.totalorder %v753_v18, 2  ;;  %vm330_vm7 = vcmp.lt.s32.totalorder %v753_v18, 4  ;;  %s728_s15 = smov 32   ;;  %s729_s16 = smov 64  }
   0x6   :  { %vm104_vm1 = vcmp.lt.s32.totalorder %v19_v23, 1023  ;;  %vm306_vm8 = vcmp.ge.s32.totalorder %v753_v18, 4  ;;  %vm379_vm9 = vcmp.lt.s32.totalorder %v753_v18, 8  ;;  %vm355_vm10 = vcmp.ge.s32.totalorder %v753_v18, 8  ;;  %s730_s17 = smov [#allocation2]  }
   0x7   :  { %v29_v10 = vrot.slane %v9_v0, %v747_v9  ;;  %v36_v11 = vrot.slane %v22_v7, %v747_v9  ;;  %v53_v12 = vrot.slane %v39_v8, %v747_v9  ;;  %v46_v14 = vrot.slane %v10_v2, %v747_v9  ;;  %s675_s18 = sshll.u32 %s730_s17, 4  ;;  %s676_s18 = int_to_ptr.vmem [resolvable:$true] %s675_s18 }
   0x8   :  { %vm428_vm11 = vcmp.lt.s32.totalorder %v753_v18, 16  ;;  %vm404_vm12 = vcmp.ge.s32.totalorder %v753_v18, 16  ;;  %vm477_vm13 = vcmp.lt.s32.totalorder %v753_v18, 32  ;;  %vm453_vm14 = vcmp.ge.s32.totalorder %v753_v18, 32  ;;  %s697_s19 = scalar_lea.vmem %s676_s18, 256  ;;  %p702_p1 = scmp.lt.s32.totalorder %s676_s18, %s676_s18 }
   0x9   :  { %64 = vrot.lane.b32.xlu0 %v29_v10, %s722_s10  ;;  %68 = vrot.lane.b32.xlu1 %v36_v11, %s722_s10  ;;  %v55_v13 = vcombine.high %v53_v12, %v53_v12  ;;  %v37_v15 = vcombine.high %v29_v10, %v29_v10  ;;  %v38_v16 = vcombine.high %v36_v11, %v36_v11  ;;  %vm526_vm15 = vcmp.lt.s32.totalorder %v753_v18, 64  ;;  %p698_p0 = scmp.ne.s32.totalorder %s676_s18, %s697_s19  ;;  %p703_p2 = scmp.lt.s32.totalorder %s697_s19, %s697_s19 }
   0xa   :  { %v54_v17 = vcombine.high %v46_v14, %v46_v14 }
   0xb   :  { %p704_p3 = por %p703_p2, %p702_p1 }
   0xd   :  { %78 = vrot.lane.b32.xlu0 %v55_v13, %s722_s10  ;;  %72 = vrot.lane.b32.xlu1 %v46_v14, %s722_s10  ;;  %p705_p4 = pnand %p704_p3, %p698_p0 }
  0x11   :  { %66 = vrot.lane.b32.xlu1 %v37_v15, %s722_s10  ;;  %70 = vrot.lane.b32.xlu0 %v38_v16, %s722_s10 }
  0x15   :  { %76 = vrot.lane.b32.xlu1 %v53_v12, %s722_s10  ;;  %74 = vrot.lane.b32.xlu0 %v54_v17, %s722_s10 }
  0x7b   :  { %v65_v19 = vpop.permute.xlu0 %64  ;;  %v69_v20 = vpop.permute.xlu1 %68 }
  0x7f   :  { %v79_v21 = vpop.permute.xlu0 %78  ;;  %v73_v22 = vpop.permute.xlu1 %72 }
  0x80   :  { %v88_v24 = vsel %vm80_vm0, %v79_v21, %v65_v19 }
  0x81   :  { %v96_v25 = vsub.f32 %v88_v24, %v55_v13 }
  0x83   :  { %v67_v26 = vpop.permute.xlu1 %66  ;;  %v71_v27 = vpop.permute.xlu0 %70  ;;  %v112_v35 = vsel %vm104_vm1, %v96_v25, inf }
  0x84   :  { %v86_v28 = vsel %vm80_vm0, %v67_v26, %v69_v20  ;;  %v87_v29 = vsel %vm80_vm0, %v65_v19, %v67_v26  ;;  %v84_v30 = vsel %vm80_vm0, %v71_v27, %v73_v22  ;;  %v85_v31 = vsel %vm80_vm0, %v69_v20, %v71_v27 }
  0x85   :  { %v92_v32 = vsub.f32 %v84_v30, %v38_v16  ;;  %v89_v33 = vsub.f32 %v87_v29, %v29_v10  ;;  %v90_v34 = vsub.f32 %v86_v28, %v37_v15  ;;  %v91_v36 = vsub.f32 %v85_v31, %v36_v11 }
  0x86   :  { %v124_v46 = vsel %vm113_vm2, %v112_v35, inf }
  0x87   :  { %v77_v37 = vpop.permute.xlu1 %76  ;;  %v75_v38 = vpop.permute.xlu0 %74  ;;  %v117_v42 = vsel %vm113_vm2, %v92_v32, inf  ;;  %v114_v47 = vsel %vm113_vm2, %v89_v33, inf  ;;  %v115_v48 = vsel %vm113_vm2, %v90_v34, inf  ;;  %v116_v49 = vsel %vm113_vm2, %v91_v36, inf }
  0x88   :  { %v81_v39 = vsel %vm80_vm0, %v77_v37, %v79_v21  ;;  %v82_v40 = vsel %vm80_vm0, %v75_v38, %v77_v37  ;;  %v83_v41 = vsel %vm80_vm0, %v73_v22, %v75_v38  ;;  %v125_v56 = vmin.f32 %v117_v42, %v124_v46 }
  0x89   :  { %v95_v43 = vsub.f32 %v81_v39, %v53_v12  ;;  %v93_v44 = vsub.f32 %v83_v41, %v46_v14  ;;  %v94_v45 = vsub.f32 %v82_v40, %v54_v17  ;;  %vm502_vm0 = vcmp.ge.s32.totalorder %v753_v18, 64 }
  0x8b   :  { %v122_v50 = vsel %vm113_vm2, %v95_v43, inf  ;;  %v118_v51 = vsel %vm113_vm2, %v93_v44, inf  ;;  %v120_v52 = vsel %vm113_vm2, %v94_v45, inf }
  0x8c   :  { %v119_v53 = vmin.f32 %v114_v47, %v118_v51  ;;  %v121_v54 = vmin.f32 %v115_v48, %v120_v52  ;;  %v123_v55 = vmin.f32 %v116_v49, %v122_v50 }
  0x8e   :  { %v126_v57 = vmin.f32 %v119_v53, %v121_v54  ;;  %v127_v58 = vmin.f32 %v123_v55, %v125_v56 }
  0x90   :  { %v128_v59 = vmin.f32 %v126_v57, %v127_v58 }
  0x92   :  { %129 = vmin.xlane.f32.xlu0 %v128_v59 }
 0x11f   :  { %v130_v60 = vpop.xlane.xlu0 %129 }
 0x120   :  { %v131_v61 = vsub.f32 0.0, %v130_v60 }
 0x122   :  { %v132_v62 = vmax.f32 %v131_v61, 0.0 }
 0x124   :  { %v133_v63 = vadd.f32 %v132_v62, %v89_v33  ;;  %v134_v0 = vadd.f32 %v132_v62, %v90_v34  ;;  %v135_v1 = vadd.f32 %v132_v62, %v91_v36  ;;  %v136_v2 = vadd.f32 %v132_v62, %v92_v32 }
 0x125   :  { %v137_v6 = vadd.f32 %v132_v62, %v93_v44  ;;  %v138_v10 = vadd.f32 %v132_v62, %v94_v45  ;;  %v140_v12 = vadd.f32 %v132_v62, %v96_v25  ;;  %v139_v14 = vadd.f32 %v132_v62, %v95_v43 }
 0x126   :  { %v149_v3 = vsel %vm113_vm2, %v133_v63, 0.0  ;;  %v150_v4 = vsel %vm113_vm2, %v134_v0, 0.0  ;;  %v152_v7 = vsel %vm113_vm2, %v135_v1, 0.0  ;;  %v154_v11 = vsel %vm113_vm2, %v136_v2, 0.0 }
 0x127   :  { %v151_v5 = vadd.f32 %v150_v4, %v149_v3  ;;  %v156_v15 = vsel %vm113_vm2, %v137_v6, 0.0  ;;  %v158_v17 = vsel %vm113_vm2, %v138_v10, 0.0  ;;  %v148_v19 = vsel %vm104_vm1, %v140_v12, 0.0 }
 0x128   :  { %v160_v21 = vsel %vm113_vm2, %v139_v14, 0.0  ;;  %v162_v24 = vsel %vm113_vm2, %v148_v19, 0.0 }
 0x129   :  { %v153_v8 = vadd.f32 %v152_v7, %v151_v5 }
 0x12b   :  { %v155_v13 = vadd.f32 %v154_v11, %v153_v8 }
 0x12d   :  { %v157_v16 = vadd.f32 %v156_v15, %v155_v13 }
 0x12f   :  { %v159_v20 = vadd.f32 %v158_v17, %v157_v16 }
 0x131   :  { %v161_v22 = vadd.f32 %v160_v21, %v159_v20 }
 0x133   :  { %v163_v26 = vadd.f32 %v162_v24, %v161_v22 }
 0x135   :  { %164 = vadd.xlane.f32.xlu1 %v163_v26 }
 0x1c2   :  { %v165_v27 = vpop.xlane.xlu1 %164 }
 0x1c3   :  { %v166_v28 = vadd.f32 1e-12, %v165_v27 }
 0x1c5   :  { %695 = vrcp.f32 %v166_v28 }
 0x1cf   :  { %v696_v25 = vpop.eup %695 }
 0x1d0   :  { %v175_v29 = vmul.f32 %v696_v25, %v148_v19  ;;  %v168_v30 = vmul.f32 %v696_v25, %v133_v63  ;;  %v173_v23 = vmul.f32 %v696_v25, %v138_v10  ;;  %v174_v31 = vmul.f32 %v696_v25, %v139_v14 }
 0x1d1   :  { %v171_v32 = vmul.f32 %v696_v25, %v136_v2  ;;  %v172_v33 = vmul.f32 %v696_v25, %v137_v6  ;;  %v169_v34 = vmul.f32 %v696_v25, %v134_v0  ;;  %v170_v35 = vmul.f32 %v696_v25, %v135_v1 }
 0x1d2   :  { %198 = vrot.lane.b32.xlu1 %v175_v29, %s723_s0  ;;  %184 = vrot.lane.b32.xlu0 %v168_v30, %s723_s0 }
 0x1d6   :  { %194 = vrot.lane.b32.xlu1 %v173_v23, %s723_s0  ;;  %196 = vrot.lane.b32.xlu0 %v174_v31, %s723_s0 }
 0x1da   :  { %190 = vrot.lane.b32.xlu1 %v171_v32, %s723_s0  ;;  %192 = vrot.lane.b32.xlu0 %v172_v33, %s723_s0 }
 0x1de   :  { %186 = vrot.lane.b32.xlu1 %v169_v34, %s723_s0  ;;  %188 = vrot.lane.b32.xlu0 %v170_v35, %s723_s0 }
 0x244   :  { %v199_v36 = vpop.permute.xlu1 %198  ;;  %v185_v37 = vpop.permute.xlu0 %184 }
 0x245   :  { %v208_v42 = vsel %vm200_vm3, %v199_v36, %v185_v37 }
 0x246   :  { %v209_v45 = vsel %vm176_vm4, %v208_v42, 0.0 }
 0x248   :  { %v195_v38 = vpop.permute.xlu1 %194  ;;  %v197_v39 = vpop.permute.xlu0 %196 }
 0x249   :  { %v202_v40 = vsel %vm200_vm3, %v195_v38, %v197_v39  ;;  %v201_v41 = vsel %vm200_vm3, %v197_v39, %v199_v36 }
 0x24a   :  { %229 = vrot.lane.b32.xlu0 %v202_v40, %s723_s0  ;;  %231 = vrot.lane.b32.xlu1 %v201_v41, %s723_s0 }
 0x24c   :  { %v191_v43 = vpop.permute.xlu1 %190  ;;  %v193_v44 = vpop.permute.xlu0 %192 }
 0x24d   :  { %v203_v46 = vsel %vm200_vm3, %v193_v44, %v195_v38  ;;  %v204_v48 = vsel %vm200_vm3, %v191_v43, %v193_v44 }
 0x24e   :  { %217 = vrot.lane.b32.xlu0 %v209_v45, %s723_s0  ;;  %227 = vrot.lane.b32.xlu1 %v203_v46, %s723_s0 }
 0x250   :  { %v189_v47 = vpop.permute.xlu0 %188  ;;  %v187_v50 = vpop.permute.xlu1 %186 }
 0x251   :  { %v205_v49 = vsel %vm200_vm3, %v189_v47, %v191_v43  ;;  %v206_v51 = vsel %vm200_vm3, %v187_v50, %v189_v47  ;;  %v207_v52 = vsel %vm200_vm3, %v185_v37, %v187_v50 }
 0x252   :  { %225 = vrot.lane.b32.xlu0 %v204_v48, %s723_s0  ;;  %223 = vrot.lane.b32.xlu1 %v205_v49, %s723_s0 }
 0x256   :  { %221 = vrot.lane.b32.xlu0 %v206_v51, %s723_s0  ;;  %219 = vrot.lane.b32.xlu1 %v207_v52, %s723_s0 }
 0x2bc   :  { %v232_v53 = vpop.permute.xlu1 %231  ;;  %v230_v54 = vpop.permute.xlu0 %229 }
 0x2bd   :  { %v233_v55 = vsel %vm200_vm3, %v230_v54, %v232_v53 }
 0x2be   :  { %v256_v56 = vadd.f32 %v233_v55, %v201_v41 }
 0x2c0   :  { %v228_v57 = vpop.permute.xlu1 %227  ;;  %279 = vrot.lane.b32.xlu1 %v256_v56, %s724_s11  ;;  %v218_v58 = vpop.permute.xlu0 %217 }
 0x2c1   :  { %v234_v59 = vsel %vm200_vm3, %v228_v57, %v230_v54  ;;  %v240_v60 = vsel %vm200_vm3, %v232_v53, %v218_v58 }
 0x2c2   :  { %v255_v61 = vadd.f32 %v234_v59, %v202_v40  ;;  %v241_v62 = vsel %vm176_vm4, %v240_v60, 0.0 }
 0x2c3   :  { %v249_v2 = vadd.f32 %v241_v62, %v209_v45 }
 0x2c4   :  { %v224_v63 = vpop.permute.xlu1 %223  ;;  %277 = vrot.lane.b32.xlu0 %v255_v61, %s724_s11  ;;  %v226_v0 = vpop.permute.xlu0 %225 }
 0x2c5   :  { %v235_v1 = vsel %vm200_vm3, %v226_v0, %v228_v57  ;;  %v236_v4 = vsel %vm200_vm3, %v224_v63, %v226_v0 }
 0x2c6   :  { %v254_v3 = vadd.f32 %v235_v1, %v203_v46  ;;  %v253_v8 = vadd.f32 %v236_v4, %v204_v48 }
 0x2c8   :  { %v220_v5 = vpop.permute.xlu1 %219  ;;  %265 = vrot.lane.b32.xlu0 %v249_v2, %s724_s11  ;;  %275 = vrot.lane.b32.xlu1 %v254_v3, %s724_s11  ;;  %v222_v6 = vpop.permute.xlu0 %221 }
 0x2c9   :  { %v237_v7 = vsel %vm200_vm3, %v222_v6, %v224_v63  ;;  %v239_v11 = vsel %vm200_vm3, %v218_v58, %v220_v5  ;;  %v238_v12 = vsel %vm200_vm3, %v220_v5, %v222_v6 }
 0x2ca   :  { %v252_v10 = vadd.f32 %v237_v7, %v205_v49  ;;  %v250_v13 = vadd.f32 %v239_v11, %v207_v52  ;;  %v251_v14 = vadd.f32 %v238_v12, %v206_v51 }
 0x2cc   :  { %273 = vrot.lane.b32.xlu0 %v253_v8, %s724_s11  ;;  %271 = vrot.lane.b32.xlu1 %v252_v10, %s724_s11 }
 0x2d0   :  { %269 = vrot.lane.b32.xlu0 %v251_v14, %s724_s11  ;;  %267 = vrot.lane.b32.xlu1 %v250_v13, %s724_s11 }
 0x332   :  { %v280_v15 = vpop.permute.xlu1 %279 }
 0x336   :  { %v278_v16 = vpop.permute.xlu0 %277 }
 0x337   :  { %v282_v17 = vsel %vm281_vm5, %v278_v16, %v280_v15 }
 0x338   :  { %v305_v19 = vadd.f32 %v282_v17, %v256_v56 }
 0x33a   :  { %v276_v20 = vpop.permute.xlu1 %275  ;;  %328 = vrot.lane.b32.xlu1 %v305_v19, %s725_s12  ;;  %v266_v21 = vpop.permute.xlu0 %265 }
 0x33b   :  { %v283_v22 = vsel %vm281_vm5, %v276_v20, %v278_v16  ;;  %v289_v24 = vsel %vm281_vm5, %v280_v15, %v266_v21 }
 0x33c   :  { %v304_v26 = vadd.f32 %v283_v22, %v255_v61  ;;  %v290_v27 = vsel %vm257_vm6, %v289_v24, 0.0 }
 0x33d   :  { %v298_v30 = vadd.f32 %v290_v27, %v249_v2 }
 0x33e   :  { %v272_v28 = vpop.permute.xlu1 %271  ;;  %326 = vrot.lane.b32.xlu0 %v304_v26, %s725_s12  ;;  %v274_v25 = vpop.permute.xlu0 %273 }
 0x33f   :  { %v284_v29 = vsel %vm281_vm5, %v274_v25, %v276_v20  ;;  %v285_v31 = vsel %vm281_vm5, %v272_v28, %v274_v25 }
 0x340   :  { %v303_v23 = vadd.f32 %v284_v29, %v254_v3  ;;  %v302_v35 = vadd.f32 %v285_v31, %v253_v8 }
 0x342   :  { %v268_v32 = vpop.permute.xlu1 %267  ;;  %314 = vrot.lane.b32.xlu0 %v298_v30, %s725_s12  ;;  %324 = vrot.lane.b32.xlu1 %v303_v23, %s725_s12  ;;  %v270_v33 = vpop.permute.xlu0 %269 }
 0x343   :  { %v286_v34 = vsel %vm281_vm5, %v270_v33, %v272_v28  ;;  %v288_v37 = vsel %vm281_vm5, %v266_v21, %v268_v32  ;;  %v287_v38 = vsel %vm281_vm5, %v268_v32, %v270_v33 }
 0x344   :  { %v301_v36 = vadd.f32 %v286_v34, %v252_v10  ;;  %v299_v39 = vadd.f32 %v288_v37, %v250_v13  ;;  %v300_v40 = vadd.f32 %v287_v38, %v251_v14 }
 0x346   :  { %322 = vrot.lane.b32.xlu0 %v302_v35, %s725_s12  ;;  %320 = vrot.lane.b32.xlu1 %v301_v36, %s725_s12 }
 0x34a   :  { %316 = vrot.lane.b32.xlu0 %v299_v39, %s725_s12  ;;  %318 = vrot.lane.b32.xlu1 %v300_v40, %s725_s12 }
 0x3ac   :  { %v329_v41 = vpop.permute.xlu1 %328 }
 0x3b0   :  { %v327_v42 = vpop.permute.xlu0 %326 }
 0x3b1   :  { %v331_v43 = vsel %vm330_vm7, %v327_v42, %v329_v41 }
 0x3b2   :  { %v354_v44 = vadd.f32 %v331_v43, %v305_v19 }
 0x3b4   :  { %v325_v45 = vpop.permute.xlu1 %324  ;;  %377 = vrot.lane.b32.xlu1 %v354_v44, %s726_s13  ;;  %v315_v46 = vpop.permute.xlu0 %314 }
 0x3b5   :  { %v332_v47 = vsel %vm330_vm7, %v325_v45, %v327_v42  ;;  %v338_v49 = vsel %vm330_vm7, %v329_v41, %v315_v46 }
 0x3b6   :  { %v353_v48 = vadd.f32 %v332_v47, %v304_v26  ;;  %v339_v56 = vsel %vm306_vm8, %v338_v49, 0.0 }
 0x3b7   :  { %v347_v60 = vadd.f32 %v339_v56, %v298_v30 }
 0x3b8   :  { %v321_v50 = vpop.permute.xlu1 %320  ;;  %375 = vrot.lane.b32.xlu0 %v353_v48, %s726_s13  ;;  %v323_v51 = vpop.permute.xlu0 %322 }
 0x3b9   :  { %v333_v52 = vsel %vm330_vm7, %v323_v51, %v325_v45  ;;  %v334_v53 = vsel %vm330_vm7, %v321_v50, %v323_v51 }
 0x3ba   :  { %v351_v54 = vadd.f32 %v334_v53, %v302_v35  ;;  %v352_v55 = vadd.f32 %v333_v52, %v303_v23 }
 0x3bc   :  { %v319_v57 = vpop.permute.xlu1 %318  ;;  %371 = vrot.lane.b32.xlu0 %v351_v54, %s726_s13  ;;  %373 = vrot.lane.b32.xlu1 %v352_v55, %s726_s13  ;;  %v317_v58 = vpop.permute.xlu0 %316 }
 0x3bd   :  { %v337_v59 = vsel %vm330_vm7, %v315_v46, %v317_v58  ;;  %v335_v62 = vsel %vm330_vm7, %v319_v57, %v321_v50  ;;  %v336_v63 = vsel %vm330_vm7, %v317_v58, %v319_v57 }
 0x3be   :  { %v348_v61 = vadd.f32 %v337_v59, %v299_v39  ;;  %v350_v0 = vadd.f32 %v335_v62, %v301_v36  ;;  %v349_v1 = vadd.f32 %v336_v63, %v300_v40 }
 0x3c0   :  { %363 = vrot.lane.b32.xlu0 %v347_v60, %s726_s13  ;;  %365 = vrot.lane.b32.xlu1 %v348_v61, %s726_s13 }
 0x3c4   :  { %369 = vrot.lane.b32.xlu1 %v350_v0, %s726_s13  ;;  %367 = vrot.lane.b32.xlu0 %v349_v1, %s726_s13 }
 0x426   :  { %v378_v2 = vpop.permute.xlu1 %377 }
 0x42a   :  { %v376_v3 = vpop.permute.xlu0 %375 }
 0x42b   :  { %v380_v4 = vsel %vm379_vm9, %v376_v3, %v378_v2 }
 0x42c   :  { %v403_v5 = vadd.f32 %v380_v4, %v354_v44 }
 0x42e   :  { %v374_v6 = vpop.permute.xlu1 %373  ;;  %426 = vrot.lane.b32.xlu1 %v403_v5, %s727_s14  ;;  %v372_v7 = vpop.permute.xlu0 %371 }
 0x42f   :  { %v381_v8 = vsel %vm379_vm9, %v374_v6, %v376_v3  ;;  %v382_v10 = vsel %vm379_vm9, %v372_v7, %v374_v6 }
 0x430   :  { %v402_v11 = vadd.f32 %v381_v8, %v353_v48  ;;  %v401_v12 = vadd.f32 %v382_v10, %v352_v55 }
 0x432   :  { %v366_v13 = vpop.permute.xlu1 %365  ;;  %424 = vrot.lane.b32.xlu0 %v402_v11, %s727_s14  ;;  %422 = vrot.lane.b32.xlu1 %v401_v12, %s727_s14  ;;  %v364_v14 = vpop.permute.xlu0 %363 }
 0x433   :  { %v386_v15 = vsel %vm379_vm9, %v364_v14, %v366_v13  ;;  %v387_v16 = vsel %vm379_vm9, %v378_v2, %v364_v14 }
 0x434   :  { %v397_v17 = vadd.f32 %v386_v15, %v348_v61  ;;  %v388_v19 = vsel %vm355_vm10, %v387_v16, 0.0 }
 0x435   :  { %v396_v24 = vadd.f32 %v388_v19, %v347_v60 }
 0x436   :  { %v370_v20 = vpop.permute.xlu1 %369  ;;  %414 = vrot.lane.b32.xlu0 %v397_v17, %s727_s14  ;;  %v368_v21 = vpop.permute.xlu0 %367 }
 0x437   :  { %v385_v22 = vsel %vm379_vm9, %v366_v13, %v368_v21  ;;  %v383_v27 = vsel %vm379_vm9, %v370_v20, %v372_v7  ;;  %v384_v28 = vsel %vm379_vm9, %v368_v21, %v370_v20 }
 0x438   :  { %v398_v26 = vadd.f32 %v385_v22, %v349_v1  ;;  %v400_v25 = vadd.f32 %v383_v27, %v351_v54  ;;  %v399_v29 = vadd.f32 %v384_v28, %v350_v0 }
 0x43a   :  { %412 = vrot.lane.b32.xlu0 %v396_v24, %s727_s14  ;;  %416 = vrot.lane.b32.xlu1 %v398_v26, %s727_s14 }
 0x43e   :  { %420 = vrot.lane.b32.xlu1 %v400_v25, %s727_s14  ;;  %418 = vrot.lane.b32.xlu0 %v399_v29, %s727_s14 }
 0x4a0   :  { %v427_v30 = vpop.permute.xlu1 %426 }
 0x4a4   :  { %v423_v23 = vpop.permute.xlu1 %422  ;;  %v425_v31 = vpop.permute.xlu0 %424 }
 0x4a5   :  { %v429_v32 = vsel %vm428_vm11, %v425_v31, %v427_v30  ;;  %v430_v33 = vsel %vm428_vm11, %v423_v23, %v425_v31 }
 0x4a6   :  { %v904_v34 = vadd.f32 %v430_v33, %v402_v11  ;;  %v452_v35 = vadd.f32 %v429_v32, %v403_v5 }
 0x4a8   :  { %473 = vrot.lane.b32.xlu0 %v904_v34, %s728_s15  ;;  %475 = vrot.lane.b32.xlu1 %v452_v35, %s728_s15  ;;  %v415_v36 = vpop.permute.xlu0 %414 }
 0x4ac   :  { %v417_v37 = vpop.permute.xlu1 %416  ;;  %v413_v38 = vpop.permute.xlu0 %412 }
 0x4ad   :  { %v434_v39 = vsel %vm428_vm11, %v415_v36, %v417_v37  ;;  %v436_v40 = vsel %vm428_vm11, %v427_v30, %v413_v38  ;;  %v435_v48 = vsel %vm428_vm11, %v413_v38, %v415_v36 }
 0x4ae   :  { %v447_v41 = vadd.f32 %v434_v39, %v398_v26  ;;  %v437_v42 = vsel %vm404_vm12, %v436_v40, 0.0  ;;  %v446_v50 = vadd.f32 %v435_v48, %v397_v17 }
 0x4af   :  { %v445_v46 = vadd.f32 %v437_v42, %v396_v24 }
 0x4b0   :  { %v421_v43 = vpop.permute.xlu1 %420  ;;  %465 = vrot.lane.b32.xlu0 %v447_v41, %s728_s15  ;;  %v419_v44 = vpop.permute.xlu0 %418 }
 0x4b1   :  { %v433_v45 = vsel %vm428_vm11, %v417_v37, %v419_v44  ;;  %v432_v49 = vsel %vm428_vm11, %v419_v44, %v421_v43  ;;  %v431_v52 = vsel %vm428_vm11, %v421_v43, %v423_v23 }
 0x4b2   :  { %v448_v47 = vadd.f32 %v433_v45, %v399_v29  ;;  %v449_v51 = vadd.f32 %v432_v49, %v400_v25  ;;  %v450_v53 = vadd.f32 %v431_v52, %v401_v12 }
 0x4b4   :  { %461 = vrot.lane.b32.xlu0 %v445_v46, %s728_s15  ;;  %467 = vrot.lane.b32.xlu1 %v448_v47, %s728_s15 }
 0x4b8   :  { %463 = vrot.lane.b32.xlu1 %v446_v50, %s728_s15  ;;  %469 = vrot.lane.b32.xlu0 %v449_v51, %s728_s15 }
 0x4bc   :  { %471 = vrot.lane.b32.xlu1 %v450_v53, %s728_s15 }
 0x51a   :  { %v476_v54 = vpop.permute.xlu1 %475  ;;  %v474_v55 = vpop.permute.xlu0 %473 }
 0x51b   :  { %v478_v56 = vsel %vm477_vm13, %v474_v55, %v476_v54 }
 0x51c   :  { %v501_v57 = vadd.f32 %v478_v56, %v452_v35 }
 0x51e   :  { %524 = vrot.lane.b32.xlu1 %v501_v57, %s729_s16 }
 0x522   :  { %v466_v58 = vpop.permute.xlu0 %465 }
 0x526   :  { %v468_v59 = vpop.permute.xlu1 %467  ;;  %v462_v60 = vpop.permute.xlu0 %461 }
 0x527   :  { %v482_v61 = vsel %vm477_vm13, %v466_v58, %v468_v59  ;;  %v485_v63 = vsel %vm477_vm13, %v476_v54, %v462_v60 }
 0x528   :  { %v497_v62 = vadd.f32 %v482_v61, %v448_v47  ;;  %v486_v6 = vsel %vm453_vm14, %v485_v63, 0.0 }
 0x529   :  { %v494_v10 = vadd.f32 %v486_v6, %v445_v46 }
 0x52a   :  { %v464_v0 = vpop.permute.xlu1 %463  ;;  %516 = vrot.lane.b32.xlu0 %v497_v62, %s729_s16  ;;  %v470_v1 = vpop.permute.xlu0 %469 }
 0x52b   :  { %v484_v2 = vsel %vm477_vm13, %v462_v60, %v464_v0  ;;  %v481_v3 = vsel %vm477_vm13, %v468_v59, %v470_v1  ;;  %v483_v7 = vsel %vm477_vm13, %v464_v0, %v466_v58 }
 0x52c   :  { %v495_v4 = vadd.f32 %v484_v2, %v446_v50  ;;  %v498_v5 = vadd.f32 %v481_v3, %v449_v51  ;;  %v496_v11 = vadd.f32 %v483_v7, %v447_v41 }
 0x52e   :  { %v472_v8 = vpop.permute.xlu1 %471  ;;  %512 = vrot.lane.b32.xlu0 %v495_v4, %s729_s16  ;;  %518 = vrot.lane.b32.xlu1 %v498_v5, %s729_s16 }
 0x52f   :  { %v479_v12 = vsel %vm477_vm13, %v472_v8, %v474_v55  ;;  %v480_v13 = vsel %vm477_vm13, %v470_v1, %v472_v8 }
 0x530   :  { %v499_v14 = vadd.f32 %v480_v13, %v450_v53  ;;  %v500_v15 = vadd.f32 %v479_v12, %v904_v34 }
 0x532   :  { %510 = vrot.lane.b32.xlu0 %v494_v10, %s729_s16  ;;  %514 = vrot.lane.b32.xlu1 %v496_v11, %s729_s16 }
 0x536   :  { %522 = vrot.lane.b32.xlu1 %v500_v15, %s729_s16  ;;  %520 = vrot.lane.b32.xlu0 %v499_v14, %s729_s16 }
 0x590   :  { %v525_v16 = vpop.permute.xlu1 %524 }
 0x59c   :  { %v517_v17 = vpop.permute.xlu0 %516 }
 0x5a0   :  { %v519_v19 = vpop.permute.xlu1 %518  ;;  %v513_v20 = vpop.permute.xlu0 %512 }
 0x5a1   :  { %v530_v21 = vsel %vm526_vm15, %v517_v17, %v519_v19 }
 0x5a2   :  { %v547_v22 = vadd.f32 %v530_v21, %v498_v5 }
 0x5a4   :  { %v515_v24 = vpop.permute.xlu1 %514  ;;  %v511_v26 = vpop.permute.xlu0 %510 }
 0x5a5   :  { %v531_v27 = vsel %vm526_vm15, %v515_v24, %v517_v17  ;;  %v532_v28 = vsel %vm526_vm15, %v513_v20, %v515_v24  ;;  %v533_v25 = vsel %vm526_vm15, %v511_v26, %v513_v20  ;;  %v534_v29 = vsel %vm526_vm15, %v525_v16, %v511_v26 }
 0x5a6   :  { %v545_v30 = vadd.f32 %v532_v28, %v496_v11  ;;  %v546_v23 = vadd.f32 %v531_v27, %v497_v62  ;;  %v535_v31 = vsel %vm502_vm0, %v534_v29, 0.0  ;;  %v544_v32 = vadd.f32 %v533_v25, %v495_v4 }
 0x5a7   :  { %v543_v33 = vadd.f32 %v535_v31, %v494_v10 }
 0x5a8   :  { %v570_v34 = vadd.f32 %v546_v23, %v545_v30  ;;  %v571_v35 = vadd.f32 %v547_v22, %v546_v23  ;;  %v569_v36 = vadd.f32 %v545_v30, %v544_v32  ;;  %v523_v37 = vpop.permute.xlu1 %522  ;;  %v521_v38 = vpop.permute.xlu0 %520 }
 0x5a9   :  { %v568_v39 = vadd.f32 %v544_v32, %v543_v33  ;;  %v527_v40 = vsel %vm526_vm15, %v523_v37, %v525_v16  ;;  %v528_v41 = vsel %vm526_vm15, %v521_v38, %v523_v37  ;;  %v529_v42 = vsel %vm526_vm15, %v519_v19, %v521_v38 }
 0x5aa   :  { %v593_v43 = vadd.f32 %v569_v36, %v543_v33  ;;  %v550_v44 = vadd.f32 %v527_v40, %v501_v57  ;;  %v548_v45 = vadd.f32 %v529_v42, %v499_v14  ;;  %v549_v47 = vadd.f32 %v528_v41, %v500_v15 }
 0x5ab   :  { %v594_v46 = vadd.f32 %v570_v34, %v568_v39  ;;  %v631_v48 = vcombine.low %v543_v33, %v568_v39  ;;  %v595_v49 = vadd.f32 %v571_v35, %v569_v36 }
 0x5ac   :  { %v572_v50 = vadd.f32 %v548_v45, %v547_v22  ;;  %v573_v51 = vadd.f32 %v549_v47, %v548_v45  ;;  %v574_v52 = vadd.f32 %v550_v44, %v549_v47 }
 0x5ad   :  { %v632_v53 = vcombine.low %v593_v43, %v594_v46  ;;  %v639_v58 = vrot.slane %v631_v48, %v747_v9  ;;  %v619_v18 = vadd.f32 %v595_v49, %v543_v33 }
 0x5ae   :  { %v596_v54 = vadd.f32 %v572_v50, %v570_v34  ;;  %v597_v55 = vadd.f32 %v573_v51, %v571_v35  ;;  %v598_v56 = vadd.f32 %v574_v52, %v572_v50 }
 0x5af   :  { %v646_v59 = vrot.slane %v632_v53, %v747_v9 }
 0x5b0   :  { %v620_v60 = vadd.f32 %v596_v54, %v568_v39  ;;  %v621_v61 = vadd.f32 %v597_v55, %v593_v43  ;;  %v622_v57 = vadd.f32 %v598_v56, %v594_v46 }
 0x5b1   :  { %v647_v62 = vcombine.low %v639_v58, %v646_v59 }
 0x5b2   :  { %v648_v63 = vcombine.low %v619_v18, %v620_v60  ;;  %v649_v0 = vcombine.low %v621_v61, %v622_v57 }
 0x5b3   :  { %667 = vst [vmem:[#allocation2] sm:$0xff] %v647_v62 }
 0x5b4   :  { %v656_v1 = vrot.slane %v648_v63, %v747_v9  ;;  %v663_v2 = vrot.slane %v649_v0, %v747_v9 }
 0x5b6   :  { %v664_v3 = vcombine.low %v656_v1, %v663_v2 }
 0x5b8   :  { %668 = vst [vmem:[#allocation2 + $0x8] sm:$0xff] %v664_v3 }
 0x5b9   :  { %708 = shalt.err (!%p705_p4)
}
 0x5ba   :  { %s709_s22 = scalar_lea.hbm %s974_s1, 256 }
 0x5bb   :  { %p710_p5 = scmp.ne.s32.totalorder %s974_s1, %s709_s22  ;;  %p713_p6 = scmp.lt.u32.totalorder %s709_s22, %s974_s1 }
 0x5bd   :  { %p715_p7 = pnand %p713_p6, %p710_p5 }
 0x5bf   :  { %718 = shalt.err (!%p715_p7)
}
 0x5c0   :  { %678 = dma.vmem_to_hbm [thread:$0]  %s676_s18, 256, %s974_s1, [#allocation3]  }
 0x5c1   :  { %719 = dma.done.wait [#allocation3], 256  }
 0x5c2   :  { %720 = vsyncadd [#allocation3], 4294967040 }
 0x5c3   :  { %682 = vsyncpa [#allocation3], 1 }

</bundles_post_ra>
